<compile_context>
chip_gen: v6e
topology: v6e:2x2x1
jax: 0.10.0
libtpu: 0.0.40
codegen_flags: <defaults>
</compile_context>

<pallas_src>
import functools

import jax
import jax.numpy as jnp
from jax.experimental import pallas as pl
from jax.experimental.pallas import tpu as pltpu


def _pick_images_per_block(n, cap=8):
    """Largest divisor of n that is <= cap (images processed per grid step)."""
    for g in range(min(n, cap), 0, -1):
        if n % g == 0:
            return g
    return 1


def _pick_row_tile(h, w, max_rows=128):
    """Largest divisor of h keeping the (row_tile*W, Cp) f32 tile in vregs."""
    best = 1
    for d in range(1, h + 1):
        if h % d == 0 and d * w <= max_rows:
            best = d
    return best


# ----------------------------------------------------------------------------
# Fused kernel: 3x3 conv (stride 1, pad 1) + bias + ReLU -> SPoC -> L2N
#   x_ref    : (G, H, W, Cin)       bf16  unpadded NHWC images for this block
#   w_ref    : (9, Cin, Cp)         bf16  HWIO weights, taps flattened, Cout padded->Cp
#   b_ref    : (1, Cp)              f32   bias, zero-padded
#   o_ref    : (G, Cp)              f32   L2-normalized SPoC descriptors
#   xpad_ref : (G, H+2, W+2, Cin)   bf16  VMEM scratch: halo-padded image
# ----------------------------------------------------------------------------
def _extractor_fused_kernel(x_ref, w_ref, b_ref, o_ref, xpad_ref, *,
                            G, H, W, Cin, Cp, eps, row_tile):
    # --- halo fill: zero-pad the image inside VMEM (no padded HBM copy) ---
    xpad_ref[...] = jnp.zeros_like(xpad_ref)
    xpad_ref[:, 1:H + 1, 1:W + 1, :] = x_ref[...]

    bias = b_ref[...]                                   # (1, Cp) f32
    n_row_tiles = H // row_tile
    inv_hw = 1.0 / float(H * W)

    for g in range(G):
        acc = jnp.zeros((1, Cp), jnp.float32)           # fused SPoC accumulator
        for t in range(n_row_tiles):
            r0 = t * row_tile
            # y tile: (row_tile*W, Cp) f32 — never the full (H*W, Cp) map.
            y = jnp.zeros((row_tile * W, Cp), jnp.float32)
            # 9 accumulating MXU matmuls on shifted slices (no im2col scratch).
            for kh in range(3):
                for kw in range(3):
                    slab = xpad_ref[g, r0 + kh:r0 + kh + row_tile, kw:kw + W, :]
                    slab = slab.reshape(row_tile * W, Cin)     # Cin stays minor
                    y = y + jnp.dot(slab, w_ref[kh * 3 + kw],
                                    preferred_element_type=jnp.float32)
            y = jnp.maximum(y + bias, 0.0)                     # bias + ReLU (f32)
            acc = acc + jnp.sum(y, axis=0, keepdims=True)      # SPoC partial sum
        v = acc * inv_hw                                       # SPoC mean  (1, Cp)
        # L2N: v / (||v||_2 + eps); padded columns are exactly 0 -> norm unchanged.
        nrm = jnp.sqrt(jnp.sum(v * v, axis=1, keepdims=True))  # (1, 1)
        inv = pl.reciprocal(nrm + eps, approx=True)            # EUP
        o_ref[g:g + 1, :] = (v * inv).astype(o_ref.dtype)


# ----------------------------------------------------------------------------
# Full extractor forward (Pallas)
# ----------------------------------------------------------------------------
@jax.jit
def extractor_forward(x_nchw, conv_w, conv_b):
    N, Cin, H, W = x_nchw.shape
    Cout = conv_w.shape[-1]
    Cp = ((Cout + 127) // 128) * 128                 # lane-dense matmul-N / output dim
    G = _pick_images_per_block(N)                    # images per grid step
    row_tile = _pick_row_tile(H, W)                  # M-tiling of the spatial rows

    # NHWC, bf16; NO spatial pad in HBM (halo is built in VMEM by the kernel).
    x = jnp.transpose(x_nchw, (0, 2, 3, 1)).astype(jnp.bfloat16)

    # (3,3,Cin,Cout) -> (9,Cin,Cp) bf16, zero-padded output channels.
    w = jnp.pad(conv_w.reshape(9, Cin, Cout),
                ((0, 0), (0, 0), (0, Cp - Cout))).astype(jnp.bfloat16)
    b = jnp.pad(conv_b.reshape(1, Cout),
                ((0, 0), (0, Cp - Cout))).astype(jnp.float32)

    kernel = functools.partial(_extractor_fused_kernel, G=G, H=H, W=W, Cin=Cin,
                               Cp=Cp, eps=1e-6, row_tile=row_tile)

    out = pl.pallas_call(
        kernel,
        out_shape=jax.ShapeDtypeStruct((N, Cp), jnp.float32),
        grid_spec=pltpu.PrefetchScalarGridSpec(
            num_scalar_prefetch=0,
            grid=(N // G,),
            in_specs=[
                pl.BlockSpec((G, H, W, Cin), lambda n: (n, 0, 0, 0)),
                pl.BlockSpec((9, Cin, Cp), lambda n: (0, 0, 0)),
                pl.BlockSpec((1, Cp), lambda n: (0, 0)),
            ],
            out_specs=pl.BlockSpec((G, Cp), lambda n: (n, 0)),
            scratch_shapes=[pltpu.VMEM((G, H + 2, W + 2, Cin), jnp.bfloat16)],
        ),
        compiler_params=pltpu.CompilerParams(
            dimension_semantics=("parallel",),
            vmem_limit_bytes=64 * 1024 * 1024,
        ),
    )(x, w, b)

    return out[:, :Cout]                              # Flatten + drop pad columns


# ----------------------------------------------------------------------------
# Pure-JAX reference (same bf16 MXU feed, f32 accumulation / epilogue)
# ----------------------------------------------------------------------------
def extractor_forward_ref(x_nchw, conv_w, conv_b):
    x = jnp.transpose(x_nchw, (0, 2, 3, 1))
    y = jax.lax.conv_general_dilated(
        x.astype(jnp.bfloat16), conv_w.astype(jnp.bfloat16),
        window_strides=(1, 1), padding="SAME",
        dimension_numbers=("NHWC", "HWIO", "NHWC"),
        preferred_element_type=jnp.float32)
    y = jnp.maximum(y + conv_b.astype(jnp.float32), 0.0)
    v = jnp.mean(y, axis=(1, 2))                                     # SPoC  (N, C)
    nrm = jnp.sqrt(jnp.sum(v * v, axis=1, keepdims=True))
    return v / (nrm + 1e-6)                                          # L2N + Flatten


if __name__ == "__main__":
    # Small shapes: batch=2, in-channels=4, spatial=16x16, backbone out-channels=8
    N, Cin, H, W, Cout = 2, 4, 16, 16, 8

    key = jax.random.PRNGKey(0)
    kx, kw_, kb = jax.random.split(key, 3)
    x = jax.random.normal(kx, (N, Cin, H, W), dtype=jnp.float32)     # NCHW like PyTorch
    conv_w = 0.1 * jax.random.normal(kw_, (3, 3, Cin, Cout), dtype=jnp.float32)
    conv_b = 0.1 * jax.random.normal(kb, (Cout,), dtype=jnp.float32)

    out = jax.block_until_ready(extractor_forward(x, conv_w, conv_b))
    ref = jax.block_until_ready(extractor_forward_ref(x, conv_w, conv_b))

    assert out.shape == (N, Cout), out.shape
    # tolerance covers accumulation-order differences + approx reciprocal in L2N
    max_err = float(jnp.max(jnp.abs(out - ref)))
    assert max_err < 2e-3, max_err

    print("KERNEL_OK")
</pallas_src>

<mosaic_0001>
module attributes {stable_mosaic.version = 11 : i64} {
  func.func @_extractor_fused_kernel(%arg0: i32, %arg1: memref<2x16x16x4xbf16, #tpu.memory_space<vmem>>, %arg2: memref<9x4x128xbf16, #tpu.memory_space<vmem>>, %arg3: memref<1x128xf32, #tpu.memory_space<vmem>>, %arg4: memref<2x128xf32, #tpu.memory_space<vmem>>, %arg5: memref<2x18x18x4xbf16, #tpu.memory_space<vmem>>) attributes {dimension_semantics = [#tpu.dimension_semantics<parallel>], iteration_bounds = array<i64: 1>, scalar_prefetch = 0 : i64, scratch_operands = 1 : i64, tpu.core_type = #tpu.core_type<tc>, window_params = [{transform_indices = @transform_0, window_bounds = array<i64: 2, 16, 16, 4>}, {pipeline_mode = #tpu.pipeline_mode<synchronous>, transform_indices = @transform_1, window_bounds = array<i64: 9, 4, 128>}, {pipeline_mode = #tpu.pipeline_mode<synchronous>, transform_indices = @transform_2, window_bounds = array<i64: 1, 128>}, {transform_indices = @transform_3, window_bounds = array<i64: 2, 128>}]} {
    %cst = arith.constant 0.000000e+00 : bf16
    %0 = vector.broadcast %cst : bf16 to vector<2x18x18x4xbf16>
    %c0 = arith.constant 0 : index
    %c0_0 = arith.constant 0 : index
    %c0_1 = arith.constant 0 : index
    %c0_2 = arith.constant 0 : index
    %1 = vector.load %arg5[%c0, %c0_0, %c0_1, %c0_2] : memref<2x18x18x4xbf16, #tpu.memory_space<vmem>>, vector<2x18x18x4xbf16>
    tpu.vector_store %arg5[%c0, %c0_0, %c0_1, %c0_2], %0 {strides = array<i32>} : memref<2x18x18x4xbf16, #tpu.memory_space<vmem>>, vector<2x18x18x4xbf16>,
    %c0_3 = arith.constant 0 : index
    %c0_4 = arith.constant 0 : index
    %c0_5 = arith.constant 0 : index
    %c0_6 = arith.constant 0 : index
    %2 = vector.load %arg1[%c0_3, %c0_4, %c0_5, %c0_6] : memref<2x16x16x4xbf16, #tpu.memory_space<vmem>>, vector<2x16x16x4xbf16>
    %c0_7 = arith.constant 0 : index
    %c1 = arith.constant 1 : index
    %c1_8 = arith.constant 1 : index
    %c0_9 = arith.constant 0 : index
    %3 = vector.load %arg5[%c0_7, %c1, %c1_8, %c0_9] : memref<2x18x18x4xbf16, #tpu.memory_space<vmem>>, vector<2x16x16x4xbf16>
    tpu.vector_store %arg5[%c0_7, %c1, %c1_8, %c0_9], %2 {strides = array<i32>} : memref<2x18x18x4xbf16, #tpu.memory_space<vmem>>, vector<2x16x16x4xbf16>,
    %c0_10 = arith.constant 0 : index
    %c0_11 = arith.constant 0 : index
    %4 = vector.load %arg3[%c0_10, %c0_11] : memref<1x128xf32, #tpu.memory_space<vmem>>, vector<1x128xf32>
    %cst_12 = arith.constant 0.000000e+00 : f32
    %5 = vector.broadcast %cst_12 : f32 to vector<1x128xf32>
    %cst_13 = arith.constant 0.000000e+00 : f32
    %6 = vector.broadcast %cst_13 : f32 to vector<128x128xf32>
    %c0_14 = arith.constant 0 : index
    %c0_15 = arith.constant 0 : index
    %c0_16 = arith.constant 0 : index
    %c0_17 = arith.constant 0 : index
    %7 = vector.load %arg5[%c0_14, %c0_15, %c0_16, %c0_17] : memref<2x18x18x4xbf16, #tpu.memory_space<vmem>>, vector<1x8x16x4xbf16>
    %8 = vector.shape_cast %7 : vector<1x8x16x4xbf16> to vector<8x16x4xbf16>
    %9 = vector.shape_cast %8 : vector<8x16x4xbf16> to vector<128x4xbf16>
    %c0_18 = arith.constant 0 : index
    %c0_19 = arith.constant 0 : index
    %c0_20 = arith.constant 0 : index
    %10 = vector.load %arg2[%c0_18, %c0_19, %c0_20] : memref<9x4x128xbf16, #tpu.memory_space<vmem>>, vector<1x4x128xbf16>
    %11 = vector.shape_cast %10 : vector<1x4x128xbf16> to vector<4x128xbf16>
    %cst_21 = arith.constant dense<0.000000e+00> : vector<128x128xf32>
    %12 = tpu.matmul %9, %11, %cst_21 {dimension_numbers = #tpu.dot_dimension_numbers<[1], [0], [0], [1], [0, 0, 1, 1], [], []>} : vector<128x4xbf16>, vector<4x128xbf16>, vector<128x128xf32> -> vector<128x128xf32>
    %13 = arith.addf %6, %12 : vector<128x128xf32>
    %c0_22 = arith.constant 0 : index
    %c0_23 = arith.constant 0 : index
    %c1_24 = arith.constant 1 : index
    %c0_25 = arith.constant 0 : index
    %14 = vector.load %arg5[%c0_22, %c0_23, %c1_24, %c0_25] : memref<2x18x18x4xbf16, #tpu.memory_space<vmem>>, vector<1x8x16x4xbf16>
    %15 = vector.shape_cast %14 : vector<1x8x16x4xbf16> to vector<8x16x4xbf16>
    %16 = vector.shape_cast %15 : vector<8x16x4xbf16> to vector<128x4xbf16>
    %c1_26 = arith.constant 1 : index
    %c0_27 = arith.constant 0 : index
    %c0_28 = arith.constant 0 : index
    %17 = vector.load %arg2[%c1_26, %c0_27, %c0_28] : memref<9x4x128xbf16, #tpu.memory_space<vmem>>, vector<1x4x128xbf16>
    %18 = vector.shape_cast %17 : vector<1x4x128xbf16> to vector<4x128xbf16>
    %cst_29 = arith.constant dense<0.000000e+00> : vector<128x128xf32>
    %19 = tpu.matmul %16, %18, %cst_29 {dimension_numbers = #tpu.dot_dimension_numbers<[1], [0], [0], [1], [0, 0, 1, 1], [], []>} : vector<128x4xbf16>, vector<4x128xbf16>, vector<128x128xf32> -> vector<128x128xf32>
    %20 = arith.addf %13, %19 : vector<128x128xf32>
    %c0_30 = arith.constant 0 : index
    %c0_31 = arith.constant 0 : index
    %c2 = arith.constant 2 : index
    %c0_32 = arith.constant 0 : index
    %21 = vector.load %arg5[%c0_30, %c0_31, %c2, %c0_32] : memref<2x18x18x4xbf16, #tpu.memory_space<vmem>>, vector<1x8x16x4xbf16>
    %22 = vector.shape_cast %21 : vector<1x8x16x4xbf16> to vector<8x16x4xbf16>
    %23 = vector.shape_cast %22 : vector<8x16x4xbf16> to vector<128x4xbf16>
    %c2_33 = arith.constant 2 : index
    %c0_34 = arith.constant 0 : index
    %c0_35 = arith.constant 0 : index
    %24 = vector.load %arg2[%c2_33, %c0_34, %c0_35] : memref<9x4x128xbf16, #tpu.memory_space<vmem>>, vector<1x4x128xbf16>
    %25 = vector.shape_cast %24 : vector<1x4x128xbf16> to vector<4x128xbf16>
    %cst_36 = arith.constant dense<0.000000e+00> : vector<128x128xf32>
    %26 = tpu.matmul %23, %25, %cst_36 {dimension_numbers = #tpu.dot_dimension_numbers<[1], [0], [0], [1], [0, 0, 1, 1], [], []>} : vector<128x4xbf16>, vector<4x128xbf16>, vector<128x128xf32> -> vector<128x128xf32>
    %27 = arith.addf %20, %26 : vector<128x128xf32>
    %c0_37 = arith.constant 0 : index
    %c1_38 = arith.constant 1 : index
    %c0_39 = arith.constant 0 : index
    %c0_40 = arith.constant 0 : index
    %28 = vector.load %arg5[%c0_37, %c1_38, %c0_39, %c0_40] : memref<2x18x18x4xbf16, #tpu.memory_space<vmem>>, vector<1x8x16x4xbf16>
    %29 = vector.shape_cast %28 : vector<1x8x16x4xbf16> to vector<8x16x4xbf16>
    %30 = vector.shape_cast %29 : vector<8x16x4xbf16> to vector<128x4xbf16>
    %c3 = arith.constant 3 : index
    %c0_41 = arith.constant 0 : index
    %c0_42 = arith.constant 0 : index
    %31 = vector.load %arg2[%c3, %c0_41, %c0_42] : memref<9x4x128xbf16, #tpu.memory_space<vmem>>, vector<1x4x128xbf16>
    %32 = vector.shape_cast %31 : vector<1x4x128xbf16> to vector<4x128xbf16>
    %cst_43 = arith.constant dense<0.000000e+00> : vector<128x128xf32>
    %33 = tpu.matmul %30, %32, %cst_43 {dimension_numbers = #tpu.dot_dimension_numbers<[1], [0], [0], [1], [0, 0, 1, 1], [], []>} : vector<128x4xbf16>, vector<4x128xbf16>, vector<128x128xf32> -> vector<128x128xf32>
    %34 = arith.addf %27, %33 : vector<128x128xf32>
    %c0_44 = arith.constant 0 : index
    %c1_45 = arith.constant 1 : index
    %c1_46 = arith.constant 1 : index
    %c0_47 = arith.constant 0 : index
    %35 = vector.load %arg5[%c0_44, %c1_45, %c1_46, %c0_47] : memref<2x18x18x4xbf16, #tpu.memory_space<vmem>>, vector<1x8x16x4xbf16>
    %36 = vector.shape_cast %35 : vector<1x8x16x4xbf16> to vector<8x16x4xbf16>
    %37 = vector.shape_cast %36 : vector<8x16x4xbf16> to vector<128x4xbf16>
    %c4 = arith.constant 4 : index
    %c0_48 = arith.constant 0 : index
    %c0_49 = arith.constant 0 : index
    %38 = vector.load %arg2[%c4, %c0_48, %c0_49] : memref<9x4x128xbf16, #tpu.memory_space<vmem>>, vector<1x4x128xbf16>
    %39 = vector.shape_cast %38 : vector<1x4x128xbf16> to vector<4x128xbf16>
    %cst_50 = arith.constant dense<0.000000e+00> : vector<128x128xf32>
    %40 = tpu.matmul %37, %39, %cst_50 {dimension_numbers = #tpu.dot_dimension_numbers<[1], [0], [0], [1], [0, 0, 1, 1], [], []>} : vector<128x4xbf16>, vector<4x128xbf16>, vector<128x128xf32> -> vector<128x128xf32>
    %41 = arith.addf %34, %40 : vector<128x128xf32>
    %c0_51 = arith.constant 0 : index
    %c1_52 = arith.constant 1 : index
    %c2_53 = arith.constant 2 : index
    %c0_54 = arith.constant 0 : index
    %42 = vector.load %arg5[%c0_51, %c1_52, %c2_53, %c0_54] : memref<2x18x18x4xbf16, #tpu.memory_space<vmem>>, vector<1x8x16x4xbf16>
    %43 = vector.shape_cast %42 : vector<1x8x16x4xbf16> to vector<8x16x4xbf16>
    %44 = vector.shape_cast %43 : vector<8x16x4xbf16> to vector<128x4xbf16>
    %c5 = arith.constant 5 : index
    %c0_55 = arith.constant 0 : index
    %c0_56 = arith.constant 0 : index
    %45 = vector.load %arg2[%c5, %c0_55, %c0_56] : memref<9x4x128xbf16, #tpu.memory_space<vmem>>, vector<1x4x128xbf16>
    %46 = vector.shape_cast %45 : vector<1x4x128xbf16> to vector<4x128xbf16>
    %cst_57 = arith.constant dense<0.000000e+00> : vector<128x128xf32>
    %47 = tpu.matmul %44, %46, %cst_57 {dimension_numbers = #tpu.dot_dimension_numbers<[1], [0], [0], [1], [0, 0, 1, 1], [], []>} : vector<128x4xbf16>, vector<4x128xbf16>, vector<128x128xf32> -> vector<128x128xf32>
    %48 = arith.addf %41, %47 : vector<128x128xf32>
    %c0_58 = arith.constant 0 : index
    %c2_59 = arith.constant 2 : index
    %c0_60 = arith.constant 0 : index
    %c0_61 = arith.constant 0 : index
    %49 = vector.load %arg5[%c0_58, %c2_59, %c0_60, %c0_61] : memref<2x18x18x4xbf16, #tpu.memory_space<vmem>>, vector<1x8x16x4xbf16>
    %50 = vector.shape_cast %49 : vector<1x8x16x4xbf16> to vector<8x16x4xbf16>
    %51 = vector.shape_cast %50 : vector<8x16x4xbf16> to vector<128x4xbf16>
    %c6 = arith.constant 6 : index
    %c0_62 = arith.constant 0 : index
    %c0_63 = arith.constant 0 : index
    %52 = vector.load %arg2[%c6, %c0_62, %c0_63] : memref<9x4x128xbf16, #tpu.memory_space<vmem>>, vector<1x4x128xbf16>
    %53 = vector.shape_cast %52 : vector<1x4x128xbf16> to vector<4x128xbf16>
    %cst_64 = arith.constant dense<0.000000e+00> : vector<128x128xf32>
    %54 = tpu.matmul %51, %53, %cst_64 {dimension_numbers = #tpu.dot_dimension_numbers<[1], [0], [0], [1], [0, 0, 1, 1], [], []>} : vector<128x4xbf16>, vector<4x128xbf16>, vector<128x128xf32> -> vector<128x128xf32>
    %55 = arith.addf %48, %54 : vector<128x128xf32>
    %c0_65 = arith.constant 0 : index
    %c2_66 = arith.constant 2 : index
    %c1_67 = arith.constant 1 : index
    %c0_68 = arith.constant 0 : index
    %56 = vector.load %arg5[%c0_65, %c2_66, %c1_67, %c0_68] : memref<2x18x18x4xbf16, #tpu.memory_space<vmem>>, vector<1x8x16x4xbf16>
    %57 = vector.shape_cast %56 : vector<1x8x16x4xbf16> to vector<8x16x4xbf16>
    %58 = vector.shape_cast %57 : vector<8x16x4xbf16> to vector<128x4xbf16>
    %c7 = arith.constant 7 : index
    %c0_69 = arith.constant 0 : index
    %c0_70 = arith.constant 0 : index
    %59 = vector.load %arg2[%c7, %c0_69, %c0_70] : memref<9x4x128xbf16, #tpu.memory_space<vmem>>, vector<1x4x128xbf16>
    %60 = vector.shape_cast %59 : vector<1x4x128xbf16> to vector<4x128xbf16>
    %cst_71 = arith.constant dense<0.000000e+00> : vector<128x128xf32>
    %61 = tpu.matmul %58, %60, %cst_71 {dimension_numbers = #tpu.dot_dimension_numbers<[1], [0], [0], [1], [0, 0, 1, 1], [], []>} : vector<128x4xbf16>, vector<4x128xbf16>, vector<128x128xf32> -> vector<128x128xf32>
    %62 = arith.addf %55, %61 : vector<128x128xf32>
    %c0_72 = arith.constant 0 : index
    %c2_73 = arith.constant 2 : index
    %c2_74 = arith.constant 2 : index
    %c0_75 = arith.constant 0 : index
    %63 = vector.load %arg5[%c0_72, %c2_73, %c2_74, %c0_75] : memref<2x18x18x4xbf16, #tpu.memory_space<vmem>>, vector<1x8x16x4xbf16>
    %64 = vector.shape_cast %63 : vector<1x8x16x4xbf16> to vector<8x16x4xbf16>
    %65 = vector.shape_cast %64 : vector<8x16x4xbf16> to vector<128x4xbf16>
    %c8 = arith.constant 8 : index
    %c0_76 = arith.constant 0 : index
    %c0_77 = arith.constant 0 : index
    %66 = vector.load %arg2[%c8, %c0_76, %c0_77] : memref<9x4x128xbf16, #tpu.memory_space<vmem>>, vector<1x4x128xbf16>
    %67 = vector.shape_cast %66 : vector<1x4x128xbf16> to vector<4x128xbf16>
    %cst_78 = arith.constant dense<0.000000e+00> : vector<128x128xf32>
    %68 = tpu.matmul %65, %67, %cst_78 {dimension_numbers = #tpu.dot_dimension_numbers<[1], [0], [0], [1], [0, 0, 1, 1], [], []>} : vector<128x4xbf16>, vector<4x128xbf16>, vector<128x128xf32> -> vector<128x128xf32>
    %69 = arith.addf %62, %68 : vector<128x128xf32>
    %70 = vector.broadcast %4 : vector<1x128xf32> to vector<128x128xf32>
    %71 = arith.addf %69, %70 : vector<128x128xf32>
    %cst_79 = arith.constant 0.000000e+00 : f32
    %72 = vector.broadcast %cst_79 : f32 to vector<128x128xf32>
    %73 = arith.maximumf %71, %72 : vector<128x128xf32>
    %cst_80 = arith.constant dense<0.000000e+00> : vector<128xf32>
    %74 = vector.multi_reduction <add>, %73, %cst_80 [0] : vector<128x128xf32> to vector<128xf32>
    %75 = vector.shape_cast %74 : vector<128xf32> to vector<1x128xf32>
    %76 = arith.addf %5, %75 : vector<1x128xf32>
    %cst_81 = arith.constant 0.000000e+00 : f32
    %77 = vector.broadcast %cst_81 : f32 to vector<128x128xf32>
    %c0_82 = arith.constant 0 : index
    %c8_83 = arith.constant 8 : index
    %c0_84 = arith.constant 0 : index
    %c0_85 = arith.constant 0 : index
    %78 = vector.load %arg5[%c0_82, %c8_83, %c0_84, %c0_85] : memref<2x18x18x4xbf16, #tpu.memory_space<vmem>>, vector<1x8x16x4xbf16>
    %79 = vector.shape_cast %78 : vector<1x8x16x4xbf16> to vector<8x16x4xbf16>
    %80 = vector.shape_cast %79 : vector<8x16x4xbf16> to vector<128x4xbf16>
    %c0_86 = arith.constant 0 : index
    %c0_87 = arith.constant 0 : index
    %c0_88 = arith.constant 0 : index
    %81 = vector.load %arg2[%c0_86, %c0_87, %c0_88] : memref<9x4x128xbf16, #tpu.memory_space<vmem>>, vector<1x4x128xbf16>
    %82 = vector.shape_cast %81 : vector<1x4x128xbf16> to vector<4x128xbf16>
    %cst_89 = arith.constant dense<0.000000e+00> : vector<128x128xf32>
    %83 = tpu.matmul %80, %82, %cst_89 {dimension_numbers = #tpu.dot_dimension_numbers<[1], [0], [0], [1], [0, 0, 1, 1], [], []>} : vector<128x4xbf16>, vector<4x128xbf16>, vector<128x128xf32> -> vector<128x128xf32>
    %84 = arith.addf %77, %83 : vector<128x128xf32>
    %c0_90 = arith.constant 0 : index
    %c8_91 = arith.constant 8 : index
    %c1_92 = arith.constant 1 : index
    %c0_93 = arith.constant 0 : index
    %85 = vector.load %arg5[%c0_90, %c8_91, %c1_92, %c0_93] : memref<2x18x18x4xbf16, #tpu.memory_space<vmem>>, vector<1x8x16x4xbf16>
    %86 = vector.shape_cast %85 : vector<1x8x16x4xbf16> to vector<8x16x4xbf16>
    %87 = vector.shape_cast %86 : vector<8x16x4xbf16> to vector<128x4xbf16>
    %c1_94 = arith.constant 1 : index
    %c0_95 = arith.constant 0 : index
    %c0_96 = arith.constant 0 : index
    %88 = vector.load %arg2[%c1_94, %c0_95, %c0_96] : memref<9x4x128xbf16, #tpu.memory_space<vmem>>, vector<1x4x128xbf16>
    %89 = vector.shape_cast %88 : vector<1x4x128xbf16> to vector<4x128xbf16>
    %cst_97 = arith.constant dense<0.000000e+00> : vector<128x128xf32>
    %90 = tpu.matmul %87, %89, %cst_97 {dimension_numbers = #tpu.dot_dimension_numbers<[1], [0], [0], [1], [0, 0, 1, 1], [], []>} : vector<128x4xbf16>, vector<4x128xbf16>, vector<128x128xf32> -> vector<128x128xf32>
    %91 = arith.addf %84, %90 : vector<128x128xf32>
    %c0_98 = arith.constant 0 : index
    %c8_99 = arith.constant 8 : index
    %c2_100 = arith.constant 2 : index
    %c0_101 = arith.constant 0 : index
    %92 = vector.load %arg5[%c0_98, %c8_99, %c2_100, %c0_101] : memref<2x18x18x4xbf16, #tpu.memory_space<vmem>>, vector<1x8x16x4xbf16>
    %93 = vector.shape_cast %92 : vector<1x8x16x4xbf16> to vector<8x16x4xbf16>
    %94 = vector.shape_cast %93 : vector<8x16x4xbf16> to vector<128x4xbf16>
    %c2_102 = arith.constant 2 : index
    %c0_103 = arith.constant 0 : index
    %c0_104 = arith.constant 0 : index
    %95 = vector.load %arg2[%c2_102, %c0_103, %c0_104] : memref<9x4x128xbf16, #tpu.memory_space<vmem>>, vector<1x4x128xbf16>
    %96 = vector.shape_cast %95 : vector<1x4x128xbf16> to vector<4x128xbf16>
    %cst_105 = arith.constant dense<0.000000e+00> : vector<128x128xf32>
    %97 = tpu.matmul %94, %96, %cst_105 {dimension_numbers = #tpu.dot_dimension_numbers<[1], [0], [0], [1], [0, 0, 1, 1], [], []>} : vector<128x4xbf16>, vector<4x128xbf16>, vector<128x128xf32> -> vector<128x128xf32>
    %98 = arith.addf %91, %97 : vector<128x128xf32>
    %c0_106 = arith.constant 0 : index
    %c9 = arith.constant 9 : index
    %c0_107 = arith.constant 0 : index
    %c0_108 = arith.constant 0 : index
    %99 = vector.load %arg5[%c0_106, %c9, %c0_107, %c0_108] : memref<2x18x18x4xbf16, #tpu.memory_space<vmem>>, vector<1x8x16x4xbf16>
    %100 = vector.shape_cast %99 : vector<1x8x16x4xbf16> to vector<8x16x4xbf16>
    %101 = vector.shape_cast %100 : vector<8x16x4xbf16> to vector<128x4xbf16>
    %c3_109 = arith.constant 3 : index
    %c0_110 = arith.constant 0 : index
    %c0_111 = arith.constant 0 : index
    %102 = vector.load %arg2[%c3_109, %c0_110, %c0_111] : memref<9x4x128xbf16, #tpu.memory_space<vmem>>, vector<1x4x128xbf16>
    %103 = vector.shape_cast %102 : vector<1x4x128xbf16> to vector<4x128xbf16>
    %cst_112 = arith.constant dense<0.000000e+00> : vector<128x128xf32>
    %104 = tpu.matmul %101, %103, %cst_112 {dimension_numbers = #tpu.dot_dimension_numbers<[1], [0], [0], [1], [0, 0, 1, 1], [], []>} : vector<128x4xbf16>, vector<4x128xbf16>, vector<128x128xf32> -> vector<128x128xf32>
    %105 = arith.addf %98, %104 : vector<128x128xf32>
    %c0_113 = arith.constant 0 : index
    %c9_114 = arith.constant 9 : index
    %c1_115 = arith.constant 1 : index
    %c0_116 = arith.constant 0 : index
    %106 = vector.load %arg5[%c0_113, %c9_114, %c1_115, %c0_116] : memref<2x18x18x4xbf16, #tpu.memory_space<vmem>>, vector<1x8x16x4xbf16>
    %107 = vector.shape_cast %106 : vector<1x8x16x4xbf16> to vector<8x16x4xbf16>
    %108 = vector.shape_cast %107 : vector<8x16x4xbf16> to vector<128x4xbf16>
    %c4_117 = arith.constant 4 : index
    %c0_118 = arith.constant 0 : index
    %c0_119 = arith.constant 0 : index
    %109 = vector.load %arg2[%c4_117, %c0_118, %c0_119] : memref<9x4x128xbf16, #tpu.memory_space<vmem>>, vector<1x4x128xbf16>
    %110 = vector.shape_cast %109 : vector<1x4x128xbf16> to vector<4x128xbf16>
    %cst_120 = arith.constant dense<0.000000e+00> : vector<128x128xf32>
    %111 = tpu.matmul %108, %110, %cst_120 {dimension_numbers = #tpu.dot_dimension_numbers<[1], [0], [0], [1], [0, 0, 1, 1], [], []>} : vector<128x4xbf16>, vector<4x128xbf16>, vector<128x128xf32> -> vector<128x128xf32>
    %112 = arith.addf %105, %111 : vector<128x128xf32>
    %c0_121 = arith.constant 0 : index
    %c9_122 = arith.constant 9 : index
    %c2_123 = arith.constant 2 : index
    %c0_124 = arith.constant 0 : index
    %113 = vector.load %arg5[%c0_121, %c9_122, %c2_123, %c0_124] : memref<2x18x18x4xbf16, #tpu.memory_space<vmem>>, vector<1x8x16x4xbf16>
    %114 = vector.shape_cast %113 : vector<1x8x16x4xbf16> to vector<8x16x4xbf16>
    %115 = vector.shape_cast %114 : vector<8x16x4xbf16> to vector<128x4xbf16>
    %c5_125 = arith.constant 5 : index
    %c0_126 = arith.constant 0 : index
    %c0_127 = arith.constant 0 : index
    %116 = vector.load %arg2[%c5_125, %c0_126, %c0_127] : memref<9x4x128xbf16, #tpu.memory_space<vmem>>, vector<1x4x128xbf16>
    %117 = vector.shape_cast %116 : vector<1x4x128xbf16> to vector<4x128xbf16>
    %cst_128 = arith.constant dense<0.000000e+00> : vector<128x128xf32>
    %118 = tpu.matmul %115, %117, %cst_128 {dimension_numbers = #tpu.dot_dimension_numbers<[1], [0], [0], [1], [0, 0, 1, 1], [], []>} : vector<128x4xbf16>, vector<4x128xbf16>, vector<128x128xf32> -> vector<128x128xf32>
    %119 = arith.addf %112, %118 : vector<128x128xf32>
    %c0_129 = arith.constant 0 : index
    %c10 = arith.constant 10 : index
    %c0_130 = arith.constant 0 : index
    %c0_131 = arith.constant 0 : index
    %120 = vector.load %arg5[%c0_129, %c10, %c0_130, %c0_131] : memref<2x18x18x4xbf16, #tpu.memory_space<vmem>>, vector<1x8x16x4xbf16>
    %121 = vector.shape_cast %120 : vector<1x8x16x4xbf16> to vector<8x16x4xbf16>
    %122 = vector.shape_cast %121 : vector<8x16x4xbf16> to vector<128x4xbf16>
    %c6_132 = arith.constant 6 : index
    %c0_133 = arith.constant 0 : index
    %c0_134 = arith.constant 0 : index
    %123 = vector.load %arg2[%c6_132, %c0_133, %c0_134] : memref<9x4x128xbf16, #tpu.memory_space<vmem>>, vector<1x4x128xbf16>
    %124 = vector.shape_cast %123 : vector<1x4x128xbf16> to vector<4x128xbf16>
    %cst_135 = arith.constant dense<0.000000e+00> : vector<128x128xf32>
    %125 = tpu.matmul %122, %124, %cst_135 {dimension_numbers = #tpu.dot_dimension_numbers<[1], [0], [0], [1], [0, 0, 1, 1], [], []>} : vector<128x4xbf16>, vector<4x128xbf16>, vector<128x128xf32> -> vector<128x128xf32>
    %126 = arith.addf %119, %125 : vector<128x128xf32>
    %c0_136 = arith.constant 0 : index
    %c10_137 = arith.constant 10 : index
    %c1_138 = arith.constant 1 : index
    %c0_139 = arith.constant 0 : index
    %127 = vector.load %arg5[%c0_136, %c10_137, %c1_138, %c0_139] : memref<2x18x18x4xbf16, #tpu.memory_space<vmem>>, vector<1x8x16x4xbf16>
    %128 = vector.shape_cast %127 : vector<1x8x16x4xbf16> to vector<8x16x4xbf16>
    %129 = vector.shape_cast %128 : vector<8x16x4xbf16> to vector<128x4xbf16>
    %c7_140 = arith.constant 7 : index
    %c0_141 = arith.constant 0 : index
    %c0_142 = arith.constant 0 : index
    %130 = vector.load %arg2[%c7_140, %c0_141, %c0_142] : memref<9x4x128xbf16, #tpu.memory_space<vmem>>, vector<1x4x128xbf16>
    %131 = vector.shape_cast %130 : vector<1x4x128xbf16> to vector<4x128xbf16>
    %cst_143 = arith.constant dense<0.000000e+00> : vector<128x128xf32>
    %132 = tpu.matmul %129, %131, %cst_143 {dimension_numbers = #tpu.dot_dimension_numbers<[1], [0], [0], [1], [0, 0, 1, 1], [], []>} : vector<128x4xbf16>, vector<4x128xbf16>, vector<128x128xf32> -> vector<128x128xf32>
    %133 = arith.addf %126, %132 : vector<128x128xf32>
    %c0_144 = arith.constant 0 : index
    %c10_145 = arith.constant 10 : index
    %c2_146 = arith.constant 2 : index
    %c0_147 = arith.constant 0 : index
    %134 = vector.load %arg5[%c0_144, %c10_145, %c2_146, %c0_147] : memref<2x18x18x4xbf16, #tpu.memory_space<vmem>>, vector<1x8x16x4xbf16>
    %135 = vector.shape_cast %134 : vector<1x8x16x4xbf16> to vector<8x16x4xbf16>
    %136 = vector.shape_cast %135 : vector<8x16x4xbf16> to vector<128x4xbf16>
    %c8_148 = arith.constant 8 : index
    %c0_149 = arith.constant 0 : index
    %c0_150 = arith.constant 0 : index
    %137 = vector.load %arg2[%c8_148, %c0_149, %c0_150] : memref<9x4x128xbf16, #tpu.memory_space<vmem>>, vector<1x4x128xbf16>
    %138 = vector.shape_cast %137 : vector<1x4x128xbf16> to vector<4x128xbf16>
    %cst_151 = arith.constant dense<0.000000e+00> : vector<128x128xf32>
    %139 = tpu.matmul %136, %138, %cst_151 {dimension_numbers = #tpu.dot_dimension_numbers<[1], [0], [0], [1], [0, 0, 1, 1], [], []>} : vector<128x4xbf16>, vector<4x128xbf16>, vector<128x128xf32> -> vector<128x128xf32>
    %140 = arith.addf %133, %139 : vector<128x128xf32>
    %141 = vector.broadcast %4 : vector<1x128xf32> to vector<128x128xf32>
    %142 = arith.addf %140, %141 : vector<128x128xf32>
    %cst_152 = arith.constant 0.000000e+00 : f32
    %143 = vector.broadcast %cst_152 : f32 to vector<128x128xf32>
    %144 = arith.maximumf %142, %143 : vector<128x128xf32>
    %cst_153 = arith.constant dense<0.000000e+00> : vector<128xf32>
    %145 = vector.multi_reduction <add>, %144, %cst_153 [0] : vector<128x128xf32> to vector<128xf32>
    %146 = vector.shape_cast %145 : vector<128xf32> to vector<1x128xf32>
    %147 = arith.addf %76, %146 : vector<1x128xf32>
    %cst_154 = arith.constant 3.906250e-03 : f32
    %148 = vector.broadcast %cst_154 : f32 to vector<1x128xf32>
    %149 = arith.mulf %147, %148 : vector<1x128xf32>
    %150 = arith.mulf %149, %149 : vector<1x128xf32>
    %cst_155 = arith.constant dense<0.000000e+00> : vector<1xf32>
    %151 = vector.multi_reduction <add>, %150, %cst_155 [1] : vector<1x128xf32> to vector<1xf32>
    %152 = vector.shape_cast %151 : vector<1xf32> to vector<1x1xf32>
    %153 = math.sqrt %152 : vector<1x1xf32>
    %cst_156 = arith.constant 9.99999997E-7 : f32
    %154 = vector.broadcast %cst_156 : f32 to vector<1x1xf32>
    %155 = arith.addf %153, %154 : vector<1x1xf32>
    %156 = tpu.reciprocal %155 {approx = true} : vector<1x1xf32> -> vector<1x1xf32>
    %157 = vector.broadcast %156 : vector<1x1xf32> to vector<1x128xf32>
    %158 = arith.mulf %149, %157 : vector<1x128xf32>
    %c0_157 = arith.constant 0 : index
    %c0_158 = arith.constant 0 : index
    %159 = vector.load %arg4[%c0_157, %c0_158] : memref<2x128xf32, #tpu.memory_space<vmem>>, vector<1x128xf32>
    tpu.vector_store %arg4[%c0_157, %c0_158], %158 {strides = array<i32>} : memref<2x128xf32, #tpu.memory_space<vmem>>, vector<1x128xf32>,
    %cst_159 = arith.constant 0.000000e+00 : f32
    %160 = vector.broadcast %cst_159 : f32 to vector<1x128xf32>
    %cst_160 = arith.constant 0.000000e+00 : f32
    %161 = vector.broadcast %cst_160 : f32 to vector<128x128xf32>
    %c1_161 = arith.constant 1 : index
    %c0_162 = arith.constant 0 : index
    %c0_163 = arith.constant 0 : index
    %c0_164 = arith.constant 0 : index
    %162 = vector.load %arg5[%c1_161, %c0_162, %c0_163, %c0_164] : memref<2x18x18x4xbf16, #tpu.memory_space<vmem>>, vector<1x8x16x4xbf16>
    %163 = vector.shape_cast %162 : vector<1x8x16x4xbf16> to vector<8x16x4xbf16>
    %164 = vector.shape_cast %163 : vector<8x16x4xbf16> to vector<128x4xbf16>
    %c0_165 = arith.constant 0 : index
    %c0_166 = arith.constant 0 : index
    %c0_167 = arith.constant 0 : index
    %165 = vector.load %arg2[%c0_165, %c0_166, %c0_167] : memref<9x4x128xbf16, #tpu.memory_space<vmem>>, vector<1x4x128xbf16>
    %166 = vector.shape_cast %165 : vector<1x4x128xbf16> to vector<4x128xbf16>
    %cst_168 = arith.constant dense<0.000000e+00> : vector<128x128xf32>
    %167 = tpu.matmul %164, %166, %cst_168 {dimension_numbers = #tpu.dot_dimension_numbers<[1], [0], [0], [1], [0, 0, 1, 1], [], []>} : vector<128x4xbf16>, vector<4x128xbf16>, vector<128x128xf32> -> vector<128x128xf32>
    %168 = arith.addf %161, %167 : vector<128x128xf32>
    %c1_169 = arith.constant 1 : index
    %c0_170 = arith.constant 0 : index
    %c1_171 = arith.constant 1 : index
    %c0_172 = arith.constant 0 : index
    %169 = vector.load %arg5[%c1_169, %c0_170, %c1_171, %c0_172] : memref<2x18x18x4xbf16, #tpu.memory_space<vmem>>, vector<1x8x16x4xbf16>
    %170 = vector.shape_cast %169 : vector<1x8x16x4xbf16> to vector<8x16x4xbf16>
    %171 = vector.shape_cast %170 : vector<8x16x4xbf16> to vector<128x4xbf16>
    %c1_173 = arith.constant 1 : index
    %c0_174 = arith.constant 0 : index
    %c0_175 = arith.constant 0 : index
    %172 = vector.load %arg2[%c1_173, %c0_174, %c0_175] : memref<9x4x128xbf16, #tpu.memory_space<vmem>>, vector<1x4x128xbf16>
    %173 = vector.shape_cast %172 : vector<1x4x128xbf16> to vector<4x128xbf16>
    %cst_176 = arith.constant dense<0.000000e+00> : vector<128x128xf32>
    %174 = tpu.matmul %171, %173, %cst_176 {dimension_numbers = #tpu.dot_dimension_numbers<[1], [0], [0], [1], [0, 0, 1, 1], [], []>} : vector<128x4xbf16>, vector<4x128xbf16>, vector<128x128xf32> -> vector<128x128xf32>
    %175 = arith.addf %168, %174 : vector<128x128xf32>
    %c1_177 = arith.constant 1 : index
    %c0_178 = arith.constant 0 : index
    %c2_179 = arith.constant 2 : index
    %c0_180 = arith.constant 0 : index
    %176 = vector.load %arg5[%c1_177, %c0_178, %c2_179, %c0_180] : memref<2x18x18x4xbf16, #tpu.memory_space<vmem>>, vector<1x8x16x4xbf16>
    %177 = vector.shape_cast %176 : vector<1x8x16x4xbf16> to vector<8x16x4xbf16>
    %178 = vector.shape_cast %177 : vector<8x16x4xbf16> to vector<128x4xbf16>
    %c2_181 = arith.constant 2 : index
    %c0_182 = arith.constant 0 : index
    %c0_183 = arith.constant 0 : index
    %179 = vector.load %arg2[%c2_181, %c0_182, %c0_183] : memref<9x4x128xbf16, #tpu.memory_space<vmem>>, vector<1x4x128xbf16>
    %180 = vector.shape_cast %179 : vector<1x4x128xbf16> to vector<4x128xbf16>
    %cst_184 = arith.constant dense<0.000000e+00> : vector<128x128xf32>
    %181 = tpu.matmul %178, %180, %cst_184 {dimension_numbers = #tpu.dot_dimension_numbers<[1], [0], [0], [1], [0, 0, 1, 1], [], []>} : vector<128x4xbf16>, vector<4x128xbf16>, vector<128x128xf32> -> vector<128x128xf32>
    %182 = arith.addf %175, %181 : vector<128x128xf32>
    %c1_185 = arith.constant 1 : index
    %c1_186 = arith.constant 1 : index
    %c0_187 = arith.constant 0 : index
    %c0_188 = arith.constant 0 : index
    %183 = vector.load %arg5[%c1_185, %c1_186, %c0_187, %c0_188] : memref<2x18x18x4xbf16, #tpu.memory_space<vmem>>, vector<1x8x16x4xbf16>
    %184 = vector.shape_cast %183 : vector<1x8x16x4xbf16> to vector<8x16x4xbf16>
    %185 = vector.shape_cast %184 : vector<8x16x4xbf16> to vector<128x4xbf16>
    %c3_189 = arith.constant 3 : index
    %c0_190 = arith.constant 0 : index
    %c0_191 = arith.constant 0 : index
    %186 = vector.load %arg2[%c3_189, %c0_190, %c0_191] : memref<9x4x128xbf16, #tpu.memory_space<vmem>>, vector<1x4x128xbf16>
    %187 = vector.shape_cast %186 : vector<1x4x128xbf16> to vector<4x128xbf16>
    %cst_192 = arith.constant dense<0.000000e+00> : vector<128x128xf32>
    %188 = tpu.matmul %185, %187, %cst_192 {dimension_numbers = #tpu.dot_dimension_numbers<[1], [0], [0], [1], [0, 0, 1, 1], [], []>} : vector<128x4xbf16>, vector<4x128xbf16>, vector<128x128xf32> -> vector<128x128xf32>
    %189 = arith.addf %182, %188 : vector<128x128xf32>
    %c1_193 = arith.constant 1 : index
    %c1_194 = arith.constant 1 : index
    %c1_195 = arith.constant 1 : index
    %c0_196 = arith.constant 0 : index
    %190 = vector.load %arg5[%c1_193, %c1_194, %c1_195, %c0_196] : memref<2x18x18x4xbf16, #tpu.memory_space<vmem>>, vector<1x8x16x4xbf16>
    %191 = vector.shape_cast %190 : vector<1x8x16x4xbf16> to vector<8x16x4xbf16>
    %192 = vector.shape_cast %191 : vector<8x16x4xbf16> to vector<128x4xbf16>
    %c4_197 = arith.constant 4 : index
    %c0_198 = arith.constant 0 : index
    %c0_199 = arith.constant 0 : index
    %193 = vector.load %arg2[%c4_197, %c0_198, %c0_199] : memref<9x4x128xbf16, #tpu.memory_space<vmem>>, vector<1x4x128xbf16>
    %194 = vector.shape_cast %193 : vector<1x4x128xbf16> to vector<4x128xbf16>
    %cst_200 = arith.constant dense<0.000000e+00> : vector<128x128xf32>
    %195 = tpu.matmul %192, %194, %cst_200 {dimension_numbers = #tpu.dot_dimension_numbers<[1], [0], [0], [1], [0, 0, 1, 1], [], []>} : vector<128x4xbf16>, vector<4x128xbf16>, vector<128x128xf32> -> vector<128x128xf32>
    %196 = arith.addf %189, %195 : vector<128x128xf32>
    %c1_201 = arith.constant 1 : index
    %c1_202 = arith.constant 1 : index
    %c2_203 = arith.constant 2 : index
    %c0_204 = arith.constant 0 : index
    %197 = vector.load %arg5[%c1_201, %c1_202, %c2_203, %c0_204] : memref<2x18x18x4xbf16, #tpu.memory_space<vmem>>, vector<1x8x16x4xbf16>
    %198 = vector.shape_cast %197 : vector<1x8x16x4xbf16> to vector<8x16x4xbf16>
    %199 = vector.shape_cast %198 : vector<8x16x4xbf16> to vector<128x4xbf16>
    %c5_205 = arith.constant 5 : index
    %c0_206 = arith.constant 0 : index
    %c0_207 = arith.constant 0 : index
    %200 = vector.load %arg2[%c5_205, %c0_206, %c0_207] : memref<9x4x128xbf16, #tpu.memory_space<vmem>>, vector<1x4x128xbf16>
    %201 = vector.shape_cast %200 : vector<1x4x128xbf16> to vector<4x128xbf16>
    %cst_208 = arith.constant dense<0.000000e+00> : vector<128x128xf32>
    %202 = tpu.matmul %199, %201, %cst_208 {dimension_numbers = #tpu.dot_dimension_numbers<[1], [0], [0], [1], [0, 0, 1, 1], [], []>} : vector<128x4xbf16>, vector<4x128xbf16>, vector<128x128xf32> -> vector<128x128xf32>
    %203 = arith.addf %196, %202 : vector<128x128xf32>
    %c1_209 = arith.constant 1 : index
    %c2_210 = arith.constant 2 : index
    %c0_211 = arith.constant 0 : index
    %c0_212 = arith.constant 0 : index
    %204 = vector.load %arg5[%c1_209, %c2_210, %c0_211, %c0_212] : memref<2x18x18x4xbf16, #tpu.memory_space<vmem>>, vector<1x8x16x4xbf16>
    %205 = vector.shape_cast %204 : vector<1x8x16x4xbf16> to vector<8x16x4xbf16>
    %206 = vector.shape_cast %205 : vector<8x16x4xbf16> to vector<128x4xbf16>
    %c6_213 = arith.constant 6 : index
    %c0_214 = arith.constant 0 : index
    %c0_215 = arith.constant 0 : index
    %207 = vector.load %arg2[%c6_213, %c0_214, %c0_215] : memref<9x4x128xbf16, #tpu.memory_space<vmem>>, vector<1x4x128xbf16>
    %208 = vector.shape_cast %207 : vector<1x4x128xbf16> to vector<4x128xbf16>
    %cst_216 = arith.constant dense<0.000000e+00> : vector<128x128xf32>
    %209 = tpu.matmul %206, %208, %cst_216 {dimension_numbers = #tpu.dot_dimension_numbers<[1], [0], [0], [1], [0, 0, 1, 1], [], []>} : vector<128x4xbf16>, vector<4x128xbf16>, vector<128x128xf32> -> vector<128x128xf32>
    %210 = arith.addf %203, %209 : vector<128x128xf32>
    %c1_217 = arith.constant 1 : index
    %c2_218 = arith.constant 2 : index
    %c1_219 = arith.constant 1 : index
    %c0_220 = arith.constant 0 : index
    %211 = vector.load %arg5[%c1_217, %c2_218, %c1_219, %c0_220] : memref<2x18x18x4xbf16, #tpu.memory_space<vmem>>, vector<1x8x16x4xbf16>
    %212 = vector.shape_cast %211 : vector<1x8x16x4xbf16> to vector<8x16x4xbf16>
    %213 = vector.shape_cast %212 : vector<8x16x4xbf16> to vector<128x4xbf16>
    %c7_221 = arith.constant 7 : index
    %c0_222 = arith.constant 0 : index
    %c0_223 = arith.constant 0 : index
    %214 = vector.load %arg2[%c7_221, %c0_222, %c0_223] : memref<9x4x128xbf16, #tpu.memory_space<vmem>>, vector<1x4x128xbf16>
    %215 = vector.shape_cast %214 : vector<1x4x128xbf16> to vector<4x128xbf16>
    %cst_224 = arith.constant dense<0.000000e+00> : vector<128x128xf32>
    %216 = tpu.matmul %213, %215, %cst_224 {dimension_numbers = #tpu.dot_dimension_numbers<[1], [0], [0], [1], [0, 0, 1, 1], [], []>} : vector<128x4xbf16>, vector<4x128xbf16>, vector<128x128xf32> -> vector<128x128xf32>
    %217 = arith.addf %210, %216 : vector<128x128xf32>
    %c1_225 = arith.constant 1 : index
    %c2_226 = arith.constant 2 : index
    %c2_227 = arith.constant 2 : index
    %c0_228 = arith.constant 0 : index
    %218 = vector.load %arg5[%c1_225, %c2_226, %c2_227, %c0_228] : memref<2x18x18x4xbf16, #tpu.memory_space<vmem>>, vector<1x8x16x4xbf16>
    %219 = vector.shape_cast %218 : vector<1x8x16x4xbf16> to vector<8x16x4xbf16>
    %220 = vector.shape_cast %219 : vector<8x16x4xbf16> to vector<128x4xbf16>
    %c8_229 = arith.constant 8 : index
    %c0_230 = arith.constant 0 : index
    %c0_231 = arith.constant 0 : index
    %221 = vector.load %arg2[%c8_229, %c0_230, %c0_231] : memref<9x4x128xbf16, #tpu.memory_space<vmem>>, vector<1x4x128xbf16>
    %222 = vector.shape_cast %221 : vector<1x4x128xbf16> to vector<4x128xbf16>
    %cst_232 = arith.constant dense<0.000000e+00> : vector<128x128xf32>
    %223 = tpu.matmul %220, %222, %cst_232 {dimension_numbers = #tpu.dot_dimension_numbers<[1], [0], [0], [1], [0, 0, 1, 1], [], []>} : vector<128x4xbf16>, vector<4x128xbf16>, vector<128x128xf32> -> vector<128x128xf32>
    %224 = arith.addf %217, %223 : vector<128x128xf32>
    %225 = vector.broadcast %4 : vector<1x128xf32> to vector<128x128xf32>
    %226 = arith.addf %224, %225 : vector<128x128xf32>
    %cst_233 = arith.constant 0.000000e+00 : f32
    %227 = vector.broadcast %cst_233 : f32 to vector<128x128xf32>
    %228 = arith.maximumf %226, %227 : vector<128x128xf32>
    %cst_234 = arith.constant dense<0.000000e+00> : vector<128xf32>
    %229 = vector.multi_reduction <add>, %228, %cst_234 [0] : vector<128x128xf32> to vector<128xf32>
    %230 = vector.shape_cast %229 : vector<128xf32> to vector<1x128xf32>
    %231 = arith.addf %160, %230 : vector<1x128xf32>
    %cst_235 = arith.constant 0.000000e+00 : f32
    %232 = vector.broadcast %cst_235 : f32 to vector<128x128xf32>
    %c1_236 = arith.constant 1 : index
    %c8_237 = arith.constant 8 : index
    %c0_238 = arith.constant 0 : index
    %c0_239 = arith.constant 0 : index
    %233 = vector.load %arg5[%c1_236, %c8_237, %c0_238, %c0_239] : memref<2x18x18x4xbf16, #tpu.memory_space<vmem>>, vector<1x8x16x4xbf16>
    %234 = vector.shape_cast %233 : vector<1x8x16x4xbf16> to vector<8x16x4xbf16>
    %235 = vector.shape_cast %234 : vector<8x16x4xbf16> to vector<128x4xbf16>
    %c0_240 = arith.constant 0 : index
    %c0_241 = arith.constant 0 : index
    %c0_242 = arith.constant 0 : index
    %236 = vector.load %arg2[%c0_240, %c0_241, %c0_242] : memref<9x4x128xbf16, #tpu.memory_space<vmem>>, vector<1x4x128xbf16>
    %237 = vector.shape_cast %236 : vector<1x4x128xbf16> to vector<4x128xbf16>
    %cst_243 = arith.constant dense<0.000000e+00> : vector<128x128xf32>
    %238 = tpu.matmul %235, %237, %cst_243 {dimension_numbers = #tpu.dot_dimension_numbers<[1], [0], [0], [1], [0, 0, 1, 1], [], []>} : vector<128x4xbf16>, vector<4x128xbf16>, vector<128x128xf32> -> vector<128x128xf32>
    %239 = arith.addf %232, %238 : vector<128x128xf32>
    %c1_244 = arith.constant 1 : index
    %c8_245 = arith.constant 8 : index
    %c1_246 = arith.constant 1 : index
    %c0_247 = arith.constant 0 : index
    %240 = vector.load %arg5[%c1_244, %c8_245, %c1_246, %c0_247] : memref<2x18x18x4xbf16, #tpu.memory_space<vmem>>, vector<1x8x16x4xbf16>
    %241 = vector.shape_cast %240 : vector<1x8x16x4xbf16> to vector<8x16x4xbf16>
    %242 = vector.shape_cast %241 : vector<8x16x4xbf16> to vector<128x4xbf16>
    %c1_248 = arith.constant 1 : index
    %c0_249 = arith.constant 0 : index
    %c0_250 = arith.constant 0 : index
    %243 = vector.load %arg2[%c1_248, %c0_249, %c0_250] : memref<9x4x128xbf16, #tpu.memory_space<vmem>>, vector<1x4x128xbf16>
    %244 = vector.shape_cast %243 : vector<1x4x128xbf16> to vector<4x128xbf16>
    %cst_251 = arith.constant dense<0.000000e+00> : vector<128x128xf32>
    %245 = tpu.matmul %242, %244, %cst_251 {dimension_numbers = #tpu.dot_dimension_numbers<[1], [0], [0], [1], [0, 0, 1, 1], [], []>} : vector<128x4xbf16>, vector<4x128xbf16>, vector<128x128xf32> -> vector<128x128xf32>
    %246 = arith.addf %239, %245 : vector<128x128xf32>
    %c1_252 = arith.constant 1 : index
    %c8_253 = arith.constant 8 : index
    %c2_254 = arith.constant 2 : index
    %c0_255 = arith.constant 0 : index
    %247 = vector.load %arg5[%c1_252, %c8_253, %c2_254, %c0_255] : memref<2x18x18x4xbf16, #tpu.memory_space<vmem>>, vector<1x8x16x4xbf16>
    %248 = vector.shape_cast %247 : vector<1x8x16x4xbf16> to vector<8x16x4xbf16>
    %249 = vector.shape_cast %248 : vector<8x16x4xbf16> to vector<128x4xbf16>
    %c2_256 = arith.constant 2 : index
    %c0_257 = arith.constant 0 : index
    %c0_258 = arith.constant 0 : index
    %250 = vector.load %arg2[%c2_256, %c0_257, %c0_258] : memref<9x4x128xbf16, #tpu.memory_space<vmem>>, vector<1x4x128xbf16>
    %251 = vector.shape_cast %250 : vector<1x4x128xbf16> to vector<4x128xbf16>
    %cst_259 = arith.constant dense<0.000000e+00> : vector<128x128xf32>
    %252 = tpu.matmul %249, %251, %cst_259 {dimension_numbers = #tpu.dot_dimension_numbers<[1], [0], [0], [1], [0, 0, 1, 1], [], []>} : vector<128x4xbf16>, vector<4x128xbf16>, vector<128x128xf32> -> vector<128x128xf32>
    %253 = arith.addf %246, %252 : vector<128x128xf32>
    %c1_260 = arith.constant 1 : index
    %c9_261 = arith.constant 9 : index
    %c0_262 = arith.constant 0 : index
    %c0_263 = arith.constant 0 : index
    %254 = vector.load %arg5[%c1_260, %c9_261, %c0_262, %c0_263] : memref<2x18x18x4xbf16, #tpu.memory_space<vmem>>, vector<1x8x16x4xbf16>
    %255 = vector.shape_cast %254 : vector<1x8x16x4xbf16> to vector<8x16x4xbf16>
    %256 = vector.shape_cast %255 : vector<8x16x4xbf16> to vector<128x4xbf16>
    %c3_264 = arith.constant 3 : index
    %c0_265 = arith.constant 0 : index
    %c0_266 = arith.constant 0 : index
    %257 = vector.load %arg2[%c3_264, %c0_265, %c0_266] : memref<9x4x128xbf16, #tpu.memory_space<vmem>>, vector<1x4x128xbf16>
    %258 = vector.shape_cast %257 : vector<1x4x128xbf16> to vector<4x128xbf16>
    %cst_267 = arith.constant dense<0.000000e+00> : vector<128x128xf32>
    %259 = tpu.matmul %256, %258, %cst_267 {dimension_numbers = #tpu.dot_dimension_numbers<[1], [0], [0], [1], [0, 0, 1, 1], [], []>} : vector<128x4xbf16>, vector<4x128xbf16>, vector<128x128xf32> -> vector<128x128xf32>
    %260 = arith.addf %253, %259 : vector<128x128xf32>
    %c1_268 = arith.constant 1 : index
    %c9_269 = arith.constant 9 : index
    %c1_270 = arith.constant 1 : index
    %c0_271 = arith.constant 0 : index
    %261 = vector.load %arg5[%c1_268, %c9_269, %c1_270, %c0_271] : memref<2x18x18x4xbf16, #tpu.memory_space<vmem>>, vector<1x8x16x4xbf16>
    %262 = vector.shape_cast %261 : vector<1x8x16x4xbf16> to vector<8x16x4xbf16>
    %263 = vector.shape_cast %262 : vector<8x16x4xbf16> to vector<128x4xbf16>
    %c4_272 = arith.constant 4 : index
    %c0_273 = arith.constant 0 : index
    %c0_274 = arith.constant 0 : index
    %264 = vector.load %arg2[%c4_272, %c0_273, %c0_274] : memref<9x4x128xbf16, #tpu.memory_space<vmem>>, vector<1x4x128xbf16>
    %265 = vector.shape_cast %264 : vector<1x4x128xbf16> to vector<4x128xbf16>
    %cst_275 = arith.constant dense<0.000000e+00> : vector<128x128xf32>
    %266 = tpu.matmul %263, %265, %cst_275 {dimension_numbers = #tpu.dot_dimension_numbers<[1], [0], [0], [1], [0, 0, 1, 1], [], []>} : vector<128x4xbf16>, vector<4x128xbf16>, vector<128x128xf32> -> vector<128x128xf32>
    %267 = arith.addf %260, %266 : vector<128x128xf32>
    %c1_276 = arith.constant 1 : index
    %c9_277 = arith.constant 9 : index
    %c2_278 = arith.constant 2 : index
    %c0_279 = arith.constant 0 : index
    %268 = vector.load %arg5[%c1_276, %c9_277, %c2_278, %c0_279] : memref<2x18x18x4xbf16, #tpu.memory_space<vmem>>, vector<1x8x16x4xbf16>
    %269 = vector.shape_cast %268 : vector<1x8x16x4xbf16> to vector<8x16x4xbf16>
    %270 = vector.shape_cast %269 : vector<8x16x4xbf16> to vector<128x4xbf16>
    %c5_280 = arith.constant 5 : index
    %c0_281 = arith.constant 0 : index
    %c0_282 = arith.constant 0 : index
    %271 = vector.load %arg2[%c5_280, %c0_281, %c0_282] : memref<9x4x128xbf16, #tpu.memory_space<vmem>>, vector<1x4x128xbf16>
    %272 = vector.shape_cast %271 : vector<1x4x128xbf16> to vector<4x128xbf16>
    %cst_283 = arith.constant dense<0.000000e+00> : vector<128x128xf32>
    %273 = tpu.matmul %270, %272, %cst_283 {dimension_numbers = #tpu.dot_dimension_numbers<[1], [0], [0], [1], [0, 0, 1, 1], [], []>} : vector<128x4xbf16>, vector<4x128xbf16>, vector<128x128xf32> -> vector<128x128xf32>
    %274 = arith.addf %267, %273 : vector<128x128xf32>
    %c1_284 = arith.constant 1 : index
    %c10_285 = arith.constant 10 : index
    %c0_286 = arith.constant 0 : index
    %c0_287 = arith.constant 0 : index
    %275 = vector.load %arg5[%c1_284, %c10_285, %c0_286, %c0_287] : memref<2x18x18x4xbf16, #tpu.memory_space<vmem>>, vector<1x8x16x4xbf16>
    %276 = vector.shape_cast %275 : vector<1x8x16x4xbf16> to vector<8x16x4xbf16>
    %277 = vector.shape_cast %276 : vector<8x16x4xbf16> to vector<128x4xbf16>
    %c6_288 = arith.constant 6 : index
    %c0_289 = arith.constant 0 : index
    %c0_290 = arith.constant 0 : index
    %278 = vector.load %arg2[%c6_288, %c0_289, %c0_290] : memref<9x4x128xbf16, #tpu.memory_space<vmem>>, vector<1x4x128xbf16>
    %279 = vector.shape_cast %278 : vector<1x4x128xbf16> to vector<4x128xbf16>
    %cst_291 = arith.constant dense<0.000000e+00> : vector<128x128xf32>
    %280 = tpu.matmul %277, %279, %cst_291 {dimension_numbers = #tpu.dot_dimension_numbers<[1], [0], [0], [1], [0, 0, 1, 1], [], []>} : vector<128x4xbf16>, vector<4x128xbf16>, vector<128x128xf32> -> vector<128x128xf32>
    %281 = arith.addf %274, %280 : vector<128x128xf32>
    %c1_292 = arith.constant 1 : index
    %c10_293 = arith.constant 10 : index
    %c1_294 = arith.constant 1 : index
    %c0_295 = arith.constant 0 : index
    %282 = vector.load %arg5[%c1_292, %c10_293, %c1_294, %c0_295] : memref<2x18x18x4xbf16, #tpu.memory_space<vmem>>, vector<1x8x16x4xbf16>
    %283 = vector.shape_cast %282 : vector<1x8x16x4xbf16> to vector<8x16x4xbf16>
    %284 = vector.shape_cast %283 : vector<8x16x4xbf16> to vector<128x4xbf16>
    %c7_296 = arith.constant 7 : index
    %c0_297 = arith.constant 0 : index
    %c0_298 = arith.constant 0 : index
    %285 = vector.load %arg2[%c7_296, %c0_297, %c0_298] : memref<9x4x128xbf16, #tpu.memory_space<vmem>>, vector<1x4x128xbf16>
    %286 = vector.shape_cast %285 : vector<1x4x128xbf16> to vector<4x128xbf16>
    %cst_299 = arith.constant dense<0.000000e+00> : vector<128x128xf32>
    %287 = tpu.matmul %284, %286, %cst_299 {dimension_numbers = #tpu.dot_dimension_numbers<[1], [0], [0], [1], [0, 0, 1, 1], [], []>} : vector<128x4xbf16>, vector<4x128xbf16>, vector<128x128xf32> -> vector<128x128xf32>
    %288 = arith.addf %281, %287 : vector<128x128xf32>
    %c1_300 = arith.constant 1 : index
    %c10_301 = arith.constant 10 : index
    %c2_302 = arith.constant 2 : index
    %c0_303 = arith.constant 0 : index
    %289 = vector.load %arg5[%c1_300, %c10_301, %c2_302, %c0_303] : memref<2x18x18x4xbf16, #tpu.memory_space<vmem>>, vector<1x8x16x4xbf16>
    %290 = vector.shape_cast %289 : vector<1x8x16x4xbf16> to vector<8x16x4xbf16>
    %291 = vector.shape_cast %290 : vector<8x16x4xbf16> to vector<128x4xbf16>
    %c8_304 = arith.constant 8 : index
    %c0_305 = arith.constant 0 : index
    %c0_306 = arith.constant 0 : index
    %292 = vector.load %arg2[%c8_304, %c0_305, %c0_306] : memref<9x4x128xbf16, #tpu.memory_space<vmem>>, vector<1x4x128xbf16>
    %293 = vector.shape_cast %292 : vector<1x4x128xbf16> to vector<4x128xbf16>
    %cst_307 = arith.constant dense<0.000000e+00> : vector<128x128xf32>
    %294 = tpu.matmul %291, %293, %cst_307 {dimension_numbers = #tpu.dot_dimension_numbers<[1], [0], [0], [1], [0, 0, 1, 1], [], []>} : vector<128x4xbf16>, vector<4x128xbf16>, vector<128x128xf32> -> vector<128x128xf32>
    %295 = arith.addf %288, %294 : vector<128x128xf32>
    %296 = vector.broadcast %4 : vector<1x128xf32> to vector<128x128xf32>
    %297 = arith.addf %295, %296 : vector<128x128xf32>
    %cst_308 = arith.constant 0.000000e+00 : f32
    %298 = vector.broadcast %cst_308 : f32 to vector<128x128xf32>
    %299 = arith.maximumf %297, %298 : vector<128x128xf32>
    %cst_309 = arith.constant dense<0.000000e+00> : vector<128xf32>
    %300 = vector.multi_reduction <add>, %299, %cst_309 [0] : vector<128x128xf32> to vector<128xf32>
    %301 = vector.shape_cast %300 : vector<128xf32> to vector<1x128xf32>
    %302 = arith.addf %231, %301 : vector<1x128xf32>
    %cst_310 = arith.constant 3.906250e-03 : f32
    %303 = vector.broadcast %cst_310 : f32 to vector<1x128xf32>
    %304 = arith.mulf %302, %303 : vector<1x128xf32>
    %305 = arith.mulf %304, %304 : vector<1x128xf32>
    %cst_311 = arith.constant dense<0.000000e+00> : vector<1xf32>
    %306 = vector.multi_reduction <add>, %305, %cst_311 [1] : vector<1x128xf32> to vector<1xf32>
    %307 = vector.shape_cast %306 : vector<1xf32> to vector<1x1xf32>
    %308 = math.sqrt %307 : vector<1x1xf32>
    %cst_312 = arith.constant 9.99999997E-7 : f32
    %309 = vector.broadcast %cst_312 : f32 to vector<1x1xf32>
    %310 = arith.addf %308, %309 : vector<1x1xf32>
    %311 = tpu.reciprocal %310 {approx = true} : vector<1x1xf32> -> vector<1x1xf32>
    %312 = vector.broadcast %311 : vector<1x1xf32> to vector<1x128xf32>
    %313 = arith.mulf %304, %312 : vector<1x128xf32>
    %c1_313 = arith.constant 1 : index
    %c0_314 = arith.constant 0 : index
    %314 = vector.load %arg4[%c1_313, %c0_314] : memref<2x128xf32, #tpu.memory_space<vmem>>, vector<1x128xf32>
    tpu.vector_store %arg4[%c1_313, %c0_314], %313 {strides = array<i32>} : memref<2x128xf32, #tpu.memory_space<vmem>>, vector<1x128xf32>,
    return
  }
  func.func @transform_0(%arg0: i32) -> (i32, i32, i32, i32) {
    %c0_i32 = arith.constant 0 : i32
    %c0_i32_0 = arith.constant 0 : i32
    %c0_i32_1 = arith.constant 0 : i32
    %c0_i32_2 = arith.constant 0 : i32
    return %arg0, %c0_i32, %c0_i32_0, %c0_i32_1 : i32, i32, i32, i32
  }
  func.func @transform_1(%arg0: i32) -> (i32, i32, i32) {
    %c0_i32 = arith.constant 0 : i32
    %c0_i32_0 = arith.constant 0 : i32
    %c0_i32_1 = arith.constant 0 : i32
    %c0_i32_2 = arith.constant 0 : i32
    return %c0_i32, %c0_i32_0, %c0_i32_1 : i32, i32, i32
  }
  func.func @transform_2(%arg0: i32) -> (i32, i32) {
    %c0_i32 = arith.constant 0 : i32
    %c0_i32_0 = arith.constant 0 : i32
    %c0_i32_1 = arith.constant 0 : i32
    return %c0_i32, %c0_i32_0 : i32, i32
  }
  func.func @transform_3(%arg0: i32) -> (i32, i32) {
    %c0_i32 = arith.constant 0 : i32
    %c0_i32_0 = arith.constant 0 : i32
    return %arg0, %c0_i32 : i32, i32
  }
}

</mosaic_0001>

<bundles_post_ra>
// kernel: extractor_forward.1
= control target key start
LH: loop header
LB: loop body
LE: loop exit
PB: predicated region body
PF: predicated region fallthrough
CT: control target
= control target key end

     0   :  { %vm1335_vm0 = vcmask 1041408   ;;  %vm16_vm1 = vcmask 27648   ;;  %v12865_v5 = vmov 0   ;;  %vm19_vm2 = vcmask 24576   ;;  %s18406_s0 = inlined_call_operand.vmem [shape: bf16[2,16,16,4], index: 0, kind: input, shape index: {}]   ;;  %s18407_s1 = inlined_call_operand.vmem [shape: bf16[9,4,128], index: 1, kind: input, shape index: {}]   ;;  %s18408_s2 = inlined_call_operand.vmem [shape: f32[1,128], index: 2, kind: input, shape index: {}]   ;;  %s18409_s3 = inlined_call_operand.hbm [shape: f32[2,128], index: 3, kind: output, shape index: {}]  }
   0x1   :  { %v1080_v0 = vld [vmem:[%s18407_s1] sm:$0x3]  ;;  %v11032_v1 = vld [vmem:[%s18407_s1 + $0x2] sm:$0x3]  ;;  %17 = vst.msk [vmem:[#allocation2] sm:$0xf] %vm16_vm1, %v12865_v5 }
   0x2   :  { %12694 = vmatprep.subr.msk.bf16.mxu1 %vm1335_vm0, %v1080_v0  ;;  %v12895_v2 = vsel %vm1335_vm0, %v1080_v0, 0  ;;  %12693 = vmatprep.subr.msk.bf16.mxu0 %vm1335_vm0, %v11032_v1  ;;  %v12899_v3 = vsel %vm1335_vm0, %v11032_v1, 0  ;;  %v12904_v4 = vld [vmem:[%s18406_s0] sm:$0xf]  ;;  %18 = vst.msk [vmem:[#allocation2 + $0x4] sm:$0xf] %vm16_vm1, %v12865_v5 }
   0x3   :  { %12064 = vmatpush3.bf16.msra.mxu1 %v12895_v2  ;;  %21 = vst.msk [vmem:[#allocation2 + $0xc] sm:$0xf] %vm16_vm1, %v12865_v5  ;;  %22 = vst.msk [vmem:[#allocation2 + $0x10] sm:$0xf] %vm16_vm1, %v12865_v5  ;;  %12046 = vmatpush3.bf16.msra.mxu0 %v12899_v3  ;;  %v127_v6 = vld [vmem:[%s18406_s0 + $0x4] sm:$0xf] }
   0x4   :  { %24 = vst.msk [vmem:[#allocation2 + $0x18] sm:$0xf] %vm16_vm1, %v12865_v5  ;;  %25 = vst.msk [vmem:[#allocation2 + $0x1c] sm:$0xf] %vm16_vm1, %v12865_v5  ;;  %vm190_vm3 = vsmask.f32 256 }
   0x5   :  { %27 = vst.msk [vmem:[#allocation2 + $0x24] sm:$0xf] %vm16_vm1, %v12865_v5  ;;  %28 = vst.msk [vmem:[#allocation2 + $0x28] sm:$0xf] %vm16_vm1, %v12865_v5  ;;  %v194_v7 = vshrl.u32 %v12904_v4, 16  ;;  %v197_v8 = vshll.u32 %v12904_v4, 16 }
   0x6   :  { %30 = vst.msk [vmem:[#allocation2 + $0x30] sm:$0xf] %vm16_vm1, %v12865_v5  ;;  %31 = vst.msk [vmem:[#allocation2 + $0x34] sm:$0xf] %vm16_vm1, %v12865_v5  ;;  %vm191_vm4 = vsmask.f32 4368 }
   0x7   :  { %33 = vst.msk [vmem:[#allocation2 + $0x3c] sm:$0xf] %vm16_vm1, %v12865_v5  ;;  %34 = vst.msk [vmem:[#allocation2 + $0x40] sm:$0xf] %vm16_vm1, %v12865_v5  ;;  %v202_v9 = vshrl.u32 %v127_v6, 16  ;;  %v205_v10 = vshll.u32 %v127_v6, 16 }
   0x8   :  { %36 = vst.msk [vmem:[#allocation2 + $0x48] sm:$0xf] %vm16_vm1, %v12865_v5  ;;  %37 = vst.msk [vmem:[#allocation2 + $0x4c] sm:$0xf] %vm16_vm1, %v12865_v5  ;;  %v196_v11 = vrot.slane %v194_v7, 7  ;;  %vm1310_vm8 = vcmask 31744  }
   0x9   :  { %39 = vst.msk [vmem:[#allocation2 + $0x54] sm:$0xf] %vm16_vm1, %v12865_v5  ;;  %40 = vst.msk [vmem:[#allocation2 + $0x58] sm:$0xf] %vm16_vm1, %v12865_v5  ;;  %vm835_vm5 = vsmask.f32 7938 }
   0xa   :  { %42 = vst.msk [vmem:[#allocation2 + $0x60] sm:$0xf] %vm16_vm1, %v12865_v5  ;;  %43 = vst.msk [vmem:[#allocation2 + $0x64] sm:$0xf] %vm16_vm1, %v12865_v5  ;;  %vm1089_vm6 = vsmask.f32 3328  ;;  %v199_v15 = vor.u32 %v197_v8, %v196_v11 }
   0xb   :  { %45 = vst.msk [vmem:[#allocation2 + $0x6c] sm:$0xf] %vm16_vm1, %v12865_v5  ;;  %46 = vst.msk [vmem:[#allocation2 + $0x70] sm:$0xf] %vm16_vm1, %v12865_v5  ;;  %v204_v12 = vrot.slane %v202_v9, 7  ;;  %v18450_v14 = vmov 0 }
   0xc   :  { %48 = vst.msk [vmem:[#allocation2 + $0x78] sm:$0xf] %vm16_vm1, %v12865_v5  ;;  %49 = vst.msk [vmem:[#allocation2 + $0x7c] sm:$0xf] %vm16_vm1, %v12865_v5  ;;  %vm1090_vm7 = vsmask.f32 7440 }
   0xd   :  { %51 = vst.msk [vmem:[#allocation2 + $0x84] sm:$0xf] %vm16_vm1, %v12865_v5  ;;  %52 = vst.msk [vmem:[#allocation2 + $0x88] sm:$0xf] %vm16_vm1, %v12865_v5  ;;  %v11073_v13 = vld [vmem:[%s18407_s1 + $0x4] sm:$0x3]  ;;  %v207_v19 = vor.u32 %v205_v10, %v204_v12 }
   0xe   :  { %54 = vst.msk [vmem:[#allocation2 + $0x90] sm:$0xf] %vm16_vm1, %v12865_v5  ;;  %55 = vst.msk [vmem:[#allocation2 + $0x94] sm:$0xf] %vm16_vm1, %v12865_v5  ;;  %v200_v16 = vrot.slane %v196_v11, 4  ;;  %12695 = vmatprep.subr.msk.bf16.mxu0 %vm1335_vm0, %v11073_v13  ;;  %v209_v20 = vrot.slane %v204_v12, 4 }
   0xf   :  { %57 = vst.msk [vmem:[#allocation2 + $0x9c] sm:$0xf] %vm16_vm1, %v12865_v5  ;;  %58 = vst.msk [vmem:[#allocation2 + $0xa0] sm:$0xf] %vm16_vm1, %v12865_v5  ;;  %v11090_v17 = vld [vmem:[%s18407_s1 + $0x6] sm:$0x3] }
  0x10   :  { %60 = vst.msk [vmem:[#allocation2 + $0xa8] sm:$0xf] %vm16_vm1, %v12865_v5  ;;  %61 = vst.msk [vmem:[#allocation2 + $0xac] sm:$0xf] %vm16_vm1, %v12865_v5  ;;  %v128_v18 = vld [vmem:[%s18406_s0 + $0x8] sm:$0xf]  ;;  %12696 = vmatprep.subr.msk.bf16.mxu1 %vm1335_vm0, %v11090_v17 }
  0x11   :  { %63 = vst.msk [vmem:[#allocation2 + $0xb4] sm:$0xf] %vm16_vm1, %v12865_v5  ;;  %64 = vst.msk [vmem:[#allocation2 + $0xb8] sm:$0xf] %vm16_vm1, %v12865_v5  ;;  %v13146_v21 = vsel %vm1335_vm0, %v11073_v13, 0  ;;  %v13150_v22 = vsel %vm1335_vm0, %v11090_v17, 0 }
  0x12   :  { %66 = vst.msk [vmem:[#allocation2 + $0xc0] sm:$0xf] %vm16_vm1, %v12865_v5  ;;  %67 = vst.msk [vmem:[#allocation2 + $0xc4] sm:$0xf] %vm16_vm1, %v12865_v5  ;;  %v129_v23 = vld [vmem:[%s18406_s0 + $0xc] sm:$0xf] }
  0x13   :  { %69 = vst.msk [vmem:[#allocation2 + $0xcc] sm:$0xf] %vm16_vm1, %v12865_v5  ;;  %70 = vst.msk [vmem:[#allocation2 + $0xd0] sm:$0xf] %vm16_vm1, %v12865_v5  ;;  %v18453_v24 = vmov 0  ;;  %v211_v25 = vshrl.u32 %v128_v18, 16 }
  0x14   :  { %72 = vst.msk [vmem:[#allocation2 + $0xd8] sm:$0xf] %vm16_vm1, %v12865_v5  ;;  %73 = vst.msk [vmem:[#allocation2 + $0xdc] sm:$0xf] %vm16_vm1, %v12865_v5  ;;  %v214_v26 = vshll.u32 %v128_v18, 16  ;;  %v219_v27 = vshrl.u32 %v129_v23, 16 }
  0x15   :  { %75 = vst.msk [vmem:[#allocation2 + $0xe4] sm:$0xf] %vm16_vm1, %v12865_v5  ;;  %76 = vst.msk [vmem:[#allocation2 + $0xe8] sm:$0xf] %vm16_vm1, %v12865_v5  ;;  %v222_v28 = vshll.u32 %v129_v23, 16  ;;  %v18456_v38 = vmov 0 }
  0x16   :  { %78 = vst.msk [vmem:[#allocation2 + $0xf0] sm:$0xf] %vm16_vm1, %v12865_v5  ;;  %79 = vst.msk [vmem:[#allocation2 + $0xf4] sm:$0xf] %vm16_vm1, %v12865_v5  ;;  %v1064_v29 = vld [vmem:[#allocation2] sm:$0xf] }
  0x17   :  { %81 = vst.msk [vmem:[#allocation2 + $0xfc] sm:$0xf] %vm16_vm1, %v12865_v5  ;;  %82 = vst.msk [vmem:[#allocation2 + $0x100] sm:$0xf] %vm16_vm1, %v12865_v5  ;;  %v13161_v30 = vld [vmem:[#allocation2 + $0x4] sm:$0xf] }
  0x18   :  { %84 = vst.msk [vmem:[#allocation2 + $0x108] sm:$0xf] %vm16_vm1, %v12865_v5  ;;  %85 = vst.msk [vmem:[#allocation2 + $0x10c] sm:$0xf] %vm16_vm1, %v12865_v5  ;;  %v837_v32 = vld [vmem:[#allocation2 + $0xc] sm:$0xf]  ;;  %v11049_v37 = vcombine.low %v1064_v29, %v13161_v30 }
  0x19   :  { %87 = vst.msk [vmem:[#allocation2 + $0x114] sm:$0xf] %vm16_vm1, %v12865_v5  ;;  %88 = vst.msk [vmem:[#allocation2 + $0x118] sm:$0xf] %vm16_vm1, %v12865_v5  ;;  %v130_v33 = vld [vmem:[%s18406_s0 + $0x10] sm:$0xf] }
  0x1a   :  { %90 = vst.msk [vmem:[#allocation2 + $0x120] sm:$0xf] %vm16_vm1, %v12865_v5  ;;  %91 = vst.msk [vmem:[#allocation2 + $0x124] sm:$0xf] %vm16_vm1, %v12865_v5  ;;  %v1093_v34 = vshrl.u32 %v1064_v29, 16  ;;  %v1096_v35 = vshll.u32 %v1064_v29, 16  ;;  %12065 = vmatprep.mubr.msk.bf16.mxu1 %vm1310_vm8, %v11049_v37 }
  0x1b   :  { %93 = vst.msk [vmem:[#allocation2 + $0x12c] sm:$0xf] %vm16_vm1, %v12865_v5  ;;  %94 = vst.msk [vmem:[#allocation2 + $0x130] sm:$0xf] %vm16_vm1, %v12865_v5  ;;  %v1106_v36 = vshrl.u32 %v13161_v30, 16  ;;  %v1629_v40 = vrot.slane %v13161_v30, 5 }
  0x1c   :  { %96 = vst.msk [vmem:[#allocation2 + $0x138] sm:$0xf] %vm16_vm1, %v12865_v5  ;;  %97 = vst.msk [vmem:[#allocation2 + $0x13c] sm:$0xf] %vm16_vm1, %v12865_v5  ;;  %v1102_v42 = vshll.u32 %v13161_v30, 16  ;;  %v1095_v45 = vrot.slane %v1093_v34, 4 }
  0x1d   :  { %99 = vst.msk [vmem:[#allocation2 + $0x144] sm:$0xf] %vm16_vm1, %v12865_v5  ;;  %100 = vst.msk [vmem:[#allocation2 + $0x148] sm:$0xf] %vm16_vm1, %v12865_v5  ;;  %v1098_v46 = vrot.slane %v1096_v35, 5  ;;  %v1108_v47 = vrot.slane %v1106_v36, 4 }
  0x1e   :  { %102 = vst.msk [vmem:[#allocation2 + $0x150] sm:$0xf] %vm16_vm1, %v12865_v5  ;;  %103 = vst.msk [vmem:[#allocation2 + $0x154] sm:$0xf] %vm16_vm1, %v12865_v5  ;;  %v13188_v49 = vrot.slane %v1629_v40, 4  ;;  %v1104_v50 = vrot.slane %v1102_v42, 5 }
  0x1f   :  { %105 = vst.msk [vmem:[#allocation2 + $0x15c] sm:$0xf] %vm16_vm1, %v12865_v5  ;;  %106 = vst.msk [vmem:[#allocation2 + $0x160] sm:$0xf] %vm16_vm1, %v12865_v5  ;;  %v131_v53 = vld [vmem:[%s18406_s0 + $0x14] sm:$0xf]  ;;  %v1099_v54 = vor.u32 %v1098_v46, %v1095_v45 }
  0x20   :  { %108 = vst.msk [vmem:[#allocation2 + $0x168] sm:$0xf] %vm16_vm1, %v12865_v5  ;;  %109 = vst.msk [vmem:[#allocation2 + $0x16c] sm:$0xf] %vm16_vm1, %v12865_v5  ;;  %vm1624_vm12 = vcmask 1042432   ;;  %vm1625_vm13 = vcmask 1046532   ;;  %v1109_v59 = vor.u32 %v1108_v47, %v1104_v50 }
  0x21   :  { %111 = vst.msk [vmem:[#allocation2 + $0x174] sm:$0xf] %vm16_vm1, %v12865_v5  ;;  %112 = vst.msk [vmem:[#allocation2 + $0x178] sm:$0xf] %vm16_vm1, %v12865_v5  ;;  %v213_v55 = vrot.slane %v211_v25, 7  ;;  %v221_v56 = vrot.slane %v219_v27, 7 }
  0x22   :  { %114 = vst.msk [vmem:[#allocation2 + $0x180] sm:$0xf] %vm16_vm1, %v12865_v5  ;;  %115 = vst.msk [vmem:[#allocation2 + $0x184] sm:$0xf] %vm16_vm1, %v12865_v5  ;;  %v228_v57 = vshrl.u32 %v130_v33, 16  ;;  %v231_v60 = vshll.u32 %v130_v33, 16 }
  0x23   :  { %117 = vst.msk [vmem:[#allocation2 + $0x18c] sm:$0xf] %vm16_vm1, %v12865_v5  ;;  %118 = vst.msk [vmem:[#allocation2 + $0x190] sm:$0xf] %vm16_vm1, %v12865_v5  ;;  %v236_v61 = vshrl.u32 %v131_v53, 16  ;;  %v239_v62 = vshll.u32 %v131_v53, 16  ;;  %v216_v0 = vor.u32 %v214_v26, %v213_v55  ;;  %v224_v4 = vor.u32 %v222_v28, %v221_v56 }
  0x24   :  { %120 = vst.msk [vmem:[#allocation2 + $0x198] sm:$0xf] %vm16_vm1, %v12865_v5  ;;  %121 = vst.msk [vmem:[#allocation2 + $0x19c] sm:$0xf] %vm16_vm1, %v12865_v5  ;;  %v1100_v63 = vrot.slane %v1099_v54, 4  ;;  %v217_v1 = vrot.slane %v213_v55, 4 }
  0x25   :  { %123 = vst.msk [vmem:[#allocation2 + $0x1a4] sm:$0xf] %vm16_vm1, %v12865_v5  ;;  %124 = vst.msk [vmem:[#allocation2 + $0x1a8] sm:$0xf] %vm16_vm1, %v12865_v5  ;;  %v1110_v7 = vrot.slane %v1109_v59, 4  ;;  %v230_v8 = vrot.slane %v228_v57, 7 }
  0x26   :  { %20 = vst.msk [vmem:[#allocation2 + $0x8] sm:$0x1] %vm19_vm2, %v12865_v5  ;;  %23 = vst.msk [vmem:[#allocation2 + $0x14] sm:$0x1] %vm19_vm2, %v12865_v5  ;;  %v238_v9 = vrot.slane %v236_v61, 7  ;;  %v226_v10 = vrot.slane %v221_v56, 4 }
  0x27   :  { %26 = vst.msk [vmem:[#allocation2 + $0x20] sm:$0x1] %vm19_vm2, %v12865_v5  ;;  %29 = vst.msk [vmem:[#allocation2 + $0x2c] sm:$0x1] %vm19_vm2, %v12865_v5  ;;  %v853_v23 = vld [vmem:[#allocation2 + $0x24] sm:$0xf] }
  0x28   :  { %32 = vst.msk [vmem:[#allocation2 + $0x38] sm:$0x1] %vm19_vm2, %v12865_v5  ;;  %35 = vst.msk [vmem:[#allocation2 + $0x44] sm:$0x1] %vm19_vm2, %v12865_v5  ;;  %v234_v36 = vrot.slane %v230_v8, 4  ;;  %v241_v46 = vor.u32 %v239_v62, %v238_v9  ;;  %v18461_v57 = vmov 0 }
  0x29   :  { %38 = vst.msk [vmem:[#allocation2 + $0x50] sm:$0x1] %vm19_vm2, %v12865_v5  ;;  %41 = vst.msk [vmem:[#allocation2 + $0x5c] sm:$0x1] %vm19_vm2, %v12865_v5  ;;  %v134_v56 = vld [vmem:[%s18406_s0 + $0x20] sm:$0xf] }
  0x2a   :  { %44 = vst.msk [vmem:[#allocation2 + $0x68] sm:$0x1] %vm19_vm2, %v12865_v5  ;;  %47 = vst.msk [vmem:[#allocation2 + $0x74] sm:$0x1] %vm19_vm2, %v12865_v5 }
  0x2b   :  { %50 = vst.msk [vmem:[#allocation2 + $0x80] sm:$0x1] %vm19_vm2, %v12865_v5  ;;  %53 = vst.msk [vmem:[#allocation2 + $0x8c] sm:$0x1] %vm19_vm2, %v12865_v5 }
  0x2c   :  { %56 = vst.msk [vmem:[#allocation2 + $0x98] sm:$0x1] %vm19_vm2, %v12865_v5  ;;  %59 = vst.msk [vmem:[#allocation2 + $0xa4] sm:$0x1] %vm19_vm2, %v12865_v5 }
  0x2d   :  { %62 = vst.msk [vmem:[#allocation2 + $0xb0] sm:$0x1] %vm19_vm2, %v12865_v5  ;;  %65 = vst.msk [vmem:[#allocation2 + $0xbc] sm:$0x1] %vm19_vm2, %v12865_v5  ;;  %v13177_v39 = vld [vmem:[#allocation2 + $0x8] sm:$0x1] }
  0x2e   :  { %68 = vst.msk [vmem:[#allocation2 + $0xc8] sm:$0x1] %vm19_vm2, %v12865_v5  ;;  %71 = vst.msk [vmem:[#allocation2 + $0xd4] sm:$0x1] %vm19_vm2, %v12865_v5  ;;  %v1112_v43 = vshll.u32 %v13177_v39, 16  ;;  %v1632_v48 = vrot.slane %v13177_v39, 5 }
  0x2f   :  { %74 = vst.msk [vmem:[#allocation2 + $0xe0] sm:$0x1] %vm19_vm2, %v12865_v5  ;;  %77 = vst.msk [vmem:[#allocation2 + $0xec] sm:$0x1] %vm19_vm2, %v12865_v5  ;;  %v843_v44 = vld [vmem:[#allocation2 + $0x14] sm:$0x1] }
  0x30   :  { %80 = vst.msk [vmem:[#allocation2 + $0xf8] sm:$0x1] %vm19_vm2, %v12865_v5  ;;  %83 = vst.msk [vmem:[#allocation2 + $0x104] sm:$0x1] %vm19_vm2, %v12865_v5  ;;  %v1114_v51 = vrot.slane %v1112_v43, 5 }
  0x31   :  { %86 = vst.msk [vmem:[#allocation2 + $0x110] sm:$0x1] %vm19_vm2, %v12865_v5  ;;  %89 = vst.msk [vmem:[#allocation2 + $0x11c] sm:$0x1] %vm19_vm2, %v12865_v5  ;;  %v850_v25 = vld [vmem:[#allocation2 + $0x20] sm:$0x1] }
  0x32   :  { %92 = vst.msk [vmem:[#allocation2 + $0x128] sm:$0x1] %vm19_vm2, %v12865_v5  ;;  %95 = vst.msk [vmem:[#allocation2 + $0x134] sm:$0x1] %vm19_vm2, %v12865_v5  ;;  %v13270_v39 = vld [vmem:[%s18406_s0 + $0x24] sm:$0xf] }
  0x33   :  { %98 = vst.msk [vmem:[#allocation2 + $0x140] sm:$0x1] %vm19_vm2, %v12865_v5  ;;  %101 = vst.msk [vmem:[#allocation2 + $0x14c] sm:$0x1] %vm19_vm2, %v12865_v5 }
  0x34   :  { %104 = vst.msk [vmem:[#allocation2 + $0x158] sm:$0x1] %vm19_vm2, %v12865_v5  ;;  %107 = vst.msk [vmem:[#allocation2 + $0x164] sm:$0x1] %vm19_vm2, %v12865_v5 }
  0x35   :  { %110 = vst.msk [vmem:[#allocation2 + $0x170] sm:$0x1] %vm19_vm2, %v12865_v5  ;;  %113 = vst.msk [vmem:[#allocation2 + $0x17c] sm:$0x1] %vm19_vm2, %v12865_v5 }
  0x36   :  { %116 = vst.msk [vmem:[#allocation2 + $0x188] sm:$0x1] %vm19_vm2, %v12865_v5  ;;  %119 = vst.msk [vmem:[#allocation2 + $0x194] sm:$0x1] %vm19_vm2, %v12865_v5 }
  0x37   :  { %122 = vst.msk [vmem:[#allocation2 + $0x1a0] sm:$0x1] %vm19_vm2, %v12865_v5  ;;  %125 = vst.msk [vmem:[#allocation2 + $0x1ac] sm:$0x1] %vm19_vm2, %v12865_v5  ;;  %v846_v5 = vld [vmem:[#allocation2 + $0x18] sm:$0xf] }
  0x38   :  { %vm13134_vm9 = vmor %vm190_vm3, %vm191_vm4 }
  0x39   :  { %v18451_v14 = vsel %vm13134_vm9, 4294967295, %v18450_v14  ;;  %vm13157_vm10 = vmand %vm16_vm1, %vm835_vm5  ;;  %v208_v31 = vsel %vm13134_vm9, %v200_v16, %v207_v19  ;;  %v225_v18 = vsel %vm13134_vm9, %v217_v1, %v224_v4 }
  0x3a   :  { %18452 = vst [vmem:[#allocation6_spill] sm:$0xff] %v18451_v14  ;;  %v18454_v24 = vsel %vm13157_vm10, 4294967295, %v18453_v24  ;;  %840 = vst.msk [vmem:[#allocation2 + $0x10] sm:$0xf] %vm16_vm1, %v208_v31  ;;  %v838_v41 = vsel %vm13157_vm10, %v199_v15, %v837_v32  ;;  %v847_v19 = vsel %vm13157_vm10, %v216_v0, %v846_v5  ;;  %v132_v31 = vld [vmem:[%s18406_s0 + $0x18] sm:$0xf] }
  0x3b   :  { %18455 = vst [vmem:[#allocation7_spill] sm:$0xff] %v18454_v24  ;;  %vm13173_vm11 = vmand %vm19_vm2, %vm190_vm3  ;;  %v245_v55 = vshrl.u32 %v132_v31, 16  ;;  %v248_v62 = vshll.u32 %v132_v31, 16 }
  0x3c   :  { %v18457_v38 = vsel %vm13173_vm11, 4294967295, %v18456_v38  ;;  %839 = vst [vmem:[#allocation2 + $0xc] sm:$0xf] %v838_v41  ;;  %v844_v52 = vsel %vm13173_vm11, %v209_v20, %v843_v44  ;;  %vm13197_vm14 = vmor %vm1089_vm6, %vm1090_vm7  ;;  %v233_v20 = vor.u32 %v231_v60, %v230_v8  ;;  %v857_v44 = vld [vmem:[#allocation2 + $0x2c] sm:$0x1]  ;;  %v851_v54 = vsel %vm13173_vm11, %v226_v10, %v850_v25 }
  0x3d   :  { %18458 = vst [vmem:[#allocation8_spill] sm:$0xff] %v18457_v38  ;;  %845 = vst [vmem:[#allocation2 + $0x14] sm:$0x1] %v844_v52  ;;  %v1105_v13 = vsel %vm13197_vm14, %v1100_v63, %v1104_v50  ;;  %v1115_v17 = vsel %vm13197_vm14, %v1110_v7, %v1114_v51  ;;  %v243_v50 = vrot.slane %v238_v9, 4  ;;  %v133_v51 = vld [vmem:[%s18406_s0 + $0x1c] sm:$0xf]  ;;  %v242_v60 = vsel %vm13134_vm9, %v234_v36, %v241_v46 }
  0x3e   :  { %848 = vst [vmem:[#allocation2 + $0x18] sm:$0xf] %v847_v19  ;;  %849 = vst.msk [vmem:[#allocation2 + $0x1c] sm:$0xf] %vm16_vm1, %v225_v18  ;;  %v11033_v32 = vcombine.low %v1105_v13, %v1115_v17  ;;  %v854_v47 = vsel %vm13157_vm10, %v233_v20, %v853_v23  ;;  %v247_v0 = vrot.slane %v245_v55, 7  ;;  %v253_v1 = vshrl.u32 %v133_v51, 16 }
  0x3f   :  { %855 = vst [vmem:[#allocation2 + $0x24] sm:$0xf] %v854_v47  ;;  %vm13242_vm15 = vmor %vm1624_vm12, %vm1625_vm13  ;;  %v858_v61 = vsel %vm13173_vm11, %v243_v50, %v857_v44  ;;  %v256_v4 = vshll.u32 %v133_v51, 16  ;;  %v262_v9 = vshrl.u32 %v134_v56, 16  ;;  %v265_v10 = vshll.u32 %v134_v56, 16 }
  0x40   :  { %12047 = vmatprep.mubr.msk.bf16.mxu0 %vm1310_vm8, %v11033_v32  ;;  %v18462_v57 = vsel %vm13242_vm15, 4294967295, %v18461_v57  ;;  %852 = vst [vmem:[#allocation2 + $0x20] sm:$0x1] %v851_v54  ;;  %856 = vst.msk [vmem:[#allocation2 + $0x28] sm:$0xf] %vm16_vm1, %v242_v60  ;;  %v250_v25 = vor.u32 %v248_v62, %v247_v0  ;;  %v255_v32 = vrot.slane %v253_v1, 7 }
  0x41   :  { %v13201_v6 = vld [vmem:[#allocation2 + $0x10] sm:$0xf]  ;;  %18463 = vst [vmem:[#allocation9_spill] sm:$0xff] %v18462_v57  ;;  %859 = vst [vmem:[#allocation2 + $0x2c] sm:$0x1] %v858_v61  ;;  %v270_v44 = vshrl.u32 %v13270_v39, 16 }
  0x42   :  { %v1130_v11 = vshrl.u32 %v13201_v6, 16  ;;  %v1636_v12 = vrot.slane %v13201_v6, 5  ;;  %v1126_v15 = vshll.u32 %v13201_v6, 16  ;;  %v860_v18 = vld [vmem:[#allocation2 + $0x30] sm:$0xf]  ;;  %v258_v51 = vor.u32 %v256_v4, %v255_v32 }
  0x43   :  { %v1066_v16 = vld [vmem:[#allocation2 + $0xc] sm:$0xf] }
  0x44   :  { %v1117_v26 = vshrl.u32 %v1066_v16, 16  ;;  %v1120_v27 = vshll.u32 %v1066_v16, 16  ;;  %v11050_v28 = vcombine.low %v1066_v16, %v13201_v6  ;;  %v13217_v29 = vrot.slane %v1636_v12, 4  ;;  %v13223_v33 = vld [vmem:[#allocation2 + $0x14] sm:$0x1] }
  0x45   :  { %v1128_v34 = vrot.slane %v1126_v15, 5  ;;  %v1132_v35 = vrot.slane %v1130_v11, 4  ;;  %v1136_v42 = vshll.u32 %v13223_v33, 16  ;;  %v1639_v43 = vrot.slane %v13223_v33, 5  ;;  %v1068_v7 = vld [vmem:[#allocation2 + $0x18] sm:$0xf] }
  0x46   :  { %v1119_v37 = vrot.slane %v1117_v26, 4  ;;  %v1122_v41 = vrot.slane %v1120_v27, 5  ;;  %12066 = vmatmul.mubr.msk.bf16.vlgmr.msra.gmra.mxu1 %vm1310_vm8, %v11050_v28  ;;  %v13253_v8 = vld [vmem:[#allocation2 + $0x1c] sm:$0xf]  ;;  %v13260_v11 = vsel %vm13242_vm15, %v13188_v49, %v1632_v48  ;;  %v1141_v15 = vshrl.u32 %v1068_v7, 16 }
  0x47   :  { %v1133_v45 = vor.u32 %v1132_v35, %v1128_v34  ;;  %12100 = vmatpush3.bf16.msra.mxu1 %v13150_v22  ;;  %v1138_v53 = vrot.slane %v1136_v42, 5  ;;  %v1144_v16 = vshll.u32 %v1068_v7, 16  ;;  %v1154_v17 = vshrl.u32 %v13253_v8, 16  ;;  %v1070_v28 = vld [vmem:[#allocation2 + $0x24] sm:$0xf] }
  0x48   :  { %v1123_v52 = vor.u32 %v1122_v41, %v1119_v37  ;;  %v11051_v20 = vcombine.low %v1068_v7, %v13253_v8  ;;  %v1150_v23 = vshll.u32 %v13253_v8, 16  ;;  %v1143_v48 = vrot.slane %v1141_v15, 4  ;;  %v13279_v41 = vld [vmem:[#allocation2 + $0x20] sm:$0x1]  ;;  %v13285_v50 = vld [vmem:[#allocation2 + $0x2c] sm:$0x1] }
  0x49   :  { %v1134_v59 = vrot.slane %v1133_v45, 4  ;;  %v1146_v49 = vrot.slane %v1144_v16, 5  ;;  %v1156_v26 = vrot.slane %v1154_v17, 4  ;;  %v251_v27 = vrot.slane %v247_v0, 4  ;;  %v13282_v45 = vld [vmem:[#allocation2 + $0x28] sm:$0xf] }
  0x4a   :  { %v1124_v63 = vrot.slane %v1123_v52, 4  ;;  %12069 = vmatprep.mubr.msk.bf16.mxu1 %vm1310_vm8, %v11051_v20  ;;  %v1152_v31 = vrot.slane %v1150_v23, 5  ;;  %v13276_v35 = vrot.slane %v262_v9, 7  ;;  %v1165_v36 = vshrl.u32 %v1070_v28, 16  ;;  %v864_v7 = vld [vmem:[#allocation2 + $0x38] sm:$0x1] }
  0x4b   :  { %v1139_v5 = vsel %vm13197_vm14, %v1134_v59, %v1138_v53  ;;  %v1168_v37 = vshll.u32 %v1070_v28, 16  ;;  %v1147_v42 = vor.u32 %v1146_v49, %v1143_v48  ;;  %v1160_v47 = vshll.u32 %v13279_v41, 16  ;;  %v867_v59 = vld [vmem:[#allocation2 + $0x3c] sm:$0xf]  ;;  %v871_v16 = vld [vmem:[#allocation2 + $0x44] sm:$0x1] }
  0x4c   :  { %v1129_v13 = vsel %vm13197_vm14, %v1124_v63, %v1128_v34  ;;  %v861_v34 = vsel %vm13157_vm10, %v250_v25, %v860_v18  ;;  %v1157_v46 = vor.u32 %v1156_v26, %v1152_v31  ;;  %v267_v52 = vor.u32 %v265_v10, %v13276_v35  ;;  %v136_v17 = vld [vmem:[%s18406_s0 + $0x28] sm:$0xf]  ;;  %v137_v48 = vld [vmem:[%s18406_s0 + $0x2c] sm:$0xf]  ;;  %v1602_v33 = vld [vmem:[#allocation2 + $0x18] sm:$0xe] }
  0x4d   :  { %v11034_v19 = vcombine.low %v1129_v13, %v1139_v5  ;;  %862 = vst [vmem:[#allocation2 + $0x30] sm:$0xf] %v861_v34  ;;  %v1167_v53 = vrot.slane %v1165_v36, 4  ;;  %v1170_v54 = vrot.slane %v1168_v37, 5  ;;  %v1178_v55 = vshrl.u32 %v13282_v45, 16 }
  0x4e   :  { %v11052_v56 = vcombine.low %v1070_v28, %v13282_v45  ;;  %v1148_v60 = vrot.slane %v1147_v42, 4  ;;  %v1158_v61 = vrot.slane %v1157_v46, 4  ;;  %v1162_v62 = vrot.slane %v1160_v47, 5  ;;  %v13307_v18 = vld [vmem:[%s18407_s1 + $0x8] sm:$0x3] }
  0x4f   :  { %12048 = vmatmul.mubr.msk.bf16.vlgmr.msra.gmra.mxu0 %vm1310_vm8, %v11034_v19  ;;  %v1174_v63 = vshll.u32 %v13282_v45, 16  ;;  %v1171_v0 = vor.u32 %v1170_v54, %v1167_v53  ;;  %v1180_v1 = vrot.slane %v1178_v55, 4  ;;  %v1184_v4 = vshll.u32 %v13285_v50, 16  ;;  %v13317_v49 = vld [vmem:[%s18407_s1 + $0xa] sm:$0x3] }
  0x50   :  { %12082 = vmatpush3.bf16.msra.mxu0 %v13146_v21  ;;  %12070 = vmatmul.mubr.msk.bf16.gmra.mxu1 %vm1310_vm8, %v11052_v56  ;;  %v259_v5 = vsel %vm13134_vm9, %v251_v27, %v258_v51  ;;  %v1153_v9 = vsel %vm13197_vm14, %v1148_v60, %v1152_v31  ;;  %v1163_v10 = vsel %vm13197_vm14, %v1158_v61, %v1162_v62  ;;  %v268_v15 = vrot.slane %v13276_v35, 4  ;;  %v874_v61 = vld [vmem:[#allocation2 + $0x48] sm:$0xf] }
  0x51   :  { %v1176_v13 = vrot.slane %v1174_v63, 5  ;;  %863 = vst.msk [vmem:[#allocation2 + $0x34] sm:$0xf] %vm16_vm1, %v259_v5  ;;  %v11035_v19 = vcombine.low %v1153_v9, %v1163_v10  ;;  %v1172_v20 = vrot.slane %v1171_v0, 4  ;;  %v1186_v23 = vrot.slane %v1184_v4, 5  ;;  %12697 = vmatprep.subr.msk.bf16.mxu0 %vm1335_vm0, %v13307_v18  ;;  %12698 = vmatprep.subr.msk.bf16.mxu1 %vm1335_vm0, %v13317_v49 }
  0x52   :  { %v272_v25 = vrot.slane %v270_v44, 7  ;;  %v273_v28 = vshll.u32 %v13270_v39, 16  ;;  %v868_v31 = vsel %vm13157_vm10, %v267_v52, %v867_v59  ;;  %v260_v34 = vrot.slane %v255_v32, 4  ;;  %v138_v32 = vld [vmem:[%s18406_s0 + $0x30] sm:$0xf] }
  0x53   :  { %v1181_v26 = vor.u32 %v1180_v1, %v1176_v13  ;;  %12051 = vmatprep.mubr.msk.bf16.mxu0 %vm1310_vm8, %v11035_v19  ;;  %v1177_v35 = vsel %vm13197_vm14, %v1172_v20, %v1176_v13  ;;  %869 = vst [vmem:[#allocation2 + $0x3c] sm:$0xf] %v868_v31  ;;  %v279_v47 = vshrl.u32 %v136_v17, 16  ;;  %v282_v54 = vshll.u32 %v136_v17, 16  ;;  %v139_v17 = vld [vmem:[%s18406_s0 + $0x34] sm:$0xf] }
  0x54   :  { %v1072_v27 = vld [vmem:[#allocation2 + $0x30] sm:$0xf]  ;;  %v277_v42 = vrot.slane %v272_v25, 4  ;;  %v275_v46 = vor.u32 %v273_v28, %v272_v25  ;;  %v865_v39 = vsel %vm13173_vm11, %v260_v34, %v864_v7  ;;  %v287_v60 = vshrl.u32 %v137_v48, 16 }
  0x55   :  { %v1189_v36 = vshrl.u32 %v1072_v27, 16  ;;  %v1192_v37 = vshll.u32 %v1072_v27, 16  ;;  %v1182_v44 = vrot.slane %v1181_v26, 4  ;;  %866 = vst [vmem:[#allocation2 + $0x38] sm:$0x1] %v865_v39  ;;  %v281_v59 = vrot.slane %v279_v47, 7 }
  0x56   :  { %v872_v53 = vsel %vm13173_vm11, %v277_v42, %v871_v16  ;;  %v276_v56 = vsel %vm13134_vm9, %v268_v15, %v275_v46  ;;  %v290_v1 = vshll.u32 %v137_v48, 16  ;;  %v296_v4 = vshrl.u32 %v138_v32, 16  ;;  %v881_v46 = vld [vmem:[#allocation2 + $0x54] sm:$0xf] }
  0x57   :  { %v1191_v51 = vrot.slane %v1189_v36, 4  ;;  %v1194_v52 = vrot.slane %v1192_v37, 5  ;;  %v1187_v55 = vsel %vm13197_vm14, %v1182_v44, %v1186_v23  ;;  %873 = vst [vmem:[#allocation2 + $0x44] sm:$0x1] %v872_v53  ;;  %870 = vst.msk [vmem:[#allocation2 + $0x40] sm:$0xf] %vm16_vm1, %v276_v56  ;;  %v284_v10 = vor.u32 %v282_v54, %v281_v59 }
  0x58   :  { %v11036_v62 = vcombine.low %v1177_v35, %v1187_v55  ;;  %v13338_v63 = vld [vmem:[#allocation2 + $0x34] sm:$0xf]  ;;  %v285_v15 = vrot.slane %v281_v59, 4  ;;  %v289_v16 = vrot.slane %v287_v60, 7  ;;  %v298_v19 = vrot.slane %v296_v4, 7 }
  0x59   :  { %v1195_v0 = vor.u32 %v1194_v52, %v1191_v51  ;;  %v1202_v5 = vshrl.u32 %v13338_v63, 16  ;;  %v11053_v7 = vcombine.low %v1072_v27, %v13338_v63  ;;  %v1198_v9 = vshll.u32 %v13338_v63, 16 }
  0x5a   :  { %12052 = vmatmul.mubr.msk.bf16.gmra.mxu0 %vm1310_vm8, %v11036_v62  ;;  %v1074_v20 = vld [vmem:[#allocation2 + $0x3c] sm:$0xf]  ;;  %v875_v48 = vsel %vm13157_vm10, %v284_v10, %v874_v61  ;;  %v299_v26 = vshll.u32 %v138_v32, 16  ;;  %v292_v31 = vor.u32 %v290_v1, %v289_v16  ;;  %v302_v34 = vrot.slane %v298_v19, 4  ;;  %v878_v1 = vld [vmem:[#allocation2 + $0x50] sm:$0x1] }
  0x5b   :  { %v1196_v13 = vrot.slane %v1195_v0, 4  ;;  %12073 = vmatprep.mubr.msk.bf16.mxu1 %vm1310_vm8, %v11053_v7  ;;  %v1200_v23 = vrot.slane %v1198_v9, 5  ;;  %v1204_v25 = vrot.slane %v1202_v5, 4  ;;  %v1213_v27 = vshrl.u32 %v1074_v20, 16  ;;  %876 = vst [vmem:[#allocation2 + $0x48] sm:$0xf] %v875_v48 }
  0x5c   :  { %v1216_v28 = vshll.u32 %v1074_v20, 16  ;;  %v13351_v35 = vld [vmem:[#allocation2 + $0x38] sm:$0x1]  ;;  %v301_v42 = vor.u32 %v299_v26, %v298_v19  ;;  %v304_v44 = vshrl.u32 %v139_v17, 16  ;;  %v293_v32 = vsel %vm13134_vm9, %v285_v15, %v292_v31  ;;  %v885_v10 = vld [vmem:[#allocation2 + $0x5c] sm:$0x1] }
  0x5d   :  { %v1201_v36 = vsel %vm13197_vm14, %v1196_v13, %v1200_v23  ;;  %v1205_v37 = vor.u32 %v1204_v25, %v1200_v23  ;;  %v1215_v39 = vrot.slane %v1213_v27, 4  ;;  %v1208_v51 = vshll.u32 %v13351_v35, 16  ;;  %877 = vst.msk [vmem:[#allocation2 + $0x4c] sm:$0xf] %vm16_vm1, %v293_v32  ;;  %v1600_v13 = vld [vmem:[#allocation2] sm:$0xe] }
  0x5e   :  { %v1218_v47 = vrot.slane %v1216_v28, 5  ;;  %v13356_v52 = vld [vmem:[#allocation2 + $0x44] sm:$0x1]  ;;  %v13360_v53 = vld [vmem:[#allocation2 + $0x40] sm:$0xf]  ;;  %v306_v56 = vrot.slane %v304_v44, 7  ;;  %v882_v9 = vsel %vm13157_vm10, %v301_v42, %v881_v46 }
  0x5f   :  { %v1206_v54 = vrot.slane %v1205_v37, 4  ;;  %v1232_v55 = vshll.u32 %v13356_v52, 16  ;;  %v307_v59 = vshll.u32 %v139_v17, 16  ;;  %v1226_v60 = vshrl.u32 %v13360_v53, 16  ;;  %883 = vst [vmem:[#allocation2 + $0x54] sm:$0xf] %v882_v9 }
  0x60   :  { %v11054_v61 = vcombine.low %v1074_v20, %v13360_v53  ;;  %v1210_v62 = vrot.slane %v1208_v51, 5  ;;  %v1219_v0 = vor.u32 %v1218_v47, %v1215_v39  ;;  %v1222_v4 = vshll.u32 %v13360_v53, 16  ;;  %v1601_v23 = vld [vmem:[#allocation2 + $0xc] sm:$0xe] }
  0x61   :  { %v1234_v5 = vrot.slane %v1232_v55, 5  ;;  %v309_v7 = vor.u32 %v307_v59, %v306_v56  ;;  %v1228_v19 = vrot.slane %v1226_v60, 4  ;;  %v294_v20 = vrot.slane %v289_v16, 4 }
  0x62   :  { %12074 = vmatmul.mubr.msk.bf16.gmra.mxu1 %vm1310_vm8, %v11054_v61  ;;  %v1211_v15 = vsel %vm13197_vm14, %v1206_v54, %v1210_v62  ;;  %v1220_v17 = vrot.slane %v1219_v0, 4  ;;  %v1224_v48 = vrot.slane %v1222_v4, 5  ;;  %v1076_v26 = vld [vmem:[#allocation2 + $0x48] sm:$0xf]  ;;  %v311_v28 = vrot.slane %v306_v56, 4 }
  0x63   :  { %v11037_v25 = vcombine.low %v1201_v36, %v1211_v15  ;;  %v310_v27 = vsel %vm13134_vm9, %v302_v34, %v309_v7  ;;  %v1237_v31 = vshrl.u32 %v1076_v26, 16  ;;  %v1240_v37 = vshll.u32 %v1076_v26, 16 }
  0x64   :  { %884 = vst.msk [vmem:[#allocation2 + $0x58] sm:$0xf] %vm16_vm1, %v310_v27  ;;  %v879_v42 = vsel %vm13173_vm11, %v294_v20, %v878_v1  ;;  %v11065_v44 = vrot.slane %v1600_v13, 9  ;;  %v1225_v16 = vsel %vm13197_vm14, %v1220_v17, %v1224_v48  ;;  %v1229_v36 = vor.u32 %v1228_v19, %v1224_v48  ;;  %v13382_v39 = vld [vmem:[#allocation2 + $0x4c] sm:$0xf] }
  0x65   :  { %12055 = vmatprep.mubr.msk.bf16.mxu0 %vm1310_vm8, %v11037_v25  ;;  %880 = vst [vmem:[#allocation2 + $0x50] sm:$0x1] %v879_v42  ;;  %v886_v46 = vsel %vm13173_vm11, %v311_v28, %v885_v10  ;;  %v11066_v34 = vrot.slane %v1601_v23, 9  ;;  %v1239_v47 = vrot.slane %v1237_v31, 4  ;;  %v1242_v51 = vrot.slane %v1240_v37, 5  ;;  %v12739_v13 = vld [vmem:[#allocation2 + $0xc] sm:$0xff]  }
  0x66   :  { %887 = vst [vmem:[#allocation2 + $0x5c] sm:$0x1] %v886_v46  ;;  %v13388_v32 = vsel %vm13242_vm15, %v11065_v44, %v1629_v40  ;;  %v13395_v54 = vsel %vm13242_vm15, %v13217_v29, %v1639_v43  ;;  %v1230_v55 = vrot.slane %v1229_v36, 4  ;;  %v1250_v56 = vshrl.u32 %v13382_v39, 16  ;;  %v1078_v62 = vld [vmem:[#allocation2 + $0x54] sm:$0xf] }
  0x67   :  { %v11055_v59 = vcombine.low %v1076_v26, %v13382_v39  ;;  %v1246_v60 = vshll.u32 %v13382_v39, 16  ;;  %v1243_v61 = vor.u32 %v1242_v51, %v1239_v47  ;;  %v11074_v30 = vcombine.low %v13388_v32, %v13260_v11  ;;  %v1603_v19 = vld [vmem:[#allocation2 + $0x24] sm:$0xe]  ;;  %v2429_v11 = vld [vmem:[#allocation2 + $0xc] sm:$0xe] }
  0x68   :  { %v13406_v40 = vsel %vm13242_vm15, %v11066_v34, %v1636_v12  ;;  %v13410_v29 = vsel %vm1335_vm0, %v13307_v18, 0  ;;  %v1235_v43 = vsel %vm13197_vm14, %v1230_v55, %v1234_v5  ;;  %v1252_v1 = vrot.slane %v1250_v56, 4 }
  0x69   :  { %12077 = vmatprep.mubr.msk.bf16.mxu1 %vm1310_vm8, %v11055_v59  ;;  %v1248_v0 = vrot.slane %v1246_v60, 5  ;;  %v11075_v6 = vcombine.low %v13406_v40, %v13395_v54  ;;  %v11038_v4 = vcombine.low %v1225_v16, %v1235_v43  ;;  %v1261_v7 = vshrl.u32 %v1078_v62, 16  ;;  %v1604_v60 = vld [vmem:[#allocation2 + $0x30] sm:$0xe]  ;;  %v12744_v40 = vld [vmem:[#allocation2 + $0x48] sm:$0xff]  }
  0x6a   :  { %v1264_v12 = vshll.u32 %v1078_v62, 16  ;;  %v1244_v9 = vrot.slane %v1243_v61, 4  ;;  %v13421_v15 = vsel %vm1335_vm0, %v13317_v49, 0  ;;  %v11067_v5 = vrot.slane %v1602_v33, 9 }
  0x6b   :  { %v13417_v10 = vld [vmem:[#allocation2 + $0x58] sm:$0xf]  ;;  %v1253_v18 = vor.u32 %v1252_v1, %v1248_v0  ;;  %v1643_v17 = vrot.slane %v13253_v8, 5  ;;  %12056 = vmatmul.mubr.msk.bf16.gmra.mxu0 %vm1310_vm8, %v11038_v4  ;;  %v1263_v20 = vrot.slane %v1261_v7, 4  ;;  %v1646_v47 = vrot.slane %v13279_v41, 5  ;;  %v12741_v7 = vld [vmem:[#allocation2 + $0x24] sm:$0xff]  }
  0x6c   :  { %v1266_v23 = vrot.slane %v1264_v12, 5  ;;  %v1274_v25 = vshrl.u32 %v13417_v10, 16  ;;  %v11056_v48 = vcombine.low %v1078_v62, %v13417_v10  ;;  %v13427_v26 = vld [vmem:[#allocation2 + $0x50] sm:$0x1]  ;;  %v1249_v27 = vsel %vm13197_vm14, %v1244_v9, %v1248_v0  ;;  %v1605_v0 = vld [vmem:[#allocation2 + $0x3c] sm:$0xe] }
  0x6d   :  { %v1254_v28 = vrot.slane %v1253_v18, 4  ;;  %v1256_v49 = vshll.u32 %v13427_v26, 16  ;;  %v13432_v31 = vld [vmem:[#allocation2 + $0x5c] sm:$0x1]  ;;  %v1270_v8 = vshll.u32 %v13417_v10, 16  ;;  %v13439_v16 = vsel %vm13242_vm15, %v11067_v5, %v1643_v17 }
  0x6e   :  { %12078 = vmatmul.mubr.msk.bf16.gmra.mxu1 %vm1310_vm8, %v11056_v48  ;;  %v1267_v37 = vor.u32 %v1266_v23, %v1263_v20  ;;  %v1276_v42 = vrot.slane %v1274_v25, 4  ;;  %v1280_v44 = vshll.u32 %v13432_v31, 16  ;;  %v1645_v34 = vrot.slane %v1643_v17, 4  ;;  %v12740_v4 = vld [vmem:[#allocation2 + $0x18] sm:$0xff]  }
  0x6f   :  { %v1258_v36 = vrot.slane %v1256_v49, 5  ;;  %v1272_v46 = vrot.slane %v1270_v8, 5  ;;  %12101 = vmatprep.mubr.msk.bf16.mxu1 %vm1310_vm8, %v12739_v13  ;;  %v11068_v56 = vrot.slane %v1603_v19, 9  ;;  %v1650_v59 = vrot.slane %v13282_v45, 5  ;;  %v141_v25 = vld [vmem:[%s18406_s0 + $0x3c] sm:$0xf] }
  0x70   :  { %v1268_v51 = vrot.slane %v1267_v37, 4  ;;  %v1282_v55 = vrot.slane %v1280_v44, 5  ;;  %v13448_v43 = vsel %vm13242_vm15, %v1645_v34, %v1646_v47  ;;  %v1653_v62 = vrot.slane %v13285_v50, 5  ;;  %v140_v50 = vld [vmem:[%s18406_s0 + $0x38] sm:$0xf]  ;;  %v12742_v47 = vld [vmem:[#allocation2 + $0x30] sm:$0xff]  }
  0x71   :  { %v1259_v61 = vsel %vm13197_vm14, %v1254_v28, %v1258_v36  ;;  %v1277_v33 = vor.u32 %v1276_v42, %v1272_v46  ;;  %v11076_v45 = vcombine.low %v13439_v16, %v13448_v43  ;;  %v13457_v12 = vsel %vm13242_vm15, %v11068_v56, %v1650_v59  ;;  %v1606_v28 = vld [vmem:[#allocation2 + $0x48] sm:$0xe]  ;;  %v1607_v34 = vld [vmem:[#allocation2 + $0x54] sm:$0xe] }
  0x72   :  { %v11039_v1 = vcombine.low %v1249_v27, %v1259_v61  ;;  %v1273_v41 = vsel %vm13197_vm14, %v1268_v51, %v1272_v46  ;;  %v1652_v18 = vrot.slane %v1650_v59, 4  ;;  %v11069_v13 = vrot.slane %v1604_v60, 9  ;;  %v888_v59 = vld [vmem:[#allocation2 + $0x60] sm:$0xf] }
  0x73   :  { %v1278_v9 = vrot.slane %v1277_v33, 4  ;;  %v1657_v5 = vrot.slane %v13338_v63, 5  ;;  %v1660_v17 = vrot.slane %v13351_v35, 5  ;;  %v11070_v19 = vrot.slane %v1605_v0, 9  ;;  %v12743_v61 = vld [vmem:[#allocation2 + $0x3c] sm:$0xff]  }
  0x74   :  { %12059 = vmatprep.mubr.msk.bf16.mxu0 %vm1310_vm8, %v11039_v1  ;;  %v1664_v20 = vrot.slane %v13360_v53, 5  ;;  %v1667_v23 = vrot.slane %v13356_v52, 5  ;;  %v13474_v48 = vsel %vm13242_vm15, %v1652_v18, %v1653_v62  ;;  %v13483_v52 = vld [vmem:[%s18407_s1 + $0xe] sm:$0x3]  ;;  %v313_v44 = vshrl.u32 %v140_v50, 16 }
  0x75   :  { %v1283_v63 = vsel %vm13197_vm14, %v1278_v9, %v1282_v55  ;;  %v13478_v27 = vsel %vm13242_vm15, %v11069_v13, %v1657_v5  ;;  %v1659_v35 = vrot.slane %v1657_v5, 4  ;;  %v11077_v49 = vcombine.low %v13457_v12, %v13474_v48 }
  0x76   :  { %v11040_v53 = vcombine.low %v1273_v41, %v1283_v63  ;;  %12102 = vmatmul.mubr.msk.bf16.vlgmr.msra.gmra.mxu1 %vm1310_vm8, %v12740_v4  ;;  %v13490_v8 = vsel %vm13242_vm15, %v11070_v19, %v1664_v20  ;;  %v1666_v37 = vrot.slane %v1664_v20, 4  ;;  %v316_v36 = vshll.u32 %v140_v50, 16  ;;  %v2048_v41 = vld [vmem:[#allocation2 + $0x10] sm:$0xf]  ;;  %v2049_v50 = vld [vmem:[#allocation2 + $0x14] sm:$0x1] }
  0x77   :  { %12136 = vmatpush3.bf16.msra.mxu1 %v13421_v15  ;;  %12105 = vmatprep.mubr.msk.bf16.mxu1 %vm1310_vm8, %v12741_v7  ;;  %v13496_v42 = vsel %vm13242_vm15, %v1659_v35, %v1660_v17  ;;  %v321_v46 = vshrl.u32 %v141_v25, 16  ;;  %v324_v56 = vshll.u32 %v141_v25, 16  ;;  %v11071_v60 = vrot.slane %v1606_v28, 9  ;;  %v2430_v17 = vld [vmem:[#allocation2 + $0x18] sm:$0xe] }
  0x78   :  { %12060 = vmatmul.mubr.msk.bf16.gmra.mxu0 %vm1310_vm8, %v11040_v53  ;;  %v11078_v51 = vcombine.low %v13478_v27, %v13496_v42  ;;  %v13503_v55 = vsel %vm13242_vm15, %v1666_v37, %v1667_v23  ;;  %12700 = vmatprep.subr.msk.bf16.mxu1 %vm1335_vm0, %v13483_v52  ;;  %v315_v62 = vrot.slane %v313_v44, 7  ;;  %v1671_v1 = vrot.slane %v13382_v39, 5  ;;  %v2052_v35 = vld [vmem:[#allocation2 + $0x20] sm:$0x1]  ;;  %v2047_v28 = vld [vmem:[#allocation2 + $0xc] sm:$0xf] }
  0x79   :  { %12083 = vmatprep.mubr.msk.bf16.mxu0 %vm1310_vm8, %v11074_v30  ;;  %v11079_v33 = vcombine.low %v13490_v8, %v13503_v55  ;;  %v13513_v0 = vrot.slane %v321_v46, 7  ;;  %v1674_v4 = vrot.slane %v13427_v26, 5  ;;  %v11072_v7 = vrot.slane %v1607_v34, 9  ;;  %v2061_v55 = vld [vmem:[#allocation2 + $0x44] sm:$0x1] }
  0x7a   :  { %v1678_v9 = vrot.slane %v13417_v10, 5  ;;  %v1681_v18 = vrot.slane %v13432_v31, 5  ;;  %v318_v32 = vor.u32 %v316_v36, %v315_v62  ;;  %v319_v30 = vrot.slane %v315_v62, 4  ;;  %v2051_v31 = vld [vmem:[#allocation2 + $0x1c] sm:$0xf] }
  0x7b   :  { %v326_v13 = vor.u32 %v324_v56, %v13513_v0  ;;  %v328_v5 = vrot.slane %v13513_v0, 4  ;;  %v13523_v39 = vsel %vm13242_vm15, %v11071_v60, %v1671_v1  ;;  %v1673_v19 = vrot.slane %v1671_v1, 4  ;;  %v2050_v60 = vld [vmem:[#allocation2 + $0x18] sm:$0xf] }
  0x7c   :  { %v13527_v26 = vsel %vm13242_vm15, %v11072_v7, %v1678_v9  ;;  %v1680_v10 = vrot.slane %v1678_v9, 4  ;;  %v889_v23 = vsel %vm13157_vm10, %v318_v32, %v888_v59  ;;  %v11124_v25 = vrot.slane %v2429_v11, 9  ;;  %v11149_v59 = vld [vmem:[%s18407_s1 + $0xc] sm:$0x3] }
  0x7d   :  { %v327_v20 = vsel %vm13134_vm9, %v319_v30, %v326_v13  ;;  %v2463_v63 = vrot.slane %v2048_v41, 5  ;;  %890 = vst [vmem:[#allocation2 + $0x60] sm:$0xf] %v889_v23  ;;  %v13537_v53 = vsel %vm13242_vm15, %v1673_v19, %v1674_v4  ;;  %v2466_v44 = vrot.slane %v2049_v50, 5  ;;  %v2431_v23 = vld [vmem:[#allocation2 + $0x24] sm:$0xe] }
  0x7e   :  { %12106 = vmatmul.mubr.msk.bf16.gmra.mxu1 %vm1310_vm8, %v12742_v47  ;;  %891 = vst.msk [vmem:[#allocation2 + $0x64] sm:$0xf] %vm16_vm1, %v327_v20  ;;  %v13541_v37 = vsel %vm13242_vm15, %v1680_v10, %v1681_v18  ;;  %v11125_v36 = vrot.slane %v2430_v17, 9  ;;  %v11080_v46 = vcombine.low %v13523_v39, %v13537_v53  ;;  %v2473_v62 = vrot.slane %v2052_v35, 5  ;;  %v13579_v20 = vld [vmem:[#allocation2 + $0x28] sm:$0xf] }
  0x7f   :  { %12109 = vmatprep.mubr.msk.bf16.mxu1 %vm1310_vm8, %v12743_v61  ;;  %v11081_v34 = vcombine.low %v13527_v26, %v13541_v37  ;;  %v13550_v47 = vsel %vm13242_vm15, %v11124_v25, %v2463_v63  ;;  %v2465_v56 = vrot.slane %v2463_v63, 4  ;;  %v2470_v61 = vrot.slane %v2051_v31, 5 }
  0x80   :  { %12084 = vmatmul.mubr.msk.bf16.vlgmr.msra.gmra.mxu0 %vm1310_vm8, %v11075_v6  ;;  %v2072_v1 = vshrl.u32 %v2047_v28, 16  ;;  %v2075_v4 = vshll.u32 %v2047_v28, 16  ;;  %v2081_v9 = vshll.u32 %v2048_v41, 16  ;;  %v2085_v18 = vshrl.u32 %v2048_v41, 16  ;;  %v12745_v6 = vld [vmem:[#allocation2 + $0x54] sm:$0xff]  }
  0x81   :  { %12118 = vmatpush3.bf16.msra.mxu0 %v13410_v29  ;;  %12087 = vmatprep.mubr.msk.bf16.mxu0 %vm1310_vm8, %v11076_v45  ;;  %v13566_v7 = vsel %vm13242_vm15, %v2465_v56, %v2466_v44  ;;  %v2091_v54 = vshll.u32 %v2049_v50, 16  ;;  %v13572_v32 = vsel %vm13242_vm15, %v11125_v36, %v2470_v61  ;;  %v2472_v30 = vrot.slane %v2470_v61, 4 }
  0x82   :  { %v11133_v11 = vcombine.low %v13550_v47, %v13566_v7  ;;  %v2074_v16 = vrot.slane %v2072_v1, 4  ;;  %12699 = vmatprep.subr.msk.bf16.mxu0 %vm1335_vm0, %v11149_v59  ;;  %v2077_v43 = vrot.slane %v2075_v4, 5  ;;  %v2083_v45 = vrot.slane %v2081_v9, 5 }
  0x83   :  { %v2087_v13 = vrot.slane %v2085_v18, 4  ;;  %v2093_v17 = vrot.slane %v2091_v54, 5  ;;  %v13577_v41 = vsel %vm13242_vm15, %v2472_v30, %v2473_v62  ;;  %v2096_v50 = vshrl.u32 %v2050_v60, 16  ;;  %v2055_v62 = vld [vmem:[#allocation2 + $0x2c] sm:$0x1] }
  0x84   :  { %v2099_v19 = vshll.u32 %v2050_v60, 16  ;;  %v2105_v10 = vshll.u32 %v2051_v31, 16  ;;  %v11134_v25 = vcombine.low %v13572_v32, %v13577_v41  ;;  %v2078_v63 = vor.u32 %v2077_v43, %v2074_v16  ;;  %v2432_v54 = vld [vmem:[#allocation2 + $0x30] sm:$0xe]  ;;  %v2058_v16 = vld [vmem:[#allocation2 + $0x38] sm:$0x1] }
  0x85   :  { %v2088_v28 = vor.u32 %v2087_v13, %v2083_v45  ;;  %v2109_v44 = vshrl.u32 %v2051_v31, 16  ;;  %v2098_v36 = vrot.slane %v2096_v50, 4  ;;  %v2115_v1 = vshll.u32 %v2052_v35, 16  ;;  %v12746_v43 = vld [vmem:[#allocation2 + $0x60] sm:$0xff]  }
  0x86   :  { %12110 = vmatmul.mubr.msk.bf16.gmra.mxu1 %vm1310_vm8, %v12744_v40  ;;  %v2101_v56 = vrot.slane %v2099_v19, 5  ;;  %v2107_v61 = vrot.slane %v2105_v10, 5  ;;  %v2079_v60 = vrot.slane %v2078_v63, 4  ;;  %v13586_v18 = vsel %vm1335_vm0, %v11149_v59, 0 }
  0x87   :  { %12113 = vmatprep.mubr.msk.bf16.mxu1 %vm1310_vm8, %v12745_v6  ;;  %v2089_v4 = vrot.slane %v2088_v28, 4  ;;  %v2111_v9 = vrot.slane %v2109_v44, 4  ;;  %18464 = vst [vmem:[#allocation10_spill] sm:$0xff] %v13586_v18  ;;  %v2117_v40 = vrot.slane %v2115_v1, 5  ;;  %v13594_v35 = vsel %vm1335_vm0, %v13483_v52, 0 }
  0x88   :  { %12088 = vmatmul.mubr.msk.bf16.gmra.mxu0 %vm1310_vm8, %v11077_v49  ;;  %v2102_v31 = vor.u32 %v2101_v56, %v2098_v36  ;;  %18465 = vst [vmem:[#allocation11_spill] sm:$0xff] %v13594_v35  ;;  %v11126_v30 = vrot.slane %v2431_v23, 9  ;;  %v13596_v6 = vld [vmem:[#allocation2 + $0x34] sm:$0xf]  ;;  %v2084_v59 = vsel %vm13197_vm14, %v2079_v60, %v2083_v45  ;;  %v2477_v49 = vrot.slane %v13579_v20, 5 }
  0x89   :  { %12091 = vmatprep.mubr.msk.bf16.mxu0 %vm1310_vm8, %v11078_v51  ;;  %v2094_v12 = vsel %vm13197_vm14, %v2089_v4, %v2093_v17  ;;  %v2112_v48 = vor.u32 %v2111_v9, %v2107_v61  ;;  %v2053_v52 = vld [vmem:[#allocation2 + $0x24] sm:$0xf]  ;;  %v2480_v19 = vrot.slane %v2055_v62, 5  ;;  %v11127_v10 = vrot.slane %v2432_v54, 9  ;;  %v2056_v44 = vld [vmem:[#allocation2 + $0x30] sm:$0xf] }
  0x8a   :  { %v13607_v13 = vcombine.low %v2084_v59, %v2094_v12  ;;  %v2103_v50 = vrot.slane %v2102_v31, 4  ;;  %v2478_v42 = vsel %vm13242_vm15, %v11126_v30, %v2477_v49  ;;  %v2479_v51 = vrot.slane %v2477_v49, 4  ;;  %v2433_v49 = vld [vmem:[#allocation2 + $0x3c] sm:$0xe] }
  0x8b   :  { %v2113_v27 = vrot.slane %v2112_v48, 4  ;;  %v2484_v45 = vrot.slane %v13596_v6, 5  ;;  %v2487_v23 = vrot.slane %v2058_v16, 5  ;;  %v2120_v63 = vshrl.u32 %v2053_v52, 16  ;;  %v13641_v48 = vld [vmem:[#allocation2 + $0x40] sm:$0xf] }
  0x8c   :  { %v2108_v17 = vsel %vm13197_vm14, %v2103_v50, %v2107_v61  ;;  %v2123_v28 = vshll.u32 %v2053_v52, 16  ;;  %v2481_v56 = vsel %vm13242_vm15, %v2479_v51, %v2480_v19  ;;  %v2133_v30 = vshrl.u32 %v13579_v20, 16 }
  0x8d   :  { %v2118_v36 = vsel %vm13197_vm14, %v2113_v27, %v2117_v40  ;;  %v13620_v1 = vsel %vm13242_vm15, %v11127_v10, %v2484_v45  ;;  %v2486_v60 = vrot.slane %v2484_v45, 4  ;;  %v11135_v61 = vcombine.low %v2478_v42, %v2481_v56  ;;  %v13649_v10 = vld [vmem:[#allocation2 + $0x4c] sm:$0xf]  ;;  %v13651_v27 = vld [vmem:[#allocation2 + $0x50] sm:$0x1] }
  0x8e   :  { %12114 = vmatmul.mubr.msk.bf16.gmra.mxu1 %vm1310_vm8, %v12746_v43  ;;  %v13623_v4 = vcombine.low %v2108_v17, %v2118_v36  ;;  %v2122_v9 = vrot.slane %v2120_v63, 4  ;;  %v2125_v54 = vrot.slane %v2123_v28, 5  ;;  %v2129_v40 = vshll.u32 %v13579_v20, 16  ;;  %v2434_v42 = vld [vmem:[#allocation2 + $0x48] sm:$0xe] }
  0x8f   :  { %12137 = vmatprep.mubr.msk.bf16.mxu1 %vm1310_vm8, %v11133_v11  ;;  %v13631_v31 = vsel %vm13242_vm15, %v2486_v60, %v2487_v23  ;;  %v2139_v59 = vshll.u32 %v2055_v62, 16  ;;  %v2144_v7 = vshrl.u32 %v2056_v44, 16  ;;  %v2147_v11 = vshll.u32 %v2056_v44, 16  ;;  %v2059_v45 = vld [vmem:[#allocation2 + $0x3c] sm:$0xf] }
  0x90   :  { %12092 = vmatmul.mubr.msk.bf16.gmra.mxu0 %vm1310_vm8, %v11079_v33  ;;  %v11136_v12 = vcombine.low %v13620_v1, %v13631_v31  ;;  %v2126_v47 = vor.u32 %v2125_v54, %v2122_v9  ;;  %v2131_v20 = vrot.slane %v2129_v40, 5  ;;  %v2135_v62 = vrot.slane %v2133_v30, 4  ;;  %v13711_v1 = vld [vmem:[%s18407_s1 + $0x10] sm:$0x3] }
  0x91   :  { %12095 = vmatprep.mubr.msk.bf16.mxu0 %vm1310_vm8, %v11080_v46  ;;  %v2141_v52 = vrot.slane %v2139_v59, 5  ;;  %v2153_v8 = vshll.u32 %v13596_v6, 16  ;;  %v2146_v43 = vrot.slane %v2144_v7, 4  ;;  %v2149_v50 = vrot.slane %v2147_v11, 5  ;;  %v2062_v7 = vld [vmem:[#allocation2 + $0x48] sm:$0xf] }
  0x92   :  { %v2127_v33 = vrot.slane %v2126_v47, 4  ;;  %v2157_v19 = vshrl.u32 %v13596_v6, 16  ;;  %v2136_v51 = vor.u32 %v2135_v62, %v2131_v20  ;;  %v2163_v53 = vshll.u32 %v2058_v16, 16  ;;  %v12821_v11 = vld [vmem:[%s18407_s1 + $0x2] sm:$0x3] }
  0x93   :  { %v2155_v39 = vrot.slane %v2153_v8, 5  ;;  %v11128_v46 = vrot.slane %v2433_v49, 9  ;;  %v2150_v23 = vor.u32 %v2149_v50, %v2146_v43  ;;  %v2491_v28 = vrot.slane %v13641_v48, 5 }
  0x94   :  { %v2132_v17 = vsel %vm13197_vm14, %v2127_v33, %v2131_v20  ;;  %v2159_v63 = vrot.slane %v2157_v19, 4  ;;  %v2137_v44 = vrot.slane %v2136_v51, 4  ;;  %v2165_v36 = vrot.slane %v2163_v53, 5  ;;  %v13694_v19 = vld [vmem:[#allocation2 + $0x58] sm:$0xf] }
  0x95   :  { %v2494_v6 = vrot.slane %v2061_v55, 5  ;;  %v11129_v56 = vrot.slane %v2434_v42, 9  ;;  %v2151_v60 = vrot.slane %v2150_v23, 4  ;;  %v2492_v9 = vsel %vm13242_vm15, %v11128_v46, %v2491_v28  ;;  %v2435_v46 = vld [vmem:[#allocation2 + $0x54] sm:$0xe] }
  0x96   :  { %12138 = vmatmul.mubr.msk.bf16.vlgmr.msra.gmra.mxu1 %vm1310_vm8, %v11134_v25  ;;  %v2160_v16 = vor.u32 %v2159_v63, %v2155_v39  ;;  %v2493_v54 = vrot.slane %v2491_v28, 4  ;;  %v2142_v40 = vsel %vm13197_vm14, %v2137_v44, %v2141_v52  ;;  %v2498_v30 = vrot.slane %v13649_v10, 5 }
  0x97   :  { %12172 = vmatpush3.bf16.msra.mxu1 %v13594_v35  ;;  %12141 = vmatprep.mubr.msk.bf16.mxu1 %vm1310_vm8, %v11135_v61  ;;  %v2501_v59 = vrot.slane %v13651_v27, 5  ;;  %v2168_v32 = vshrl.u32 %v2059_v45, 16  ;;  %v11110_v41 = vcombine.low %v2132_v17, %v2142_v40  ;;  %v2156_v25 = vsel %vm13197_vm14, %v2151_v60, %v2155_v39 }
  0x98   :  { %12096 = vmatmul.mubr.msk.bf16.gmra.mxu0 %vm1310_vm8, %v11081_v34  ;;  %v2161_v47 = vrot.slane %v2160_v16, 4  ;;  %v2495_v61 = vsel %vm13242_vm15, %v2493_v54, %v2494_v6  ;;  %12702 = vmatprep.subr.msk.bf16.mxu1 %vm1335_vm0, %v12821_v11  ;;  %v13684_v37 = vsel %vm13242_vm15, %v11129_v56, %v2498_v30  ;;  %v2500_v34 = vrot.slane %v2498_v30, 4  ;;  %v892_v6 = vld [vmem:[#allocation2 + $0x68] sm:$0x1]  ;;  %v2436_v54 = vld [vmem:[#allocation2 + $0x60] sm:$0xe] }
  0x99   :  { %12119 = vmatprep.mubr.msk.bf16.mxu0 %vm1310_vm8, %v13607_v13  ;;  %v11137_v26 = vcombine.low %v2492_v9, %v2495_v61  ;;  %v2170_v49 = vrot.slane %v2168_v32, 4  ;;  %v2171_v62 = vshll.u32 %v2059_v45, 16  ;;  %v2177_v52 = vshll.u32 %v13641_v48, 16 }
  0x9a   :  { %v2166_v20 = vsel %vm13197_vm14, %v2161_v47, %v2165_v36  ;;  %v2181_v8 = vshrl.u32 %v13641_v48, 16  ;;  %v2502_v13 = vsel %vm13242_vm15, %v2500_v34, %v2501_v59  ;;  %v2187_v43 = vshll.u32 %v2061_v55, 16  ;;  %v13704_v36 = vld [vmem:[#allocation2 + $0x5c] sm:$0x1]  ;;  %v2065_v47 = vld [vmem:[#allocation2 + $0x54] sm:$0xf] }
  0x9b   :  { %v13690_v33 = vcombine.low %v2156_v25, %v2166_v20  ;;  %v2192_v50 = vshrl.u32 %v2062_v7, 16  ;;  %v11138_v42 = vcombine.low %v13684_v37, %v2502_v13  ;;  %v2173_v51 = vrot.slane %v2171_v62, 5  ;;  %v2069_v25 = vld [vmem:[#allocation2 + $0x64] sm:$0xf] }
  0x9c   :  { %v2179_v39 = vrot.slane %v2177_v52, 5  ;;  %v2183_v53 = vrot.slane %v2181_v8, 4  ;;  %v2189_v45 = vrot.slane %v2187_v43, 5  ;;  %v2195_v23 = vshll.u32 %v2062_v7, 16  ;;  %v2068_v43 = vld [vmem:[#allocation2 + $0x60] sm:$0xf] }
  0x9d   :  { %v2194_v17 = vrot.slane %v2192_v50, 4  ;;  %v2201_v48 = vshll.u32 %v13649_v10, 16  ;;  %v2174_v55 = vor.u32 %v2173_v51, %v2170_v49  ;;  %v2205_v28 = vshrl.u32 %v13649_v10, 16 }
  0x9e   :  { %12142 = vmatmul.mubr.msk.bf16.gmra.mxu1 %vm1310_vm8, %v11136_v12  ;;  %v2184_v63 = vor.u32 %v2183_v53, %v2179_v39  ;;  %v2211_v44 = vshll.u32 %v13651_v27, 16  ;;  %v2197_v56 = vrot.slane %v2195_v23, 5  ;;  %v11130_v16 = vrot.slane %v2435_v46, 9  ;;  %v2882_v46 = vld [vmem:[#allocation2 + $0x18] sm:$0xf] }
  0x9f   :  { %12145 = vmatprep.mubr.msk.bf16.mxu1 %vm1310_vm8, %v11137_v26  ;;  %v2203_v60 = vrot.slane %v2201_v48, 5  ;;  %v2505_v9 = vrot.slane %v13694_v19, 5  ;;  %v2175_v31 = vrot.slane %v2174_v55, 4  ;;  %v2207_v10 = vrot.slane %v2205_v28, 4 }
  0xa0   :  { %12120 = vmatmul.mubr.msk.bf16.vlgmr.msra.gmra.mxu0 %vm1310_vm8, %v13623_v4  ;;  %v2185_v12 = vrot.slane %v2184_v63, 4  ;;  %v2213_v27 = vrot.slane %v2211_v44, 5  ;;  %v2198_v40 = vor.u32 %v2197_v56, %v2194_v17  ;;  %v2508_v32 = vrot.slane %v13704_v36, 5 }
  0xa1   :  { %12154 = vmatpush3.bf16.msra.mxu0 %v13586_v18  ;;  %12123 = vmatprep.mubr.msk.bf16.mxu0 %vm1310_vm8, %v11110_v41  ;;  %v2506_v30 = vsel %vm13242_vm15, %v11130_v16, %v2505_v9  ;;  %v2507_v59 = vrot.slane %v2505_v9, 4  ;;  %v2180_v4 = vsel %vm13197_vm14, %v2175_v31, %v2179_v39  ;;  %v2208_v7 = vor.u32 %v2207_v10, %v2203_v60 }
  0xa2   :  { %v2190_v61 = vsel %vm13197_vm14, %v2185_v12, %v2189_v45  ;;  %v893_v41 = vsel %vm13173_vm11, %v328_v5, %v892_v6  ;;  %12701 = vmatprep.subr.msk.bf16.mxu0 %vm1335_vm0, %v13711_v1  ;;  %v2199_v26 = vrot.slane %v2198_v40, 4  ;;  %v11131_v34 = vrot.slane %v2436_v54, 9 }
  0xa3   :  { %v11112_v11 = vcombine.low %v2180_v4, %v2190_v61  ;;  %v2509_v37 = vsel %vm13242_vm15, %v2507_v59, %v2508_v32  ;;  %894 = vst [vmem:[#allocation2 + $0x68] sm:$0x1] %v893_v41  ;;  %v2209_v49 = vrot.slane %v2208_v7, 4  ;;  %v2512_v62 = vrot.slane %v2069_v25, 5  ;;  %v13754_v7 = vld [vmem:[#allocation2 + $0x20] sm:$0x1] }
  0xa4   :  { %v11139_v20 = vcombine.low %v2506_v30, %v2509_v37  ;;  %v2216_v52 = vshrl.u32 %v2065_v47, 16  ;;  %v2204_v0 = vsel %vm13197_vm14, %v2199_v26, %v2203_v60  ;;  %v2219_v8 = vshll.u32 %v2065_v47, 16  ;;  %v13746_v30 = vld [vmem:[#allocation2 + $0x1c] sm:$0xf]  ;;  %v2885_v41 = vld [vmem:[#allocation2 + $0x24] sm:$0xf] }
  0xa5   :  { %v2225_v5 = vshll.u32 %v13694_v19, 16  ;;  %v2229_v13 = vshrl.u32 %v13694_v19, 16  ;;  %v2214_v50 = vsel %vm13197_vm14, %v2209_v49, %v2213_v27  ;;  %v2513_v51 = vsel %vm13242_vm15, %v11131_v34, %v2512_v62 }
  0xa6   :  { %12146 = vmatmul.mubr.msk.bf16.gmra.mxu1 %vm1310_vm8, %v11138_v42  ;;  %v2514_v39 = vrot.slane %v2512_v62, 4  ;;  %v2218_v53 = vrot.slane %v2216_v52, 4  ;;  %v11113_v45 = vcombine.low %v2204_v0, %v2214_v50  ;;  %v2221_v17 = vrot.slane %v2219_v8, 5 }
  0xa7   :  { %12149 = vmatprep.mubr.msk.bf16.mxu1 %vm1310_vm8, %v11139_v20  ;;  %v2227_v23 = vrot.slane %v2225_v5, 5  ;;  %v2231_v48 = vrot.slane %v2229_v13, 4  ;;  %v2235_v19 = vshll.u32 %v13704_v36, 16  ;;  %v2240_v42 = vshrl.u32 %v2068_v43, 16  ;;  %v13763_v5 = vld [vmem:[#allocation2 + $0x28] sm:$0xf] }
  0xa8   :  { %12124 = vmatmul.mubr.msk.bf16.gmra.mxu0 %vm1310_vm8, %v13690_v33  ;;  %v2243_v55 = vshll.u32 %v2068_v43, 16  ;;  %v2249_v63 = vshll.u32 %v2069_v25, 16  ;;  %v2222_v28 = vor.u32 %v2221_v17, %v2218_v53  ;;  %v2253_v6 = vshrl.u32 %v2069_v25, 16 }
  0xa9   :  { %12127 = vmatprep.mubr.msk.bf16.mxu0 %vm1310_vm8, %v11112_v11  ;;  %v2232_v44 = vor.u32 %v2231_v48, %v2227_v23  ;;  %v2907_v56 = vshrl.u32 %v2882_v46, 16  ;;  %v2237_v16 = vrot.slane %v2235_v19, 5  ;;  %v2242_v9 = vrot.slane %v2240_v42, 4  ;;  %v13770_v42 = vld [vmem:[#allocation2 + $0x34] sm:$0xf] }
  0xaa   :  { %v2070_v60 = vld [vmem:[#allocation2 + $0x68] sm:$0x1]  ;;  %v2245_v31 = vrot.slane %v2243_v55, 5  ;;  %v2251_v12 = vrot.slane %v2249_v63, 5  ;;  %v2223_v27 = vrot.slane %v2222_v28, 4  ;;  %v2255_v33 = vrot.slane %v2253_v6, 4 }
  0xab   :  { %v2515_v10 = vrot.slane %v2070_v60, 5  ;;  %v2233_v54 = vrot.slane %v2232_v44, 4  ;;  %v2259_v36 = vshll.u32 %v2070_v60, 16  ;;  %v2909_v59 = vrot.slane %v2907_v56, 4  ;;  %v13774_v6 = vld [vmem:[#allocation2 + $0x38] sm:$0x1] }
  0xac   :  { %v2246_v40 = vor.u32 %v2245_v31, %v2242_v9  ;;  %v2910_v32 = vshll.u32 %v2882_v46, 16  ;;  %v2228_v25 = vsel %vm13197_vm14, %v2223_v27, %v2227_v23  ;;  %v2256_v61 = vor.u32 %v2255_v33, %v2251_v12  ;;  %v13768_v46 = vld [vmem:[#allocation2 + $0x2c] sm:$0x1]  ;;  %v2891_v31 = vld [vmem:[#allocation2 + $0x3c] sm:$0xf] }
  0xad   :  { %v2516_v47 = vsel %vm13242_vm15, %v2514_v39, %v2515_v10  ;;  %v2238_v4 = vsel %vm13197_vm14, %v2233_v54, %v2237_v16  ;;  %v2261_v34 = vrot.slane %v2259_v36, 5  ;;  %v2916_v62 = vshll.u32 %v13746_v30, 16  ;;  %v12747_v33 = vld [vmem:[#allocation2 + $0x18] sm:$0xff]  }
  0xae   :  { %v11140_v11 = vcombine.low %v2513_v51, %v2516_v47  ;;  %v11114_v26 = vcombine.low %v2228_v25, %v2238_v4  ;;  %v2247_v37 = vrot.slane %v2246_v40, 4  ;;  %v2257_v49 = vrot.slane %v2256_v61, 4  ;;  %v13783_v40 = vld [vmem:[#allocation2 + $0x40] sm:$0xf] }
  0xaf   :  { %v2912_v20 = vrot.slane %v2910_v32, 5  ;;  %v2920_v52 = vshrl.u32 %v13746_v30, 16  ;;  %v2926_v8 = vshll.u32 %v13754_v7, 16  ;;  %v2931_v13 = vshrl.u32 %v2885_v41, 16 }
  0xb0   :  { %12128 = vmatmul.mubr.msk.bf16.gmra.mxu0 %vm1310_vm8, %v11113_v45  ;;  %12150 = vmatmul.mubr.msk.bf16.gmra.mxu1 %vm1310_vm8, %v11140_v11  ;;  %v2252_v0 = vsel %vm13197_vm14, %v2247_v37, %v2251_v12  ;;  %v2934_v43 = vshll.u32 %v2885_v41, 16  ;;  %v2262_v50 = vsel %vm13197_vm14, %v2257_v49, %v2261_v34  ;;  %v2918_v39 = vrot.slane %v2916_v62, 5  ;;  %v2888_v45 = vld [vmem:[#allocation2 + $0x30] sm:$0xf] }
  0xb1   :  { %12131 = vmatprep.mubr.msk.bf16.mxu0 %vm1310_vm8, %v11114_v26  ;;  %v2913_v51 = vor.u32 %v2912_v20, %v2909_v59  ;;  %v2922_v53 = vrot.slane %v2920_v52, 4  ;;  %v11115_v17 = vcombine.low %v2252_v0, %v2262_v50  ;;  %v2928_v23 = vrot.slane %v2926_v8, 5 }
  0xb2   :  { %v2933_v48 = vrot.slane %v2931_v13, 4  ;;  %v2936_v19 = vrot.slane %v2934_v43, 5  ;;  %v2940_v28 = vshll.u32 %v13763_v5, 16  ;;  %v2944_v44 = vshrl.u32 %v13763_v5, 16 }
  0xb3   :  { %v2914_v55 = vrot.slane %v2913_v51, 4  ;;  %v2923_v63 = vor.u32 %v2922_v53, %v2918_v39  ;;  %v2950_v60 = vshll.u32 %v13768_v46, 16  ;;  %v13779_v16 = vsel %vm1335_vm0, %v13711_v1, 0 }
  0xb4   :  { %v2937_v56 = vor.u32 %v2936_v19, %v2933_v48  ;;  %18466 = vst [vmem:[#allocation12_spill] sm:$0xff] %v13779_v16  ;;  %v2955_v9 = vshrl.u32 %v2888_v45, 16  ;;  %v2942_v27 = vrot.slane %v2940_v28, 5  ;;  %v2946_v54 = vrot.slane %v2944_v44, 4 }
  0xb5   :  { %v2919_v12 = vsel %vm13197_vm14, %v2914_v55, %v2918_v39  ;;  %v2924_v10 = vrot.slane %v2923_v63, 4  ;;  %v2952_v59 = vrot.slane %v2950_v60, 5  ;;  %v2958_v47 = vshll.u32 %v2888_v45, 16 }
  0xb6   :  { %v2938_v36 = vrot.slane %v2937_v56, 4  ;;  %v2957_v32 = vrot.slane %v2955_v9, 4  ;;  %v2947_v1 = vor.u32 %v2946_v54, %v2942_v27  ;;  %v2964_v4 = vshll.u32 %v13770_v42, 16 }
  0xb7   :  { %v2929_v25 = vsel %vm13197_vm14, %v2924_v10, %v2928_v23  ;;  %v2968_v61 = vshrl.u32 %v13770_v42, 16  ;;  %v2960_v26 = vrot.slane %v2958_v47, 5  ;;  %v2974_v37 = vshll.u32 %v13774_v6, 16 }
  0xb8   :  { %12132 = vmatmul.mubr.msk.bf16.gmra.mxu0 %vm1310_vm8, %v11115_v17  ;;  %v11167_v41 = vcombine.low %v2919_v12, %v2929_v25  ;;  %v2943_v11 = vsel %vm13197_vm14, %v2938_v36, %v2942_v27 }
  0xb9   :  { %8 = vsyncpa [#allocation4], 0  ;;  %v2948_v34 = vrot.slane %v2947_v1, 4  ;;  %12155 = vmatprep.mubr.msk.bf16.mxu0 %vm1310_vm8, %v12747_v33  ;;  %v2966_v49 = vrot.slane %v2964_v4, 5  ;;  %v2970_v20 = vrot.slane %v2968_v61, 4  ;;  %v2979_v52 = vshrl.u32 %v2891_v31, 16 }
  0xba   :  { %v13794_v62 = vld [vmem:[#allocation2 + $0x44] sm:$0x1]  ;;  %12173 = vmatprep.mubr.msk.bf16.mxu1 %vm1310_vm8, %v11167_v41  ;;  %v2961_v0 = vor.u32 %v2960_v26, %v2957_v32  ;;  %v2976_v8 = vrot.slane %v2974_v37, 5  ;;  %v2982_v13 = vshll.u32 %v2891_v31, 16  ;;  %v2988_v43 = vshll.u32 %v13783_v40, 16  ;;  %v12749_v60 = vld [vmem:[#allocation2 + $0x30] sm:$0xff]  }
  0xbb   :  { %v2894_v50 = vld [vmem:[#allocation2 + $0x48] sm:$0xf]  ;;  %v2953_v51 = vsel %vm13197_vm14, %v2948_v34, %v2952_v59  ;;  %v2971_v39 = vor.u32 %v2970_v20, %v2966_v49  ;;  %v2981_v53 = vrot.slane %v2979_v52, 4  ;;  %v2992_v45 = vshrl.u32 %v13783_v40, 16  ;;  %v13801_v17 = vld [vmem:[#allocation2 + $0x4c] sm:$0xf] }
  0xbc   :  { %v11168_v23 = vcombine.low %v2943_v11, %v2953_v51  ;;  %v12748_v48 = vld [vmem:[#allocation2 + $0x24] sm:$0xff]   ;;  %v2962_v19 = vrot.slane %v2961_v0, 4  ;;  %v2984_v55 = vrot.slane %v2982_v13, 5  ;;  %v2990_v63 = vrot.slane %v2988_v43, 5  ;;  %v13807_v10 = vld [vmem:[#allocation2 + $0x50] sm:$0x1] }
  0xbd   :  { %v2972_v28 = vrot.slane %v2971_v39, 4  ;;  %v2994_v44 = vrot.slane %v2992_v45, 4  ;;  %v2998_v56 = vshll.u32 %v13794_v62, 16  ;;  %v3003_v9 = vshrl.u32 %v2894_v50, 16  ;;  %v2897_v33 = vld [vmem:[#allocation2 + $0x54] sm:$0xf] }
  0xbe   :  { %12174 = vmatmul.mubr.msk.bf16.vlgmr.msra.gmra.mxu1 %vm1310_vm8, %v11168_v23  ;;  %v2967_v31 = vsel %vm13197_vm14, %v2962_v19, %v2966_v49  ;;  %v2985_v12 = vor.u32 %v2984_v55, %v2981_v53  ;;  %v3006_v27 = vshll.u32 %v2894_v50, 16  ;;  %v3012_v54 = vshll.u32 %v13801_v17, 16  ;;  %v13813_v25 = vld [vmem:[#allocation2 + $0x58] sm:$0xf]  ;;  %v12822_v11 = vld [vmem:[%s18407_s1 + $0x4] sm:$0x3] }
  0xbf   :  { %12208 = vmatpush3.bf16.msra.mxu1 %v12899_v3  ;;  %v2977_v36 = vsel %vm13197_vm14, %v2972_v28, %v2976_v8  ;;  %v2995_v59 = vor.u32 %v2994_v44, %v2990_v63  ;;  %v3000_v32 = vrot.slane %v2998_v56, 5  ;;  %v3005_v47 = vrot.slane %v3003_v9, 4  ;;  %v13827_v52 = vld [vmem:[#allocation2 + $0x5c] sm:$0x1]  ;;  %v2900_v13 = vld [vmem:[#allocation2 + $0x60] sm:$0xf] }
  0xc0   :  { %12156 = vmatmul.mubr.msk.bf16.vlgmr.msra.gmra.mxu0 %vm1310_vm8, %v12748_v48  ;;  %v11169_v1 = vcombine.low %v2967_v31, %v2977_v36  ;;  %v2986_v4 = vrot.slane %v2985_v12, 4  ;;  %v3008_v61 = vrot.slane %v3006_v27, 5  ;;  %v3014_v41 = vrot.slane %v3012_v54, 5  ;;  %12704 = vmatprep.subr.msk.bf16.mxu1 %vm1335_vm0, %v12822_v11  ;;  %v12823_v43 = vld [vmem:[%s18407_s1] sm:$0x3] }
  0xc1   :  { %12190 = vmatpush3.bf16.msra.mxu0 %v13779_v16  ;;  %v2996_v3 = vrot.slane %v2995_v59, 4  ;;  %12159 = vmatprep.mubr.msk.bf16.mxu0 %vm1310_vm8, %v12749_v60  ;;  %v3016_v26 = vshrl.u32 %v13801_v17, 16  ;;  %v3022_v37 = vshll.u32 %v13807_v10, 16  ;;  %v3027_v34 = vshrl.u32 %v2897_v33, 16  ;;  %v13836_v45 = vld [vmem:[#allocation2 + $0x64] sm:$0xf] }
  0xc2   :  { %12177 = vmatprep.mubr.msk.bf16.mxu1 %vm1310_vm8, %v11169_v1  ;;  %v2991_v49 = vsel %vm13197_vm14, %v2986_v4, %v2990_v63  ;;  %v3009_v20 = vor.u32 %v3008_v61, %v3005_v47  ;;  %v3030_v0 = vshll.u32 %v2897_v33, 16  ;;  %v3036_v8 = vshll.u32 %v13813_v25, 16  ;;  %12703 = vmatprep.subr.msk.bf16.mxu0 %vm1335_vm0, %v12823_v43  ;;  %v12750_v48 = vld [vmem:[#allocation2 + $0x3c] sm:$0xff]   ;;  %v12751_v60 = vld [vmem:[#allocation2 + $0x48] sm:$0xff]  }
  0xc3   :  { %v3001_v50 = vsel %vm13197_vm14, %v2996_v3, %v3000_v32  ;;  %v3018_v51 = vrot.slane %v3016_v26, 4  ;;  %v3024_v39 = vrot.slane %v3022_v37, 5  ;;  %v3029_v53 = vrot.slane %v3027_v34, 4  ;;  %v13843_v27 = vld [vmem:[#allocation2 + $0x68] sm:$0x1] }
  0xc4   :  { %v11170_v23 = vcombine.low %v2991_v49, %v3001_v50  ;;  %v3010_v19 = vrot.slane %v3009_v20, 4  ;;  %v3032_v55 = vrot.slane %v3030_v0, 5  ;;  %v3038_v63 = vrot.slane %v3036_v8, 5  ;;  %v142_v36 = vld [vmem:[%s18406_s0 + $0x40] sm:$0xf] }
  0xc5   :  { %v3019_v28 = vor.u32 %v3018_v51, %v3014_v41  ;;  %v3040_v44 = vshrl.u32 %v13813_v25, 16  ;;  %v3046_v56 = vshll.u32 %v13827_v52, 16  ;;  %v3051_v9 = vshrl.u32 %v2900_v13, 16  ;;  %v143_v34 = vld [vmem:[%s18406_s0 + $0x44] sm:$0xf] }
  0xc6   :  { %12178 = vmatmul.mubr.msk.bf16.gmra.mxu1 %vm1310_vm8, %v11170_v23  ;;  %v3015_v31 = vsel %vm13197_vm14, %v3010_v19, %v3014_v41  ;;  %v3033_v12 = vor.u32 %v3032_v55, %v3029_v53  ;;  %v3054_v54 = vshll.u32 %v2900_v13, 16  ;;  %v3060_v33 = vshll.u32 %v13836_v45, 16  ;;  %v13860_v43 = vld [vmem:[#allocation2 + $0x60] sm:$0xf]  ;;  %v895_v23 = vld [vmem:[#allocation2 + $0x6c] sm:$0xf] }
  0xc7   :  { %v3020_v59 = vrot.slane %v3019_v28, 4  ;;  %v3042_v32 = vrot.slane %v3040_v44, 4  ;;  %v3048_v47 = vrot.slane %v3046_v56, 5  ;;  %v3053_v1 = vrot.slane %v3051_v9, 4  ;;  %v13863_v56 = vld [vmem:[#allocation2 + $0x64] sm:$0xf] }
  0xc8   :  { %12160 = vmatmul.mubr.msk.bf16.gmra.mxu0 %vm1310_vm8, %v12750_v48  ;;  %v3034_v4 = vrot.slane %v3033_v12, 4  ;;  %v3056_v61 = vrot.slane %v3054_v54, 5  ;;  %v3062_v11 = vrot.slane %v3060_v33, 5  ;;  %v3064_v41 = vshrl.u32 %v13836_v45, 16  ;;  %v12752_v48 = vld [vmem:[#allocation2 + $0x54] sm:$0xff]  }
  0xc9   :  { %v3025_v3 = vsel %vm13197_vm14, %v3020_v59, %v3024_v39  ;;  %v3043_v26 = vor.u32 %v3042_v32, %v3038_v63  ;;  %12163 = vmatprep.mubr.msk.bf16.mxu0 %vm1310_vm8, %v12751_v60  ;;  %v3070_v37 = vshll.u32 %v13843_v27, 16  ;;  %v330_v49 = vshrl.u32 %v142_v36, 16  ;;  %v13870_v32 = vld [vmem:[#allocation2 + $0x68] sm:$0x1] }
  0xca   :  { %v11171_v20 = vcombine.low %v3015_v31, %v3025_v3  ;;  %v3039_v0 = vsel %vm13197_vm14, %v3034_v4, %v3038_v63  ;;  %v3057_v8 = vor.u32 %v3056_v61, %v3053_v1  ;;  %v3066_v13 = vrot.slane %v3064_v41, 4  ;;  %v12753_v31 = vld [vmem:[#allocation2 + $0x60] sm:$0xff]   ;;  %v899_v4 = vld [vmem:[#allocation2 + $0x74] sm:$0x1] }
  0xcb   :  { %v3044_v50 = vrot.slane %v3043_v26, 4  ;;  %v3072_v51 = vrot.slane %v3070_v37, 5  ;;  %v332_v39 = vrot.slane %v330_v49, 7  ;;  %v333_v53 = vshll.u32 %v142_v36, 16 }
  0xcc   :  { %12181 = vmatprep.mubr.msk.bf16.mxu1 %vm1310_vm8, %v11171_v20  ;;  %v3058_v19 = vrot.slane %v3057_v8, 4  ;;  %v3067_v55 = vor.u32 %v3066_v13, %v3062_v11  ;;  %v338_v28 = vshrl.u32 %v143_v34, 16  ;;  %v341_v44 = vshll.u32 %v143_v34, 16  ;;  %v3264_v34 = vld [vmem:[#allocation2 + $0x18] sm:$0xe] }
  0xcd   :  { %v3049_v63 = vsel %vm13197_vm14, %v3044_v50, %v3048_v47  ;;  %v335_v60 = vor.u32 %v333_v53, %v332_v39  ;;  %v336_v9 = vrot.slane %v332_v39, 4  ;;  %v3604_v12 = vshrl.u32 %v13860_v43, 16  ;;  %v3265_v39 = vld [vmem:[#allocation2 + $0x24] sm:$0xe] }
  0xce   :  { %v11172_v54 = vcombine.low %v3039_v0, %v3049_v63  ;;  %v3063_v33 = vsel %vm13197_vm14, %v3058_v19, %v3062_v11  ;;  %v3068_v36 = vrot.slane %v3067_v55, 4  ;;  %v340_v59 = vrot.slane %v338_v28, 7  ;;  %v13894_v55 = vld [vmem:[%s18406_s0 + $0x48] sm:$0xf] }
  0xcf   :  { %v896_v1 = vsel %vm13157_vm10, %v335_v60, %v895_v23  ;;  %v3606_v61 = vrot.slane %v3604_v12, 4  ;;  %v3607_v47 = vshll.u32 %v13860_v43, 16  ;;  %v3613_v41 = vshll.u32 %v13863_v56, 16 }
  0xd0   :  { %12182 = vmatmul.mubr.msk.bf16.gmra.mxu1 %vm1310_vm8, %v11172_v54  ;;  %12164 = vmatmul.mubr.msk.bf16.gmra.mxu0 %vm1310_vm8, %v12752_v48  ;;  %v3073_v11 = vsel %vm13197_vm14, %v3068_v36, %v3072_v51  ;;  %v343_v3 = vor.u32 %v341_v44, %v340_v59  ;;  %v345_v26 = vrot.slane %v340_v59, 4  ;;  %897 = vst [vmem:[#allocation2 + $0x6c] sm:$0xf] %v896_v1  ;;  %v3617_v37 = vshrl.u32 %v13863_v56, 16 }
  0xd1   :  { %v11173_v49 = vcombine.low %v3063_v33, %v3073_v11  ;;  %12167 = vmatprep.mubr.msk.bf16.mxu0 %vm1310_vm8, %v12753_v31  ;;  %v3609_v20 = vrot.slane %v3607_v47, 5  ;;  %v3615_v0 = vrot.slane %v3613_v41, 5  ;;  %v3623_v8 = vshll.u32 %v13870_v32, 16 }
  0xd2   :  { %v344_v13 = vsel %vm13134_vm9, %v336_v9, %v343_v3  ;;  %v900_v50 = vsel %vm13173_vm11, %v345_v26, %v899_v4  ;;  %v3619_v51 = vrot.slane %v3617_v37, 4  ;;  %v11183_v23 = vrot.slane %v3264_v34, 9 }
  0xd3   :  { %12185 = vmatprep.mubr.msk.bf16.mxu1 %vm1310_vm8, %v11173_v49  ;;  %898 = vst.msk [vmem:[#allocation2 + $0x70] sm:$0xf] %vm16_vm1, %v344_v13  ;;  %901 = vst [vmem:[#allocation2 + $0x74] sm:$0x1] %v900_v50  ;;  %v3610_v53 = vor.u32 %v3609_v20, %v3606_v61  ;;  %v3298_v48 = vrot.slane %v13746_v30, 5  ;;  %v3301_v19 = vrot.slane %v13754_v7, 5 }
  0xd4   :  { %v3620_v28 = vor.u32 %v3619_v51, %v3615_v0  ;;  %v3625_v44 = vrot.slane %v3623_v8, 5  ;;  %v3305_v63 = vrot.slane %v13763_v5, 5  ;;  %v11184_v31 = vrot.slane %v3265_v39, 9  ;;  %v145_v8 = vld [vmem:[%s18406_s0 + $0x4c] sm:$0xf] }
  0xd5   :  { %v3611_v60 = vrot.slane %v3610_v53, 4  ;;  %v3300_v9 = vrot.slane %v3298_v48, 4  ;;  %v3308_v12 = vrot.slane %v13768_v46, 5  ;;  %v347_v30 = vshrl.u32 %v13894_v55, 16 }
  0xd6   :  { %v3621_v54 = vrot.slane %v3620_v28, 4  ;;  %v3307_v33 = vrot.slane %v3305_v63, 4  ;;  %v3299_v1 = vsel %vm13242_vm15, %v11183_v23, %v3298_v48  ;;  %v3306_v11 = vsel %vm13242_vm15, %v11184_v31, %v3305_v63 }
  0xd7   :  { %v2903_v36 = vld [vmem:[#allocation2 + $0x6c] sm:$0xf]  ;;  %v3616_v7 = vsel %vm13197_vm14, %v3611_v60, %v3615_v0  ;;  %v3302_v5 = vsel %vm13242_vm15, %v3300_v9, %v3301_v19  ;;  %v350_v26 = vshll.u32 %v13894_v55, 16 }
  0xd8   :  { %v13901_v59 = vld [vmem:[#allocation2 + $0x6c] sm:$0xf]  ;;  %v3075_v4 = vshrl.u32 %v2903_v36, 16  ;;  %v3078_v61 = vshll.u32 %v2903_v36, 16  ;;  %v3626_v46 = vsel %vm13197_vm14, %v3621_v54, %v3625_v44  ;;  %v3309_v3 = vsel %vm13242_vm15, %v3307_v33, %v3308_v12 }
  0xd9   :  { %v3628_v47 = vshrl.u32 %v13901_v59, 16  ;;  %v3631_v41 = vshll.u32 %v13901_v59, 16  ;;  %v11192_v0 = vcombine.low %v3299_v1, %v3302_v5  ;;  %v11209_v53 = vcombine.low %v3616_v7, %v3626_v46  ;;  %v902_v7 = vld [vmem:[#allocation2 + $0x78] sm:$0xf]  ;;  %v146_v1 = vld [vmem:[%s18406_s0 + $0x50] sm:$0xf] }
  0xda   :  { %v13916_v37 = vld [vmem:[#allocation2 + $0x70] sm:$0xf]  ;;  %v13918_v34 = vld [vmem:[#allocation2 + $0x74] sm:$0x1]  ;;  %v3077_v49 = vrot.slane %v3075_v4, 4  ;;  %v3080_v20 = vrot.slane %v3078_v61, 5  ;;  %v11193_v44 = vcombine.low %v3306_v11, %v3309_v3 }
  0xdb   :  { %v3084_v13 = vshll.u32 %v13916_v37, 16  ;;  %v3088_v50 = vshrl.u32 %v13916_v37, 16  ;;  %v3094_v51 = vshll.u32 %v13918_v34, 16  ;;  %v12754_v39 = vld [vmem:[#allocation2 + $0x6c] sm:$0xff]   ;;  %v13928_v19 = vld [vmem:[#allocation2 + $0x74] sm:$0x1] }
  0xdc   :  { %v3081_v23 = vor.u32 %v3080_v20, %v3077_v49  ;;  %v13926_v48 = vld [vmem:[#allocation2 + $0x70] sm:$0xf]  ;;  %v3630_v55 = vrot.slane %v3628_v47, 4  ;;  %v3633_v28 = vrot.slane %v3631_v41, 5  ;;  %12168 = vmatmul.mubr.msk.bf16.gmra.mxu0 %vm1310_vm8, %v12754_v39  ;;  %v3647_v36 = vshll.u32 %v13928_v19, 16 }
  0xdd   :  { %v3086_v63 = vrot.slane %v3084_v13, 5  ;;  %v3090_v60 = vrot.slane %v3088_v50, 4  ;;  %v3096_v9 = vrot.slane %v3094_v51, 5  ;;  %v3637_v31 = vshll.u32 %v13926_v48, 16  ;;  %12191 = vmatprep.mubr.msk.bf16.mxu0 %vm1310_vm8, %v11192_v0  ;;  %v906_v0 = vld [vmem:[#allocation2 + $0x80] sm:$0x1] }
  0xde   :  { %v3082_v12 = vrot.slane %v3081_v23, 4  ;;  %v3634_v54 = vor.u32 %v3633_v28, %v3630_v55  ;;  %v3641_v33 = vshrl.u32 %v13926_v48, 16  ;;  %v349_v61 = vrot.slane %v347_v30, 7  ;;  %v147_v30 = vld [vmem:[%s18406_s0 + $0x54] sm:$0xf] }
  0xdf   :  { %v3091_v5 = vor.u32 %v3090_v60, %v3086_v63  ;;  %v3639_v4 = vrot.slane %v3637_v31, 5  ;;  %v355_v46 = vshrl.u32 %v145_v8, 16  ;;  %v3649_v3 = vrot.slane %v3647_v36, 5  ;;  %v3266_v28 = vld [vmem:[#allocation2 + $0x30] sm:$0xe] }
  0xe0   :  { %v3087_v47 = vsel %vm13197_vm14, %v3082_v12, %v3086_v63  ;;  %v3635_v41 = vrot.slane %v3634_v54, 4  ;;  %v3643_v11 = vrot.slane %v3641_v33, 4  ;;  %v352_v20 = vor.u32 %v350_v26, %v349_v61 }
  0xe1   :  { %v3092_v49 = vrot.slane %v3091_v5, 4  ;;  %v353_v13 = vrot.slane %v349_v61, 4  ;;  %v357_v50 = vrot.slane %v355_v46, 7  ;;  %v358_v23 = vshll.u32 %v145_v8, 16  ;;  %v909_v8 = vld [vmem:[#allocation2 + $0x84] sm:$0xf] }
  0xe2   :  { %v3640_v51 = vsel %vm13197_vm14, %v3635_v41, %v3639_v4  ;;  %v3644_v39 = vor.u32 %v3643_v11, %v3639_v4  ;;  %v364_v55 = vshrl.u32 %v146_v1, 16  ;;  %v903_v26 = vsel %vm13157_vm10, %v352_v20, %v902_v7  ;;  %v913_v41 = vld [vmem:[#allocation2 + $0x8c] sm:$0x1] }
  0xe3   :  { %v3097_v63 = vsel %vm13197_vm14, %v3092_v49, %v3096_v9  ;;  %v362_v60 = vrot.slane %v357_v50, 4  ;;  %v367_v31 = vshll.u32 %v146_v1, 16  ;;  %v360_v33 = vor.u32 %v358_v23, %v357_v50  ;;  %904 = vst [vmem:[#allocation2 + $0x78] sm:$0xf] %v903_v26  ;;  %v3267_v9 = vld [vmem:[#allocation2 + $0x3c] sm:$0xe] }
  0xe4   :  { %v11174_v12 = vcombine.low %v3087_v47, %v3097_v63  ;;  %v3645_v54 = vrot.slane %v3644_v39, 4  ;;  %v366_v36 = vrot.slane %v364_v55, 7  ;;  %12192 = vmatmul.mubr.msk.bf16.vlgmr.msra.gmra.mxu0 %vm1310_vm8, %v11193_v44  ;;  %v372_v4 = vshrl.u32 %v147_v30, 16 }
  0xe5   :  { %v907_v5 = vsel %vm13173_vm11, %v362_v60, %v906_v0  ;;  %v375_v61 = vshll.u32 %v147_v30, 16  ;;  %v11185_v46 = vrot.slane %v3266_v28, 9  ;;  %12226 = vmatpush3.bf16.msra.mxu0 %v12895_v2  ;;  %v361_v1 = vsel %vm13134_vm9, %v353_v13, %v360_v33  ;;  %v148_v2 = vld [vmem:[%s18406_s0 + $0x58] sm:$0xf] }
  0xe6   :  { %12186 = vmatmul.mubr.msk.bf16.gmra.mxu1 %vm1310_vm8, %v11174_v12  ;;  %v3650_v7 = vsel %vm13197_vm14, %v3645_v54, %v3649_v3  ;;  %908 = vst [vmem:[#allocation2 + $0x80] sm:$0x1] %v907_v5  ;;  %v369_v47 = vor.u32 %v367_v31, %v366_v36  ;;  %v370_v44 = vrot.slane %v366_v36, 4  ;;  %905 = vst.msk [vmem:[#allocation2 + $0x7c] sm:$0xf] %vm16_vm1, %v361_v1  ;;  %v374_v49 = vrot.slane %v372_v4, 7 }
  0xe7   :  { %12209 = vmatprep.mubr.msk.bf16.mxu1 %vm1310_vm8, %v11209_v53  ;;  %v11210_v11 = vcombine.low %v3640_v51, %v3650_v7  ;;  %v3312_v20 = vrot.slane %v13770_v42, 5  ;;  %v3315_v50 = vrot.slane %v13774_v6, 5  ;;  %v12824_v3 = vld [vmem:[%s18407_s1 + $0x6] sm:$0x3]  ;;  %v11186_v13 = vrot.slane %v3267_v9, 9 }
  0xe8   :  { %12705 = vmatprep.subr.msk.bf16.mxu0 %vm1335_vm0, %v12824_v3  ;;  %v910_v53 = vsel %vm13157_vm10, %v369_v47, %v909_v8  ;;  %v3319_v0 = vrot.slane %v13783_v40, 5  ;;  %v3322_v42 = vrot.slane %v13794_v62, 5  ;;  %v149_v6 = vld [vmem:[%s18406_s0 + $0x5c] sm:$0xf]  ;;  %v377_v51 = vor.u32 %v375_v61, %v374_v49  ;;  %v13991_v54 = vld [vmem:[%s18406_s0 + $0x60] sm:$0xf] }
  0xe9   :  { %v379_v39 = vrot.slane %v374_v49, 4  ;;  %911 = vst [vmem:[#allocation2 + $0x84] sm:$0xf] %v910_v53  ;;  %v3313_v23 = vsel %vm13242_vm15, %v11185_v46, %v3312_v20  ;;  %v3314_v30 = vrot.slane %v3312_v20, 4  ;;  %v381_v63 = vshrl.u32 %v148_v2, 16 }
  0xea   :  { %v3320_v55 = vsel %vm13242_vm15, %v11186_v13, %v3319_v0  ;;  %v3321_v28 = vrot.slane %v3319_v0, 4  ;;  %v384_v60 = vshll.u32 %v148_v2, 16  ;;  %v13980_v40 = vld [vmem:[#allocation2 + $0x78] sm:$0xf]  ;;  %v378_v62 = vsel %vm13134_vm9, %v370_v44, %v377_v51  ;;  %v916_v1 = vld [vmem:[#allocation2 + $0x90] sm:$0xf] }
  0xeb   :  { %v914_v26 = vsel %vm13173_vm11, %v379_v39, %v913_v41  ;;  %v3316_v31 = vsel %vm13242_vm15, %v3314_v30, %v3315_v50  ;;  %v389_v12 = vshrl.u32 %v149_v6, 16  ;;  %v3652_v33 = vshrl.u32 %v13980_v40, 16  ;;  %912 = vst.msk [vmem:[#allocation2 + $0x88] sm:$0xf] %vm16_vm1, %v378_v62  ;;  %v920_v53 = vld [vmem:[#allocation2 + $0x98] sm:$0x1] }
  0xec   :  { %v3655_v36 = vshll.u32 %v13980_v40, 16  ;;  %915 = vst [vmem:[#allocation2 + $0x8c] sm:$0x1] %v914_v26  ;;  %v11194_v8 = vcombine.low %v3313_v23, %v3316_v31  ;;  %v3323_v5 = vsel %vm13242_vm15, %v3321_v28, %v3322_v42  ;;  %v383_v46 = vrot.slane %v381_v63, 7  ;;  %v12825_v39 = vld [vmem:[%s18407_s1 + $0x8] sm:$0x3] }
  0xed   :  { %v13998_v4 = vld [vmem:[#allocation2 + $0x80] sm:$0x1]  ;;  %v11195_v61 = vcombine.low %v3320_v55, %v3323_v5  ;;  %v391_v9 = vrot.slane %v389_v12, 7  ;;  %v392_v7 = vshll.u32 %v149_v6, 16  ;;  %v14001_v47 = vld [vmem:[#allocation2 + $0x7c] sm:$0xf] }
  0xee   :  { %12210 = vmatmul.mubr.msk.bf16.vlgmr.msra.gmra.mxu1 %vm1310_vm8, %v11210_v11  ;;  %v3654_v44 = vrot.slane %v3652_v33, 4  ;;  %v3657_v41 = vrot.slane %v3655_v36, 5  ;;  %v3671_v49 = vshll.u32 %v13998_v4, 16  ;;  %12195 = vmatprep.mubr.msk.bf16.mxu0 %vm1310_vm8, %v11194_v8  ;;  %v398_v20 = vshrl.u32 %v13991_v54, 16  ;;  %v151_v26 = vld [vmem:[%s18406_s0 + $0x64] sm:$0xf] }
  0xef   :  { %12244 = vmatpush3.bf16.msra.mxu1 %v13146_v21  ;;  %v3661_v50 = vshll.u32 %v14001_v47, 16  ;;  %v3665_v2 = vshrl.u32 %v14001_v47, 16  ;;  %12196 = vmatmul.mubr.msk.bf16.gmra.mxu0 %vm1310_vm8, %v11195_v61  ;;  %v386_v3 = vor.u32 %v384_v60, %v383_v46  ;;  %v387_v11 = vrot.slane %v383_v46, 4 }
  0xf0   :  { %v3658_v13 = vor.u32 %v3657_v41, %v3654_v44  ;;  %v3673_v0 = vrot.slane %v3671_v49, 5  ;;  %v14010_v42 = vld [vmem:[#allocation2 + $0x84] sm:$0xf]  ;;  %v394_v6 = vor.u32 %v392_v7, %v391_v9  ;;  %v396_v51 = vrot.slane %v391_v9, 4  ;;  %12706 = vmatprep.subr.msk.bf16.mxu1 %vm1335_vm0, %v12825_v39  ;;  %v923_v7 = vld [vmem:[#allocation2 + $0x9c] sm:$0xf] }
  0xf1   :  { %v3663_v21 = vrot.slane %v3661_v50, 5  ;;  %v3667_v23 = vrot.slane %v3665_v2, 4  ;;  %v3676_v30 = vshrl.u32 %v14010_v42, 16  ;;  %v3679_v55 = vshll.u32 %v14010_v42, 16  ;;  %v3268_v50 = vld [vmem:[#allocation2 + $0x48] sm:$0xe] }
  0xf2   :  { %v3659_v28 = vrot.slane %v3658_v13, 4  ;;  %v395_v63 = vsel %vm13134_vm9, %v387_v11, %v394_v6  ;;  %v917_v60 = vsel %vm13157_vm10, %v386_v3, %v916_v1  ;;  %v921_v62 = vsel %vm13173_vm11, %v396_v51, %v920_v53  ;;  %v14027_v12 = vld [vmem:[#allocation2 + $0x88] sm:$0xf] }
  0xf3   :  { %v3668_v31 = vor.u32 %v3667_v23, %v3663_v21  ;;  %v14029_v33 = vld [vmem:[#allocation2 + $0x8c] sm:$0x1]  ;;  %v3678_v36 = vrot.slane %v3676_v30, 4  ;;  %v3681_v8 = vrot.slane %v3679_v55, 5  ;;  %918 = vst [vmem:[#allocation2 + $0x90] sm:$0xf] %v917_v60 }
  0xf4   :  { %919 = vst.msk [vmem:[#allocation2 + $0x94] sm:$0xf] %vm16_vm1, %v395_v63  ;;  %922 = vst [vmem:[#allocation2 + $0x98] sm:$0x1] %v921_v62  ;;  %v3664_v5 = vsel %vm13197_vm14, %v3659_v28, %v3663_v21  ;;  %v3685_v61 = vshll.u32 %v14027_v12, 16  ;;  %v3689_v46 = vshrl.u32 %v14027_v12, 16 }
  0xf5   :  { %v3695_v9 = vshll.u32 %v14029_v33, 16  ;;  %v3669_v1 = vrot.slane %v3668_v31, 4  ;;  %v3682_v44 = vor.u32 %v3681_v8, %v3678_v36  ;;  %v400_v41 = vrot.slane %v398_v20, 7  ;;  %v927_v28 = vld [vmem:[#allocation2 + $0xa4] sm:$0x1] }
  0xf6   :  { %v401_v49 = vshll.u32 %v13991_v54, 16  ;;  %v3687_v2 = vrot.slane %v3685_v61, 5  ;;  %v3691_v3 = vrot.slane %v3689_v46, 4  ;;  %v406_v53 = vshrl.u32 %v151_v26, 16 }
  0xf7   :  { %v3697_v11 = vrot.slane %v3695_v9, 5  ;;  %v3674_v13 = vsel %vm13197_vm14, %v3669_v1, %v3673_v0  ;;  %v3683_v6 = vrot.slane %v3682_v44, 4  ;;  %v404_v39 = vrot.slane %v400_v41, 4 }
  0xf8   :  { %v403_v51 = vor.u32 %v401_v49, %v400_v41  ;;  %v11211_v21 = vcombine.low %v3664_v5, %v3674_v13  ;;  %v3692_v23 = vor.u32 %v3691_v3, %v3687_v2  ;;  %v408_v30 = vrot.slane %v406_v53, 7  ;;  %v3269_v41 = vld [vmem:[#allocation2 + $0x54] sm:$0xe] }
  0xf9   :  { %v409_v55 = vshll.u32 %v151_v26, 16  ;;  %v11187_v54 = vrot.slane %v3268_v50, 9  ;;  %v3326_v63 = vrot.slane %v13801_v17, 5  ;;  %v3688_v60 = vsel %vm13197_vm14, %v3683_v6, %v3687_v2 }
  0xfa   :  { %v924_v20 = vsel %vm13157_vm10, %v403_v51, %v923_v7  ;;  %12213 = vmatprep.mubr.msk.bf16.mxu1 %vm1310_vm8, %v11211_v21  ;;  %v3693_v0 = vrot.slane %v3692_v23, 4  ;;  %v14046_v62 = vld [vmem:[#allocation2 + $0x90] sm:$0xf]  ;;  %v413_v8 = vrot.slane %v408_v30, 4  ;;  %v3329_v23 = vrot.slane %v13807_v10, 5 }
  0xfb   :  { %v14048_v31 = vld [vmem:[#allocation2 + $0x94] sm:$0xf]  ;;  %v411_v36 = vor.u32 %v409_v55, %v408_v30  ;;  %925 = vst [vmem:[#allocation2 + $0x9c] sm:$0xf] %v924_v20  ;;  %v14050_v26 = vld [vmem:[#allocation2 + $0x98] sm:$0x1]  ;;  %v3327_v6 = vsel %vm13242_vm15, %v11187_v54, %v3326_v63 }
  0xfc   :  { %v3700_v5 = vshrl.u32 %v14046_v62, 16  ;;  %v3703_v61 = vshll.u32 %v14046_v62, 16  ;;  %v3709_v17 = vshll.u32 %v14048_v31, 16  ;;  %v3713_v46 = vshrl.u32 %v14048_v31, 16  ;;  %v4105_v24 = vld [vmem:[#allocation2 + $0x90] sm:$0xe] }
  0xfd   :  { %v3698_v9 = vsel %vm13197_vm14, %v3693_v0, %v3697_v11  ;;  %v3719_v7 = vshll.u32 %v14050_v26, 16  ;;  %v412_v1 = vsel %vm13134_vm9, %v404_v39, %v411_v36  ;;  %v928_v44 = vsel %vm13173_vm11, %v413_v8, %v927_v28  ;;  %v152_v11 = vld [vmem:[%s18406_s0 + $0x68] sm:$0xf]  ;;  %v153_v39 = vld [vmem:[%s18406_s0 + $0x6c] sm:$0xf] }
  0xfe   :  { %v11212_v49 = vcombine.low %v3688_v60, %v3698_v9  ;;  %v3702_v50 = vrot.slane %v3700_v5, 4  ;;  %v3705_v2 = vrot.slane %v3703_v61, 5  ;;  %v3711_v3 = vrot.slane %v3709_v17, 5  ;;  %926 = vst.msk [vmem:[#allocation2 + $0xa0] sm:$0xf] %vm16_vm1, %v412_v1 }
  0xff   :  { %929 = vst [vmem:[#allocation2 + $0xa4] sm:$0x1] %v928_v44  ;;  %v3715_v53 = vrot.slane %v3713_v46, 4  ;;  %v3721_v13 = vrot.slane %v3719_v7, 5  ;;  %v3328_v51 = vrot.slane %v3326_v63, 4  ;;  %v11188_v30 = vrot.slane %v3269_v41, 9 }
 0x100   :  { %12214 = vmatmul.mubr.msk.bf16.gmra.mxu1 %vm1310_vm8, %v11212_v49  ;;  %v3706_v21 = vor.u32 %v3705_v2, %v3702_v50  ;;  %v3333_v55 = vrot.slane %v13813_v25, 5  ;;  %v3336_v28 = vrot.slane %v13827_v52, 5  ;;  %v415_v60 = vshrl.u32 %v152_v11, 16  ;;  %v930_v44 = vld [vmem:[#allocation2 + $0xa8] sm:$0xf] }
 0x101   :  { %v3716_v20 = vor.u32 %v3715_v53, %v3711_v3  ;;  %v418_v0 = vshll.u32 %v152_v11, 16  ;;  %v3330_v63 = vsel %vm13242_vm15, %v3328_v51, %v3329_v23  ;;  %v423_v1 = vshrl.u32 %v153_v39, 16  ;;  %v154_v41 = vld [vmem:[%s18406_s0 + $0x70] sm:$0xf] }
 0x102   :  { %v3707_v36 = vrot.slane %v3706_v21, 4  ;;  %v14076_v54 = vld [vmem:[#allocation2 + $0x9c] sm:$0xf]  ;;  %v3334_v8 = vsel %vm13242_vm15, %v11188_v30, %v3333_v55  ;;  %v3335_v5 = vrot.slane %v3333_v55, 4  ;;  %v11196_v17 = vcombine.low %v3327_v6, %v3330_v63  ;;  %v934_v30 = vld [vmem:[#allocation2 + $0xb0] sm:$0x1] }
 0x103   :  { %v3717_v61 = vrot.slane %v3716_v20, 4  ;;  %v3724_v10 = vshrl.u32 %v14076_v54, 16  ;;  %v3727_v25 = vshll.u32 %v14076_v54, 16  ;;  %v417_v7 = vrot.slane %v415_v60, 7 }
 0x104   :  { %v3712_v52 = vsel %vm13197_vm14, %v3707_v36, %v3711_v3  ;;  %v3337_v9 = vsel %vm13242_vm15, %v3335_v5, %v3336_v28  ;;  %12199 = vmatprep.mubr.msk.bf16.mxu0 %vm1310_vm8, %v11196_v17  ;;  %v425_v60 = vrot.slane %v423_v1, 7  ;;  %v3270_v36 = vld [vmem:[#allocation2 + $0x60] sm:$0xe]  ;;  %v4141_v14 = vrot.slane %v14001_v47, 5 }
 0x105   :  { %v3722_v49 = vsel %vm13197_vm14, %v3717_v61, %v3721_v13  ;;  %v14095_v50 = vld [vmem:[#allocation2 + $0xa0] sm:$0xf]  ;;  %v3726_v11 = vrot.slane %v3724_v10, 4  ;;  %v3729_v53 = vrot.slane %v3727_v25, 5  ;;  %v11197_v3 = vcombine.low %v3334_v8, %v3337_v9  ;;  %v155_v13 = vld [vmem:[%s18406_s0 + $0x74] sm:$0xf] }
 0x106   :  { %v14084_v46 = vpop.f32.mrf.mxu1  ;;  %v14097_v2 = vld [vmem:[#allocation2 + $0xa4] sm:$0x1]  ;;  %v11213_v6 = vcombine.low %v3712_v52, %v3722_v49  ;;  %v3733_v51 = vshll.u32 %v14095_v50, 16  ;;  %v3737_v21 = vshrl.u32 %v14095_v50, 16  ;;  %v420_v20 = vor.u32 %v418_v0, %v417_v7 }
 0x107   :  { %v3743_v23 = vshll.u32 %v14097_v2, 16  ;;  %v3730_v55 = vor.u32 %v3729_v53, %v3726_v11  ;;  %12200 = vmatmul.mubr.msk.bf16.gmra.mxu0 %vm1310_vm8, %v11197_v3  ;;  %v421_v28 = vrot.slane %v417_v7, 4  ;;  %v426_v10 = vshll.u32 %v153_v39, 16  ;;  %v3271_v39 = vld [vmem:[#allocation2 + $0x6c] sm:$0xe] }
 0x108   :  { %v14107_v63 = vpop.f32.mrf.mxu1  ;;  %12217 = vmatprep.mubr.msk.bf16.mxu1 %vm1310_vm8, %v11213_v6  ;;  %v3735_v8 = vrot.slane %v3733_v51, 5  ;;  %v3739_v5 = vrot.slane %v3737_v21, 4  ;;  %v430_v17 = vrot.slane %v425_v60, 4  ;;  %v931_v52 = vsel %vm13157_vm10, %v420_v20, %v930_v44 }
 0x109   :  { %v3745_v61 = vrot.slane %v3743_v23, 5  ;;  %v3731_v25 = vrot.slane %v3730_v55, 4  ;;  %v432_v9 = vshrl.u32 %v154_v41, 16  ;;  %v428_v11 = vor.u32 %v426_v10, %v425_v60  ;;  %932 = vst [vmem:[#allocation2 + $0xa8] sm:$0xf] %v931_v52 }
 0x10a   :  { %v3740_v49 = vor.u32 %v3739_v5, %v3735_v8  ;;  %v435_v0 = vshll.u32 %v154_v41, 16  ;;  %v440_v7 = vshrl.u32 %v155_v13, 16  ;;  %v935_v53 = vsel %vm13173_vm11, %v430_v17, %v934_v30  ;;  %v14116_v51 = vpop.f32.mrf.mxu1  ;;  %v937_v55 = vld [vmem:[#allocation2 + $0xb4] sm:$0xf]  ;;  %v4101_v52 = vld [vmem:[#allocation2 + $0x60] sm:$0xe] }
 0x10b   :  { %v3736_v1 = vsel %vm13197_vm14, %v3731_v25, %v3735_v8  ;;  %v434_v3 = vrot.slane %v432_v9, 7  ;;  %v443_v6 = vshll.u32 %v155_v13, 16  ;;  %v429_v44 = vsel %vm13134_vm9, %v421_v28, %v428_v11  ;;  %936 = vst [vmem:[#allocation2 + $0xb0] sm:$0x1] %v935_v53  ;;  %v941_v8 = vld [vmem:[#allocation2 + $0xbc] sm:$0x1] }
 0x10c   :  { %v3741_v21 = vrot.slane %v3740_v49, 4  ;;  %v442_v23 = vrot.slane %v440_v7, 7  ;;  %v11189_v41 = vrot.slane %v3270_v36, 9  ;;  %933 = vst.msk [vmem:[#allocation2 + $0xac] sm:$0xf] %vm16_vm1, %v429_v44  ;;  %v3340_v30 = vrot.slane %v13836_v45, 5  ;;  %v14131_v45 = vpop.f32.mrf.mxu1 }
 0x10d   :  { %v437_v20 = vor.u32 %v435_v0, %v434_v3  ;;  %v438_v60 = vrot.slane %v434_v3, 4  ;;  %v3343_v13 = vrot.slane %v13843_v27, 5  ;;  %v11190_v17 = vrot.slane %v3271_v39, 9 }
 0x10e   :  { %v3746_v10 = vsel %vm13197_vm14, %v3741_v21, %v3745_v61  ;;  %v445_v25 = vor.u32 %v443_v6, %v442_v23  ;;  %v447_v28 = vrot.slane %v442_v23, 4  ;;  %v3341_v49 = vsel %vm13242_vm15, %v11189_v41, %v3340_v30 }
 0x10f   :  { %v14123_v5 = vpop.f32.mrf.mxu0  ;;  %v11214_v9 = vcombine.low %v3736_v1, %v3746_v10  ;;  %v938_v36 = vsel %vm13157_vm10, %v437_v20, %v937_v55  ;;  %v3342_v11 = vrot.slane %v3340_v30, 4  ;;  %v3347_v0 = vrot.slane %v13916_v37, 5  ;;  %v4102_v1 = vld [vmem:[#allocation2 + $0x6c] sm:$0xe] }
 0x110   :  { %v446_v27 = vsel %vm13134_vm9, %v438_v60, %v445_v25  ;;  %939 = vst [vmem:[#allocation2 + $0xb4] sm:$0xf] %v938_v36  ;;  %v942_v61 = vsel %vm13173_vm11, %v447_v28, %v941_v8  ;;  %v3350_v7 = vrot.slane %v13918_v34, 5  ;;  %v14140_v53 = vld [vmem:[#allocation2 + $0xa8] sm:$0xf]  ;;  %v11241_v6 = vrot.slane %v4101_v52, 9  ;;  %v14161_v30 = vpop.f32.mrf.mxu1 }
 0x111   :  { %12218 = vmatmul.mubr.msk.bf16.gmra.mxu1 %vm1310_vm8, %v11214_v9  ;;  %940 = vst.msk [vmem:[#allocation2 + $0xb8] sm:$0xf] %vm16_vm1, %v446_v27  ;;  %943 = vst [vmem:[#allocation2 + $0xbc] sm:$0x1] %v942_v61  ;;  %v3344_v3 = vsel %vm13242_vm15, %v3342_v11, %v3343_v13  ;;  %v4127_v39 = vrot.slane %v13863_v56, 5  ;;  %v4130_v21 = vrot.slane %v13870_v32, 5  ;;  %v14147_v44 = vpop.f32.mrf.mxu0  ;;  %v11225_v55 = vcombine.low %v13860_v43, %v13863_v56 }
 0x112   :  { %v3748_v37 = vshrl.u32 %v14140_v53, 16  ;;  %v3751_v34 = vshll.u32 %v14140_v53, 16  ;;  %v11198_v23 = vcombine.low %v3341_v49, %v3344_v3  ;;  %v14153_v41 = vld [vmem:[#allocation2 + $0xb0] sm:$0x1]  ;;  %v3348_v20 = vsel %vm13242_vm15, %v11190_v17, %v3347_v0 }
 0x113   :  { %v3349_v60 = vrot.slane %v3347_v0, 4  ;;  %v14159_v8 = vsel %vm13242_vm15, %v11241_v6, %v4127_v39  ;;  %v4129_v32 = vrot.slane %v4127_v39, 4  ;;  %v14163_v13 = vld [vmem:[#allocation2 + $0xac] sm:$0xf]  ;;  %v3767_v28 = vshll.u32 %v14153_v41, 16  ;;  %v14175_v36 = vpop.f32.mrf.mxu0  ;;  %v14184_v39 = vpop.f32.mrf.mxu1 }
 0x114   :  { %v3750_v10 = vrot.slane %v3748_v37, 4  ;;  %v3753_v25 = vrot.slane %v3751_v34, 5  ;;  %12203 = vmatprep.mubr.msk.bf16.mxu0 %vm1310_vm8, %v11198_v23  ;;  %v11242_v43 = vrot.slane %v4102_v1, 9  ;;  %v3757_v56 = vshll.u32 %v14163_v13, 16 }
 0x115   :  { %v3761_v17 = vshrl.u32 %v14163_v13, 16  ;;  %v3351_v52 = vsel %vm13242_vm15, %v3349_v60, %v3350_v7  ;;  %v14173_v9 = vsel %vm13242_vm15, %v4129_v32, %v4130_v21  ;;  %v4134_v27 = vrot.slane %v13926_v48, 5  ;;  %v14207_v16 = vpop.f32.mrf.mxu1 }
 0x116   :  { %v3754_v49 = vor.u32 %v3753_v25, %v3750_v10  ;;  %v11199_v11 = vcombine.low %v3348_v20, %v3351_v52  ;;  %v11226_v61 = vcombine.low %v13901_v59, %v13926_v48  ;;  %v3759_v0 = vrot.slane %v3757_v56, 5  ;;  %v4103_v10 = vld [vmem:[#allocation2 + $0x78] sm:$0xe]  ;;  %v14202_v25 = vpop.f32.mrf.mxu0  ;;  %v4104_v59 = vld [vmem:[#allocation2 + $0x84] sm:$0xe] }
 0x117   :  { %v3763_v1 = vrot.slane %v3761_v17, 4  ;;  %v3769_v3 = vrot.slane %v3767_v28, 5  ;;  %v14180_v6 = vld [vmem:[#allocation2 + $0xb4] sm:$0xf]  ;;  %v11227_v7 = vcombine.low %v13980_v40, %v14001_v47  ;;  %v14196_v48 = vsel %vm13242_vm15, %v11242_v43, %v4134_v27 }
 0x118   :  { %v3755_v21 = vrot.slane %v3754_v49, 4  ;;  %v14186_v37 = vld [vmem:[#allocation2 + $0xb8] sm:$0xf]  ;;  %v14188_v34 = vld [vmem:[#allocation2 + $0xbc] sm:$0x1]  ;;  %v3772_v23 = vshrl.u32 %v14180_v6, 16  ;;  %12204 = vmatmul.mubr.msk.bf16.gmra.mxu0 %vm1310_vm8, %v11199_v11 }
 0x119   :  { %v3764_v20 = vor.u32 %v3763_v1, %v3759_v0  ;;  %v3775_v40 = vshll.u32 %v14180_v6, 16  ;;  %v3781_v60 = vshll.u32 %v14186_v37, 16  ;;  %v3785_v32 = vshrl.u32 %v14186_v37, 16  ;;  %12227 = vmatprep.mubr.msk.bf16.mxu0 %vm1310_vm8, %v11225_v55 }
 0x11a   :  { %v3760_v28 = vsel %vm13197_vm14, %v3755_v21, %v3759_v0  ;;  %v3774_v56 = vrot.slane %v3772_v23, 4  ;;  %v3791_v17 = vshll.u32 %v14188_v34, 16  ;;  %v4136_v43 = vrot.slane %v4134_v27, 4 }
 0x11b   :  { %v3765_v52 = vrot.slane %v3764_v20, 4  ;;  %v3777_v49 = vrot.slane %v3775_v40, 5  ;;  %v3783_v11 = vrot.slane %v3781_v60, 5  ;;  %v3787_v1 = vrot.slane %v3785_v32, 4  ;;  %v14215_v20 = vpop.f32.mrf.mxu0 }
 0x11c   :  { %v3793_v35 = vrot.slane %v3791_v17, 5  ;;  %v4137_v55 = vrot.slane %v13928_v19, 5  ;;  %v11243_v38 = vrot.slane %v4103_v10, 9  ;;  %v11228_v27 = vcombine.low %v14010_v42, %v14027_v12 }
 0x11d   :  { %v3770_v0 = vsel %vm13197_vm14, %v3765_v52, %v3769_v3  ;;  %v3778_v21 = vor.u32 %v3777_v49, %v3774_v56  ;;  %v3788_v23 = vor.u32 %v3787_v1, %v3783_v11  ;;  %v4143_v60 = vrot.slane %v4141_v14, 4  ;;  %v14221_v3 = vpop.f32.mrf.mxu1  ;;  %v4106_v52 = vld [vmem:[#allocation2 + $0x9c] sm:$0xe] }
 0x11e   :  { %v11215_v40 = vcombine.low %v3760_v28, %v3770_v0  ;;  %v4144_v32 = vrot.slane %v13998_v4, 5  ;;  %v11229_v19 = vcombine.low %v14046_v62, %v14048_v31  ;;  %v11244_v17 = vrot.slane %v4104_v59, 9 }
 0x11f   :  { %v3779_v10 = vrot.slane %v3778_v21, 4  ;;  %v3789_v47 = vrot.slane %v3788_v23, 4  ;;  %v4148_v18 = vrot.slane %v14027_v12, 5  ;;  %v14226_v42 = vsel %vm13242_vm15, %v4136_v43, %v4137_v55 }
 0x120   :  { %12221 = vmatprep.mubr.msk.bf16.mxu1 %vm1310_vm8, %v11215_v40  ;;  %12228 = vmatmul.mubr.msk.bf16.vlgmr.msra.gmra.mxu0 %vm1310_vm8, %v11226_v61  ;;  %v4151_v4 = vrot.slane %v14029_v33, 5  ;;  %v11245_v28 = vrot.slane %v4105_v24, 9  ;;  %v4155_v56 = vrot.slane %v14048_v31, 5  ;;  %v14238_v43 = vsel %vm13242_vm15, %v11243_v38, %v4141_v14  ;;  %v4107_v24 = vld [vmem:[#allocation2 + $0xa8] sm:$0xe]  ;;  %v14244_v33 = vpop.f32.mrf.mxu0 }
 0x121   :  { %v3784_v59 = vsel %vm13197_vm14, %v3779_v10, %v3783_v11  ;;  %v3794_v12 = vsel %vm13197_vm14, %v3789_v47, %v3793_v35  ;;  %12262 = vmatpush3.bf16.msra.mxu0 %v13150_v22  ;;  %v14242_v61 = vsel %vm13242_vm15, %v4143_v60, %v4144_v32  ;;  %v14248_v11 = vsel %vm13242_vm15, %v11244_v17, %v4148_v18  ;;  %v12826_v14 = vld [vmem:[%s18407_s1 + $0xa] sm:$0x3]  ;;  %v4108_v47 = vld [vmem:[#allocation2 + $0xb4] sm:$0xe]  ;;  %v14332_v31 = vld [vmem:[#allocation2 + $0x7c] sm:$0xf] }
 0x122   :  { %v11216_v49 = vcombine.low %v3784_v59, %v3794_v12  ;;  %v4150_v1 = vrot.slane %v4148_v18, 4  ;;  %12231 = vmatprep.mubr.msk.bf16.mxu0 %vm1310_vm8, %v11227_v7  ;;  %v4157_v22 = vrot.slane %v4155_v56, 4  ;;  %12707 = vmatprep.subr.msk.bf16.mxu0 %vm1335_vm0, %v12826_v14  ;;  %v4158_v38 = vrot.slane %v14050_v26, 5  ;;  %v14258_v21 = vpop.f32.mrf.mxu1  ;;  %v14284_v17 = vpop.f32.mrf.mxu0 }
 0x123   :  { %v11246_v35 = vrot.slane %v4106_v52, 9  ;;  %v4162_v55 = vrot.slane %v14095_v50, 5  ;;  %v4165_v0 = vrot.slane %v14097_v2, 5  ;;  %v14267_v7 = vsel %vm13242_vm15, %v11245_v28, %v4155_v56  ;;  %v4536_v28 = vld [vmem:[#allocation2 + $0x6c] sm:$0xf] }
 0x124   :  { %12222 = vmatmul.mubr.msk.bf16.gmra.mxu1 %vm1310_vm8, %v11216_v49  ;;  %v14263_v18 = vsel %vm13242_vm15, %v4150_v1, %v4151_v4  ;;  %v11247_v23 = vrot.slane %v4107_v24, 9  ;;  %v4169_v26 = vrot.slane %v14163_v13, 5  ;;  %v18467_v40 = vcombine.low %v14159_v8, %v14173_v9  ;;  %v14286_v4 = vpop.f32.mrf.mxu1  ;;  %v14314_v49 = vld [vmem:[#allocation2 + $0x74] sm:$0x1]  ;;  %v4539_v1 = vld [vmem:[#allocation2 + $0x78] sm:$0xf] }
 0x125   :  { %v11250_v2 = vcombine.low %v14196_v48, %v14226_v42  ;;  %v14278_v60 = vsel %vm13242_vm15, %v4157_v22, %v4158_v38  ;;  %v14282_v32 = vsel %vm13242_vm15, %v11246_v35, %v4162_v55  ;;  %v4164_v10 = vrot.slane %v4162_v55, 4  ;;  %v14326_v35 = vpop.f32.mrf.mxu0  ;;  %v14373_v52 = vld [vmem:[#allocation2 + $0x88] sm:$0xf] }
 0x126   :  { %12245 = vmatprep.mubr.msk.bf16.mxu1 %vm1310_vm8, %v18467_v40  ;;  %v11251_v8 = vcombine.low %v14238_v43, %v14242_v61  ;;  %v11230_v9 = vcombine.low %v14076_v54, %v14095_v50  ;;  %v4171_v48 = vrot.slane %v4169_v26, 4  ;;  %v4172_v42 = vrot.slane %v14153_v41, 5  ;;  %v14302_v43 = vld [vmem:[#allocation2 + $0x70] sm:$0xf]  ;;  %v14304_v61 = vpop.f32.mrf.mxu1  ;;  %18468 = vst [vmem:[#allocation13_spill] sm:$0xff] %v14373_v52 }
 0x127   :  { %v14299_v59 = vsel %vm13242_vm15, %v4164_v10, %v4165_v0  ;;  %v4176_v12 = vrot.slane %v14186_v37, 5  ;;  %v14311_v50 = vsel %vm13242_vm15, %v11247_v23, %v4169_v26  ;;  %v11248_v41 = vrot.slane %v4108_v47, 9  ;;  %v14335_v26 = vld [vmem:[#allocation2 + $0x80] sm:$0x1] }
 0x128   :  { %12232 = vmatmul.mubr.msk.bf16.gmra.mxu0 %vm1310_vm8, %v11228_v27  ;;  %v4179_v24 = vrot.slane %v14188_v34, 5  ;;  %v14322_v27 = vsel %vm13242_vm15, %v4171_v48, %v4172_v42  ;;  %v11231_v14 = vcombine.low %v14140_v53, %v14163_v13  ;;  %v4561_v38 = vshrl.u32 %v4536_v28, 16  ;;  %v14337_v13 = vpop.f32.mrf.mxu1 }
 0x129   :  { %12235 = vmatprep.mubr.msk.bf16.mxu0 %vm1310_vm8, %v11229_v19  ;;  %v4178_v22 = vrot.slane %v4176_v12, 4  ;;  %v4564_v55 = vshll.u32 %v4536_v28, 16  ;;  %v4570_v0 = vshll.u32 %v14302_v43, 16  ;;  %v4574_v62 = vshrl.u32 %v14302_v43, 16 }
 0x12a   :  { %v4563_v19 = vrot.slane %v4561_v38, 4  ;;  %v4580_v23 = vshll.u32 %v14314_v49, 16  ;;  %v4585_v40 = vshrl.u32 %v4539_v1, 16  ;;  %v4588_v53 = vshll.u32 %v4539_v1, 16 }
 0x12b   :  { %v14342_v10 = vsel %vm13242_vm15, %v11248_v41, %v4176_v12  ;;  %v4566_v47 = vrot.slane %v4564_v55, 5  ;;  %v14344_v48 = vrot.slane %v4570_v0, 5  ;;  %v4576_v42 = vrot.slane %v4574_v62, 4  ;;  %v14353_v54 = vpop.f32.mrf.mxu0 }
 0x12c   :  { %12246 = vmatmul.mubr.msk.bf16.vlgmr.msra.gmra.mxu1 %vm1310_vm8, %v11250_v2  ;;  %v14350_v28 = vsel %vm13242_vm15, %v4178_v22, %v4179_v24  ;;  %v4587_v1 = vrot.slane %v4585_v40, 4  ;;  %v4590_v38 = vrot.slane %v4588_v53, 5  ;;  %v4594_v2 = vshll.u32 %v14332_v31, 16  ;;  %v4545_v24 = vld [vmem:[#allocation2 + $0x90] sm:$0xf] }
 0x12d   :  { %12280 = vmatpush3.bf16.msra.mxu1 %v13410_v29  ;;  %12249 = vmatprep.mubr.msk.bf16.mxu1 %vm1310_vm8, %v11251_v8  ;;  %v4567_v12 = vor.u32 %v4566_v47, %v4563_v19  ;;  %v4577_v41 = vor.u32 %v4576_v42, %v14344_v48  ;;  %v4598_v55 = vshrl.u32 %v14332_v31, 16  ;;  %v4604_v0 = vshll.u32 %v14335_v26, 16  ;;  %v12827_v29 = vld [vmem:[%s18407_s1 + $0xc] sm:$0x3]  ;;  %v4542_v8 = vld [vmem:[#allocation2 + $0x84] sm:$0xf]  ;;  %v14366_v19 = vpop.f32.mrf.mxu0 }
 0x12e   :  { %12708 = vmatprep.subr.msk.bf16.mxu1 %vm1335_vm0, %v12827_v29  ;;  %v4582_v22 = vrot.slane %v4580_v23, 5  ;;  %v4591_v62 = vor.u32 %v4590_v38, %v4587_v1  ;;  %v14364_v40 = vrot.slane %v4594_v2, 5  ;;  %v14368_v53 = vpop.f32.mrf.mxu1  ;;  %v14379_v1 = vadd.f32 %v14084_v46, %v14123_v5 }
 0x12f   :  { %v4568_v42 = vrot.slane %v4567_v12, 4  ;;  %v4578_v34 = vrot.slane %v4577_v41, 4  ;;  %v4600_v29 = vrot.slane %v4598_v55, 4  ;;  %v14383_v38 = vadd.f32 %v14107_v63, %v14147_v44  ;;  %v14387_v12 = vpop.f32.mrf.mxu0 }
 0x130   :  { %12236 = vmatmul.mubr.msk.bf16.gmra.mxu0 %vm1310_vm8, %v11230_v9  ;;  %v14385_v9 = vld [vmem:[#allocation2 + $0x8c] sm:$0x1]  ;;  %v4609_v2 = vshrl.u32 %v4542_v8, 16  ;;  %v14389_v41 = vpop.f32.mrf.mxu1  ;;  %v4592_v55 = vrot.slane %v4591_v62, 4  ;;  %v4606_v47 = vrot.slane %v4604_v0, 5  ;;  %v4612_v23 = vshll.u32 %v4542_v8, 16 }
 0x131   :  { %12239 = vmatprep.mubr.msk.bf16.mxu0 %vm1310_vm8, %v11231_v14  ;;  %18469 = vst [vmem:[#allocation14_spill] sm:$0xff] %v14383_v38  ;;  %18470 = vst [vmem:[#allocation15_spill] sm:$0xff] %v14385_v9  ;;  %v4601_v14 = vor.u32 %v4600_v29, %v14364_v40  ;;  %v4573_v46 = vsel %vm13197_vm14, %v4568_v42, %v14344_v48  ;;  %v4583_v63 = vsel %vm13197_vm14, %v4578_v34, %v4582_v22  ;;  %v14406_v48 = vld [vmem:[#allocation2 + $0x94] sm:$0xf]  ;;  %v12756_v22 = vld [vmem:[#allocation2 + $0x6c] sm:$0xff]  }
 0x132   :  { %v4611_v5 = vrot.slane %v4609_v2, 4  ;;  %v4618_v44 = vshll.u32 %v14373_v52, 16  ;;  %v14398_v56 = vpop.f32.mrf.mxu1  ;;  %v18471_v62 = vcombine.low %v14248_v11, %v14263_v18  ;;  %v4614_v8 = vrot.slane %v4612_v23, 5  ;;  %v14418_v18 = vld [vmem:[#allocation2 + $0x98] sm:$0x1] }
 0x133   :  { %v4602_v0 = vrot.slane %v4601_v14, 4  ;;  %v4622_v29 = vshrl.u32 %v14373_v52, 16  ;;  %v4628_v57 = vshll.u32 %v14385_v9, 16  ;;  %v18472_v34 = vcombine.low %v14267_v7, %v14278_v60  ;;  %v14420_v14 = vpop.f32.mrf.mxu0 }
 0x134   :  { %12250 = vmatmul.mubr.msk.bf16.gmra.mxu1 %vm1310_vm8, %v18471_v62  ;;  %v14412_v42 = vrot.slane %v4618_v44, 5  ;;  %v14416_v11 = vadd.f32 %v14116_v51, %v14175_v36  ;;  %v4633_v23 = vshrl.u32 %v4545_v24, 16  ;;  %v4636_v2 = vshll.u32 %v4545_v24, 16  ;;  %v14422_v62 = vpop.f32.mrf.mxu1 }
 0x135   :  { %12253 = vmatprep.mubr.msk.bf16.mxu1 %vm1310_vm8, %v18472_v34  ;;  %v4597_v7 = vsel %vm13197_vm14, %v4592_v55, %v14364_v40  ;;  %v4615_v44 = vor.u32 %v4614_v8, %v4611_v5  ;;  %v4624_v34 = vrot.slane %v4622_v29, 4  ;;  %v4607_v51 = vsel %vm13197_vm14, %v4602_v0, %v4606_v47  ;;  %v4548_v47 = vld [vmem:[#allocation2 + $0x9c] sm:$0xf] }
 0x136   :  { %18473 = vst [vmem:[#allocation16_spill] sm:$0xff] %v14416_v11  ;;  %v4635_v36 = vrot.slane %v4633_v23, 4  ;;  %v4638_v9 = vrot.slane %v4636_v2, 5  ;;  %v4642_v52 = vshll.u32 %v14406_v48, 16  ;;  %v14431_v24 = vpop.f32.mrf.mxu1  ;;  %v18475_v11 = vcombine.low %v14180_v6, %v14186_v37  ;;  %v14445_v2 = vld [vmem:[#allocation2 + $0xa0] sm:$0xf] }
 0x137   :  { %18474 = vst [vmem:[#allocation17_spill] sm:$0xff] %v14431_v24  ;;  %v14437_v38 = vcombine.low %v4573_v46, %v4583_v63  ;;  %v4625_v40 = vor.u32 %v4624_v34, %v14412_v42  ;;  %v4646_v55 = vshrl.u32 %v14406_v48, 16  ;;  %v4652_v5 = vshll.u32 %v14418_v18, 16 }
 0x138   :  { %12240 = vmatmul.mubr.msk.bf16.gmra.mxu0 %vm1310_vm8, %v18475_v11  ;;  %v4616_v0 = vrot.slane %v4615_v44, 4  ;;  %v4630_v8 = vrot.slane %v4628_v57, 5  ;;  %v4639_v29 = vor.u32 %v4638_v9, %v4635_v36  ;;  %v14443_v23 = vrot.slane %v4642_v52, 5  ;;  %v14447_v6 = vpop.f32.mrf.mxu0  ;;  %v14449_v37 = vpop.f32.mrf.mxu1  ;;  %v14462_v52 = vld [vmem:[#allocation2 + $0xa4] sm:$0x1]  ;;  %v12757_v36 = vld [vmem:[#allocation2 + $0x78] sm:$0xff]  }
 0x139   :  { %12263 = vmatprep.mubr.msk.bf16.mxu0 %vm1310_vm8, %v12756_v22  ;;  %18476 = vst [vmem:[#allocation18_spill] sm:$0xff] %v14449_v37  ;;  %v14451_v46 = vcombine.low %v4597_v7, %v4607_v51  ;;  %v4626_v63 = vrot.slane %v4625_v40, 4  ;;  %v4648_v11 = vrot.slane %v4646_v55, 4  ;;  %v4654_v60 = vrot.slane %v4652_v5, 5 }
 0x13a   :  { %v14456_v22 = vadd.f32 %v14161_v30, %v14215_v20  ;;  %v14460_v57 = vadd.f32 %v14184_v39, %v14244_v33  ;;  %v4657_v9 = vshrl.u32 %v4548_v47, 16  ;;  %v14464_v44 = vpop.f32.mrf.mxu0  ;;  %v14466_v7 = vpop.f32.mrf.mxu1  ;;  %v18478_v51 = vcombine.low %v14282_v32, %v14299_v59  ;;  %v4551_v33 = vld [vmem:[#allocation2 + $0xa8] sm:$0xf] }
 0x13b   :  { %18477 = vst [vmem:[#allocation19_spill] sm:$0xff] %v14466_v7  ;;  %v4640_v40 = vrot.slane %v4639_v29, 4  ;;  %v4649_v30 = vor.u32 %v4648_v11, %v14443_v23  ;;  %v4660_v20 = vshll.u32 %v4548_v47, 16  ;;  %v4666_v39 = vshll.u32 %v14445_v2, 16  ;;  %v12758_v59 = vld [vmem:[#allocation2 + $0x84] sm:$0xff]  }
 0x13c   :  { %12254 = vmatmul.mubr.msk.bf16.gmra.mxu1 %vm1310_vm8, %v18478_v51  ;;  %v18479_v55 = vcombine.low %v14311_v50, %v14322_v27  ;;  %v4621_v5 = vsel %vm13197_vm14, %v4616_v0, %v14412_v42  ;;  %v4631_v32 = vsel %vm13197_vm14, %v4626_v63, %v4630_v8  ;;  %v4659_v29 = vrot.slane %v4657_v9, 4  ;;  %v14484_v47 = vld [vmem:[#allocation2 + $0xac] sm:$0xf]  ;;  %v14486_v51 = vpop.f32.mrf.mxu0  ;;  %v14488_v34 = vpop.f32.mrf.mxu1 }
 0x13d   :  { %v4670_v11 = vshrl.u32 %v14445_v2, 16  ;;  %18480 = vst [vmem:[#allocation20_spill] sm:$0xff] %v14488_v34  ;;  %v4650_v50 = vrot.slane %v4649_v30, 4  ;;  %v4662_v27 = vrot.slane %v4660_v20, 5  ;;  %v4676_v7 = vshll.u32 %v14462_v52, 16 }
 0x13e   :  { %12257 = vmatprep.mubr.msk.bf16.mxu1 %vm1310_vm8, %v18479_v55  ;;  %v14490_v55 = vrot.slane %v4666_v39, 5  ;;  %v14495_v0 = vadd.f32 %v14207_v16, %v14284_v17  ;;  %v4681_v8 = vshrl.u32 %v4551_v33, 16  ;;  %v4684_v63 = vshll.u32 %v4551_v33, 16  ;;  %v14497_v9 = vpop.f32.mrf.mxu0  ;;  %v14499_v37 = vpop.f32.mrf.mxu1 }
 0x13f   :  { %v4672_v42 = vrot.slane %v4670_v11, 4  ;;  %18481 = vst [vmem:[#allocation21_spill] sm:$0xff] %v14499_v37  ;;  %v4645_v30 = vsel %vm13197_vm14, %v4640_v40, %v14443_v23  ;;  %v4655_v20 = vsel %vm13197_vm14, %v4650_v50, %v4654_v60  ;;  %v4663_v39 = vor.u32 %v4662_v27, %v4659_v29  ;;  %v14507_v11 = vld [vmem:[#allocation2 + $0xb0] sm:$0x1] }
 0x140   :  { %12264 = vmatmul.mubr.msk.bf16.vlgmr.msra.gmra.mxu0 %vm1310_vm8, %v12757_v36  ;;  %18482 = vst [vmem:[#allocation22_spill] sm:$0xff] %v14507_v11  ;;  %v4690_v16 = vshll.u32 %v14484_v47, 16  ;;  %v14513_v17 = vadd.f32 %v14131_v45, %v14202_v25  ;;  %v4683_v33 = vrot.slane %v4681_v8, 4  ;;  %v4686_v23 = vrot.slane %v4684_v63, 5  ;;  %v14517_v40 = vpop.f32.mrf.mxu0  ;;  %v14519_v60 = vpop.f32.mrf.mxu1  ;;  %v4554_v45 = vld [vmem:[#allocation2 + $0xb4] sm:$0xf] }
 0x141   :  { %12298 = vmatpush3.bf16.msra.mxu0 %v13421_v15  ;;  %12267 = vmatprep.mubr.msk.bf16.mxu0 %vm1310_vm8, %v12758_v59  ;;  %v4673_v36 = vor.u32 %v4672_v42, %v14490_v55  ;;  %18483 = vst [vmem:[#allocation23_spill] sm:$0xff] %v14519_v60  ;;  %v14521_v29 = vcombine.low %v4621_v5, %v4631_v32  ;;  %v14523_v50 = vrot.slane %v4663_v39, 4  ;;  %v4694_v15 = vshrl.u32 %v14484_v47, 16  ;;  %v12828_v25 = vld [vmem:[%s18407_s1 + $0xe] sm:$0x3]  ;;  %v12759_v60 = vld [vmem:[#allocation2 + $0x90] sm:$0xff]  }
 0x142   :  { %v14525_v27 = vrot.slane %v4690_v16, 5  ;;  %12709 = vmatprep.subr.msk.bf16.mxu0 %vm1335_vm0, %v12828_v25  ;;  %v14532_v59 = vcombine.low %v4645_v30, %v4655_v20  ;;  %v14534_v42 = vrot.slane %v4676_v7, 5  ;;  %v4687_v8 = vor.u32 %v4686_v23, %v4683_v33  ;;  %v14537_v32 = vld [vmem:[#allocation2 + $0xb8] sm:$0xf]  ;;  %v14539_v63 = vpop.f32.mrf.mxu0  ;;  %v14541_v39 = vpop.f32.mrf.mxu1  ;;  %v14554_v33 = vld [vmem:[#allocation2 + $0xbc] sm:$0x1] }
 0x143   :  { %v4700_v5 = vshll.u32 %v14507_v11, 16  ;;  %18484 = vst [vmem:[#allocation24_spill] sm:$0xff] %v14541_v39  ;;  %v18485_v16 = vcombine.low %v14342_v10, %v14350_v28  ;;  %v14547_v25 = vrot.slane %v4673_v36, 4  ;;  %v4696_v30 = vrot.slane %v4694_v15, 4  ;;  %18486 = vst [vmem:[#allocation25_spill] sm:$0xff] %v14554_v33  ;;  %v12760_v36 = vld [vmem:[#allocation2 + $0x9c] sm:$0xff]  }
 0x144   :  { %v14552_v20 = vadd.f32 %v14258_v21, %v14353_v54  ;;  %v4669_v10 = vsel %vm13197_vm14, %v14523_v50, %v14490_v55  ;;  %v14564_v28 = vadd.f32 %v14221_v3, %v14326_v35  ;;  %v14568_v23 = vadd.f32 %v14286_v4, %v14366_v19  ;;  %v14570_v54 = vpop.f32.mrf.mxu0  ;;  %v14572_v15 = vpop.f32.mrf.mxu1  ;;  %v156_v3 = vld [vmem:[%s18406_s0 + $0x78] sm:$0xf] }
 0x145   :  { %12258 = vmatmul.mubr.msk.bf16.gmra.mxu1 %vm1310_vm8, %v18485_v16  ;;  %v4705_v21 = vshrl.u32 %v4554_v45, 16  ;;  %18487 = vst [vmem:[#allocation26_spill] sm:$0xff] %v14572_v15  ;;  %v4697_v16 = vor.u32 %v4696_v30, %v14525_v27  ;;  %v4708_v7 = vshll.u32 %v4554_v45, 16  ;;  %v4714_v55 = vshll.u32 %v14537_v32, 16  ;;  %v157_v15 = vld [vmem:[%s18406_s0 + $0x7c] sm:$0xf] }
 0x146   :  { %12281 = vmatprep.mubr.msk.bf16.mxu1 %vm1310_vm8, %v14437_v38  ;;  %v4688_v38 = vrot.slane %v4687_v8, 4  ;;  %v4702_v35 = vrot.slane %v4700_v5, 5  ;;  %v4718_v4 = vshrl.u32 %v14537_v32, 16  ;;  %v4724_v19 = vshll.u32 %v14554_v33, 16  ;;  %v14584_v8 = vpop.f32.mrf.mxu0  ;;  %v14586_v30 = vpop.f32.mrf.mxu1 }
 0x147   :  { %v4707_v50 = vrot.slane %v4705_v21, 4  ;;  %18488 = vst [vmem:[#allocation27_spill] sm:$0xff] %v14586_v30  ;;  %v4698_v45 = vrot.slane %v4697_v16, 4  ;;  %v4710_v39 = vrot.slane %v4708_v7, 5  ;;  %v14589_v37 = vrot.slane %v4714_v55, 5 }
 0x148   :  { %12268 = vmatmul.mubr.msk.bf16.gmra.mxu0 %vm1310_vm8, %v12759_v60  ;;  %v14593_v5 = vadd.f32 %v14304_v61, %v14387_v12  ;;  %v4679_v21 = vsel %vm13197_vm14, %v14547_v25, %v14534_v42  ;;  %v4720_v34 = vrot.slane %v4718_v4, 4  ;;  %v449_v24 = vshrl.u32 %v156_v3, 16  ;;  %v14600_v11 = vpop.f32.mrf.mxu0  ;;  %v14602_v60 = vpop.f32.mrf.mxu1  ;;  %v944_v4 = vld [vmem:[#allocation2 + $0xc0] sm:$0xf] }
 0x149   :  { %12271 = vmatprep.mubr.msk.bf16.mxu0 %vm1310_vm8, %v12760_v36  ;;  %v452_v30 = vshll.u32 %v156_v3, 16  ;;  %18489 = vst [vmem:[#allocation28_spill] sm:$0xff] %v14602_v60  ;;  %v4693_v7 = vsel %vm13197_vm14, %v4688_v38, %v14525_v27  ;;  %v4711_v61 = vor.u32 %v4710_v39, %v4707_v50  ;;  %v457_v12 = vshrl.u32 %v157_v15, 16  ;;  %v12761_v60 = vld [vmem:[#allocation2 + $0xa8] sm:$0xff]   ;;  %v18491_v38 = vld [vmem:[#allocation10_spill] sm:$0xff] }
 0x14a   :  { %v460_v16 = vshll.u32 %v157_v15, 16  ;;  %v4703_v55 = vsel %vm13197_vm14, %v4698_v45, %v4702_v35  ;;  %v4721_v42 = vor.u32 %v4720_v34, %v14589_v37  ;;  %v4726_v25 = vrot.slane %v4724_v19, 5  ;;  %v14610_v3 = vpop.f32.mrf.mxu0  ;;  %v14612_v33 = vpop.f32.mrf.mxu1  ;;  %v948_v19 = vld [vmem:[#allocation2 + $0xc8] sm:$0x1]  ;;  %v12762_v45 = vld [vmem:[#allocation2 + $0xb4] sm:$0xff]  }
 0x14b   :  { %v451_v36 = vrot.slane %v449_v24, 7  ;;  %18490 = vst [vmem:[#allocation29_spill] sm:$0xff] %v14612_v33  ;;  %v4712_v27 = vrot.slane %v4711_v61, 4  ;;  %v459_v39 = vrot.slane %v457_v12, 7  ;;  %v14618_v15 = vadd.f32 %v14368_v53, %v14447_v6  ;;  %v4913_v24 = vld [vmem:[#allocation2 + $0x6c] sm:$0xe] }
 0x14c   :  { %v14622_v34 = vadd.f32 %v14389_v41, %v14464_v44  ;;  %v4722_v35 = vrot.slane %v4721_v42, 4  ;;  %v14629_v61 = vadd.f32 %v14398_v56, %v14486_v51  ;;  %v12090_v53 = vpop.f32.mrf.mxu0  ;;  %v14631_v6 = vpop.f32.mrf.mxu1  ;;  %v11285_v41 = vcombine.low %v4669_v10, %v4679_v21  ;;  %v4914_v33 = vld [vmem:[#allocation2 + $0x78] sm:$0xe] }
 0x14d   :  { %12282 = vmatmul.mubr.msk.bf16.vlgmr.msra.gmra.mxu1 %vm1310_vm8, %v14451_v46  ;;  %v454_v50 = vor.u32 %v452_v30, %v451_v36  ;;  %v455_v46 = vrot.slane %v451_v36, 4  ;;  %v14633_v44 = vcombine.low %v4693_v7, %v4703_v55  ;;  %v462_v12 = vor.u32 %v460_v16, %v459_v39 }
 0x14e   :  { %12316 = vmatpush3.bf16.msra.mxu1 %v18491_v38  ;;  %12285 = vmatprep.mubr.msk.bf16.mxu1 %vm1310_vm8, %v14521_v29  ;;  %v464_v38 = vrot.slane %v459_v39, 4  ;;  %v12829_v29 = vld [vmem:[%s18407_s1 + $0x10] sm:$0x3]  ;;  %v4717_v56 = vsel %vm13197_vm14, %v4712_v27, %v14589_v37  ;;  %v11297_v42 = vrot.slane %v4913_v24, 9  ;;  %v4947_v10 = vrot.slane %v14302_v43, 5  ;;  %v1789_v21 = vpop.f32.mrf.mxu0  ;;  %v14645_v7 = vpop.f32.mrf.mxu1 }
 0x14f   :  { %12710 = vmatprep.subr.msk.bf16.mxu1 %vm1335_vm0, %v12829_v29  ;;  %v945_v30 = vsel %vm13157_vm10, %v454_v50, %v944_v4  ;;  %v4727_v16 = vsel %vm13197_vm14, %v4722_v35, %v4726_v25  ;;  %v463_v36 = vsel %vm13134_vm9, %v455_v46, %v462_v12  ;;  %v4950_v4 = vrot.slane %v14314_v49, 5  ;;  %v4915_v27 = vld [vmem:[#allocation2 + $0x84] sm:$0xe]  ;;  %v18499_v29 = vld [vmem:[#allocation13_spill] sm:$0xff] }
 0x150   :  { %12272 = vmatmul.mubr.msk.bf16.gmra.mxu0 %vm1310_vm8, %v12761_v60  ;;  %946 = vst [vmem:[#allocation2 + $0xc0] sm:$0xf] %v945_v30  ;;  %v949_v37 = vsel %vm13173_vm11, %v464_v38, %v948_v19  ;;  %947 = vst.msk [vmem:[#allocation2 + $0xc4] sm:$0xf] %vm16_vm1, %v463_v36  ;;  %v14658_v43 = vadd.f32 %v14337_v13, %v14420_v14  ;;  %v4949_v60 = vrot.slane %v4947_v10, 4  ;;  %v11298_v24 = vrot.slane %v4914_v33, 9  ;;  %v12093_v35 = vpop.f32.mrf.mxu0  ;;  %v14665_v50 = vpop.f32.mrf.mxu1 }
 0x151   :  { %950 = vst [vmem:[#allocation2 + $0xc8] sm:$0x1] %v949_v37  ;;  %12275 = vmatprep.mubr.msk.bf16.mxu0 %vm1310_vm8, %v12762_v45  ;;  %v14663_v25 = vadd.f32 %v14517_v40, %v14379_v1  ;;  %v14669_v49 = vadd.f32 %v14422_v62, %v14497_v9  ;;  %v18495_v46 = vrot.slane %v14332_v31, 5  ;;  %v18496_v13 = vld [vmem:[#allocation14_spill] sm:$0xff]  ;;  %v18497_v45 = vld [vmem:[#allocation16_spill] sm:$0xff]  ;;  %v11287_v1 = vcombine.low %v4717_v56, %v4727_v16  ;;  %v18501_v56 = vld [vmem:[#allocation15_spill] sm:$0xff] }
 0x152   :  { %v14675_v14 = vadd.f32 %v14539_v63, %v18496_v13  ;;  %v14679_v12 = vadd.f32 %v14570_v54, %v18497_v45  ;;  %v14683_v33 = vsel %vm13242_vm15, %v11297_v42, %v4947_v10  ;;  %v11299_v38 = vrot.slane %v4915_v27, 9  ;;  %v1802_v9 = vpop.f32.mrf.mxu0  ;;  %v14686_v30 = vpop.f32.mrf.mxu1  ;;  %v4916_v10 = vld [vmem:[#allocation2 + $0x90] sm:$0xe] }
 0x153   :  { %v4956_v19 = vrot.slane %v18495_v46, 4  ;;  %v4961_v62 = vrot.slane %v18499_v29, 5  ;;  %18500 = vst [vmem:[#allocation10_spill] sm:$0xff] %v14686_v30  ;;  %v4951_v63 = vsel %vm13242_vm15, %v4949_v60, %v4950_v4  ;;  %v14694_v54 = vadd.f32 %v14584_v8, %v14513_v17  ;;  %v4917_v60 = vld [vmem:[#allocation2 + $0x9c] sm:$0xe] }
 0x154   :  { %v4964_v16 = vrot.slane %v18501_v56, 5  ;;  %v14699_v42 = vadd.f32 %v14600_v11, %v14456_v22  ;;  %v18502_v36 = vmov %v18495_v46  ;;  %v18503_v37 = vrot.slane %v14335_v26, 5  ;;  %v12094_v11 = vpop.f32.mrf.mxu0  ;;  %v14718_v4 = vpop.f32.mrf.mxu1  ;;  %v4918_v29 = vld [vmem:[#allocation2 + $0xa8] sm:$0xe] }
 0x155   :  { %12286 = vmatmul.mubr.msk.bf16.gmra.mxu1 %vm1310_vm8, %v14532_v59  ;;  %v14706_v59 = vsel %vm13242_vm15, %v11298_v24, %v18502_v36  ;;  %v14716_v8 = vsel %vm13242_vm15, %v11299_v38, %v4961_v62  ;;  %v4963_v22 = vrot.slane %v4961_v62, 4  ;;  %18504 = vst [vmem:[#allocation14_spill] sm:$0xff] %v14718_v4  ;;  %v4968_v31 = vrot.slane %v14406_v48, 5 }
 0x156   :  { %12289 = vmatprep.mubr.msk.bf16.mxu1 %vm1310_vm8, %v11285_v41  ;;  %v14712_v17 = vsel %vm13242_vm15, %v4956_v19, %v18503_v37  ;;  %v14723_v41 = vadd.f32 %v14610_v3, %v14460_v57  ;;  %v14726_v26 = vadd.f32 %v12090_v53, %v14495_v0  ;;  %v14729_v27 = vadd.f32 %v1789_v21, %v14564_v28  ;;  %v1805_v57 = vpop.f32.mrf.mxu0  ;;  %v14739_v3 = vpop.f32.mrf.mxu1 }
 0x157   :  { %v4557_v24 = vld [vmem:[#allocation2 + $0xc0] sm:$0xf]  ;;  %v14733_v46 = vsel %vm13242_vm15, %v4963_v22, %v4964_v16  ;;  %v11300_v19 = vrot.slane %v4916_v10, 9  ;;  %v4975_v13 = vrot.slane %v14445_v2, 5  ;;  %v14737_v48 = vadd.f32 %v12093_v35, %v14552_v20  ;;  %18505 = vst [vmem:[#allocation16_spill] sm:$0xff] %v14739_v3 }
 0x158   :  { %v14741_v0 = vld [vmem:[#allocation2 + $0xc4] sm:$0xf]  ;;  %v14743_v53 = vld [vmem:[#allocation2 + $0xc8] sm:$0x1]  ;;  %v4729_v28 = vshrl.u32 %v4557_v24, 16  ;;  %v4732_v21 = vshll.u32 %v4557_v24, 16  ;;  %v11305_v45 = vcombine.low %v14683_v33, %v4951_v63  ;;  %v12097_v56 = vpop.f32.mrf.mxu0  ;;  %v14751_v16 = vpop.f32.mrf.mxu1 }
 0x159   :  { %v4738_v2 = vshll.u32 %v14741_v0, 16  ;;  %v4742_v20 = vshrl.u32 %v14741_v0, 16  ;;  %v4748_v35 = vshll.u32 %v14743_v53, 16  ;;  %v11301_v62 = vrot.slane %v4917_v60, 9  ;;  %18506 = vst [vmem:[#allocation9_spill] sm:$0xff] %v14751_v16  ;;  %v12763_v37 = vld [vmem:[#allocation2 + $0xc0] sm:$0xff]  }
 0x15a   :  { %v4731_v10 = vrot.slane %v4729_v28, 4  ;;  %v4734_v36 = vrot.slane %v4732_v21, 5  ;;  %v4970_v63 = vrot.slane %v4968_v31, 4  ;;  %v14757_v4 = vsel %vm13242_vm15, %v11300_v19, %v4968_v31  ;;  %v1818_v39 = vpop.f32.mrf.mxu0  ;;  %v14759_v55 = vpop.f32.mrf.mxu1  ;;  %12276 = vmatmul.mubr.msk.bf16.gmra.mxu0 %vm1310_vm8, %v12763_v37  ;;  %v18513_v33 = vld [vmem:[#allocation22_spill] sm:$0xff] }
 0x15b   :  { %v4740_v22 = vrot.slane %v4738_v2, 5  ;;  %v4744_v24 = vrot.slane %v4742_v20, 4  ;;  %v4750_v38 = vrot.slane %v4748_v35, 5  ;;  %18507 = vst [vmem:[#allocation13_spill] sm:$0xff] %v14759_v55  ;;  %v18508_v28 = vrot.slane %v14418_v18, 5  ;;  %12299 = vmatprep.mubr.msk.bf16.mxu0 %vm1310_vm8, %v11305_v45 }
 0x15c   :  { %v4735_v60 = vor.u32 %v4734_v36, %v4731_v10  ;;  %v4977_v2 = vrot.slane %v4975_v13, 4  ;;  %v4978_v20 = vrot.slane %v14462_v52, 5  ;;  %v11302_v19 = vrot.slane %v4918_v29, 9  ;;  %v4919_v10 = vld [vmem:[#allocation2 + $0xb4] sm:$0xe]  ;;  %v12098_v18 = vpop.f32.mrf.mxu0  ;;  %v14777_v36 = vpop.f32.mrf.mxu1 }
 0x15d   :  { %12290 = vmatmul.mubr.msk.bf16.gmra.mxu1 %vm1310_vm8, %v14633_v44  ;;  %v14768_v21 = vsel %vm13242_vm15, %v4970_v63, %v18508_v28  ;;  %v4745_v31 = vor.u32 %v4744_v24, %v4740_v22  ;;  %v4982_v44 = vrot.slane %v14484_v47, 5  ;;  %v14775_v35 = vadd.f32 %v1802_v9, %v14568_v23  ;;  %18509 = vst [vmem:[#allocation15_spill] sm:$0xff] %v14777_v36  ;;  %v4920_v29 = vld [vmem:[#allocation2 + $0xc0] sm:$0xe]  ;;  %v14798_v28 = vld [vmem:[#allocation2 + $0x7c] sm:$0xf] }
 0x15e   :  { %12293 = vmatprep.mubr.msk.bf16.mxu1 %vm1310_vm8, %v11287_v1  ;;  %v4736_v37 = vrot.slane %v4735_v60, 4  ;;  %v4999_v63 = vrot.slane %v14743_v53, 5  ;;  %v14781_v52 = vadd.f32 %v12094_v11, %v14593_v5  ;;  %v14784_v1 = vadd.f32 %v1805_v57, %v14658_v43  ;;  %v1821_v24 = vpop.f32.mrf.mxu0  ;;  %v14792_v60 = vpop.f32.mrf.mxu1  ;;  %v18511_v57 = vld [vmem:[#allocation25_spill] sm:$0xff]  ;;  %v14823_v36 = vld [vmem:[#allocation2 + $0x80] sm:$0x1] }
 0x15f   :  { %v4746_v45 = vrot.slane %v4745_v31, 4  ;;  %v14790_v23 = vsel %vm13242_vm15, %v11301_v62, %v4975_v13  ;;  %v4984_v9 = vrot.slane %v4982_v44, 4  ;;  %18510 = vst [vmem:[#allocation30_spill] sm:$0xff] %v14792_v60  ;;  %v11303_v11 = vrot.slane %v4919_v10, 9  ;;  %v12764_v13 = vld [vmem:[#allocation2 + $0x78] sm:$0xff]  }
 0x160   :  { %v4741_v5 = vsel %vm13197_vm14, %v4736_v37, %v4740_v22  ;;  %v4989_v43 = vrot.slane %v14537_v32, 5  ;;  %v4992_v53 = vrot.slane %v18511_v57, 5  ;;  %v14804_v62 = vsel %vm13242_vm15, %v4977_v2, %v4978_v20  ;;  %v5733_v32 = vld [vmem:[#allocation2 + $0x78] sm:$0xe]  ;;  %v14813_v10 = vpop.f32.mrf.mxu0  ;;  %v14815_v37 = vpop.f32.mrf.mxu1 }
 0x161   :  { %v4751_v31 = vsel %vm13197_vm14, %v4746_v45, %v4750_v38  ;;  %v14808_v47 = vsel %vm13242_vm15, %v11302_v19, %v4982_v44  ;;  %v14811_v22 = vadd.f32 %v12097_v56, %v14618_v15  ;;  %18512 = vst [vmem:[#allocation25_spill] sm:$0xff] %v14815_v37  ;;  %v18514_v38 = vrot.slane %v18513_v33, 5  ;;  %v5734_v19 = vld [vmem:[#allocation2 + $0x84] sm:$0xe] }
 0x162   :  { %v11288_v57 = vcombine.low %v4741_v5, %v4751_v31  ;;  %v4991_v2 = vrot.slane %v4989_v43, 4  ;;  %v11304_v20 = vrot.slane %v4920_v29, 9  ;;  %v14827_v15 = vsel %vm13242_vm15, %v11303_v11, %v4989_v43  ;;  %v14834_v5 = vld [vmem:[#allocation2 + $0x88] sm:$0xf]  ;;  %v14841_v29 = vpop.f32.mrf.mxu0  ;;  %v14843_v31 = vpop.f32.mrf.mxu1 }
 0x163   :  { %v14821_v45 = vsel %vm13242_vm15, %v4984_v9, %v18514_v38  ;;  %v4996_v56 = vrot.slane %v14741_v0, 5  ;;  %v14831_v44 = vadd.f32 %v1818_v39, %v14622_v34  ;;  %v5767_v33 = vrot.slane %v14798_v28, 5  ;;  %v14839_v9 = vld [vmem:[%s18407_s1 + $0x2] sm:$0x3]  ;;  %18515 = vst [vmem:[#allocation22_spill] sm:$0xff] %v14843_v31 }
 0x164   :  { %v18516_v0 = vcombine.low %v14706_v59, %v14712_v17  ;;  %v14854_v39 = vsel %vm13242_vm15, %v4991_v2, %v4992_v53  ;;  %v11353_v11 = vrot.slane %v5733_v32, 9  ;;  %v14857_v43 = vadd.f32 %v12098_v18, %v14629_v61  ;;  %v5356_v38 = vld [vmem:[#allocation2 + $0x78] sm:$0xf]  ;;  %v14864_v34 = vld [vmem:[#allocation2 + $0x8c] sm:$0x1]  ;;  %v14866_v53 = vpop.f32.mrf.mxu0  ;;  %v14868_v32 = vpop.f32.mrf.mxu1 }
 0x165   :  { %12294 = vmatmul.mubr.msk.bf16.gmra.mxu1 %vm1310_vm8, %v11288_v57  ;;  %v18517_v57 = vld [vmem:[#allocation11_spill] sm:$0xff]  ;;  %v4998_v17 = vrot.slane %v4996_v56, 4  ;;  %v11354_v31 = vrot.slane %v5734_v19, 9  ;;  %v18519_v61 = vcombine.low %v14716_v8, %v14733_v46  ;;  %v5769_v2 = vrot.slane %v5767_v33, 4 }
 0x166   :  { %12300 = vmatmul.mubr.msk.bf16.vlgmr.msra.gmra.mxu0 %vm1310_vm8, %v18516_v0  ;;  %12317 = vmatprep.mubr.msk.bf16.mxu1 %vm1310_vm8, %v12764_v13  ;;  %v5770_v0 = vrot.slane %v14823_v36, 5  ;;  %18518 = vst [vmem:[#allocation11_spill] sm:$0xff] %v14868_v32  ;;  %v14878_v13 = vsel %vm13242_vm15, %v11304_v20, %v4996_v56  ;;  %v5381_v8 = vshrl.u32 %v5356_v38, 16  ;;  %v5384_v46 = vshll.u32 %v5356_v38, 16  ;;  %v14888_v59 = vpop.f32.mrf.mxu0  ;;  %v14890_v18 = vpop.f32.mrf.mxu1  ;;  %v12765_v20 = vld [vmem:[#allocation2 + $0x84] sm:$0xff]  }
 0x167   :  { %12334 = vmatpush3.bf16.msra.mxu0 %v18517_v57  ;;  %12303 = vmatprep.mubr.msk.bf16.mxu0 %vm1310_vm8, %v18519_v61  ;;  %v5774_v57 = vrot.slane %v14834_v5, 5  ;;  %v14885_v19 = vsel %vm13242_vm15, %v4998_v17, %v4999_v63  ;;  %v5390_v61 = vshll.u32 %v14798_v28, 16  ;;  %18520 = vst [vmem:[#allocation31_spill] sm:$0xff] %v14890_v18  ;;  %v14894_v56 = vsel %vm13242_vm15, %v11353_v11, %v5767_v33  ;;  %v5359_v63 = vld [vmem:[#allocation2 + $0x84] sm:$0xf]  ;;  %v12766_v17 = vld [vmem:[#allocation2 + $0x90] sm:$0xff]  }
 0x168   :  { %12711 = vmatprep.subr.msk.bf16.mxu0 %vm1335_vm0, %v14839_v9  ;;  %v5777_v37 = vrot.slane %v14864_v34, 5  ;;  %v14898_v60 = vadd.f32 %v1821_v24, %v14669_v49  ;;  %v14904_v55 = vsel %vm13242_vm15, %v5769_v2, %v5770_v0  ;;  %v5383_v18 = vrot.slane %v5381_v8, 4  ;;  %v14906_v3 = vpop.f32.mrf.mxu0  ;;  %v14908_v33 = vpop.f32.mrf.mxu1 }
 0x169   :  { %v5776_v32 = vrot.slane %v5774_v57, 4  ;;  %v5386_v16 = vrot.slane %v5384_v46, 5  ;;  %18522 = vst [vmem:[#allocation33_spill] sm:$0xff] %v14908_v33  ;;  %v14910_v11 = vrot.slane %v5390_v61, 5  ;;  %v5394_v49 = vshrl.u32 %v14798_v28, 16 }
 0x16a   :  { %18521 = vst [vmem:[#allocation32_spill] sm:$0xff] %v14898_v60  ;;  %v5400_v24 = vshll.u32 %v14823_v36, 16  ;;  %v18523_v60 = vld [vmem:[#allocation17_spill] sm:$0xff]  ;;  %v14918_v38 = vsel %vm13242_vm15, %v11354_v31, %v5774_v57  ;;  %v5405_v2 = vshrl.u32 %v5359_v63, 16  ;;  %v5408_v8 = vshll.u32 %v5359_v63, 16  ;;  %v14923_v61 = vpop.f32.mrf.mxu0  ;;  %v14925_v33 = vpop.f32.mrf.mxu1  ;;  %v18527_v31 = vld [vmem:[#allocation12_spill] sm:$0xff] }
 0x16b   :  { %v2033_v51 = vadd.f32 %v18523_v60, %v14663_v25  ;;  %v5387_v0 = vor.u32 %v5386_v16, %v5383_v18  ;;  %v6068_v46 = vld [vmem:[%s18407_s1] sm:$0x3]  ;;  %18524 = vst [vmem:[#allocation17_spill] sm:$0xff] %v14925_v33  ;;  %v18525_v25 = vcombine.low %v14757_v4, %v14768_v21  ;;  %v14934_v16 = vsel %vm13242_vm15, %v5776_v32, %v5777_v37 }
 0x16c   :  { %v5396_v36 = vrot.slane %v5394_v49, 4  ;;  %v5414_v28 = vshll.u32 %v14834_v5, 16  ;;  %v5407_v57 = vrot.slane %v5405_v2, 4  ;;  %v5418_v4 = vshrl.u32 %v14834_v5, 16  ;;  %v14943_v21 = vpop.f32.mrf.mxu0  ;;  %v14945_v63 = vpop.f32.mrf.mxu1  ;;  %v14954_v49 = vld [vmem:[#allocation2 + $0x94] sm:$0xf] }
 0x16d   :  { %12318 = vmatmul.mubr.msk.bf16.vlgmr.msra.gmra.mxu1 %vm1310_vm8, %v12765_v20  ;;  %v14937_v60 = vadd.f32 %v14813_v10, %v2033_v51  ;;  %v5388_v18 = vrot.slane %v5387_v0, 4  ;;  %v5410_v20 = vrot.slane %v5408_v8, 5  ;;  %18528 = vst [vmem:[#allocation12_spill] sm:$0xff] %v14945_v63  ;;  %v18529_v37 = vcombine.low %v14790_v23, %v14804_v62  ;;  %v18530_v8 = vld [vmem:[#allocation18_spill] sm:$0xff]  ;;  %v14973_v63 = vld [vmem:[#allocation2 + $0xa0] sm:$0xf] }
 0x16e   :  { %12304 = vmatmul.mubr.msk.bf16.gmra.mxu0 %vm1310_vm8, %v18525_v25  ;;  %12352 = vmatpush3.bf16.msra.mxu1 %v18527_v31  ;;  %v5397_v51 = vor.u32 %v5396_v36, %v14910_v11  ;;  %v5402_v10 = vrot.slane %v5400_v24, 5  ;;  %v5416_v32 = vrot.slane %v5414_v28, 5  ;;  %v5420_v2 = vrot.slane %v5418_v4, 4  ;;  %v14960_v62 = vld [vmem:[#allocation2 + $0x98] sm:$0x1]  ;;  %v14962_v36 = vpop.f32.mrf.mxu0  ;;  %v12767_v24 = vld [vmem:[#allocation2 + $0x9c] sm:$0xff]  }
 0x16f   :  { %18526 = vst [vmem:[#allocation34_spill] sm:$0xff] %v14937_v60  ;;  %12321 = vmatprep.mubr.msk.bf16.mxu1 %vm1310_vm8, %v12766_v17  ;;  %12307 = vmatprep.mubr.msk.bf16.mxu0 %vm1310_vm8, %v18529_v37  ;;  %v5424_v17 = vshll.u32 %v14864_v34, 16  ;;  %v5411_v0 = vor.u32 %v5410_v20, %v5407_v57  ;;  %v2031_v23 = vadd.f32 %v18530_v8, %v14675_v14  ;;  %v5735_v25 = vld [vmem:[#allocation2 + $0x90] sm:$0xe]  ;;  %v5736_v57 = vld [vmem:[#allocation2 + $0x9c] sm:$0xe] }
 0x170   :  { %12712 = vmatprep.subr.msk.bf16.mxu1 %vm1335_vm0, %v6068_v46  ;;  %v5393_v28 = vsel %vm13197_vm14, %v5388_v18, %v14910_v11  ;;  %v5398_v31 = vrot.slane %v5397_v51, 4  ;;  %v12768_v20 = vld [vmem:[#allocation2 + $0xa8] sm:$0xff]   ;;  %v5421_v5 = vor.u32 %v5420_v2, %v5416_v32  ;;  %v5781_v8 = vrot.slane %v14954_v49, 5  ;;  %v14975_v33 = vpop.f32.mrf.mxu0  ;;  %v14977_v34 = vpop.f32.mrf.mxu1  ;;  %v5362_v2 = vld [vmem:[#allocation2 + $0x90] sm:$0xf] }
 0x171   :  { %v5426_v37 = vrot.slane %v5424_v17, 5  ;;  %v5412_v4 = vrot.slane %v5411_v0, 4  ;;  %v14970_v14 = vadd.f32 %v14841_v29, %v2031_v23  ;;  %18532 = vst [vmem:[#allocation35_spill] sm:$0xff] %v14977_v34  ;;  %v11355_v18 = vrot.slane %v5735_v25, 9  ;;  %v18533_v17 = vld [vmem:[#allocation19_spill] sm:$0xff] }
 0x172   :  { %v5403_v11 = vsel %vm13197_vm14, %v5398_v31, %v5402_v10  ;;  %v5784_v51 = vrot.slane %v14960_v62, 5  ;;  %v2034_v0 = vadd.f32 %v18533_v17, %v14679_v12  ;;  %v5422_v29 = vrot.slane %v5421_v5, 4  ;;  %v14991_v60 = vld [vmem:[#allocation2 + $0xa4] sm:$0x1]  ;;  %v14993_v30 = vpop.f32.mrf.mxu0  ;;  %v14995_v10 = vpop.f32.mrf.mxu1 }
 0x173   :  { %18531 = vst [vmem:[#allocation18_spill] sm:$0xff] %v14970_v14  ;;  %v14986_v23 = vsel %vm1335_vm0, %v14839_v9, 0  ;;  %v14989_v14 = vsel %vm1335_vm0, %v6068_v46, 0  ;;  %v11356_v34 = vrot.slane %v5736_v57, 9  ;;  %18536 = vst [vmem:[#allocation37_spill] sm:$0xff] %v14995_v10  ;;  %v18537_v12 = vcombine.low %v14808_v47, %v14821_v45 }
 0x174   :  { %18534 = vst [vmem:[#allocation19_spill] sm:$0xff] %v14986_v23  ;;  %18535 = vst [vmem:[#allocation36_spill] sm:$0xff] %v14989_v14  ;;  %v5417_v9 = vsel %vm13197_vm14, %v5412_v4, %v5416_v32  ;;  %v5783_v5 = vrot.slane %v5781_v8, 4  ;;  %v15005_v46 = vadd.f32 %v14866_v53, %v2034_v0  ;;  %v5788_v25 = vrot.slane %v14973_v63, 5  ;;  %v15015_v32 = vpop.f32.mrf.mxu0  ;;  %v5365_v4 = vld [vmem:[#allocation2 + $0x9c] sm:$0xf]  ;;  %v15038_v0 = vpop.f32.mrf.mxu1 }
 0x175   :  { %12322 = vmatmul.mubr.msk.bf16.gmra.mxu1 %vm1310_vm8, %v12767_v24  ;;  %v18539_v31 = vcombine.low %v14827_v15, %v14854_v39  ;;  %v11337_v24 = vcombine.low %v5393_v28, %v5403_v11  ;;  %v5427_v47 = vsel %vm13197_vm14, %v5422_v29, %v5426_v37  ;;  %v5429_v45 = vshrl.u32 %v5362_v2, 16  ;;  %v18540_v39 = vld [vmem:[#allocation20_spill] sm:$0xff]  ;;  %18542 = vst [vmem:[#allocation39_spill] sm:$0xff] %v15038_v0 }
 0x176   :  { %12308 = vmatmul.mubr.msk.bf16.gmra.mxu0 %vm1310_vm8, %v18537_v12  ;;  %18538 = vst [vmem:[#allocation38_spill] sm:$0xff] %v15005_v46  ;;  %12325 = vmatprep.mubr.msk.bf16.mxu1 %vm1310_vm8, %v12768_v20  ;;  %v5432_v57 = vshll.u32 %v5362_v2, 16  ;;  %v15019_v53 = vsel %vm13242_vm15, %v11355_v18, %v5781_v8  ;;  %v15023_v20 = vsel %vm13242_vm15, %v5783_v5, %v5784_v51  ;;  %v5791_v15 = vrot.slane %v14991_v60, 5  ;;  %v15036_v18 = vpop.f32.mrf.mxu0  ;;  %v12769_v51 = vld [vmem:[#allocation2 + $0xb4] sm:$0xff]   ;;  %v15049_v46 = vld [vmem:[#allocation2 + $0xac] sm:$0xf] }
 0x177   :  { %12311 = vmatprep.mubr.msk.bf16.mxu0 %vm1310_vm8, %v18539_v31  ;;  %v15028_v28 = vadd.f32 %v18540_v39, %v14694_v54  ;;  %v15030_v37 = vcombine.low %v5417_v9, %v5427_v47  ;;  %v15034_v11 = vsel %vm13242_vm15, %v11356_v34, %v5788_v25  ;;  %v5431_v17 = vrot.slane %v5429_v45, 4  ;;  %18541 = vst [vmem:[#allocation20_spill] sm:$0xff] %v15036_v18  ;;  %v12770_v9 = vld [vmem:[#allocation2 + $0xc0] sm:$0xff]   ;;  %v18543_v31 = vld [vmem:[#allocation21_spill] sm:$0xff] }
 0x178   :  { %v5434_v8 = vrot.slane %v5432_v57, 5  ;;  %v5790_v2 = vrot.slane %v5788_v25, 4  ;;  %v5438_v29 = vshll.u32 %v14954_v49, 16  ;;  %v5442_v54 = vshrl.u32 %v14954_v49, 16  ;;  %v15047_v57 = vpop.f32.mrf.mxu0 }
 0x179   :  { %v5448_v12 = vshll.u32 %v14960_v62, 16  ;;  %v2037_v47 = vadd.f32 %v18543_v31, %v14699_v42  ;;  %v5453_v45 = vshrl.u32 %v5365_v4, 16  ;;  %v5456_v10 = vshll.u32 %v5365_v4, 16  ;;  %v15057_v42 = vpop.f32.mrf.mxu1 }
 0x17a   :  { %v5435_v34 = vor.u32 %v5434_v8, %v5431_v17  ;;  %v5440_v39 = vrot.slane %v5438_v29, 5  ;;  %v5444_v0 = vrot.slane %v5442_v54, 4  ;;  %v5462_v5 = vshll.u32 %v14973_v63, 16  ;;  %v5737_v17 = vld [vmem:[#allocation2 + $0xa8] sm:$0xe]  ;;  %v15055_v8 = vpop.f32.mrf.mxu0  ;;  %18544 = vst [vmem:[#allocation21_spill] sm:$0xff] %v15057_v42 }
 0x17b   :  { %v5450_v25 = vrot.slane %v5448_v12, 5  ;;  %v15052_v62 = vadd.f32 %v14906_v3, %v2037_v47  ;;  %v5455_v18 = vrot.slane %v5453_v45, 4  ;;  %v18545_v29 = vcombine.low %v14878_v13, %v14885_v19 }
 0x17c   :  { %v5436_v49 = vrot.slane %v5435_v34, 4  ;;  %v5445_v4 = vor.u32 %v5444_v0, %v5440_v39  ;;  %v5458_v54 = vrot.slane %v5456_v10, 5  ;;  %v5466_v3 = vshrl.u32 %v14973_v63, 16  ;;  %v15066_v34 = vld [vmem:[#allocation2 + $0xb0] sm:$0x1]  ;;  %v18546_v10 = vld [vmem:[#allocation23_spill] sm:$0xff]  ;;  %v15078_v63 = vpop.f32.mrf.mxu0 }
 0x17d   :  { %12326 = vmatmul.mubr.msk.bf16.gmra.mxu1 %vm1310_vm8, %v12769_v51  ;;  %v5472_v12 = vshll.u32 %v14991_v60, 16  ;;  %v15072_v51 = vsel %vm13242_vm15, %v5790_v2, %v5791_v15  ;;  %v5464_v19 = vrot.slane %v5462_v5, 5  ;;  %v2035_v0 = vadd.f32 %v18546_v10, %v14723_v41 }
 0x17e   :  { %12312 = vmatmul.mubr.msk.bf16.gmra.mxu0 %vm1310_vm8, %v18545_v29  ;;  %12329 = vmatprep.mubr.msk.bf16.mxu1 %vm1310_vm8, %v12770_v9  ;;  %v5441_v13 = vsel %vm13197_vm14, %v5436_v49, %v5440_v39  ;;  %v5446_v60 = vrot.slane %v5445_v4, 4  ;;  %v5459_v31 = vor.u32 %v5458_v54, %v5455_v18  ;;  %v5468_v47 = vrot.slane %v5466_v3, 4  ;;  %v5738_v9 = vld [vmem:[#allocation2 + $0xb4] sm:$0xe]  ;;  %v18547_v39 = vld [vmem:[#allocation24_spill] sm:$0xff]  ;;  %v15089_v41 = vpop.f32.mrf.mxu1  ;;  %v15091_v29 = vpop.f32.mrf.mxu0  ;;  %v12771_v18 = vld [vmem:[#allocation2 + $0xcc] sm:$0xff]  }
 0x17f   :  { %12335 = vmatprep.mubr.msk.bf16.mxu0 %vm1310_vm8, %v11337_v24  ;;  %v11357_v45 = vrot.slane %v5737_v17, 9  ;;  %v15081_v24 = vadd.f32 %v14923_v61, %v2035_v0  ;;  %v5795_v15 = vrot.slane %v15049_v46, 5  ;;  %v5798_v2 = vrot.slane %v15066_v34, 5  ;;  %v15087_v49 = vld [vmem:[#allocation2 + $0xb8] sm:$0xf]  ;;  %18548 = vst [vmem:[#allocation23_spill] sm:$0xff] %v15089_v41 }
 0x180   :  { %v2038_v5 = vadd.f32 %v18547_v39, %v14726_v26  ;;  %18549 = vst [vmem:[#allocation24_spill] sm:$0xff] %v15091_v29  ;;  %v5451_v17 = vsel %vm13197_vm14, %v5446_v60, %v5450_v25  ;;  %v5460_v4 = vrot.slane %v5459_v31, 4  ;;  %v5469_v61 = vor.u32 %v5468_v47, %v5464_v19  ;;  %v5368_v3 = vld [vmem:[#allocation2 + $0xa8] sm:$0xf]  ;;  %v15102_v39 = vld [vmem:[#allocation2 + $0xbc] sm:$0x1]  ;;  %v15104_v41 = vpop.f32.mrf.mxu1  ;;  %v15106_v29 = vpop.f32.mrf.mxu0 }
 0x181   :  { %v5474_v54 = vrot.slane %v5472_v12, 5  ;;  %v15097_v10 = vadd.f32 %v14888_v59, %v15028_v28  ;;  %v5797_v0 = vrot.slane %v5795_v15, 4  ;;  %v11358_v42 = vrot.slane %v5738_v9, 9  ;;  %18550 = vst [vmem:[#allocation40_spill] sm:$0xff] %v15104_v41 }
 0x182   :  { %v15100_v26 = vadd.f32 %v14943_v21, %v2038_v5  ;;  %v11339_v25 = vcombine.low %v5441_v13, %v5451_v17  ;;  %v5470_v60 = vrot.slane %v5469_v61, 4  ;;  %v15110_v12 = vsel %vm13242_vm15, %v11357_v45, %v5795_v15  ;;  %v15122_v13 = vld [vmem:[%s18407_s1 + $0x4] sm:$0x3]  ;;  %v15124_v9 = vpop.f32.mrf.mxu1  ;;  %v15126_v45 = vpop.f32.mrf.mxu0  ;;  %v18552_v17 = vld [vmem:[#allocation26_spill] sm:$0xff] }
 0x183   :  { %v5802_v59 = vrot.slane %v15087_v49, 5  ;;  %v15117_v21 = vsel %vm13242_vm15, %v5797_v0, %v5798_v2  ;;  %v5477_v31 = vshrl.u32 %v5368_v3, 16  ;;  %v5480_v47 = vshll.u32 %v5368_v3, 16  ;;  %18551 = vst [vmem:[#allocation41_spill] sm:$0xff] %v15124_v9  ;;  %v5371_v3 = vld [vmem:[#allocation2 + $0xb4] sm:$0xf] }
 0x184   :  { %v5465_v15 = vsel %vm13197_vm14, %v5460_v4, %v5464_v19  ;;  %v5475_v2 = vsel %vm13197_vm14, %v5470_v60, %v5474_v54  ;;  %v2036_v61 = vadd.f32 %v18552_v17, %v14729_v27  ;;  %v18553_v0 = vcombine.low %v14894_v56, %v14904_v55  ;;  %v15149_v54 = vpop.f32.mrf.mxu1  ;;  %v15151_v27 = vpop.f32.mrf.mxu0 }
 0x185   :  { %12330 = vmatmul.mubr.msk.bf16.gmra.mxu1 %vm1310_vm8, %v12771_v18  ;;  %v15147_v19 = vsel %vm13242_vm15, %v11358_v42, %v5802_v59  ;;  %v5479_v18 = vrot.slane %v5477_v31, 4  ;;  %v5482_v4 = vrot.slane %v5480_v47, 5  ;;  %18554 = vst [vmem:[#allocation26_spill] sm:$0xff] %v15149_v54  ;;  %v5804_v55 = vrot.slane %v5802_v59, 4  ;;  %v18555_v31 = vld [vmem:[#allocation27_spill] sm:$0xff] }
 0x186   :  { %12336 = vmatmul.mubr.msk.bf16.vlgmr.msra.gmra.mxu0 %vm1310_vm8, %v15030_v37  ;;  %12353 = vmatprep.mubr.msk.bf16.mxu1 %vm1310_vm8, %v18553_v0  ;;  %v5486_v56 = vshll.u32 %v15049_v46, 16  ;;  %v5490_v60 = vshrl.u32 %v15049_v46, 16  ;;  %v5496_v17 = vshll.u32 %v15066_v34, 16  ;;  %v11340_v42 = vcombine.low %v5465_v15, %v5475_v2  ;;  %v15161_v28 = vpop.f32.mrf.mxu1  ;;  %v15163_v5 = vpop.f32.mrf.mxu0  ;;  %v15165_v46 = vld [vmem:[#allocation2 + $0xc4] sm:$0xf] }
 0x187   :  { %12370 = vmatpush3.bf16.msra.mxu0 %v14986_v23  ;;  %12339 = vmatprep.mubr.msk.bf16.mxu0 %vm1310_vm8, %v11339_v25  ;;  %v5483_v0 = vor.u32 %v5482_v4, %v5479_v18  ;;  %v2041_v47 = vadd.f32 %v18555_v31, %v14737_v48  ;;  %v5501_v37 = vshrl.u32 %v5371_v3, 16  ;;  %18556 = vst [vmem:[#allocation27_spill] sm:$0xff] %v15161_v28  ;;  %v5504_v54 = vshll.u32 %v5371_v3, 16  ;;  %v5739_v18 = vld [vmem:[#allocation2 + $0xc0] sm:$0xe] }
 0x188   :  { %12713 = vmatprep.subr.msk.bf16.mxu0 %vm1335_vm0, %v15122_v13  ;;  %v5488_v25 = vrot.slane %v5486_v56, 5  ;;  %v5492_v59 = vrot.slane %v5490_v60, 4  ;;  %v5498_v23 = vrot.slane %v5496_v17, 5  ;;  %v5510_v2 = vshll.u32 %v15087_v49, 16  ;;  %v15171_v48 = vpop.f32.mrf.mxu0  ;;  %v15175_v60 = vld [vmem:[#allocation2 + $0xc8] sm:$0x1] }
 0x189   :  { %v5484_v34 = vrot.slane %v5483_v0, 4  ;;  %v15168_v9 = vadd.f32 %v14975_v33, %v2041_v47  ;;  %v5503_v15 = vrot.slane %v5501_v37, 4  ;;  %v5506_v31 = vrot.slane %v5504_v54, 5  ;;  %v18557_v17 = vld [vmem:[#allocation28_spill] sm:$0xff] }
 0x18a   :  { %v5493_v4 = vor.u32 %v5492_v59, %v5488_v25  ;;  %v5514_v28 = vshrl.u32 %v15087_v49, 16  ;;  %v5520_v56 = vshll.u32 %v15102_v39, 16  ;;  %v15178_v3 = vadd.f32 %v14962_v36, %v2036_v61  ;;  %v15187_v54 = vld [vmem:[%s18407_s1 + $0x6] sm:$0x3]  ;;  %v15189_v49 = vpop.f32.mrf.mxu1  ;;  %v15191_v47 = vpop.f32.mrf.mxu0 }
 0x18b   :  { %v5489_v33 = vsel %vm13197_vm14, %v5484_v34, %v5488_v25  ;;  %v5512_v37 = vrot.slane %v5510_v2, 5  ;;  %v2039_v0 = vadd.f32 %v18557_v17, %v14775_v35  ;;  %18558 = vst [vmem:[#allocation28_spill] sm:$0xff] %v15189_v49  ;;  %v18559_v36 = vcombine.low %v14918_v38, %v14934_v16  ;;  %v15214_v17 = vld [vmem:[#allocation2 + $0xd0] sm:$0xf]  ;;  %v965_v49 = vld [vmem:[#allocation2 + $0xfc] sm:$0xf] }
 0x18c   :  { %v5494_v61 = vrot.slane %v5493_v4, 4  ;;  %v5507_v25 = vor.u32 %v5506_v31, %v5503_v15  ;;  %v5516_v59 = vrot.slane %v5514_v28, 4  ;;  %v11359_v35 = vrot.slane %v5739_v18, 9  ;;  %v5740_v15 = vld [vmem:[#allocation2 + $0xcc] sm:$0xe]  ;;  %v15210_v28 = vpop.f32.mrf.mxu0 }
 0x18d   :  { %12354 = vmatmul.mubr.msk.bf16.vlgmr.msra.gmra.mxu1 %vm1310_vm8, %v18559_v36  ;;  %v18560_v34 = vcombine.low %v15019_v53, %v15023_v20  ;;  %v15204_v2 = vadd.f32 %v14993_v30, %v2039_v0  ;;  %v5809_v38 = vrot.slane %v15165_v46, 5  ;;  %v5812_v16 = vrot.slane %v15175_v60, 5  ;;  %v5374_v30 = vld [vmem:[#allocation2 + $0xc0] sm:$0xf] }
 0x18e   :  { %12340 = vmatmul.mubr.msk.bf16.gmra.mxu0 %vm1310_vm8, %v11340_v42  ;;  %12388 = vmatpush3.bf16.msra.mxu1 %v14989_v14  ;;  %v18561_v42 = vld [vmem:[#allocation29_spill] sm:$0xff]  ;;  %v5499_v18 = vsel %vm13197_vm14, %v5494_v61, %v5498_v23  ;;  %v5508_v31 = vrot.slane %v5507_v25, 4  ;;  %v5517_v53 = vor.u32 %v5516_v59, %v5512_v37  ;;  %v5522_v20 = vrot.slane %v5520_v56, 5  ;;  %v5379_v23 = vld [vmem:[#allocation2 + $0xd4] sm:$0x1]  ;;  %v15227_v61 = vpop.f32.mrf.mxu1  ;;  %v15229_v56 = vpop.f32.mrf.mxu0 }
 0x18f   :  { %12357 = vmatprep.mubr.msk.bf16.mxu1 %vm1310_vm8, %v18560_v34  ;;  %v2042_v4 = vadd.f32 %v18561_v42, %v14781_v52  ;;  %12714 = vmatprep.subr.msk.bf16.mxu1 %vm1335_vm0, %v15187_v54  ;;  %v18562_v0 = vrot.slane %v15102_v39, 5  ;;  %v11341_v36 = vcombine.low %v5489_v33, %v5499_v18  ;;  %v5811_v34 = vrot.slane %v5809_v38, 4  ;;  %18563 = vst [vmem:[#allocation29_spill] sm:$0xff] %v15227_v61 }
 0x190   :  { %v5513_v25 = vsel %vm13197_vm14, %v5508_v31, %v5512_v37  ;;  %v5518_v59 = vrot.slane %v5517_v53, 4  ;;  %v15235_v39 = vsel %vm13242_vm15, %v11359_v35, %v5809_v38  ;;  %v5816_v33 = vrot.slane %v15214_v17, 5  ;;  %v5377_v31 = vld [vmem:[#allocation2 + $0xcc] sm:$0xf] }
 0x191   :  { %v15222_v52 = vsel %vm13242_vm15, %v5804_v55, %v18562_v0  ;;  %v15225_v42 = vadd.f32 %v15015_v32, %v2042_v4  ;;  %v11360_v55 = vrot.slane %v5740_v15, 9  ;;  %12343 = vmatprep.mubr.msk.bf16.mxu0 %vm1310_vm8, %v11341_v36  ;;  %v15240_v32 = vsel %vm13242_vm15, %v5811_v34, %v5812_v16  ;;  %v15243_v0 = vpop.f32.mrf.mxu0  ;;  %v15255_v34 = vpop.f32.mrf.mxu1 }
 0x192   :  { %v5525_v4 = vshrl.u32 %v5374_v30, 16  ;;  %v5528_v18 = vshll.u32 %v5374_v30, 16  ;;  %v11366_v37 = vcombine.low %v15147_v19, %v15222_v52  ;;  %v5523_v35 = vsel %vm13197_vm14, %v5518_v59, %v5522_v20  ;;  %18564 = vst [vmem:[#allocation42_spill] sm:$0xff] %v15255_v34  ;;  %v958_v34 = vld [vmem:[#allocation2 + $0xf0] sm:$0xf] }
 0x193   :  { %v5819_v38 = vrot.slane %v5379_v23, 5  ;;  %v15251_v15 = vadd.f32 %v14631_v6, %v14784_v1  ;;  %v11342_v16 = vcombine.low %v5513_v25, %v5523_v35  ;;  %v11367_v53 = vcombine.low %v15235_v39, %v15240_v32  ;;  %v15257_v14 = vpop.f32.mrf.mxu0 }
 0x194   :  { %v5527_v36 = vrot.slane %v5525_v4, 4  ;;  %v5530_v30 = vrot.slane %v5528_v18, 5  ;;  %v18565_v19 = vcombine.low %v15034_v11, %v15072_v51  ;;  %v15265_v6 = vsel %vm13242_vm15, %v11360_v55, %v5816_v33 }
 0x195   :  { %v5534_v1 = vshll.u32 %v15165_v46, 16  ;;  %v5538_v20 = vshrl.u32 %v15165_v46, 16  ;;  %v5544_v52 = vshll.u32 %v15175_v60, 16  ;;  %v18566_v25 = vcombine.low %v15110_v12, %v15117_v21  ;;  %v15277_v46 = vld [vmem:[#allocation2 + $0xd8] sm:$0xf]  ;;  %v15279_v60 = vpop.f32.mrf.mxu0 }
 0x196   :  { %12358 = vmatmul.mubr.msk.bf16.gmra.mxu1 %vm1310_vm8, %v18565_v19  ;;  %12344 = vmatmul.mubr.msk.bf16.gmra.mxu0 %vm1310_vm8, %v11342_v16  ;;  %v5818_v11 = vrot.slane %v5816_v33, 4  ;;  %v5531_v51 = vor.u32 %v5530_v30, %v5527_v36  ;;  %v2045_v59 = vadd.f32 %v14645_v7, %v14811_v22  ;;  %v5549_v39 = vshrl.u32 %v5377_v31, 16  ;;  %v15285_v16 = vpop.f32.mrf.mxu1 }
 0x197   :  { %12361 = vmatprep.mubr.msk.bf16.mxu1 %vm1310_vm8, %v18566_v25  ;;  %v5536_v55 = vrot.slane %v5534_v1, 5  ;;  %v5540_v32 = vrot.slane %v5538_v20, 4  ;;  %v5546_v4 = vrot.slane %v5544_v52, 5  ;;  %v5552_v18 = vshll.u32 %v5377_v31, 16  ;;  %18567 = vst [vmem:[#allocation43_spill] sm:$0xff] %v15285_v16 }
 0x198   :  { %v5532_v35 = vrot.slane %v5531_v51, 4  ;;  %v15282_v12 = vadd.f32 %v15047_v57, %v2045_v59  ;;  %v5551_v21 = vrot.slane %v5549_v39, 4  ;;  %v5558_v33 = vshll.u32 %v15214_v17, 16  ;;  %v15294_v57 = vld [vmem:[#allocation2 + $0xdc] sm:$0xf] }
 0x199   :  { %v5541_v36 = vor.u32 %v5540_v32, %v5536_v55  ;;  %v5554_v7 = vrot.slane %v5552_v18, 5  ;;  %v5562_v22 = vshrl.u32 %v15214_v17, 16  ;;  %v5568_v30 = vshll.u32 %v5379_v23, 16  ;;  %v158_v17 = vld [vmem:[%s18406_s0 + $0x80] sm:$0xf]  ;;  %v15302_v23 = vpop.f32.mrf.mxu0 }
 0x19a   :  { %v15290_v31 = vsel %vm13242_vm15, %v5818_v11, %v5819_v38  ;;  %v5560_v19 = vrot.slane %v5558_v33, 5  ;;  %v2043_v1 = vadd.f32 %v14665_v50, %v14831_v44  ;;  %v6078_v20 = vshrl.u32 %v15277_v46, 16  ;;  %v159_v39 = vld [vmem:[%s18406_s0 + $0x84] sm:$0xf] }
 0x19b   :  { %v5537_v52 = vsel %vm13197_vm14, %v5532_v35, %v5536_v55  ;;  %v5542_v25 = vrot.slane %v5541_v36, 4  ;;  %v5555_v51 = vor.u32 %v5554_v7, %v5551_v21  ;;  %v5564_v59 = vrot.slane %v5562_v22, 4  ;;  %v15311_v55 = vpop.f32.mrf.mxu1  ;;  %v18569_v36 = vld [vmem:[#allocation10_spill] sm:$0xff] }
 0x19c   :  { %v5570_v38 = vrot.slane %v5568_v30, 5  ;;  %v15305_v11 = vadd.f32 %v15055_v8, %v2043_v1  ;;  %v6080_v50 = vrot.slane %v6078_v20, 4  ;;  %v6081_v44 = vshll.u32 %v15277_v46, 16  ;;  %18568 = vst [vmem:[#allocation44_spill] sm:$0xff] %v15311_v55  ;;  %v15322_v55 = vpop.f32.mrf.mxu0 }
 0x19d   :  { %v5547_v32 = vsel %vm13197_vm14, %v5542_v25, %v5546_v4  ;;  %v5556_v18 = vrot.slane %v5555_v51, 4  ;;  %v5565_v35 = vor.u32 %v5564_v59, %v5560_v19  ;;  %v6091_v21 = vshrl.u32 %v15294_v57, 16  ;;  %v951_v59 = vld [vmem:[#allocation2 + $0xe4] sm:$0xf] }
 0x19e   :  { %12362 = vmatmul.mubr.msk.bf16.gmra.mxu1 %vm1310_vm8, %v11366_v37  ;;  %v11343_v8 = vcombine.low %v5537_v52, %v5547_v32  ;;  %v6083_v33 = vrot.slane %v6081_v44, 5  ;;  %v2046_v7 = vadd.f32 %v18569_v36, %v14857_v43  ;;  %v466_v22 = vshrl.u32 %v158_v17, 16  ;;  %v15330_v43 = vpop.f32.mrf.mxu1 }
 0x19f   :  { %12365 = vmatprep.mubr.msk.bf16.mxu1 %vm1310_vm8, %v11367_v53  ;;  %v5561_v30 = vsel %vm13197_vm14, %v5556_v18, %v5560_v19  ;;  %v5566_v1 = vrot.slane %v5565_v35, 4  ;;  %v469_v37 = vshll.u32 %v158_v17, 16  ;;  %v474_v20 = vshrl.u32 %v159_v39, 16  ;;  %18570 = vst [vmem:[#allocation10_spill] sm:$0xff] %v15330_v43  ;;  %v15334_v17 = vld [vmem:[#allocation2 + $0xe0] sm:$0x1] }
 0x1a0   :  { %v11368_v4 = vcombine.low %v15265_v6, %v15290_v31  ;;  %12347 = vmatprep.mubr.msk.bf16.mxu0 %vm1310_vm8, %v11343_v8  ;;  %v15328_v53 = vadd.f32 %v15078_v63, %v2046_v7  ;;  %v468_v52 = vrot.slane %v466_v22, 7  ;;  %v477_v25 = vshll.u32 %v159_v39, 16  ;;  %v15337_v6 = vpop.f32.mrf.mxu0 }
 0x1a1   :  { %v5571_v19 = vsel %vm13197_vm14, %v5566_v1, %v5570_v38  ;;  %v476_v51 = vrot.slane %v474_v20, 7  ;;  %v6084_v44 = vor.u32 %v6083_v33, %v6080_v50  ;;  %v6087_v32 = vshll.u32 %v15294_v57, 16  ;;  %v955_v38 = vld [vmem:[#allocation2 + $0xec] sm:$0x1]  ;;  %v18573_v20 = vld [vmem:[#allocation16_spill] sm:$0xff] }
 0x1a2   :  { %v11344_v31 = vcombine.low %v5561_v30, %v5571_v19  ;;  %v11394_v63 = vcombine.low %v15277_v46, %v15294_v57  ;;  %v471_v18 = vor.u32 %v469_v37, %v468_v52  ;;  %v472_v39 = vrot.slane %v468_v52, 4  ;;  %v15341_v22 = vpop.f32.mrf.mxu0  ;;  %v18572_v30 = vld [vmem:[#allocation34_spill] sm:$0xff]  ;;  %v160_v37 = vld [vmem:[%s18406_s0 + $0x88] sm:$0xf]  ;;  %v15352_v52 = vpop.f32.mrf.mxu1 }
 0x1a3   :  { %v479_v35 = vor.u32 %v477_v25, %v476_v51  ;;  %v6085_v8 = vrot.slane %v6084_v44, 4  ;;  %v6089_v36 = vrot.slane %v6087_v32, 5  ;;  %v6093_v7 = vrot.slane %v6091_v21, 4  ;;  %18574 = vst [vmem:[#allocation34_spill] sm:$0xff] %v15352_v52  ;;  %v18575_v21 = vld [vmem:[#allocation20_spill] sm:$0xff] }
 0x1a4   :  { %12348 = vmatmul.mubr.msk.bf16.gmra.mxu0 %vm1310_vm8, %v11344_v31  ;;  %v952_v33 = vsel %vm13157_vm10, %v471_v18, %v951_v59  ;;  %v6097_v1 = vshll.u32 %v15334_v17, 16  ;;  %v2669_v19 = vadd.f32 %v18573_v20, %v18572_v30  ;;  %v481_v46 = vrot.slane %v476_v51, 4  ;;  %v161_v31 = vld [vmem:[%s18406_s0 + $0x8c] sm:$0xf]  ;;  %v15366_v18 = vpop.f32.mrf.mxu0 }
 0x1a5   :  { %v15357_v25 = vadd.f32 %v18575_v21, %v15251_v15  ;;  %v480_v59 = vsel %vm13134_vm9, %v472_v39, %v479_v35  ;;  %953 = vst [vmem:[#allocation2 + $0xe4] sm:$0xf] %v952_v33  ;;  %v6090_v32 = vsel %vm13197_vm14, %v6085_v8, %v6089_v36  ;;  %v6094_v51 = vor.u32 %v6093_v7, %v6089_v36  ;;  %v18578_v33 = vld [vmem:[#allocation18_spill] sm:$0xff]  ;;  %v18579_v8 = vld [vmem:[#allocation9_spill] sm:$0xff] }
 0x1a6   :  { %12366 = vmatmul.mubr.msk.bf16.gmra.mxu1 %vm1310_vm8, %v11368_v4  ;;  %954 = vst.msk [vmem:[#allocation2 + $0xe8] sm:$0xf] %vm16_vm1, %v480_v59  ;;  %v6099_v15 = vrot.slane %v6097_v1, 5  ;;  %v15371_v4 = vadd.f32 %v15106_v29, %v2669_v19  ;;  %v956_v35 = vsel %vm13173_vm11, %v481_v46, %v955_v38  ;;  %v2667_v36 = vadd.f32 %v18579_v8, %v18578_v33  ;;  %v162_v7 = vld [vmem:[%s18406_s0 + $0x90] sm:$0xf]  ;;  %v15396_v52 = vpop.f32.mrf.mxu0 }
 0x1a7   :  { %12389 = vmatprep.mubr.msk.bf16.mxu1 %vm1310_vm8, %v11394_v63  ;;  %v6095_v30 = vrot.slane %v6094_v51, 4  ;;  %957 = vst [vmem:[#allocation2 + $0xec] sm:$0x1] %v956_v35  ;;  %v15382_v63 = vsel %vm1335_vm0, %v15187_v54, 0  ;;  %v483_v1 = vshrl.u32 %v160_v37, 16  ;;  %v486_v20 = vshll.u32 %v160_v37, 16  ;;  %v15392_v51 = vpop.f32.mrf.mxu1 }
 0x1a8   :  { %18580 = vst [vmem:[#allocation16_spill] sm:$0xff] %v15382_v63  ;;  %v163_v29 = vld [vmem:[%s18406_s0 + $0x94] sm:$0xf]  ;;  %v15388_v38 = vadd.f32 %v15126_v45, %v2667_v36  ;;  %v491_v19 = vshrl.u32 %v161_v31, 16  ;;  %v494_v46 = vshll.u32 %v161_v31, 16  ;;  %v18582_v59 = vld [vmem:[#allocation13_spill] sm:$0xff] }
 0x1a9   :  { %v18581_v21 = vld [vmem:[#allocation38_spill] sm:$0xff]  ;;  %18583 = vst [vmem:[#allocation20_spill] sm:$0xff] %v15392_v51  ;;  %v6100_v54 = vsel %vm13197_vm14, %v6095_v30, %v6099_v15  ;;  %v485_v35 = vrot.slane %v483_v1, 7  ;;  %v500_v8 = vshrl.u32 %v162_v7, 16  ;;  %v503_v37 = vshll.u32 %v162_v7, 16  ;;  %v15401_v36 = vpop.f32.mrf.mxu1  ;;  %v18586_v30 = vld [vmem:[#allocation32_spill] sm:$0xff] }
 0x1aa   :  { %v2670_v33 = vadd.f32 %v18582_v59, %v18581_v21  ;;  %v11378_v43 = vcombine.low %v6090_v32, %v6100_v54  ;;  %v493_v16 = vrot.slane %v491_v19, 7  ;;  %v508_v31 = vshrl.u32 %v163_v29, 16  ;;  %18585 = vst [vmem:[#allocation9_spill] sm:$0xff] %v15401_v36  ;;  %v18587_v1 = vld [vmem:[#allocation14_spill] sm:$0xff] }
 0x1ab   :  { %v488_v21 = vor.u32 %v486_v20, %v485_v35  ;;  %v489_v59 = vrot.slane %v485_v35, 4  ;;  %v502_v51 = vrot.slane %v500_v8, 7  ;;  %v511_v61 = vshll.u32 %v163_v29, 16  ;;  %v15412_v29 = vpop.f32.mrf.mxu1  ;;  %v15414_v8 = vpop.f32.mrf.mxu0 }
 0x1ac   :  { %v15399_v45 = vadd.f32 %v15151_v27, %v2670_v33  ;;  %v6054_v15 = vld [vmem:[#allocation2 + $0xe4] sm:$0xf]  ;;  %v15405_v7 = vadd.f32 %v18587_v1, %v18586_v30  ;;  %12371 = vmatprep.mubr.msk.bf16.mxu0 %vm1310_vm8, %v11378_v43  ;;  %v496_v32 = vor.u32 %v494_v46, %v493_v16  ;;  %v510_v19 = vrot.slane %v508_v31, 7  ;;  %18588 = vst [vmem:[#allocation38_spill] sm:$0xff] %v15412_v29  ;;  %v962_v31 = vld [vmem:[#allocation2 + $0xf8] sm:$0x1] }
 0x1ad   :  { %v498_v54 = vrot.slane %v493_v16, 4  ;;  %v15408_v27 = vld [vmem:[#allocation2 + $0xe8] sm:$0xf]  ;;  %v6102_v33 = vshrl.u32 %v6054_v15, 16  ;;  %v959_v20 = vsel %vm13157_vm10, %v488_v21, %v958_v34  ;;  %v505_v35 = vor.u32 %v503_v37, %v502_v51  ;;  %18589 = vst [vmem:[#allocation13_spill] sm:$0xff] %v15414_v8 }
 0x1ae   :  { %18584 = vst [vmem:[#allocation18_spill] sm:$0xff] %v15399_v45  ;;  %v6105_v45 = vshll.u32 %v6054_v15, 16  ;;  %v6115_v30 = vshrl.u32 %v15408_v27, 16  ;;  %v11395_v1 = vcombine.low %v6054_v15, %v15408_v27  ;;  %v15418_v43 = vld [vmem:[#allocation2 + $0xec] sm:$0x1]  ;;  %v6111_v16 = vshll.u32 %v15408_v27, 16 }
 0x1af   :  { %v497_v46 = vsel %vm13134_vm9, %v489_v59, %v496_v32  ;;  %960 = vst [vmem:[#allocation2 + $0xf0] sm:$0xf] %v959_v20  ;;  %v6104_v36 = vrot.slane %v6102_v33, 4  ;;  %v6121_v37 = vshll.u32 %v15418_v43, 16  ;;  %v506_v21 = vrot.slane %v502_v51, 4 }
 0x1b0   :  { %v6107_v34 = vrot.slane %v6105_v45, 5  ;;  %961 = vst.msk [vmem:[#allocation2 + $0xf4] sm:$0xf] %vm16_vm1, %v497_v46  ;;  %v15428_v15 = vld [vmem:[%s18407_s1 + $0xa] sm:$0x3]  ;;  %12390 = vmatmul.mubr.msk.bf16.vlgmr.msra.gmra.mxu1 %vm1310_vm8, %v11395_v1  ;;  %v6113_v29 = vrot.slane %v6111_v16, 5  ;;  %v513_v41 = vor.u32 %v511_v61, %v510_v19  ;;  %v966_v59 = vsel %vm13157_vm10, %v505_v35, %v965_v49  ;;  %v15446_v35 = vpop.f32.mrf.mxu1 }
 0x1b1   :  { %v6117_v8 = vrot.slane %v6115_v30, 4  ;;  %v164_v45 = vld [vmem:[%s18406_s0 + $0x98] sm:$0xf]  ;;  %v6123_v33 = vrot.slane %v6121_v37, 5  ;;  %v15438_v51 = vsel %vm1335_vm0, %v15122_v13, 0  ;;  %12424 = vmatpush3.bf16.msra.mxu1 %v15382_v63  ;;  %v963_v20 = vsel %vm13173_vm11, %v498_v54, %v962_v31  ;;  %18591 = vst [vmem:[#allocation14_spill] sm:$0xff] %v15446_v35  ;;  %v15448_v30 = vpop.f32.mrf.mxu0 }
 0x1b2   :  { %v6108_v32 = vor.u32 %v6107_v34, %v6104_v36  ;;  %18590 = vst [vmem:[#allocation32_spill] sm:$0xff] %v15438_v51  ;;  %967 = vst [vmem:[#allocation2 + $0xfc] sm:$0xf] %v966_v59  ;;  %v969_v61 = vld [vmem:[#allocation2 + $0x104] sm:$0x1]  ;;  %v514_v13 = vsel %vm13134_vm9, %v506_v21, %v513_v41  ;;  %v18592_v1 = vld [vmem:[#allocation30_spill] sm:$0xff]  ;;  %12716 = vmatprep.subr.msk.bf16.mxu1 %vm1335_vm0, %v15428_v15 }
 0x1b3   :  { %v165_v49 = vld [vmem:[%s18406_s0 + $0x9c] sm:$0xf]  ;;  %v6118_v36 = vor.u32 %v6117_v8, %v6113_v29  ;;  %964 = vst [vmem:[#allocation2 + $0xf8] sm:$0x1] %v963_v20  ;;  %v2673_v16 = vadd.f32 %v18592_v1, %v15052_v62  ;;  %v515_v46 = vrot.slane %v510_v19, 4  ;;  %v18593_v31 = vld [vmem:[#allocation25_spill] sm:$0xff] }
 0x1b4   :  { %v6109_v54 = vrot.slane %v6108_v32, 4  ;;  %968 = vst.msk [vmem:[#allocation2 + $0x100] sm:$0xf] %vm16_vm1, %v514_v13  ;;  %v2671_v34 = vadd.f32 %v18593_v31, %v15081_v24  ;;  %v517_v37 = vshrl.u32 %v164_v45, 16  ;;  %v520_v59 = vshll.u32 %v164_v45, 16  ;;  %v15469_v45 = vpop.f32.mrf.mxu1 }
 0x1b5   :  { %v6119_v8 = vrot.slane %v6118_v36, 4  ;;  %v15460_v63 = vadd.f32 %v15171_v48, %v2673_v16  ;;  %v970_v41 = vsel %vm13173_vm11, %v515_v46, %v969_v61  ;;  %v525_v62 = vshrl.u32 %v165_v49, 16  ;;  %v972_v13 = vld [vmem:[#allocation2 + $0x108] sm:$0xf]  ;;  %18596 = vst [vmem:[#allocation45_spill] sm:$0xff] %v15469_v45  ;;  %v15471_v36 = vpop.f32.mrf.mxu0 }
 0x1b6   :  { %v6114_v19 = vsel %vm13197_vm14, %v6109_v54, %v6113_v29  ;;  %v6056_v21 = vld [vmem:[#allocation2 + $0xf0] sm:$0xf]  ;;  %971 = vst [vmem:[#allocation2 + $0x104] sm:$0x1] %v970_v41  ;;  %v15467_v32 = vadd.f32 %v15191_v47, %v2671_v34  ;;  %v519_v20 = vrot.slane %v517_v37, 7  ;;  %v528_v24 = vshll.u32 %v165_v49, 16  ;;  %v15491_v35 = vpop.f32.mrf.mxu1 }
 0x1b7   :  { %18594 = vst [vmem:[#allocation30_spill] sm:$0xff] %v15460_v63  ;;  %v6124_v48 = vsel %vm13197_vm14, %v6119_v8, %v6123_v33  ;;  %v15475_v61 = vld [vmem:[#allocation2 + $0xf4] sm:$0xf]  ;;  %v6126_v1 = vshrl.u32 %v6056_v21, 16  ;;  %v6129_v16 = vshll.u32 %v6056_v21, 16  ;;  %v15477_v29 = vrot.slane %v525_v62, 7 }
 0x1b8   :  { %18595 = vst [vmem:[#allocation25_spill] sm:$0xff] %v15467_v32  ;;  %v11379_v46 = vcombine.low %v6114_v19, %v6124_v48  ;;  %v6139_v47 = vshrl.u32 %v15475_v61, 16  ;;  %v11396_v54 = vcombine.low %v6056_v21, %v15475_v61  ;;  %v6135_v49 = vshll.u32 %v15475_v61, 16  ;;  %v15485_v31 = vld [vmem:[%s18407_s1 + $0x8] sm:$0x3]  ;;  %18598 = vst [vmem:[#allocation47_spill] sm:$0xff] %v15491_v35  ;;  %v15493_v32 = vpop.f32.mrf.mxu0 }
 0x1b9   :  { %v6128_v34 = vrot.slane %v6126_v1, 4  ;;  %v6131_v33 = vrot.slane %v6129_v16, 5  ;;  %v6058_v37 = vld [vmem:[#allocation2 + $0xfc] sm:$0xf]  ;;  %v522_v8 = vor.u32 %v520_v59, %v519_v20  ;;  %v523_v41 = vrot.slane %v519_v20, 4  ;;  %18599 = vst [vmem:[#allocation48_spill] sm:$0xff] %v15493_v32 }
 0x1ba   :  { %12372 = vmatmul.mubr.msk.bf16.vlgmr.msra.gmra.mxu0 %vm1310_vm8, %v11379_v46  ;;  %12393 = vmatprep.mubr.msk.bf16.mxu1 %vm1310_vm8, %v11396_v54  ;;  %v6150_v62 = vshrl.u32 %v6058_v37, 16  ;;  %v6153_v19 = vshll.u32 %v6058_v37, 16  ;;  %v15489_v48 = vld [vmem:[#allocation2 + $0xf8] sm:$0x1]  ;;  %v6137_v21 = vrot.slane %v6135_v49, 5  ;;  %v6141_v45 = vrot.slane %v6139_v47, 4 }
 0x1bb   :  { %18597 = vst [vmem:[#allocation46_spill] sm:$0xff] %v15489_v48  ;;  %12406 = vmatpush3.bf16.msra.mxu0 %v15438_v51  ;;  %v15496_v1 = vld [vmem:[#allocation2 + $0x100] sm:$0xf]  ;;  %v6132_v59 = vor.u32 %v6131_v33, %v6128_v34  ;;  %v6145_v20 = vshll.u32 %v15489_v48, 16  ;;  %v530_v16 = vor.u32 %v528_v24, %v15477_v29  ;;  %v973_v46 = vsel %vm13157_vm10, %v522_v8, %v972_v13  ;;  %v15994_v44 = vld [vmem:[#allocation2 + $0xf8] sm:$0x1] }
 0x1bc   :  { %18600 = vst [vmem:[#allocation49_spill] sm:$0xff] %v15496_v1  ;;  %v166_v47 = vld [vmem:[%s18406_s0 + $0xa0] sm:$0xf]  ;;  %v6152_v54 = vrot.slane %v6150_v62, 4  ;;  %v6155_v49 = vrot.slane %v6153_v19, 5  ;;  %v6163_v35 = vshrl.u32 %v15496_v1, 16  ;;  %v11397_v51 = vcombine.low %v6058_v37, %v15496_v1  ;;  %12715 = vmatprep.subr.msk.bf16.mxu0 %vm1335_vm0, %v15485_v31 }
 0x1bd   :  { %974 = vst [vmem:[#allocation2 + $0x108] sm:$0xf] %v973_v46  ;;  %v6133_v34 = vrot.slane %v6132_v59, 4  ;;  %v6142_v33 = vor.u32 %v6141_v45, %v6137_v21  ;;  %v6147_v24 = vrot.slane %v6145_v20, 5  ;;  %v15509_v32 = vld [vmem:[#allocation2 + $0x104] sm:$0x1]  ;;  %v531_v37 = vsel %vm13134_vm9, %v523_v41, %v530_v16  ;;  %v15519_v59 = vpop.f32.mrf.mxu1  ;;  %v15521_v45 = vpop.f32.mrf.mxu0 }
 0x1be   :  { %18601 = vst [vmem:[#allocation50_spill] sm:$0xff] %v15509_v32  ;;  %v6159_v13 = vshll.u32 %v15496_v1, 16  ;;  %12394 = vmatmul.mubr.msk.bf16.gmra.mxu1 %vm1310_vm8, %v11397_v51  ;;  %v6156_v8 = vor.u32 %v6155_v49, %v6152_v54  ;;  %v6165_v62 = vrot.slane %v6163_v35, 4  ;;  %v6169_v19 = vshll.u32 %v15509_v32, 16  ;;  %v167_v46 = vld [vmem:[%s18406_s0 + $0xa4] sm:$0xf] }
 0x1bf   :  { %18602 = vst [vmem:[#allocation51_spill] sm:$0xff] %v15519_v59  ;;  %18603 = vst [vmem:[#allocation52_spill] sm:$0xff] %v15521_v45  ;;  %v6138_v20 = vsel %vm13197_vm14, %v6133_v34, %v6137_v21  ;;  %v6143_v1 = vrot.slane %v6142_v33, 4  ;;  %v18604_v35 = vld [vmem:[#allocation22_spill] sm:$0xff]  ;;  %v534_v16 = vshrl.u32 %v166_v47, 16  ;;  %v537_v32 = vshll.u32 %v166_v47, 16  ;;  %v15539_v47 = vpop.f32.mrf.mxu0 }
 0x1c0   :  { %v6161_v51 = vrot.slane %v6159_v13, 5  ;;  %975 = vst.msk [vmem:[#allocation2 + $0x10c] sm:$0xf] %vm16_vm1, %v531_v37  ;;  %v2674_v54 = vadd.f32 %v18604_v35, %v15100_v26  ;;  %v6157_v49 = vrot.slane %v6156_v8, 4  ;;  %v6171_v41 = vrot.slane %v6169_v19, 5  ;;  %v18605_v21 = vld [vmem:[#allocation24_spill] sm:$0xff]  ;;  %v15537_v19 = vpop.f32.mrf.mxu1 }
 0x1c1   :  { %v6148_v63 = vsel %vm13197_vm14, %v6143_v1, %v6147_v24  ;;  %v542_v48 = vshrl.u32 %v167_v46, 16  ;;  %v15535_v34 = vadd.f32 %v18605_v21, %v15405_v7  ;;  %v536_v13 = vrot.slane %v534_v16, 7  ;;  %v979_v26 = vld [vmem:[#allocation2 + $0x114] sm:$0xf]  ;;  %v976_v8 = vld [vmem:[#allocation2 + $0x110] sm:$0x1] }
 0x1c2   :  { %v6166_v59 = vor.u32 %v6165_v62, %v6161_v51  ;;  %v15531_v45 = vadd.f32 %v15210_v28, %v2674_v54  ;;  %v11380_v33 = vcombine.low %v6138_v20, %v6148_v63  ;;  %v545_v37 = vshll.u32 %v167_v46, 16  ;;  %18606 = vst [vmem:[#allocation22_spill] sm:$0xff] %v15537_v19  ;;  %v18607_v54 = vld [vmem:[#allocation15_spill] sm:$0xff] }
 0x1c3   :  { %v6162_v1 = vsel %vm13197_vm14, %v6157_v49, %v6161_v51  ;;  %v544_v62 = vrot.slane %v542_v48, 7  ;;  %v532_v35 = vrot.slane %v15477_v29, 4  ;;  %v539_v20 = vor.u32 %v537_v32, %v536_v13  ;;  %v168_v29 = vld [vmem:[%s18406_s0 + $0xa8] sm:$0xf] }
 0x1c4   :  { %v6167_v24 = vrot.slane %v6166_v59, 4  ;;  %v6060_v28 = vld [vmem:[#allocation2 + $0x108] sm:$0xf]  ;;  %12375 = vmatprep.mubr.msk.bf16.mxu0 %vm1310_vm8, %v11380_v33  ;;  %v540_v46 = vrot.slane %v536_v13, 4  ;;  %v15547_v16 = vadd.f32 %v18607_v54, %v15097_v10  ;;  %v15560_v33 = vpop.f32.mrf.mxu1 }
 0x1c5   :  { %v6174_v7 = vshrl.u32 %v6060_v28, 16  ;;  %v6177_v63 = vshll.u32 %v6060_v28, 16  ;;  %v547_v19 = vor.u32 %v545_v37, %v544_v62  ;;  %v977_v59 = vsel %vm13173_vm11, %v532_v35, %v976_v8  ;;  %18608 = vst [vmem:[#allocation24_spill] sm:$0xff] %v15560_v33  ;;  %v18609_v35 = vld [vmem:[#allocation31_spill] sm:$0xff] }
 0x1c6   :  { %v6172_v21 = vsel %vm13197_vm14, %v6167_v24, %v6171_v41  ;;  %v980_v10 = vsel %vm13157_vm10, %v539_v20, %v979_v26  ;;  %978 = vst [vmem:[#allocation2 + $0x110] sm:$0x1] %v977_v59  ;;  %v15562_v41 = vpop.f32.mrf.mxu0  ;;  %v983_v24 = vld [vmem:[#allocation2 + $0x11c] sm:$0x1]  ;;  %v18610_v20 = vld [vmem:[#allocation33_spill] sm:$0xff]  ;;  %v554_v59 = vshll.u32 %v168_v29, 16 }
 0x1c7   :  { %v11381_v48 = vcombine.low %v6162_v1, %v6172_v21  ;;  %v15556_v51 = vld [vmem:[#allocation2 + $0x10c] sm:$0xf]  ;;  %v6176_v32 = vrot.slane %v6174_v7, 4  ;;  %v6179_v49 = vrot.slane %v6177_v63, 5  ;;  %v548_v8 = vsel %vm13134_vm9, %v540_v46, %v547_v19  ;;  %981 = vst [vmem:[#allocation2 + $0x114] sm:$0xf] %v980_v10 }
 0x1c8   :  { %v6187_v13 = vshrl.u32 %v15556_v51, 16  ;;  %v11398_v37 = vcombine.low %v6060_v28, %v15556_v51  ;;  %v6183_v1 = vshll.u32 %v15556_v51, 16  ;;  %982 = vst.msk [vmem:[#allocation2 + $0x118] sm:$0xf] %vm16_vm1, %v548_v8  ;;  %v2677_v7 = vadd.f32 %v18609_v35, %v15168_v9  ;;  %v169_v19 = vld [vmem:[%s18406_s0 + $0xac] sm:$0xf]  ;;  %v15597_v10 = vpop.f32.mrf.mxu0 }
 0x1c9   :  { %12376 = vmatmul.mubr.msk.bf16.gmra.mxu0 %vm1310_vm8, %v11381_v48  ;;  %v6180_v26 = vor.u32 %v6179_v49, %v6176_v32  ;;  %v549_v63 = vrot.slane %v544_v62, 4  ;;  %v2675_v54 = vadd.f32 %v18610_v20, %v15204_v2  ;;  %v551_v21 = vshrl.u32 %v168_v29, 16  ;;  %v170_v48 = vld [vmem:[%s18406_s0 + $0xb0] sm:$0xf]  ;;  %v15593_v49 = vld [vmem:[%s18406_s0 + $0xb4] sm:$0xf]  ;;  %v15595_v29 = vpop.f32.mrf.mxu1 }
 0x1ca   :  { %12397 = vmatprep.mubr.msk.bf16.mxu1 %vm1310_vm8, %v11398_v37  ;;  %v6185_v28 = vrot.slane %v6183_v1, 5  ;;  %v6189_v46 = vrot.slane %v6187_v13, 4  ;;  %v15583_v9 = vadd.f32 %v15243_v0, %v2677_v7  ;;  %18612 = vst [vmem:[#allocation31_spill] sm:$0xff] %v15595_v29  ;;  %18613 = vst [vmem:[#allocation33_spill] sm:$0xff] %v15597_v10  ;;  %v559_v0 = vshrl.u32 %v169_v19, 16 }
 0x1cb   :  { %v6181_v32 = vrot.slane %v6180_v26, 4  ;;  %v984_v2 = vsel %vm13173_vm11, %v549_v63, %v983_v24  ;;  %v15588_v62 = vadd.f32 %v15257_v14, %v2675_v54  ;;  %v553_v37 = vrot.slane %v551_v21, 7  ;;  %v986_v1 = vld [vmem:[#allocation2 + $0x120] sm:$0xf]  ;;  %v18614_v14 = vld [vmem:[#allocation17_spill] sm:$0xff] }
 0x1cc   :  { %v6190_v13 = vor.u32 %v6189_v46, %v6185_v28  ;;  %985 = vst [vmem:[#allocation2 + $0x11c] sm:$0x1] %v984_v2  ;;  %v562_v8 = vshll.u32 %v169_v19, 16  ;;  %v2678_v26 = vadd.f32 %v18614_v14, %v15225_v42  ;;  %v568_v35 = vshrl.u32 %v170_v48, 16  ;;  %v15612_v42 = vpop.f32.mrf.mxu0  ;;  %v993_v10 = vld [vmem:[#allocation2 + $0x12c] sm:$0xf] }
 0x1cd   :  { %18611 = vst [vmem:[#allocation15_spill] sm:$0xff] %v15588_v62  ;;  %v6186_v24 = vsel %vm13197_vm14, %v6181_v32, %v6185_v28  ;;  %v571_v7 = vshll.u32 %v170_v48, 16  ;;  %v15603_v63 = vld [vmem:[#allocation2 + $0x110] sm:$0x1]  ;;  %v556_v54 = vor.u32 %v554_v59, %v553_v37  ;;  %v557_v29 = vrot.slane %v553_v37, 4  ;;  %v15610_v32 = vpop.f32.mrf.mxu1  ;;  %18617 = vst [vmem:[#allocation54_spill] sm:$0xff] %v15612_v42 }
 0x1ce   :  { %v6191_v20 = vrot.slane %v6190_v13, 4  ;;  %v561_v33 = vrot.slane %v559_v0, 7  ;;  %v6062_v46 = vld [vmem:[#allocation2 + $0x114] sm:$0xf]  ;;  %v6193_v21 = vshll.u32 %v15603_v63, 16  ;;  %v15607_v19 = vadd.f32 %v15279_v60, %v2678_v26  ;;  %18616 = vst [vmem:[#allocation53_spill] sm:$0xff] %v15610_v32 }
 0x1cf   :  { %v570_v2 = vrot.slane %v568_v35, 7  ;;  %v576_v28 = vshrl.u32 %v15593_v49, 16  ;;  %v15614_v48 = vld [vmem:[#allocation2 + $0x118] sm:$0xf]  ;;  %v6198_v14 = vshrl.u32 %v6062_v46, 16  ;;  %v6201_v13 = vshll.u32 %v6062_v46, 16 }
 0x1d0   :  { %18615 = vst [vmem:[#allocation17_spill] sm:$0xff] %v15607_v19  ;;  %v564_v59 = vor.u32 %v562_v8, %v561_v33  ;;  %v987_v37 = vsel %vm13157_vm10, %v556_v54, %v986_v1  ;;  %v6211_v0 = vshrl.u32 %v15614_v48, 16  ;;  %v11399_v60 = vcombine.low %v6062_v46, %v15614_v48 }
 0x1d1   :  { %v6195_v26 = vrot.slane %v6193_v21, 5  ;;  %v6207_v35 = vshll.u32 %v15614_v48, 16  ;;  %988 = vst [vmem:[#allocation2 + $0x120] sm:$0xf] %v987_v37  ;;  %v6200_v19 = vrot.slane %v6198_v14, 4  ;;  %v6203_v32 = vrot.slane %v6201_v13, 5  ;;  %v15633_v14 = vpop.f32.mrf.mxu1 }
 0x1d2   :  { %v565_v42 = vsel %vm13134_vm9, %v557_v29, %v564_v59  ;;  %v573_v62 = vor.u32 %v571_v7, %v570_v2  ;;  %v15625_v8 = vadd.f32 %v15163_v5, %v15547_v16  ;;  %12398 = vmatmul.mubr.msk.bf16.gmra.mxu1 %vm1310_vm8, %v11399_v60  ;;  %v6213_v21 = vrot.slane %v6211_v0, 4  ;;  %18618 = vst [vmem:[#allocation55_spill] sm:$0xff] %v15633_v14  ;;  %v15635_v29 = vpop.f32.mrf.mxu0 }
 0x1d3   :  { %v6196_v1 = vsel %vm13197_vm14, %v6191_v20, %v6195_v26  ;;  %v15630_v54 = vld [vmem:[#allocation2 + $0x11c] sm:$0x1]  ;;  %v6209_v46 = vrot.slane %v6207_v35, 5  ;;  %989 = vst.msk [vmem:[#allocation2 + $0x124] sm:$0xf] %vm16_vm1, %v565_v42  ;;  %v6204_v13 = vor.u32 %v6203_v32, %v6200_v19  ;;  %v578_v16 = vrot.slane %v576_v28, 7  ;;  %v15646_v14 = vpop.f32.mrf.mxu1 }
 0x1d4   :  { %v11382_v7 = vcombine.low %v6186_v24, %v6196_v1  ;;  %v6217_v5 = vshll.u32 %v15630_v54, 16  ;;  %v574_v37 = vrot.slane %v570_v2, 4  ;;  %v579_v60 = vshll.u32 %v15593_v49, 16  ;;  %v990_v26 = vld [vmem:[#allocation2 + $0x128] sm:$0x1]  ;;  %v18619_v24 = vld [vmem:[#allocation35_spill] sm:$0xff] }
 0x1d5   :  { %v6214_v59 = vor.u32 %v6213_v21, %v6209_v46  ;;  %v994_v20 = vsel %vm13157_vm10, %v573_v62, %v993_v10  ;;  %v6205_v42 = vrot.slane %v6204_v13, 4  ;;  %v566_v35 = vrot.slane %v561_v33, 4  ;;  %v997_v32 = vld [vmem:[#allocation2 + $0x134] sm:$0x1]  ;;  %v18620_v28 = vld [vmem:[#allocation11_spill] sm:$0xff]  ;;  %18621 = vst [vmem:[#allocation35_spill] sm:$0xff] %v15646_v14  ;;  %v15648_v62 = vpop.f32.mrf.mxu0 }
 0x1d6   :  { %12379 = vmatprep.mubr.msk.bf16.mxu0 %vm1310_vm8, %v11382_v7  ;;  %v6219_v0 = vrot.slane %v6217_v5, 5  ;;  %995 = vst [vmem:[#allocation2 + $0x12c] sm:$0xf] %v994_v20  ;;  %v2681_v19 = vadd.f32 %v18619_v24, %v15282_v12  ;;  %v2672_v1 = vadd.f32 %v18620_v28, %v15178_v3  ;;  %v581_v21 = vor.u32 %v579_v60, %v578_v16  ;;  %v18622_v13 = vld [vmem:[#allocation37_spill] sm:$0xff]  ;;  %v15675_v28 = vpop.f32.mrf.mxu1 }
 0x1d7   :  { %v6215_v2 = vrot.slane %v6214_v59, 4  ;;  %v583_v49 = vrot.slane %v578_v16, 4  ;;  %v6210_v10 = vsel %vm13197_vm14, %v6205_v42, %v6209_v46  ;;  %v991_v33 = vsel %vm13173_vm11, %v566_v35, %v990_v26  ;;  %v6582_v46 = vld [vmem:[#allocation2 + $0xd8] sm:$0xe]  ;;  %18624 = vst [vmem:[#allocation11_spill] sm:$0xff] %v15675_v28 }
 0x1d8   :  { %v6064_v7 = vld [vmem:[#allocation2 + $0x120] sm:$0xf]  ;;  %v15655_v12 = vadd.f32 %v15322_v55, %v2681_v19  ;;  %v2679_v3 = vadd.f32 %v18622_v13, %v15305_v11  ;;  %v582_v60 = vsel %vm13134_vm9, %v574_v37, %v581_v21  ;;  %992 = vst [vmem:[#allocation2 + $0x128] sm:$0x1] %v991_v33  ;;  %v15680_v21 = vadd.f32 %v15229_v56, %v2672_v1 }
 0x1d9   :  { %v6220_v5 = vsel %vm13197_vm14, %v6215_v2, %v6219_v0  ;;  %v6222_v16 = vshrl.u32 %v6064_v7, 16  ;;  %v6225_v59 = vshll.u32 %v6064_v7, 16  ;;  %996 = vst.msk [vmem:[#allocation2 + $0x130] sm:$0xf] %vm16_vm1, %v582_v60  ;;  %v998_v55 = vsel %vm13173_vm11, %v583_v49, %v997_v32  ;;  %v18623_v26 = vld [vmem:[#allocation39_spill] sm:$0xff]  ;;  %v15677_v2 = vpop.f32.mrf.mxu0 }
 0x1da   :  { %v11383_v20 = vcombine.low %v6210_v10, %v6220_v5  ;;  %v15663_v42 = vld [vmem:[#allocation2 + $0x124] sm:$0xf]  ;;  %v15669_v11 = vadd.f32 %v15337_v6, %v2679_v3  ;;  %v2682_v0 = vadd.f32 %v18623_v26, %v15328_v53  ;;  %999 = vst [vmem:[#allocation2 + $0x134] sm:$0x1] %v998_v55  ;;  %v11410_v32 = vrot.slane %v6582_v46, 9  ;;  %v15705_v26 = vpop.f32.mrf.mxu1 }
 0x1db   :  { %v6224_v35 = vrot.slane %v6222_v16, 4  ;;  %v6227_v24 = vrot.slane %v6225_v59, 5  ;;  %v6235_v37 = vshrl.u32 %v15663_v42, 16  ;;  %v11400_v19 = vcombine.low %v6064_v7, %v15663_v42  ;;  %v6583_v49 = vld [vmem:[#allocation2 + $0xe4] sm:$0xe]  ;;  %v15690_v56 = vpop.f32.mrf.mxu0  ;;  %18627 = vst [vmem:[#allocation37_spill] sm:$0xff] %v15705_v26 }
 0x1dc   :  { %12380 = vmatmul.mubr.msk.bf16.gmra.mxu0 %vm1310_vm8, %v11383_v20  ;;  %v6231_v6 = vshll.u32 %v15663_v42, 16  ;;  %v15685_v53 = vadd.f32 %v15341_v22, %v2682_v0  ;;  %v6608_v13 = vrot.slane %v15294_v57, 5  ;;  %v6611_v3 = vrot.slane %v15334_v17, 5  ;;  %v18625_v16 = vld [vmem:[#allocation12_spill] sm:$0xff]  ;;  %v15701_v57 = vld [vmem:[%s18408_s2] ss:$0 sm:$0xff] }
 0x1dd   :  { %12401 = vmatprep.mubr.msk.bf16.mxu1 %vm1310_vm8, %v11400_v19  ;;  %v6066_v10 = vld [vmem:[#allocation2 + $0x12c] sm:$0xf]  ;;  %v6228_v7 = vor.u32 %v6227_v24, %v6224_v35  ;;  %v6237_v33 = vrot.slane %v6235_v37, 4  ;;  %v2676_v59 = vadd.f32 %v18625_v16, %v15357_v25  ;;  %v18626_v17 = vld [vmem:[#allocation23_spill] sm:$0xff]  ;;  %v15707_v0 = vpop.f32.mrf.mxu0  ;;  %v11411_v19 = vrot.slane %v6583_v49, 9 }
 0x1de   :  { %v6246_v1 = vshrl.u32 %v6066_v10, 16  ;;  %v6249_v5 = vshll.u32 %v6066_v10, 16  ;;  %v6233_v22 = vrot.slane %v6231_v6, 5  ;;  %v15696_v46 = vsel %vm13242_vm15, %v11410_v32, %v6608_v13 }
 0x1df   :  { %v6229_v60 = vrot.slane %v6228_v7, 4  ;;  %v6610_v20 = vrot.slane %v6608_v13, 4  ;;  %v3250_v55 = vadd.f32 %v18626_v17, %v15371_v4  ;;  %v15709_v24 = vld [vmem:[#allocation2 + $0x128] sm:$0x1] }
 0x1e0   :  { %v6248_v25 = vrot.slane %v6246_v1, 4  ;;  %v6251_v35 = vrot.slane %v6249_v5, 5  ;;  %v6238_v37 = vor.u32 %v6237_v33, %v6233_v22  ;;  %v15711_v6 = vld [vmem:[#allocation2 + $0x130] sm:$0xf]  ;;  %v6241_v7 = vshll.u32 %v15709_v24, 16  ;;  %v12780_v13 = vld [vmem:[#allocation2 + $0xe4] sm:$0xff]   ;;  %v15721_v1 = vpop.f32.mrf.mxu0 }
 0x1e1   :  { %v6234_v32 = vsel %vm13197_vm14, %v6229_v60, %v6233_v22  ;;  %v15718_v4 = vsel %vm13242_vm15, %v6610_v20, %v6611_v3  ;;  %v3504_v16 = vadd.f32 %v15396_v52, %v3250_v55  ;;  %v6259_v5 = vshrl.u32 %v15711_v6, 16  ;;  %v15725_v17 = vld [vmem:[#allocation2 + $0x134] sm:$0x1]  ;;  %v15731_v20 = vpop.f32.mrf.mxu1 }
 0x1e2   :  { %v11401_v49 = vcombine.low %v6066_v10, %v15711_v6  ;;  %v6239_v33 = vrot.slane %v6238_v37, 4  ;;  %v6252_v26 = vor.u32 %v6251_v35, %v6248_v25  ;;  %v6243_v22 = vrot.slane %v6241_v7, 5  ;;  %18628 = vst [vmem:[#allocation39_spill] sm:$0xff] %v15731_v20  ;;  %v15733_v52 = vpop.f32.mrf.mxu0  ;;  %v18629_v10 = vld [vmem:[#allocation21_spill] sm:$0xff] }
 0x1e3   :  { %v6255_v60 = vshll.u32 %v15711_v6, 16  ;;  %v6265_v28 = vshll.u32 %v15725_v17, 16  ;;  %v6261_v55 = vrot.slane %v6259_v5, 4  ;;  %v2680_v37 = vadd.f32 %v18629_v10, %v15535_v34  ;;  %v12781_v10 = vld [vmem:[#allocation2 + $0xf0] sm:$0xff]  }
 0x1e4   :  { %12402 = vmatmul.mubr.msk.bf16.gmra.mxu1 %vm1310_vm8, %v11401_v49  ;;  %v15739_v25 = vadd.f32 %v15701_v57, %v3504_v16  ;;  %v6615_v35 = vrot.slane %v15408_v27, 5  ;;  %v15743_v7 = vadd.f32 %v15302_v23, %v2676_v59  ;;  %v6244_v3 = vsel %vm13197_vm14, %v6239_v33, %v6243_v22  ;;  %v15748_v49 = vpop.f32.mrf.mxu0  ;;  %v12782_v33 = vld [vmem:[#allocation2 + $0xfc] sm:$0xff]   ;;  %v6584_v22 = vld [vmem:[#allocation2 + $0xf0] sm:$0xe] }
 0x1e5   :  { %v6253_v20 = vrot.slane %v6252_v26, 4  ;;  %v6257_v14 = vrot.slane %v6255_v60, 5  ;;  %12425 = vmatprep.mubr.msk.bf16.mxu1 %vm1310_vm8, %v12780_v13  ;;  %18630 = vst [vmem:[#allocation12_spill] sm:$0xff] %v15748_v49  ;;  %v11384_v5 = vcombine.low %v6234_v32, %v6244_v3  ;;  %v6267_v39 = vrot.slane %v6265_v28, 5  ;;  %v18631_v26 = vld [vmem:[#allocation40_spill] sm:$0xff]  ;;  %v15761_v32 = vpop.f32.mrf.mxu1  ;;  %v18635_v60 = vld [vmem:[#allocation18_spill] sm:$0xff] }
 0x1e6   :  { %v15751_v34 = vadd.f32 %v15366_v18, %v2680_v37  ;;  %v6618_v16 = vrot.slane %v15418_v43, 5  ;;  %v15757_v59 = vsel %vm13242_vm15, %v11411_v19, %v6615_v35  ;;  %v3248_v13 = vadd.f32 %v18631_v26, %v15388_v38  ;;  %18632 = vst [vmem:[#allocation23_spill] sm:$0xff] %v15761_v32  ;;  %v15763_v28 = vpop.f32.mrf.mxu0  ;;  %v18636_v3 = vld [vmem:[#allocation41_spill] sm:$0xff] }
 0x1e7   :  { %v6262_v27 = vor.u32 %v6261_v55, %v6257_v14  ;;  %18633 = vst [vmem:[#allocation21_spill] sm:$0xff] %v15763_v28  ;;  %12383 = vmatprep.mubr.msk.bf16.mxu0 %vm1310_vm8, %v11384_v5  ;;  %v6617_v18 = vrot.slane %v6615_v35, 4  ;;  %v15768_v43 = vsel %vm1335_vm0, %v15485_v31, 0  ;;  %v3251_v19 = vadd.f32 %v18636_v3, %v18635_v60  ;;  %v18637_v55 = vld [vmem:[#allocation26_spill] sm:$0xff]  ;;  %v18638_v23 = vld [vmem:[#allocation13_spill] sm:$0xff]  ;;  %v15781_v35 = vpop.f32.mrf.mxu1 }
 0x1e8   :  { %18634 = vst [vmem:[#allocation40_spill] sm:$0xff] %v15768_v43  ;;  %v3249_v37 = vadd.f32 %v18637_v55, %v15625_v8  ;;  %v6258_v38 = vsel %vm13197_vm14, %v6253_v20, %v6257_v14  ;;  %v3502_v32 = vadd.f32 %v18638_v23, %v3248_v13  ;;  %v15779_v5 = vsel %vm1335_vm0, %v15428_v15, 0  ;;  %18640 = vst [vmem:[#allocation41_spill] sm:$0xff] %v15781_v35  ;;  %v15783_v31 = vpop.f32.mrf.mxu0  ;;  %v6585_v55 = vld [vmem:[#allocation2 + $0xfc] sm:$0xe]  ;;  %v18642_v23 = vld [vmem:[#allocation30_spill] sm:$0xff] }
 0x1e9   :  { %v6263_v26 = vrot.slane %v6262_v27, 4  ;;  %18639 = vst [vmem:[#allocation18_spill] sm:$0xff] %v15779_v5  ;;  %v3505_v28 = vadd.f32 %v15448_v30, %v3251_v19  ;;  %v11412_v3 = vrot.slane %v6584_v22, 9  ;;  %v6622_v8 = vrot.slane %v15475_v61, 5  ;;  %v18641_v27 = vld [vmem:[#allocation46_spill] sm:$0xff]  ;;  %v18643_v13 = vld [vmem:[#allocation27_spill] sm:$0xff]  ;;  %v15794_v49 = vpop.f32.mrf.mxu1 }
 0x1ea   :  { %v3503_v60 = vadd.f32 %v15471_v36, %v3249_v37  ;;  %v3524_v20 = vadd.f32 %v15701_v57, %v3502_v32  ;;  %v6625_v15 = vrot.slane %v18641_v27, 5  ;;  %v3254_v35 = vadd.f32 %v18643_v13, %v18642_v23  ;;  %18644 = vst [vmem:[#allocation26_spill] sm:$0xff] %v15794_v49  ;;  %v15799_v30 = vld [vmem:[%s18407_s1 + $0xe] sm:$0x3]  ;;  %v15801_v36 = vpop.f32.mrf.mxu0  ;;  %v18645_v37 = vld [vmem:[#allocation48_spill] sm:$0xff] }
 0x1eb   :  { %v6268_v14 = vsel %vm13197_vm14, %v6263_v26, %v6267_v39  ;;  %v6619_v39 = vsel %vm13242_vm15, %v6617_v18, %v6618_v16  ;;  %v3527_v22 = vadd.f32 %v15701_v57, %v3505_v28  ;;  %v6624_v19 = vrot.slane %v6622_v8, 4  ;;  %v18646_v23 = vld [vmem:[#allocation49_spill] sm:$0xff] }
 0x1ec   :  { %v11385_v61 = vcombine.low %v6258_v38, %v6268_v14  ;;  %12426 = vmatmul.mubr.msk.bf16.vlgmr.msra.gmra.mxu1 %vm1310_vm8, %v12781_v10  ;;  %v3525_v32 = vadd.f32 %v15701_v57, %v3503_v60  ;;  %v3508_v26 = vadd.f32 %v18645_v37, %v3254_v35  ;;  %v11413_v27 = vrot.slane %v6585_v55, 9  ;;  %v15812_v38 = vpop.f32.mrf.mxu1  ;;  %v15814_v10 = vpop.f32.mrf.mxu0  ;;  %v18648_v60 = vld [vmem:[#allocation25_spill] sm:$0xff]  ;;  %v18649_v14 = vld [vmem:[#allocation28_spill] sm:$0xff] }
 0x1ed   :  { %12460 = vmatpush3.bf16.msra.mxu1 %v15779_v5  ;;  %12429 = vmatprep.mubr.msk.bf16.mxu1 %vm1310_vm8, %v12782_v33  ;;  %v6629_v13 = vrot.slane %v18646_v23, 5  ;;  %18647 = vst [vmem:[#allocation13_spill] sm:$0xff] %v15812_v38  ;;  %v3540_v16 = vmax.f32 %v3524_v20, 0.0  ;;  %v6623_v18 = vsel %vm13242_vm15, %v11412_v3, %v6622_v8  ;;  %v3252_v33 = vadd.f32 %v18649_v14, %v18648_v60  ;;  %v6586_v3 = vld [vmem:[#allocation2 + $0x108] sm:$0xe] }
 0x1ee   :  { %12384 = vmatmul.mubr.msk.bf16.gmra.mxu0 %vm1310_vm8, %v11385_v61  ;;  %v3541_v28 = vmax.f32 %v3525_v32, 0.0  ;;  %12718 = vmatprep.subr.msk.bf16.mxu1 %vm1335_vm0, %v15799_v30  ;;  %v18650_v35 = vcombine.low %v15696_v46, %v15718_v4  ;;  %v11420_v55 = vcombine.low %v15757_v59, %v6619_v39  ;;  %v3543_v37 = vmax.f32 %v3527_v22, 0.0  ;;  %v18651_v61 = vld [vmem:[#allocation50_spill] sm:$0xff]  ;;  %v15831_v8 = vpop.f32.mrf.mxu1  ;;  %v15833_v23 = vpop.f32.mrf.mxu0  ;;  %v12783_v60 = vld [vmem:[#allocation2 + $0x108] sm:$0xff]  }
 0x1ef   :  { %v6626_v20 = vsel %vm13242_vm15, %v6624_v19, %v6625_v15  ;;  %v6632_v32 = vrot.slane %v18651_v61, 5  ;;  %18652 = vst [vmem:[#allocation46_spill] sm:$0xff] %v15831_v8  ;;  %v15836_v5 = vadd.f32 %v15701_v57, %v3508_v26  ;;  %v18653_v46 = vld [vmem:[#allocation52_spill] sm:$0xff]  ;;  %v18654_v59 = vld [vmem:[#allocation29_spill] sm:$0xff]  ;;  %v15843_v15 = vsel %vm13242_vm15, %v11413_v27, %v6629_v13  ;;  %v18655_v61 = vld [vmem:[#allocation42_spill] sm:$0xff] }
 0x1f0   :  { %12407 = vmatprep.mubr.msk.bf16.mxu0 %vm1310_vm8, %v18650_v35  ;;  %v3556_v14 = vadd.f32 %v3541_v28, %v3540_v16  ;;  %v3506_v4 = vadd.f32 %v18653_v46, %v3252_v33  ;;  %v3255_v39 = vadd.f32 %v18654_v59, %v15531_v45  ;;  %v11421_v22 = vcombine.low %v6623_v18, %v6626_v20  ;;  %v12784_v35 = vld [vmem:[#allocation2 + $0x114] sm:$0xff]   ;;  %v15847_v8 = vpop.f32.mrf.mxu1  ;;  %v15849_v16 = vpop.f32.mrf.mxu0 }
 0x1f1   :  { %v6631_v19 = vrot.slane %v6629_v13, 4  ;;  %v3253_v38 = vadd.f32 %v18655_v61, %v15680_v21  ;;  %v18656_v26 = vmax.f32 %v15739_v25, 0.0  ;;  %v11414_v18 = vrot.slane %v6586_v3, 9  ;;  %v18657_v21 = vld [vmem:[#allocation43_spill] sm:$0xff]  ;;  %v6587_v59 = vld [vmem:[#allocation2 + $0x114] sm:$0xe] }
 0x1f2   :  { %v3528_v33 = vadd.f32 %v15701_v57, %v3506_v4  ;;  %v3509_v45 = vadd.f32 %v15539_v47, %v3255_v39  ;;  %v6636_v13 = vrot.slane %v15556_v51, 5  ;;  %v6639_v20 = vrot.slane %v15603_v63, 5  ;;  %v15860_v61 = vpop.f32.mrf.mxu1  ;;  %v15862_v49 = vpop.f32.mrf.mxu0 }
 0x1f3   :  { %v3557_v28 = vadd.f32 %v3556_v14, %v18656_v26  ;;  %v3507_v27 = vadd.f32 %v15562_v41, %v3253_v38  ;;  %v3258_v46 = vadd.f32 %v18657_v21, %v15583_v9  ;;  %v3546_v25 = vmax.f32 %v15836_v5, 0.0  ;;  %v18658_v38 = vld [vmem:[#allocation33_spill] sm:$0xff] }
 0x1f4   :  { %12430 = vmatmul.mubr.msk.bf16.gmra.mxu1 %vm1310_vm8, %v12783_v60  ;;  %v3544_v47 = vmax.f32 %v3528_v33, 0.0  ;;  %v3531_v41 = vadd.f32 %v15701_v57, %v3509_v45  ;;  %v6633_v51 = vsel %vm13242_vm15, %v6631_v19, %v6632_v32  ;;  %v6638_v63 = vrot.slane %v6636_v13, 4  ;;  %v15875_v60 = vld [vmem:[%s18407_s1 + $0xc] sm:$0x3]  ;;  %v15877_v5 = vpop.f32.mrf.mxu1  ;;  %v18659_v33 = vld [vmem:[#allocation15_spill] sm:$0xff]  ;;  %v18660_v45 = vld [vmem:[#allocation44_spill] sm:$0xff] }
 0x1f5   :  { %v3558_v3 = vadd.f32 %v3557_v28, %v3543_v37  ;;  %12433 = vmatprep.mubr.msk.bf16.mxu1 %vm1310_vm8, %v12784_v35  ;;  %v3529_v9 = vadd.f32 %v15701_v57, %v3507_v27  ;;  %v3512_v14 = vadd.f32 %v18658_v38, %v3258_v46  ;;  %v15879_v37 = vpop.f32.mrf.mxu0  ;;  %v6637_v32 = vsel %vm13242_vm15, %v11414_v18, %v6636_v13  ;;  %v172_v35 = vld [vmem:[%s18406_s0 + $0xb8] sm:$0xf]  ;;  %v12785_v46 = vld [vmem:[#allocation2 + $0x120] sm:$0xff]  }
 0x1f6   :  { %12408 = vmatmul.mubr.msk.bf16.vlgmr.msra.gmra.mxu0 %vm1310_vm8, %v11420_v55  ;;  %v11415_v39 = vrot.slane %v6587_v59, 9  ;;  %v6643_v19 = vrot.slane %v15614_v48, 5  ;;  %v6640_v28 = vsel %vm13242_vm15, %v6638_v63, %v6639_v20  ;;  %v6646_v55 = vrot.slane %v15630_v54, 5  ;;  %v173_v48 = vld [vmem:[%s18406_s0 + $0xbc] sm:$0xf]  ;;  %v15898_v27 = vpop.f32.mrf.mxu1  ;;  %v18663_v20 = vld [vmem:[#allocation10_spill] sm:$0xff] }
 0x1f7   :  { %v3559_v4 = vadd.f32 %v3558_v3, %v3544_v47  ;;  %12442 = vmatpush3.bf16.msra.mxu0 %v15768_v43  ;;  %12411 = vmatprep.mubr.msk.bf16.mxu0 %vm1310_vm8, %v11421_v22  ;;  %v3545_v26 = vmax.f32 %v3529_v9, 0.0  ;;  %v3256_v18 = vadd.f32 %v18660_v45, %v18659_v33  ;;  %18661 = vst [vmem:[#allocation30_spill] sm:$0xff] %v15898_v27  ;;  %v15900_v13 = vpop.f32.mrf.mxu0  ;;  %v3547_v22 = vmax.f32 %v3531_v41, 0.0  ;;  %v18662_v47 = vld [vmem:[#allocation17_spill] sm:$0xff]  ;;  %v18664_v63 = vld [vmem:[#allocation54_spill] sm:$0xff] }
 0x1f8   :  { %v11422_v21 = vcombine.low %v15843_v15, %v6633_v51  ;;  %v6645_v59 = vrot.slane %v6643_v19, 4  ;;  %v3259_v3 = vadd.f32 %v18663_v20, %v18662_v47  ;;  %12717 = vmatprep.subr.msk.bf16.mxu0 %vm1335_vm0, %v15875_v60  ;;  %v11423_v9 = vcombine.low %v6637_v32, %v6640_v28  ;;  %v12786_v33 = vld [vmem:[#allocation2 + $0x12c] sm:$0xff]   ;;  %v15908_v43 = vpop.f32.mrf.mxu1 }
 0x1f9   :  { %v3560_v54 = vadd.f32 %v3559_v4, %v3545_v26  ;;  %v3510_v38 = vadd.f32 %v18664_v63, %v3256_v18  ;;  %v585_v45 = vshrl.u32 %v172_v35, 16  ;;  %v15910_v27 = vpop.f32.mrf.mxu0  ;;  %v15914_v15 = vsel %vm13242_vm15, %v11415_v39, %v6643_v19 }
 0x1fa   :  { %v3513_v41 = vadd.f32 %v15635_v29, %v3259_v3  ;;  %v588_v51 = vshll.u32 %v172_v35, 16  ;;  %v593_v47 = vshrl.u32 %v173_v48, 16  ;;  %v15919_v4 = vsel %vm13242_vm15, %v6645_v59, %v6646_v55  ;;  %v15922_v28 = vpop.f32.mrf.mxu1  ;;  %v18665_v35 = vld [vmem:[#allocation34_spill] sm:$0xff]  ;;  %v6588_v59 = vld [vmem:[#allocation2 + $0x120] sm:$0xe] }
 0x1fb   :  { %v3561_v20 = vadd.f32 %v3560_v54, %v3546_v25  ;;  %v3532_v32 = vadd.f32 %v15701_v57, %v3510_v38  ;;  %v587_v26 = vrot.slane %v585_v45, 7  ;;  %v15924_v18 = vpop.f32.mrf.mxu0  ;;  %v15928_v39 = vadd.f32 %v15701_v57, %v3512_v14  ;;  %v1000_v25 = vld [vmem:[#allocation2 + $0x138] sm:$0xf] }
 0x1fc   :  { %12434 = vmatmul.mubr.msk.bf16.gmra.mxu1 %vm1310_vm8, %v12785_v46  ;;  %v15930_v29 = vrot.slane %v593_v47, 7  ;;  %v596_v19 = vshll.u32 %v173_v48, 16  ;;  %v3257_v55 = vadd.f32 %v18665_v35, %v15743_v7  ;;  %v15935_v45 = vpop.f32.mrf.mxu1  ;;  %v11424_v14 = vcombine.low %v15914_v15, %v15919_v4  ;;  %v6589_v47 = vld [vmem:[#allocation2 + $0x12c] sm:$0xe] }
 0x1fd   :  { %v3548_v3 = vmax.f32 %v3532_v32, 0.0  ;;  %v3562_v54 = vadd.f32 %v3561_v20, %v3547_v22  ;;  %12437 = vmatprep.mubr.msk.bf16.mxu1 %vm1310_vm8, %v12786_v33  ;;  %v590_v63 = vor.u32 %v588_v51, %v587_v26  ;;  %v591_v38 = vrot.slane %v587_v26, 4  ;;  %v15937_v46 = vpop.f32.mrf.mxu0 }
 0x1fe   :  { %12412 = vmatmul.mubr.msk.bf16.gmra.mxu0 %vm1310_vm8, %v11422_v21  ;;  %v15943_v48 = vadd.f32 %v15701_v57, %v3513_v41  ;;  %v598_v7 = vor.u32 %v596_v19, %v15930_v29  ;;  %v3511_v22 = vadd.f32 %v15648_v62, %v3257_v55  ;;  %v11416_v20 = vrot.slane %v6588_v59, 9  ;;  %v15951_v32 = vpop.f32.mrf.mxu1  ;;  %v7406_v19 = vld [vmem:[#allocation2 + $0xe4] sm:$0xe] }
 0x1ff   :  { %12415 = vmatprep.mubr.msk.bf16.mxu0 %vm1310_vm8, %v11423_v9  ;;  %v3563_v33 = vadd.f32 %v3562_v54, %v3548_v3  ;;  %v1001_v51 = vsel %vm13157_vm10, %v590_v63, %v1000_v25  ;;  %v6650_v21 = vrot.slane %v15663_v42, 5  ;;  %v15953_v15 = vpop.f32.mrf.mxu0  ;;  %v6653_v4 = vrot.slane %v15709_v24, 5  ;;  %v18666_v9 = vld [vmem:[#allocation20_spill] sm:$0xff] }
 0x200   :  { %v599_v41 = vsel %vm13134_vm9, %v591_v38, %v598_v7  ;;  %1002 = vst [vmem:[#allocation2 + $0x138] sm:$0xf] %v1001_v51  ;;  %v3533_v62 = vadd.f32 %v15701_v57, %v3511_v22  ;;  %v3262_v26 = vadd.f32 %v18666_v9, %v15655_v12  ;;  %v11417_v35 = vrot.slane %v6589_v47, 9  ;;  %v15965_v59 = vpop.f32.mrf.mxu1  ;;  %v18668_v12 = vld [vmem:[#allocation9_spill] sm:$0xff] }
 0x201   :  { %1003 = vst.msk [vmem:[#allocation2 + $0x13c] sm:$0xf] %vm16_vm1, %v599_v41  ;;  %v6651_v42 = vsel %vm13242_vm15, %v11416_v20, %v6650_v21  ;;  %v6652_v25 = vrot.slane %v6650_v21, 4  ;;  %v6657_v55 = vrot.slane %v15711_v6, 5  ;;  %18667 = vst [vmem:[#allocation27_spill] sm:$0xff] %v15965_v59  ;;  %v15967_v3 = vpop.f32.mrf.mxu0  ;;  %v6660_v63 = vrot.slane %v15725_v17, 5 }
 0x202   :  { %v3549_v54 = vmax.f32 %v3533_v62, 0.0  ;;  %v3516_v24 = vadd.f32 %v15677_v2, %v3262_v26  ;;  %v3260_v38 = vadd.f32 %v18668_v12, %v15669_v11  ;;  %v15973_v7 = vld [vmem:[#allocation2 + $0xe8] sm:$0xf]  ;;  %v15975_v22 = vld [vmem:[#allocation2 + $0xec] sm:$0x1]  ;;  %v3550_v47 = vmax.f32 %v15928_v39, 0.0  ;;  %v15980_v21 = vpop.f32.mrf.mxu1 }
 0x203   :  { %v6654_v6 = vsel %vm13242_vm15, %v6652_v25, %v6653_v4  ;;  %v6659_v51 = vrot.slane %v6657_v55, 4  ;;  %v11469_v20 = vrot.slane %v7406_v19, 9  ;;  %18669 = vst [vmem:[#allocation48_spill] sm:$0xff] %v15980_v21  ;;  %v15982_v41 = vpop.f32.mrf.mxu0  ;;  %v3551_v2 = vmax.f32 %v15943_v48, 0.0  ;;  %v7407_v9 = vld [vmem:[#allocation2 + $0xf0] sm:$0xe] }
 0x204   :  { %v3564_v17 = vadd.f32 %v3563_v33, %v3549_v54  ;;  %v11425_v62 = vcombine.low %v6651_v42, %v6654_v6  ;;  %v3514_v11 = vadd.f32 %v15690_v56, %v3260_v38  ;;  %v6658_v26 = vsel %vm13242_vm15, %v11417_v35, %v6657_v55  ;;  %v18670_v19 = vld [vmem:[#allocation38_spill] sm:$0xff]  ;;  %v15996_v48 = vpop.f32.mrf.mxu1  ;;  %v18698_v21 = vld [vmem:[#allocation21_spill] sm:$0xff] }
 0x205   :  { %v7440_v39 = vrot.slane %v15973_v7, 5  ;;  %v7443_v4 = vrot.slane %v15975_v22, 5  ;;  %v3263_v25 = vadd.f32 %v18670_v19, %v15685_v53  ;;  %v15992_v12 = vld [vmem:[#allocation2 + $0xf4] sm:$0xf]  ;;  %18671 = vst [vmem:[#allocation49_spill] sm:$0xff] %v15996_v48  ;;  %v15998_v33 = vpop.f32.mrf.mxu0  ;;  %v16002_v42 = vadd.f32 %v15701_v57, %v3516_v24 }
 0x206   :  { %12416 = vmatmul.mubr.msk.bf16.gmra.mxu0 %vm1310_vm8, %v11424_v14  ;;  %v3565_v56 = vadd.f32 %v3564_v17, %v3550_v47  ;;  %v6661_v35 = vsel %vm13242_vm15, %v6659_v51, %v6660_v63  ;;  %v3536_v55 = vadd.f32 %v15701_v57, %v3514_v11  ;;  %v7025_v53 = vld [vmem:[#allocation2 + $0xe4] sm:$0xf]  ;;  %v11470_v19 = vrot.slane %v7407_v9, 9  ;;  %v16011_v14 = vpop.f32.mrf.mxu1 }
 0x207   :  { %12419 = vmatprep.mubr.msk.bf16.mxu0 %vm1310_vm8, %v11425_v62  ;;  %v7441_v54 = vsel %vm13242_vm15, %v11469_v20, %v7440_v39  ;;  %v7442_v38 = vrot.slane %v7440_v39, 4  ;;  %v3517_v6 = vadd.f32 %v15707_v0, %v3263_v25  ;;  %18672 = vst [vmem:[#allocation25_spill] sm:$0xff] %v16011_v14  ;;  %v16013_v47 = vpop.f32.mrf.mxu0  ;;  %v7447_v63 = vrot.slane %v15992_v12, 5  ;;  %v18673_v20 = vld [vmem:[#allocation14_spill] sm:$0xff] }
 0x208   :  { %v12787_v24 = vld [vmem:[#allocation2 + $0x138] sm:$0xff]   ;;  %v3552_v17 = vmax.f32 %v3536_v55, 0.0  ;;  %v3566_v48 = vadd.f32 %v3565_v56, %v3551_v2  ;;  %v7450_v51 = vrot.slane %v15994_v44, 5  ;;  %v11426_v11 = vcombine.low %v6658_v26, %v6661_v35  ;;  %v16021_v9 = vpop.f32.mrf.mxu1  ;;  %v7028_v26 = vld [vmem:[#allocation2 + $0xf0] sm:$0xf] }
 0x209   :  { %v7444_v62 = vsel %vm13242_vm15, %v7442_v38, %v7443_v4  ;;  %v3261_v39 = vadd.f32 %v18673_v20, %v15751_v34  ;;  %v7050_v0 = vshrl.u32 %v7025_v53, 16  ;;  %18674 = vst [vmem:[#allocation28_spill] sm:$0xff] %v16021_v9  ;;  %v16023_v25 = vpop.f32.mrf.mxu0  ;;  %12438 = vmatmul.mubr.msk.bf16.gmra.mxu1 %vm1310_vm8, %v12787_v24  ;;  %v7448_v56 = vsel %vm13242_vm15, %v11470_v19, %v7447_v63 }
 0x20a   :  { %v3567_v55 = vadd.f32 %v3566_v48, %v3552_v17  ;;  %v11478_v2 = vcombine.low %v7441_v54, %v7444_v62  ;;  %v7449_v14 = vrot.slane %v7447_v63, 4  ;;  %v3554_v35 = vmax.f32 %v16002_v42, 0.0  ;;  %v16030_v20 = vpop.f32.mrf.mxu1 }
 0x20b   :  { %v3515_v4 = vadd.f32 %v15721_v1, %v3261_v39  ;;  %v7052_v38 = vrot.slane %v7050_v0, 4  ;;  %v7053_v34 = vshll.u32 %v7025_v53, 16  ;;  %18675 = vst [vmem:[#allocation50_spill] sm:$0xff] %v16030_v20  ;;  %v16032_v9 = vpop.f32.mrf.mxu0  ;;  %v7059_v54 = vshll.u32 %v15973_v7, 16 }
 0x20c   :  { %12461 = vmatprep.mubr.msk.bf16.mxu1 %vm1310_vm8, %v11478_v2  ;;  %v7451_v48 = vsel %vm13242_vm15, %v7449_v14, %v7450_v51  ;;  %v7063_v19 = vshrl.u32 %v15973_v7, 16  ;;  %v7069_v24 = vshll.u32 %v15975_v22, 16  ;;  %v3539_v42 = vadd.f32 %v15701_v57, %v3517_v6  ;;  %v16042_v63 = vpop.f32.mrf.mxu1 }
 0x20d   :  { %v11479_v1 = vcombine.low %v7448_v56, %v7451_v48  ;;  %v3537_v53 = vadd.f32 %v15701_v57, %v3515_v4  ;;  %v7055_v17 = vrot.slane %v7053_v34, 5  ;;  %18676 = vst [vmem:[#allocation52_spill] sm:$0xff] %v16042_v63  ;;  %v16044_v62 = vpop.f32.mrf.mxu0  ;;  %v7061_v39 = vrot.slane %v7059_v54, 5  ;;  %v7408_v63 = vld [vmem:[#allocation2 + $0xfc] sm:$0xe] }
 0x20e   :  { %12420 = vmatmul.mubr.msk.bf16.gmra.mxu0 %vm1310_vm8, %v11426_v11  ;;  %v7065_v14 = vrot.slane %v7063_v19, 4  ;;  %v7071_v51 = vrot.slane %v7069_v24, 5  ;;  %v7074_v0 = vshrl.u32 %v7028_v26, 16  ;;  %v7077_v20 = vshll.u32 %v7028_v26, 16  ;;  %v16048_v6 = vpop.f32.mrf.mxu1 }
 0x20f   :  { %v3553_v2 = vmax.f32 %v3537_v53, 0.0  ;;  %v7056_v7 = vor.u32 %v7055_v17, %v7052_v38  ;;  %v7083_v22 = vshll.u32 %v15992_v12, 16  ;;  %18677 = vst [vmem:[#allocation29_spill] sm:$0xff] %v16048_v6  ;;  %v16050_v56 = vpop.f32.mrf.mxu0  ;;  %v7087_v34 = vshrl.u32 %v15992_v12, 16 }
 0x210   :  { %v7066_v57 = vor.u32 %v7065_v14, %v7061_v39  ;;  %v7076_v4 = vrot.slane %v7074_v0, 4  ;;  %v7093_v48 = vshll.u32 %v15994_v44, 16  ;;  %v7079_v19 = vrot.slane %v7077_v20, 5  ;;  %v16054_v53 = vpop.f32.mrf.mxu1  ;;  %v16059_v14 = vld [vmem:[#allocation2 + $0x100] sm:$0xf] }
 0x211   :  { %v3568_v11 = vadd.f32 %v3567_v55, %v3553_v2  ;;  %v7057_v54 = vrot.slane %v7056_v7, 4  ;;  %v7085_v24 = vrot.slane %v7083_v22, 5  ;;  %18678 = vst [vmem:[#allocation42_spill] sm:$0xff] %v16054_v53  ;;  %v16056_v26 = vpop.f32.mrf.mxu0  ;;  %v3555_v38 = vmax.f32 %v3539_v42, 0.0  ;;  %12462 = vmatmul.mubr.msk.bf16.vlgmr.msra.gmra.mxu1 %vm1310_vm8, %v11479_v1  ;;  %v16063_v20 = vld [vmem:[#allocation2 + $0x104] sm:$0x1] }
 0x212   :  { %v7067_v17 = vrot.slane %v7066_v57, 4  ;;  %v7089_v6 = vrot.slane %v7087_v34, 4  ;;  %v7080_v12 = vor.u32 %v7079_v19, %v7076_v4  ;;  %v7095_v55 = vrot.slane %v7093_v48, 5  ;;  %v7409_v2 = vld [vmem:[#allocation2 + $0x108] sm:$0xe]  ;;  %v16065_v7 = vpop.f32.mrf.mxu1 }
 0x213   :  { %v3569_v0 = vadd.f32 %v3568_v11, %v3554_v35  ;;  %v7062_v44 = vsel %vm13197_vm14, %v7057_v54, %v7061_v39  ;;  %18679 = vst [vmem:[#allocation43_spill] sm:$0xff] %v16065_v7  ;;  %v16067_v22 = vpop.f32.mrf.mxu0  ;;  %v16073_v57 = vsel %vm1335_vm0, %v15799_v30, 0  ;;  %v11471_v35 = vrot.slane %v7408_v63, 9  ;;  %v16075_v34 = vld [vmem:[#allocation2 + $0x10c] sm:$0xf] }
 0x214   :  { %18680 = vst [vmem:[#allocation33_spill] sm:$0xff] %v16067_v22  ;;  %v7072_v42 = vsel %vm13197_vm14, %v7067_v17, %v7071_v51  ;;  %v7090_v1 = vor.u32 %v7089_v6, %v7085_v24  ;;  %18681 = vst [vmem:[#allocation15_spill] sm:$0xff] %v16073_v57  ;;  %v7081_v48 = vrot.slane %v7080_v12, 4  ;;  %12496 = vmatpush3.bf16.msra.mxu1 %v16073_v57  ;;  %v7454_v11 = vrot.slane %v16059_v14, 5  ;;  %v16081_v54 = vld [vmem:[#allocation2 + $0x110] sm:$0x1]  ;;  %v16083_v51 = vpop.f32.mrf.mxu1 }
 0x215   :  { %v16077_v39 = vadd.f32 %v3569_v0, %v3555_v38  ;;  %v11453_v4 = vcombine.low %v7062_v44, %v7072_v42  ;;  %v7031_v19 = vld [vmem:[#allocation2 + $0xfc] sm:$0xf]  ;;  %18683 = vst [vmem:[#allocation17_spill] sm:$0xff] %v16083_v51  ;;  %v16085_v6 = vpop.f32.mrf.mxu0  ;;  %v7457_v17 = vrot.slane %v16063_v20, 5  ;;  %v11472_v38 = vrot.slane %v7409_v2, 9 }
 0x216   :  { %18684 = vst [vmem:[#allocation10_spill] sm:$0xff] %v16085_v6  ;;  %v7091_v63 = vrot.slane %v7090_v1, 4  ;;  %v12830_v0 = vld [vmem:[%s18407_s1 + $0x2] sm:$0x3]  ;;  %v7086_v44 = vsel %vm13197_vm14, %v7081_v48, %v7085_v24  ;;  %v7455_v12 = vsel %vm13242_vm15, %v11471_v35, %v7454_v11  ;;  %v7456_v42 = vrot.slane %v7454_v11, 4  ;;  %v16099_v30 = vpop.f32.mrf.mxu1 }
 0x217   :  { %18682 = vst [vmem:[#allocation44_spill] sm:$0xff] %v16077_v39  ;;  %12720 = vmatprep.subr.msk.bf16.mxu1 %vm1335_vm0, %v12830_v0  ;;  %12443 = vmatprep.mubr.msk.bf16.mxu0 %vm1310_vm8, %v11453_v4  ;;  %v7461_v1 = vrot.slane %v16075_v34, 5  ;;  %18685 = vst [vmem:[#allocation54_spill] sm:$0xff] %v16099_v30  ;;  %v16101_v2 = vpop.f32.mrf.mxu0  ;;  %v16107_v0 = vsel %vm1335_vm0, %v15875_v60, 0  ;;  %v7464_v4 = vrot.slane %v16081_v54, 5  ;;  %v7098_v24 = vshrl.u32 %v7031_v19, 16 }
 0x218   :  { %18686 = vst [vmem:[#allocation34_spill] sm:$0xff] %v16101_v2  ;;  %v7096_v57 = vsel %vm13197_vm14, %v7091_v63, %v7095_v55  ;;  %18687 = vst [vmem:[#allocation20_spill] sm:$0xff] %v16107_v0  ;;  %v7458_v35 = vsel %vm13242_vm15, %v7456_v42, %v7457_v17  ;;  %v7034_v30 = vld [vmem:[#allocation2 + $0x108] sm:$0xf]  ;;  %v16114_v51 = vpop.f32.mrf.mxu1  ;;  %v7101_v63 = vshll.u32 %v7031_v19, 16  ;;  %v7107_v60 = vshll.u32 %v16059_v14, 16 }
 0x219   :  { %v11454_v48 = vcombine.low %v7086_v44, %v7096_v57  ;;  %v7462_v11 = vsel %vm13242_vm15, %v11472_v38, %v7461_v1  ;;  %v7463_v39 = vrot.slane %v7461_v1, 4  ;;  %18688 = vst [vmem:[#allocation9_spill] sm:$0xff] %v16114_v51  ;;  %v11480_v7 = vcombine.low %v7455_v12, %v7458_v35  ;;  %v16120_v53 = vld [vmem:[%s18407_s1 + $0x10] sm:$0x3]  ;;  %v16133_v42 = vpop.f32.mrf.mxu0  ;;  %v7410_v51 = vld [vmem:[#allocation2 + $0x114] sm:$0xe] }
 0x21a   :  { %v7100_v55 = vrot.slane %v7098_v24, 4  ;;  %v18689_v57 = vld [vmem:[#allocation45_spill] sm:$0xff]  ;;  %v7111_v44 = vshrl.u32 %v16059_v14, 16  ;;  %v7117_v19 = vshll.u32 %v16063_v20, 16  ;;  %v16131_v12 = vpop.f32.mrf.mxu1  ;;  %18691 = vst [vmem:[#allocation14_spill] sm:$0xff] %v16133_v42  ;;  %v7109_v24 = vrot.slane %v7107_v60, 5 }
 0x21b   :  { %v16124_v17 = vadd.f32 %v15733_v52, %v18689_v57  ;;  %12444 = vmatmul.mubr.msk.bf16.vlgmr.msra.gmra.mxu0 %vm1310_vm8, %v11454_v48  ;;  %v7465_v38 = vsel %vm13242_vm15, %v7463_v39, %v7464_v4  ;;  %18690 = vst [vmem:[#allocation38_spill] sm:$0xff] %v16131_v12  ;;  %12465 = vmatprep.mubr.msk.bf16.mxu1 %vm1310_vm8, %v11480_v7  ;;  %v7103_v52 = vrot.slane %v7101_v63, 5  ;;  %v7122_v35 = vshrl.u32 %v7034_v30, 16  ;;  %v16137_v48 = vld [vmem:[#allocation2 + $0x118] sm:$0xf]  ;;  %v18693_v39 = vld [vmem:[#allocation12_spill] sm:$0xff]  ;;  %v16155_v2 = vpop.f32.mrf.mxu0 }
 0x21c   :  { %12478 = vmatpush3.bf16.msra.mxu0 %v16107_v0  ;;  %v11481_v1 = vcombine.low %v7462_v11, %v7465_v38  ;;  %v18692_v57 = vld [vmem:[#allocation47_spill] sm:$0xff]  ;;  %v7113_v14 = vrot.slane %v7111_v44, 4  ;;  %v7125_v20 = vshll.u32 %v7034_v30, 16  ;;  %v7131_v12 = vshll.u32 %v16075_v34, 16  ;;  %v16146_v0 = vpop.f32.mrf.mxu1  ;;  %18696 = vst [vmem:[#allocation12_spill] sm:$0xff] %v16155_v2 }
 0x21d   :  { %v16141_v4 = vadd.f32 %v18693_v39, %v18692_v57  ;;  %12719 = vmatprep.subr.msk.bf16.mxu0 %vm1335_vm0, %v16120_v53  ;;  %18694 = vst [vmem:[#allocation45_spill] sm:$0xff] %v16146_v0  ;;  %v7104_v7 = vor.u32 %v7103_v52, %v7100_v55  ;;  %v7124_v11 = vrot.slane %v7122_v35, 4  ;;  %v7135_v63 = vshrl.u32 %v16075_v34, 16  ;;  %v16151_v38 = vld [vmem:[#allocation2 + $0x11c] sm:$0x1] }
 0x21e   :  { %12466 = vmatmul.mubr.msk.bf16.gmra.mxu1 %vm1310_vm8, %v11481_v1  ;;  %v7141_v60 = vshll.u32 %v16081_v54, 16  ;;  %v7114_v44 = vor.u32 %v7113_v14, %v7109_v24  ;;  %v7119_v30 = vrot.slane %v7117_v19, 5  ;;  %v7127_v57 = vrot.slane %v7125_v20, 5  ;;  %v7411_v42 = vld [vmem:[#allocation2 + $0x120] sm:$0xe]  ;;  %v16153_v50 = vpop.f32.mrf.mxu1 }
 0x21f   :  { %v7133_v39 = vrot.slane %v7131_v12, 5  ;;  %18695 = vst [vmem:[#allocation47_spill] sm:$0xff] %v16153_v50  ;;  %v18697_v0 = vld [vmem:[#allocation51_spill] sm:$0xff]  ;;  %v7105_v55 = vrot.slane %v7104_v7, 4  ;;  %v7137_v52 = vrot.slane %v7135_v63, 4  ;;  %v11473_v34 = vrot.slane %v7410_v51, 9  ;;  %v16169_v50 = vpop.f32.mrf.mxu0 }
 0x220   :  { %v16159_v1 = vadd.f32 %v18698_v21, %v18697_v0  ;;  %v16161_v35 = vld [vmem:[#allocation2 + $0x124] sm:$0xf]  ;;  %v7115_v54 = vrot.slane %v7114_v44, 4  ;;  %v7128_v6 = vor.u32 %v7127_v57, %v7124_v11  ;;  %v7468_v19 = vrot.slane %v16137_v48, 5  ;;  %v16165_v14 = vld [vmem:[#allocation2 + $0x128] sm:$0x1]  ;;  %v16167_v20 = vpop.f32.mrf.mxu1 }
 0x221   :  { %v7471_v12 = vrot.slane %v16151_v38, 5  ;;  %18699 = vst [vmem:[#allocation51_spill] sm:$0xff] %v16167_v20  ;;  %18700 = vst [vmem:[#allocation21_spill] sm:$0xff] %v16169_v50  ;;  %v7110_v21 = vsel %vm13197_vm14, %v7105_v55, %v7109_v24  ;;  %v7138_v0 = vor.u32 %v7137_v52, %v7133_v39  ;;  %v7143_v7 = vrot.slane %v7141_v60, 5  ;;  %v7037_v63 = vld [vmem:[#allocation2 + $0x114] sm:$0xf]  ;;  %v16179_v20 = vpop.f32.mrf.mxu0 }
 0x222   :  { %v11474_v51 = vrot.slane %v7411_v42, 9  ;;  %v7120_v11 = vsel %vm13197_vm14, %v7115_v54, %v7119_v30  ;;  %v7129_v44 = vrot.slane %v7128_v6, 4  ;;  %v7469_v57 = vsel %vm13242_vm15, %v11473_v34, %v7468_v19  ;;  %v16177_v22 = vpop.f32.mrf.mxu1  ;;  %18702 = vst [vmem:[#allocation57_spill] sm:$0xff] %v16179_v20  ;;  %v18703_v42 = vld [vmem:[#allocation22_spill] sm:$0xff] }
 0x223   :  { %v7470_v2 = vrot.slane %v7468_v19, 4  ;;  %18701 = vst [vmem:[#allocation56_spill] sm:$0xff] %v16177_v22  ;;  %v11455_v50 = vcombine.low %v7110_v21, %v7120_v11  ;;  %v7139_v59 = vrot.slane %v7138_v0, 4  ;;  %v7475_v24 = vrot.slane %v16161_v35, 5  ;;  %v16193_v54 = vpop.f32.mrf.mxu0  ;;  %v7040_v11 = vld [vmem:[#allocation2 + $0x120] sm:$0xf] }
 0x224   :  { %v7478_v60 = vrot.slane %v16165_v14, 5  ;;  %v16185_v55 = vadd.f32 %v15783_v31, %v18703_v42  ;;  %v7134_v6 = vsel %vm13197_vm14, %v7129_v44, %v7133_v39  ;;  %v7146_v52 = vshrl.u32 %v7037_v63, 16  ;;  %v16191_v34 = vpop.f32.mrf.mxu1  ;;  %18705 = vst [vmem:[#allocation58_spill] sm:$0xff] %v16193_v54  ;;  %v18708_v22 = vld [vmem:[#allocation24_spill] sm:$0xff]  ;;  %v18724_v54 = vld [vmem:[#allocation35_spill] sm:$0xff] }
 0x225   :  { %v7472_v30 = vsel %vm13242_vm15, %v7470_v2, %v7471_v12  ;;  %18704 = vst [vmem:[#allocation22_spill] sm:$0xff] %v16191_v34  ;;  %12447 = vmatprep.mubr.msk.bf16.mxu0 %vm1310_vm8, %v11455_v50  ;;  %v7144_v19 = vsel %vm13197_vm14, %v7139_v59, %v7143_v7  ;;  %v7476_v31 = vsel %vm13242_vm15, %v11474_v51, %v7475_v24  ;;  %v7477_v0 = vrot.slane %v7475_v24, 4 }
 0x226   :  { %v11482_v21 = vcombine.low %v7469_v57, %v7472_v30  ;;  %v11456_v39 = vcombine.low %v7134_v6, %v7144_v19  ;;  %v7148_v44 = vrot.slane %v7146_v52, 4  ;;  %v7149_v42 = vshll.u32 %v7037_v63, 16  ;;  %v16201_v12 = vpop.f32.mrf.mxu1  ;;  %v16203_v34 = vpop.f32.mrf.mxu0  ;;  %v7412_v30 = vld [vmem:[#allocation2 + $0x12c] sm:$0xe] }
 0x227   :  { %v7155_v2 = vshll.u32 %v16137_v48, 16  ;;  %18706 = vst [vmem:[#allocation59_spill] sm:$0xff] %v16201_v12  ;;  %18707 = vst [vmem:[#allocation60_spill] sm:$0xff] %v16203_v34  ;;  %v16207_v50 = vadd.f32 %v15801_v36, %v18708_v22  ;;  %v7479_v59 = vsel %vm13242_vm15, %v7477_v0, %v7478_v60  ;;  %v7159_v7 = vshrl.u32 %v16137_v48, 16  ;;  %v18711_v22 = vld [vmem:[#allocation31_spill] sm:$0xff] }
 0x228   :  { %12469 = vmatprep.mubr.msk.bf16.mxu1 %vm1310_vm8, %v11482_v21  ;;  %v7165_v51 = vshll.u32 %v16151_v38, 16  ;;  %12448 = vmatmul.mubr.msk.bf16.gmra.mxu0 %vm1310_vm8, %v11456_v39  ;;  %v11483_v63 = vcombine.low %v7476_v31, %v7479_v59  ;;  %v7151_v57 = vrot.slane %v7149_v42, 5  ;;  %v7170_v6 = vshrl.u32 %v7040_v11, 16  ;;  %v16215_v52 = vpop.f32.mrf.mxu1  ;;  %v16217_v36 = vpop.f32.mrf.mxu0  ;;  %v16224_v38 = vld [vmem:[#allocation2 + $0x130] sm:$0xf] }
 0x229   :  { %v7157_v24 = vrot.slane %v7155_v2, 5  ;;  %18709 = vst [vmem:[#allocation24_spill] sm:$0xff] %v16215_v52  ;;  %18710 = vst [vmem:[#allocation61_spill] sm:$0xff] %v16217_v36  ;;  %v16221_v19 = vadd.f32 %v15814_v10, %v18711_v22  ;;  %v7161_v60 = vrot.slane %v7159_v7, 4  ;;  %v7173_v21 = vshll.u32 %v7040_v11, 16  ;;  %v18714_v36 = vld [vmem:[#allocation53_spill] sm:$0xff] }
 0x22a   :  { %v7179_v48 = vshll.u32 %v16161_v35, 16  ;;  %12470 = vmatmul.mubr.msk.bf16.gmra.mxu1 %vm1310_vm8, %v11483_v63  ;;  %v7152_v31 = vor.u32 %v7151_v57, %v7148_v44  ;;  %v7172_v0 = vrot.slane %v7170_v6, 4  ;;  %v7183_v39 = vshrl.u32 %v16161_v35, 16  ;;  %v16229_v2 = vld [vmem:[#allocation2 + $0x134] sm:$0x1]  ;;  %v16231_v59 = vpop.f32.mrf.mxu1  ;;  %v16233_v10 = vpop.f32.mrf.mxu0 }
 0x22b   :  { %v7189_v42 = vshll.u32 %v16165_v14, 16  ;;  %18712 = vst [vmem:[#allocation31_spill] sm:$0xff] %v16231_v59  ;;  %18713 = vst [vmem:[#allocation62_spill] sm:$0xff] %v16233_v10  ;;  %v7162_v7 = vor.u32 %v7161_v60, %v7157_v24  ;;  %v7167_v11 = vrot.slane %v7165_v51, 5  ;;  %v7175_v22 = vrot.slane %v7173_v21, 5 }
 0x22c   :  { %v7181_v52 = vrot.slane %v7179_v48, 5  ;;  %v1004_v12 = vld [vmem:[#allocation2 + $0x140] sm:$0x1]  ;;  %v16237_v63 = vadd.f32 %v15833_v23, %v18714_v36  ;;  %v7153_v44 = vrot.slane %v7152_v31, 4  ;;  %v7185_v57 = vrot.slane %v7183_v39, 4  ;;  %v16239_v6 = vpop.f32.mrf.mxu1  ;;  %v16241_v14 = vpop.f32.mrf.mxu0 }
 0x22d   :  { %v11475_v35 = vrot.slane %v7412_v30, 9  ;;  %18715 = vst [vmem:[#allocation53_spill] sm:$0xff] %v16239_v6  ;;  %18716 = vst [vmem:[#allocation63_spill] sm:$0xff] %v16241_v14  ;;  %v7163_v34 = vrot.slane %v7162_v7, 4  ;;  %v7176_v59 = vor.u32 %v7175_v22, %v7172_v0  ;;  %v7482_v10 = vrot.slane %v16224_v38, 5 }
 0x22e   :  { %v7485_v51 = vrot.slane %v16229_v2, 5  ;;  %v7047_v60 = vld [vmem:[#allocation2 + $0x13c] sm:$0xf]  ;;  %v7158_v21 = vsel %vm13197_vm14, %v7153_v44, %v7157_v24  ;;  %v7186_v48 = vor.u32 %v7185_v57, %v7181_v52  ;;  %v7191_v23 = vrot.slane %v7189_v42, 5  ;;  %v7043_v39 = vld [vmem:[#allocation2 + $0x12c] sm:$0xf]  ;;  %v16251_v6 = vpop.f32.mrf.mxu1  ;;  %v16253_v7 = vpop.f32.mrf.mxu0 }
 0x22f   :  { %v18717_v36 = vrot.slane %v15930_v29, 4  ;;  %18719 = vst [vmem:[#allocation64_spill] sm:$0xff] %v16251_v6  ;;  %18720 = vst [vmem:[#allocation65_spill] sm:$0xff] %v16253_v7  ;;  %v7168_v0 = vsel %vm13197_vm14, %v7163_v34, %v7167_v11  ;;  %v7177_v22 = vrot.slane %v7176_v59, 4  ;;  %v7483_v14 = vsel %vm13242_vm15, %v11475_v35, %v7482_v10  ;;  %v7413_v42 = vld [vmem:[#allocation2 + $0x138] sm:$0xe] }
 0x230   :  { %v7484_v24 = vrot.slane %v7482_v10, 4  ;;  %v18721_v44 = vld [vmem:[#allocation55_spill] sm:$0xff]  ;;  %v7187_v57 = vrot.slane %v7186_v48, 4  ;;  %v16263_v6 = vpop.f32.mrf.mxu1  ;;  %v16265_v7 = vpop.f32.mrf.mxu0  ;;  %v16269_v34 = vadd.f32 %v15862_v49, %v18724_v54  ;;  %v7194_v11 = vshrl.u32 %v7043_v39, 16 }
 0x231   :  { %v1005_v30 = vsel %vm13173_vm11, %v18717_v36, %v1004_v12  ;;  %v16261_v29 = vadd.f32 %v15849_v16, %v18721_v44  ;;  %v11457_v12 = vcombine.low %v7158_v21, %v7168_v0  ;;  %v7489_v36 = vrot.slane %v7047_v60, 5  ;;  %18722 = vst [vmem:[#allocation55_spill] sm:$0xff] %v16263_v6  ;;  %18723 = vst [vmem:[#allocation66_spill] sm:$0xff] %v16265_v7  ;;  %v7046_v16 = vld [vmem:[#allocation2 + $0x138] sm:$0xf] }
 0x232   :  { %1006 = vst [vmem:[#allocation2 + $0x140] sm:$0x1] %v1005_v30  ;;  %v7182_v59 = vsel %vm13197_vm14, %v7177_v22, %v7181_v52  ;;  %v7486_v10 = vsel %vm13242_vm15, %v7484_v24, %v7485_v51  ;;  %v7192_v35 = vsel %vm13197_vm14, %v7187_v57, %v7191_v23  ;;  %v18725_v21 = vld [vmem:[#allocation11_spill] sm:$0xff]  ;;  %v11476_v49 = vrot.slane %v7413_v42, 9  ;;  %v16282_v54 = vpop.f32.mrf.mxu1  ;;  %v16284_v0 = vpop.f32.mrf.mxu0 }
 0x233   :  { %12451 = vmatprep.mubr.msk.bf16.mxu0 %vm1310_vm8, %v11457_v12  ;;  %v16280_v48 = vadd.f32 %v15879_v37, %v18725_v21  ;;  %v11484_v30 = vcombine.low %v7483_v14, %v7486_v10  ;;  %18726 = vst [vmem:[#allocation35_spill] sm:$0xff] %v16282_v54  ;;  %18727 = vst [vmem:[#allocation11_spill] sm:$0xff] %v16284_v0  ;;  %v11458_v52 = vcombine.low %v7182_v59, %v7192_v35 }
 0x234   :  { %v7196_v22 = vrot.slane %v7194_v11, 4  ;;  %v7197_v51 = vshll.u32 %v7043_v39, 16  ;;  %v7203_v24 = vshll.u32 %v16224_v38, 16  ;;  %v7491_v44 = vrot.slane %v7489_v36, 4  ;;  %v16290_v57 = vpop.f32.mrf.mxu1  ;;  %v16292_v14 = vpop.f32.mrf.mxu0  ;;  %v7857_v11 = vld [vmem:[#allocation2 + $0xf0] sm:$0xf] }
 0x235   :  { %12473 = vmatprep.mubr.msk.bf16.mxu1 %vm1310_vm8, %v11484_v30  ;;  %v7207_v23 = vshrl.u32 %v16224_v38, 16  ;;  %v7213_v12 = vshll.u32 %v16229_v2, 16  ;;  %v7218_v37 = vshrl.u32 %v7046_v16, 16  ;;  %18728 = vst [vmem:[#allocation67_spill] sm:$0xff] %v16290_v57  ;;  %18729 = vst [vmem:[#allocation68_spill] sm:$0xff] %v16292_v14  ;;  %12452 = vmatmul.mubr.msk.bf16.gmra.mxu0 %vm1310_vm8, %v11458_v52  ;;  %v7221_v10 = vshll.u32 %v7046_v16, 16 }
 0x236   :  { %v7199_v42 = vrot.slane %v7197_v51, 5  ;;  %v7205_v59 = vrot.slane %v7203_v24, 5  ;;  %v7227_v39 = vshll.u32 %v7047_v60, 16  ;;  %v7490_v21 = vsel %vm13242_vm15, %v11476_v49, %v7489_v36  ;;  %v16297_v2 = vpop.f32.mrf.mxu1  ;;  %v16299_v6 = vpop.f32.mrf.mxu0 }
 0x237   :  { %v7209_v30 = vrot.slane %v7207_v23, 4  ;;  %v7220_v38 = vrot.slane %v7218_v37, 4  ;;  %v7231_v54 = vshrl.u32 %v7047_v60, 16  ;;  %18730 = vst [vmem:[#allocation69_spill] sm:$0xff] %v16297_v2  ;;  %v7223_v0 = vrot.slane %v7221_v10, 5 }
 0x238   :  { %v7200_v14 = vor.u32 %v7199_v42, %v7196_v22  ;;  %v7229_v52 = vrot.slane %v7227_v39, 5  ;;  %v7215_v24 = vrot.slane %v7213_v12, 5  ;;  %v16301_v20 = vpop.f32.mrf.mxu1  ;;  %v16303_v31 = vpop.f32.mrf.mxu0  ;;  %v16307_v23 = vld [vmem:[#allocation2 + $0xf4] sm:$0xf]  ;;  %v7882_v37 = vshrl.u32 %v7857_v11, 16 }
 0x239   :  { %v7048_v35 = vld [vmem:[#allocation2 + $0x140] sm:$0x1]  ;;  %v7210_v51 = vor.u32 %v7209_v30, %v7205_v59  ;;  %v7233_v16 = vrot.slane %v7231_v54, 4  ;;  %18731 = vst [vmem:[#allocation70_spill] sm:$0xff] %v16301_v20  ;;  %v7224_v49 = vor.u32 %v7223_v0, %v7220_v38  ;;  %v16309_v39 = vld [vmem:[#allocation2 + $0xf8] sm:$0x1] }
 0x23a   :  { %v7492_v57 = vrot.slane %v7048_v35, 5  ;;  %v7237_v7 = vshll.u32 %v7048_v35, 16  ;;  %v7201_v60 = vrot.slane %v7200_v14, 4  ;;  %v16311_v54 = vpop.f32.mrf.mxu1  ;;  %v16313_v12 = vpop.f32.mrf.mxu0  ;;  %v7860_v38 = vld [vmem:[#allocation2 + $0xfc] sm:$0xf] }
 0x23b   :  { %v7211_v22 = vrot.slane %v7210_v51, 4  ;;  %v7234_v42 = vor.u32 %v7233_v16, %v7229_v52  ;;  %18732 = vst [vmem:[#allocation71_spill] sm:$0xff] %v16311_v54  ;;  %18733 = vst [vmem:[#allocation72_spill] sm:$0xff] %v16313_v12  ;;  %v7225_v30 = vrot.slane %v7224_v49, 4  ;;  %v7906_v54 = vshrl.u32 %v7860_v38, 16 }
 0x23c   :  { %v7493_v36 = vsel %vm13242_vm15, %v7491_v44, %v7492_v57  ;;  %v7239_v10 = vrot.slane %v7237_v7, 5  ;;  %v7206_v35 = vsel %vm13197_vm14, %v7201_v60, %v7205_v59  ;;  %v7884_v44 = vrot.slane %v7882_v37, 4  ;;  %v16322_v51 = vpop.f32.mrf.mxu1  ;;  %v16327_v60 = vld [vmem:[#allocation2 + $0x100] sm:$0xf] }
 0x23d   :  { %v11485_v2 = vcombine.low %v7490_v21, %v7493_v36  ;;  %v7885_v57 = vshll.u32 %v7857_v11, 16  ;;  %v7216_v0 = vsel %vm13197_vm14, %v7211_v22, %v7215_v24  ;;  %v7235_v14 = vrot.slane %v7234_v42, 4  ;;  %18734 = vst [vmem:[#allocation73_spill] sm:$0xff] %v16322_v51  ;;  %v16335_v42 = vld [vmem:[#allocation2 + $0x104] sm:$0x1] }
 0x23e   :  { %v7891_v7 = vshll.u32 %v16307_v23, 16  ;;  %v7895_v21 = vshrl.u32 %v16307_v23, 16  ;;  %v11459_v16 = vcombine.low %v7206_v35, %v7216_v0  ;;  %v7230_v59 = vsel %vm13197_vm14, %v7225_v30, %v7229_v52  ;;  %v12788_v35 = vld [vmem:[#allocation2 + $0xf0] sm:$0xff]   ;;  %v16337_v0 = vpop.f32.mrf.mxu1  ;;  %v16339_v52 = vpop.f32.mrf.mxu0 }
 0x23f   :  { %12474 = vmatmul.mubr.msk.bf16.gmra.mxu1 %vm1310_vm8, %v11485_v2  ;;  %v7887_v36 = vrot.slane %v7885_v57, 5  ;;  %v7901_v11 = vshll.u32 %v16309_v39, 16  ;;  %v18735_v2 = vld [vmem:[#allocation37_spill] sm:$0xff]  ;;  %v7240_v49 = vsel %vm13197_vm14, %v7235_v14, %v7239_v10  ;;  %18737 = vst [vmem:[#allocation74_spill] sm:$0xff] %v16339_v52  ;;  %v7915_v20 = vshll.u32 %v16327_v60, 16  ;;  %v18743_v52 = vld [vmem:[#allocation23_spill] sm:$0xff] }
 0x240   :  { %v16331_v24 = vadd.f32 %v15900_v13, %v18735_v2  ;;  %v7893_v37 = vrot.slane %v7891_v7, 5  ;;  %v7897_v22 = vrot.slane %v7895_v21, 4  ;;  %18736 = vst [vmem:[#allocation37_spill] sm:$0xff] %v16337_v0  ;;  %12455 = vmatprep.mubr.msk.bf16.mxu0 %vm1310_vm8, %v11459_v16  ;;  %v11460_v30 = vcombine.low %v7230_v59, %v7240_v49  ;;  %v16344_v14 = vpop.f32.mrf.mxu1  ;;  %v16346_v7 = vpop.f32.mrf.mxu0  ;;  %v18740_v21 = vld [vmem:[#allocation39_spill] sm:$0xff] }
 0x241   :  { %v7888_v57 = vor.u32 %v7887_v36, %v7884_v44  ;;  %v7903_v51 = vrot.slane %v7901_v11, 5  ;;  %v7909_v2 = vshll.u32 %v7860_v38, 16  ;;  %v7919_v10 = vshrl.u32 %v16327_v60, 16  ;;  %18738 = vst [vmem:[#allocation75_spill] sm:$0xff] %v16344_v14  ;;  %18739 = vst [vmem:[#allocation76_spill] sm:$0xff] %v16346_v7 }
 0x242   :  { %v7898_v13 = vor.u32 %v7897_v22, %v7893_v37  ;;  %v16350_v0 = vadd.f32 %v15910_v27, %v18740_v21  ;;  %12456 = vmatmul.mubr.msk.bf16.gmra.mxu0 %vm1310_vm8, %v11460_v30  ;;  %v7908_v44 = vrot.slane %v7906_v54, 4  ;;  %v7925_v59 = vshll.u32 %v16335_v42, 16  ;;  %v7863_v22 = vld [vmem:[#allocation2 + $0x108] sm:$0xf]  ;;  %v16355_v14 = vpop.f32.mrf.mxu1  ;;  %v16357_v7 = vpop.f32.mrf.mxu0 }
 0x243   :  { %v7889_v16 = vrot.slane %v7888_v57, 4  ;;  %v7911_v38 = vrot.slane %v7909_v2, 5  ;;  %v7917_v11 = vrot.slane %v7915_v20, 5  ;;  %v7921_v49 = vrot.slane %v7919_v10, 4  ;;  %12479 = vmatprep.mubr.msk.bf16.mxu0 %vm1310_vm8, %v12788_v35  ;;  %18741 = vst [vmem:[#allocation39_spill] sm:$0xff] %v16355_v14  ;;  %18742 = vst [vmem:[#allocation77_spill] sm:$0xff] %v16357_v7 }
 0x244   :  { %v7899_v36 = vrot.slane %v7898_v13, 4  ;;  %v16361_v27 = vadd.f32 %v15924_v18, %v18743_v52  ;;  %v18744_v30 = vld [vmem:[#allocation41_spill] sm:$0xff]  ;;  %v7927_v20 = vrot.slane %v7925_v59, 5  ;;  %v4326_v21 = vadd.f32 %v15847_v8, %v16141_v4  ;;  %v16377_v52 = vpop.f32.mrf.mxu1  ;;  %v12789_v14 = vld [vmem:[#allocation2 + $0xfc] sm:$0xff]   ;;  %v7866_v4 = vld [vmem:[#allocation2 + $0x114] sm:$0xf] }
 0x245   :  { %v16365_v54 = vadd.f32 %v15937_v46, %v18744_v30  ;;  %v7894_v57 = vsel %vm13197_vm14, %v7889_v16, %v7893_v37  ;;  %v16369_v13 = vld [vmem:[#allocation2 + $0x10c] sm:$0xf]  ;;  %v7912_v2 = vor.u32 %v7911_v38, %v7908_v44  ;;  %v7922_v10 = vor.u32 %v7921_v49, %v7917_v11  ;;  %v16375_v18 = vld [vmem:[#allocation2 + $0x110] sm:$0x1]  ;;  %18745 = vst [vmem:[#allocation23_spill] sm:$0xff] %v16377_v52  ;;  %v16379_v46 = vpop.f32.mrf.mxu0  ;;  %v18753_v7 = vld [vmem:[#allocation46_spill] sm:$0xff] }
 0x246   :  { %v7904_v35 = vsel %vm13197_vm14, %v7899_v36, %v7903_v51  ;;  %18746 = vst [vmem:[#allocation41_spill] sm:$0xff] %v16379_v46  ;;  %v16383_v37 = vsel %vm1335_vm0, %v16120_v53, 0  ;;  %v7930_v16 = vshrl.u32 %v7863_v22, 16  ;;  %v7933_v59 = vshll.u32 %v7863_v22, 16  ;;  %v12790_v38 = vld [vmem:[#allocation2 + $0x108] sm:$0xff]   ;;  %v16389_v49 = vpop.f32.mrf.mxu1 }
 0x247   :  { %v11512_v30 = vcombine.low %v7894_v57, %v7904_v35  ;;  %18747 = vst [vmem:[#allocation78_spill] sm:$0xff] %v16383_v37  ;;  %v7913_v51 = vrot.slane %v7912_v2, 4  ;;  %v7923_v44 = vrot.slane %v7922_v10, 4  ;;  %v16386_v36 = vadd.f32 %v15998_v33, %v4326_v21  ;;  %18748 = vst [vmem:[#allocation79_spill] sm:$0xff] %v16389_v49  ;;  %v16391_v52 = vpop.f32.mrf.mxu0  ;;  %v16396_v2 = vld [vmem:[#allocation2 + $0x118] sm:$0xf] }
 0x248   :  { %v7939_v8 = vshll.u32 %v16369_v13, 16  ;;  %18749 = vst [vmem:[#allocation80_spill] sm:$0xff] %v16391_v52  ;;  %v7932_v57 = vrot.slane %v7930_v16, 4  ;;  %v7935_v53 = vrot.slane %v7933_v59, 5  ;;  %v7943_v35 = vshrl.u32 %v16369_v13, 16  ;;  %v18750_v33 = vld [vmem:[#allocation26_spill] sm:$0xff]  ;;  %v16408_v16 = vpop.f32.mrf.mxu1 }
 0x249   :  { %12497 = vmatprep.mubr.msk.bf16.mxu1 %vm1310_vm8, %v11512_v30  ;;  %v7949_v22 = vshll.u32 %v16375_v18, 16  ;;  %v16400_v10 = vadd.f32 %v15953_v15, %v18750_v33  ;;  %v7918_v21 = vsel %vm13197_vm14, %v7913_v51, %v7917_v11  ;;  %v7928_v52 = vsel %vm13197_vm14, %v7923_v44, %v7927_v20  ;;  %v16406_v30 = vld [vmem:[#allocation2 + $0x11c] sm:$0x1]  ;;  %18751 = vst [vmem:[#allocation26_spill] sm:$0xff] %v16408_v16  ;;  %v16410_v59 = vpop.f32.mrf.mxu0 }
 0x24a   :  { %v7941_v49 = vrot.slane %v7939_v8, 5  ;;  %18752 = vst [vmem:[#allocation81_spill] sm:$0xff] %v16410_v59  ;;  %v11513_v46 = vcombine.low %v7918_v21, %v7928_v52  ;;  %v4328_v12 = vadd.f32 %v18753_v7, %v16124_v17  ;;  %12480 = vmatmul.mubr.msk.bf16.vlgmr.msra.gmra.mxu0 %vm1310_vm8, %v12789_v14  ;;  %v7936_v15 = vor.u32 %v7935_v53, %v7932_v57  ;;  %v16418_v8 = vpop.f32.mrf.mxu1  ;;  %v18756_v57 = vld [vmem:[#allocation13_spill] sm:$0xff]  ;;  %v18757_v53 = vld [vmem:[#allocation19_spill] sm:$0xff] }
 0x24b   :  { %v7945_v33 = vrot.slane %v7943_v35, 4  ;;  %12514 = vmatpush3.bf16.msra.mxu0 %v16383_v37  ;;  %v7951_v11 = vrot.slane %v7949_v22, 5  ;;  %v7954_v51 = vshrl.u32 %v7866_v4, 16  ;;  %v7957_v20 = vshll.u32 %v7866_v4, 16  ;;  %12483 = vmatprep.mubr.msk.bf16.mxu0 %vm1310_vm8, %v12790_v38  ;;  %18754 = vst [vmem:[#allocation46_spill] sm:$0xff] %v16418_v8  ;;  %v16420_v16 = vpop.f32.mrf.mxu0 }
 0x24c   :  { %v7963_v44 = vshll.u32 %v16396_v2, 16  ;;  %18755 = vst [vmem:[#allocation82_spill] sm:$0xff] %v16420_v16  ;;  %12498 = vmatmul.mubr.msk.bf16.vlgmr.msra.gmra.mxu1 %vm1310_vm8, %v11513_v46  ;;  %v7937_v17 = vrot.slane %v7936_v15, 4  ;;  %v7967_v14 = vshrl.u32 %v16396_v2, 16  ;;  %v7973_v52 = vshll.u32 %v16406_v30, 16  ;;  %v16434_v15 = vpop.f32.mrf.mxu1 }
 0x24d   :  { %v7946_v7 = vor.u32 %v7945_v33, %v7941_v49  ;;  %v12831_v4 = vld [vmem:[%s18407_s1] sm:$0x3]  ;;  %v16431_v38 = vadd.f32 %v15967_v3, %v18756_v57  ;;  %12532 = vmatpush3.bf16.msra.mxu1 %v18757_v53  ;;  %v7956_v35 = vrot.slane %v7954_v51, 4  ;;  %v7959_v46 = vrot.slane %v7957_v20, 5  ;;  %18758 = vst [vmem:[#allocation13_spill] sm:$0xff] %v16434_v15  ;;  %v16436_v33 = vpop.f32.mrf.mxu0  ;;  %v12791_v3 = vld [vmem:[#allocation2 + $0x114] sm:$0xff]  }
 0x24e   :  { %12721 = vmatprep.subr.msk.bf16.mxu0 %vm1335_vm0, %v12831_v4  ;;  %v7965_v22 = vrot.slane %v7963_v44, 5  ;;  %v7869_v21 = vld [vmem:[#allocation2 + $0x120] sm:$0xf]  ;;  %18759 = vst [vmem:[#allocation19_spill] sm:$0xff] %v16436_v33  ;;  %v16439_v37 = vadd.f32 %v15982_v41, %v4328_v12  ;;  %v7942_v4 = vsel %vm13197_vm14, %v7937_v17, %v7941_v49  ;;  %v7969_v16 = vrot.slane %v7967_v14, 4  ;;  %v16453_v17 = vpop.f32.mrf.mxu1 }
 0x24f   :  { %v7947_v8 = vrot.slane %v7946_v7, 4  ;;  %v12832_v51 = vld [vmem:[%s18407_s1 + $0x4] sm:$0x3]  ;;  %v4329_v20 = vadd.f32 %v15860_v61, %v16159_v1  ;;  %v7960_v44 = vor.u32 %v7959_v46, %v7956_v35  ;;  %v7975_v57 = vrot.slane %v7973_v52, 5  ;;  %18760 = vst [vmem:[#allocation83_spill] sm:$0xff] %v16453_v17  ;;  %v16455_v7 = vpop.f32.mrf.mxu0 }
 0x250   :  { %12722 = vmatprep.subr.msk.bf16.mxu1 %vm1335_vm0, %v12832_v51  ;;  %v4327_v41 = vadd.f32 %v15877_v5, %v16185_v55  ;;  %v16451_v12 = vld [vmem:[#allocation2 + $0x124] sm:$0xf]  ;;  %18761 = vst [vmem:[#allocation84_spill] sm:$0xff] %v16455_v7  ;;  %v7970_v53 = vor.u32 %v7969_v16, %v7965_v22  ;;  %v16459_v51 = vld [vmem:[#allocation2 + $0x128] sm:$0x1]  ;;  %v7978_v15 = vshrl.u32 %v7869_v21, 16  ;;  %v16467_v46 = vpop.f32.mrf.mxu1 }
 0x251   :  { %v12792_v49 = vld [vmem:[#allocation2 + $0x120] sm:$0xff]   ;;  %v7952_v14 = vsel %vm13197_vm14, %v7947_v8, %v7951_v11  ;;  %v7981_v61 = vshll.u32 %v7869_v21, 16  ;;  %v16462_v52 = vadd.f32 %v16013_v47, %v4329_v20  ;;  %v7961_v5 = vrot.slane %v7960_v44, 4  ;;  %v7872_v35 = vld [vmem:[#allocation2 + $0x12c] sm:$0xf]  ;;  %18762 = vst [vmem:[#allocation85_spill] sm:$0xff] %v16467_v46  ;;  %v16469_v7 = vpop.f32.mrf.mxu0 }
 0x252   :  { %v11514_v1 = vcombine.low %v7942_v4, %v7952_v14  ;;  %v16465_v55 = vadd.f32 %v16023_v25, %v4327_v41  ;;  %18763 = vst [vmem:[#allocation86_spill] sm:$0xff] %v16469_v7  ;;  %v7971_v33 = vrot.slane %v7970_v53, 4  ;;  %12484 = vmatmul.mubr.msk.bf16.gmra.mxu0 %vm1310_vm8, %v12791_v3  ;;  %v7980_v16 = vrot.slane %v7978_v15, 4  ;;  %v18764_v25 = vld [vmem:[#allocation30_spill] sm:$0xff]  ;;  %v16483_v15 = vpop.f32.mrf.mxu1 }
 0x253   :  { %v7983_v11 = vrot.slane %v7981_v61, 5  ;;  %v7987_v8 = vshll.u32 %v16451_v12, 16  ;;  %v7966_v47 = vsel %vm13197_vm14, %v7961_v5, %v7965_v22  ;;  %v4332_v21 = vadd.f32 %v18764_v25, %v16207_v50  ;;  %v16480_v44 = vld [vmem:[#allocation2 + $0x130] sm:$0xf]  ;;  %12487 = vmatprep.mubr.msk.bf16.mxu0 %vm1310_vm8, %v12792_v49  ;;  %18765 = vst [vmem:[#allocation30_spill] sm:$0xff] %v16483_v15  ;;  %v16485_v3 = vpop.f32.mrf.mxu0 }
 0x254   :  { %12501 = vmatprep.mubr.msk.bf16.mxu1 %vm1310_vm8, %v11514_v1  ;;  %v7991_v4 = vshrl.u32 %v16451_v12, 16  ;;  %v7997_v20 = vshll.u32 %v16459_v51, 16  ;;  %18766 = vst [vmem:[#allocation87_spill] sm:$0xff] %v16485_v3  ;;  %v7976_v41 = vsel %vm13197_vm14, %v7971_v33, %v7975_v57  ;;  %v16489_v53 = vld [vmem:[#allocation2 + $0x134] sm:$0x1]  ;;  %v8002_v50 = vshrl.u32 %v7872_v35, 16  ;;  %v16495_v25 = vpop.f32.mrf.mxu1 }
 0x255   :  { %v7984_v14 = vor.u32 %v7983_v11, %v7980_v16  ;;  %v7989_v22 = vrot.slane %v7987_v8, 5  ;;  %v11515_v61 = vcombine.low %v7966_v47, %v7976_v41  ;;  %v4330_v1 = vadd.f32 %v15908_v43, %v16221_v19  ;;  %18767 = vst [vmem:[#allocation88_spill] sm:$0xff] %v16495_v25  ;;  %v12793_v57 = vld [vmem:[#allocation2 + $0x12c] sm:$0xff]   ;;  %v16498_v16 = vpop.f32.mrf.mxu0  ;;  %v7875_v47 = vld [vmem:[#allocation2 + $0x138] sm:$0xf] }
 0x256   :  { %v7993_v5 = vrot.slane %v7991_v4, 4  ;;  %v4333_v49 = vadd.f32 %v15922_v28, %v16237_v63  ;;  %v8004_v3 = vrot.slane %v8002_v50, 4  ;;  %v8005_v15 = vshll.u32 %v7872_v35, 16  ;;  %18768 = vst [vmem:[#allocation89_spill] sm:$0xff] %v16498_v16  ;;  %v12794_v28 = vld [vmem:[#allocation2 + $0x138] sm:$0xff]   ;;  %v16503_v63 = vpop.f32.mrf.mxu1 }
 0x257   :  { %v7985_v7 = vrot.slane %v7984_v14, 4  ;;  %v8011_v33 = vshll.u32 %v16480_v44, 16  ;;  %12502 = vmatmul.mubr.msk.bf16.gmra.mxu1 %vm1310_vm8, %v11515_v61  ;;  %v7999_v8 = vrot.slane %v7997_v20, 5  ;;  %v8015_v43 = vshrl.u32 %v16480_v44, 16  ;;  %18769 = vst [vmem:[#allocation90_spill] sm:$0xff] %v16503_v63 }
 0x258   :  { %v7994_v11 = vor.u32 %v7993_v5, %v7989_v22  ;;  %v8021_v19 = vshll.u32 %v16489_v53, 16  ;;  %v16506_v4 = vadd.f32 %v16032_v9, %v4332_v21  ;;  %v16509_v35 = vadd.f32 %v16044_v62, %v4330_v1  ;;  %v16511_v50 = vld [vmem:[#allocation2 + $0x13c] sm:$0xf]  ;;  %v16518_v25 = vpop.f32.mrf.mxu1  ;;  %v16527_v1 = vld [vmem:[#allocation2 + $0x140] sm:$0x1] }
 0x259   :  { %v8007_v41 = vrot.slane %v8005_v15, 5  ;;  %v8013_v14 = vrot.slane %v8011_v33, 5  ;;  %v7990_v20 = vsel %vm13197_vm14, %v7985_v7, %v7989_v22  ;;  %v16516_v5 = vadd.f32 %v16050_v56, %v4333_v49  ;;  %18770 = vst [vmem:[#allocation91_spill] sm:$0xff] %v16518_v25  ;;  %v16523_v15 = vpop.f32.mrf.mxu0 }
 0x25a   :  { %v7995_v61 = vrot.slane %v7994_v11, 4  ;;  %v8017_v16 = vrot.slane %v8015_v43, 4  ;;  %v8023_v9 = vrot.slane %v8021_v19, 5  ;;  %v4331_v62 = vadd.f32 %v15935_v45, %v16261_v29  ;;  %12488 = vmatmul.mubr.msk.bf16.gmra.mxu0 %vm1310_vm8, %v12793_v57  ;;  %18771 = vst [vmem:[#allocation92_spill] sm:$0xff] %v16523_v15  ;;  %v16534_v45 = vpop.f32.mrf.mxu1 }
 0x25b   :  { %v8008_v63 = vor.u32 %v8007_v41, %v8004_v3  ;;  %v8026_v21 = vshrl.u32 %v7875_v47, 16  ;;  %v8029_v56 = vshll.u32 %v7875_v47, 16  ;;  %v8035_v49 = vshll.u32 %v16511_v50, 16  ;;  %v174_v3 = vld [vmem:[%s18406_s0 + $0xc0] sm:$0xf]  ;;  %12491 = vmatprep.mubr.msk.bf16.mxu0 %vm1310_vm8, %v12794_v28  ;;  %18772 = vst [vmem:[#allocation93_spill] sm:$0xff] %v16534_v45 }
 0x25c   :  { %v8000_v7 = vsel %vm13197_vm14, %v7995_v61, %v7999_v8  ;;  %v8018_v22 = vor.u32 %v8017_v16, %v8013_v14  ;;  %v4336_v57 = vadd.f32 %v15951_v32, %v16269_v34  ;;  %v8039_v19 = vshrl.u32 %v16511_v50, 16  ;;  %v16539_v47 = vpop.f32.mrf.mxu1  ;;  %v175_v32 = vld [vmem:[%s18406_s0 + $0xc4] sm:$0xf] }
 0x25d   :  { %v11516_v29 = vcombine.low %v7990_v20, %v8000_v7  ;;  %v8009_v33 = vrot.slane %v8008_v63, 4  ;;  %v8028_v11 = vrot.slane %v8026_v21, 4  ;;  %v8031_v8 = vrot.slane %v8029_v56, 5  ;;  %18773 = vst [vmem:[#allocation94_spill] sm:$0xff] %v16539_v47  ;;  %v16551_v20 = vpop.f32.mrf.mxu0 }
 0x25e   :  { %v8019_v16 = vrot.slane %v8018_v22, 4  ;;  %v8037_v43 = vrot.slane %v8035_v49, 5  ;;  %v16545_v41 = vadd.f32 %v16056_v26, %v4331_v62  ;;  %v8045_v63 = vshll.u32 %v16527_v1, 16  ;;  %18774 = vst [vmem:[#allocation95_spill] sm:$0xff] %v16551_v20  ;;  %v16555_v56 = vpop.f32.mrf.mxu1  ;;  %v18776_v26 = vld [vmem:[#allocation27_spill] sm:$0xff] }
 0x25f   :  { %12505 = vmatprep.mubr.msk.bf16.mxu1 %vm1310_vm8, %v11516_v29  ;;  %v8014_v28 = vsel %vm13197_vm14, %v8009_v33, %v8013_v14  ;;  %v602_v34 = vshrl.u32 %v174_v3, 16  ;;  %v8032_v21 = vor.u32 %v8031_v8, %v8028_v11  ;;  %v8041_v7 = vrot.slane %v8039_v19, 4  ;;  %18775 = vst [vmem:[#allocation96_spill] sm:$0xff] %v16555_v56  ;;  %v1007_v33 = vld [vmem:[#allocation2 + $0x144] sm:$0xf]  ;;  %v18779_v11 = vld [vmem:[#allocation10_spill] sm:$0xff] }
 0x260   :  { %v8024_v61 = vsel %vm13197_vm14, %v8019_v16, %v8023_v9  ;;  %v605_v22 = vshll.u32 %v174_v3, 16  ;;  %v4334_v62 = vadd.f32 %v18776_v26, %v16280_v48  ;;  %v8047_v49 = vrot.slane %v8045_v63, 5  ;;  %v8546_v20 = vld [vmem:[#allocation2 + $0x138] sm:$0xf]  ;;  %v16559_v46 = vpop.f32.mrf.mxu1  ;;  %v18778_v9 = vld [vmem:[#allocation33_spill] sm:$0xff]  ;;  %v18780_v48 = vld [vmem:[#allocation48_spill] sm:$0xff] }
 0x261   :  { %v11517_v14 = vcombine.low %v8014_v28, %v8024_v61  ;;  %v604_v29 = vrot.slane %v602_v34, 7  ;;  %v8033_v47 = vrot.slane %v8032_v21, 4  ;;  %v8042_v15 = vor.u32 %v8041_v7, %v8037_v43  ;;  %18777 = vst [vmem:[#allocation27_spill] sm:$0xff] %v16559_v46  ;;  %v16570_v28 = vpop.f32.mrf.mxu0  ;;  %v16574_v21 = vld [vmem:[#allocation2 + $0x13c] sm:$0xf] }
 0x262   :  { %v610_v45 = vshrl.u32 %v175_v32, 16  ;;  %v613_v25 = vshll.u32 %v175_v32, 16  ;;  %v16563_v3 = vadd.f32 %v18778_v9, %v4336_v57  ;;  %v16566_v16 = vadd.f32 %v18779_v11, %v4334_v62  ;;  %18781 = vst [vmem:[#allocation33_spill] sm:$0xff] %v16570_v28  ;;  %v16576_v7 = vpop.f32.mrf.mxu1  ;;  %v18783_v57 = vld [vmem:[#allocation34_spill] sm:$0xff]  ;;  %v16585_v11 = vld [vmem:[#allocation2 + $0x140] sm:$0x1] }
 0x263   :  { %12506 = vmatmul.mubr.msk.bf16.gmra.mxu1 %vm1310_vm8, %v11517_v14  ;;  %v4337_v8 = vadd.f32 %v18780_v48, %v16331_v24  ;;  %v607_v19 = vor.u32 %v605_v22, %v604_v29  ;;  %v8038_v63 = vsel %vm13197_vm14, %v8033_v47, %v8037_v43  ;;  %v8043_v32 = vrot.slane %v8042_v15, 4  ;;  %18782 = vst [vmem:[#allocation10_spill] sm:$0xff] %v16576_v7  ;;  %v1011_v24 = vld [vmem:[#allocation2 + $0x14c] sm:$0x1] }
 0x264   :  { %v608_v34 = vrot.slane %v604_v29, 4  ;;  %v612_v61 = vrot.slane %v610_v45, 7  ;;  %v18785_v22 = vld [vmem:[#allocation49_spill] sm:$0xff]  ;;  %v8571_v43 = vshrl.u32 %v8546_v20, 16  ;;  %v8580_v7 = vshll.u32 %v16574_v21, 16 }
 0x265   :  { %v16579_v14 = vadd.f32 %v18783_v57, %v4337_v8  ;;  %v1008_v62 = vsel %vm13157_vm10, %v607_v19, %v1007_v33  ;;  %v4335_v9 = vadd.f32 %v18785_v22, %v16350_v0  ;;  %v8048_v15 = vsel %vm13197_vm14, %v8043_v32, %v8047_v49  ;;  %v18786_v29 = vld [vmem:[#allocation25_spill] sm:$0xff]  ;;  %v16591_v8 = vpop.f32.mrf.mxu1  ;;  %v16594_v22 = vpop.f32.mrf.mxu0  ;;  %v12835_v49 = vld [vmem:[#allocation2 + $0x138] sm:$0xf] }
 0x266   :  { %v615_v45 = vor.u32 %v613_v25, %v612_v61  ;;  %v617_v47 = vrot.slane %v612_v61, 4  ;;  %1009 = vst [vmem:[#allocation2 + $0x144] sm:$0xf] %v1008_v62  ;;  %v4340_v48 = vadd.f32 %v18786_v29, %v16361_v27  ;;  %18787 = vst [vmem:[#allocation48_spill] sm:$0xff] %v16591_v8  ;;  %v11518_v57 = vcombine.low %v8038_v63, %v8048_v15  ;;  %v8238_v0 = vld [vmem:[#allocation2 + $0xf0] sm:$0xe] }
 0x267   :  { %v8573_v33 = vrot.slane %v8571_v43, 4  ;;  %v8574_v19 = vshll.u32 %v8546_v20, 16  ;;  %18788 = vst [vmem:[#allocation34_spill] sm:$0xff] %v16594_v22  ;;  %v8584_v32 = vshrl.u32 %v16574_v21, 16  ;;  %v8590_v27 = vshll.u32 %v16585_v11, 16  ;;  %v16602_v61 = vpop.f32.mrf.mxu1  ;;  %v18792_v20 = vld [vmem:[#allocation14_spill] sm:$0xff] }
 0x268   :  { %v616_v56 = vsel %vm13134_vm9, %v608_v34, %v615_v45  ;;  %v1012_v25 = vsel %vm13173_vm11, %v617_v47, %v1011_v24  ;;  %18791 = vst [vmem:[#allocation7_spill] sm:$0xff] %v16602_v61  ;;  %12509 = vmatprep.mubr.msk.bf16.mxu1 %vm1310_vm8, %v11518_v57  ;;  %v16607_v63 = vadd.f32 %v18792_v20, %v4335_v9  ;;  %v18793_v62 = vld [vmem:[#allocation28_spill] sm:$0xff]  ;;  %v16611_v15 = vrot.slane %v8580_v7, 5  ;;  %v16624_v7 = vpop.f32.mrf.mxu0 }
 0x269   :  { %1010 = vst.msk [vmem:[#allocation2 + $0x148] sm:$0xf] %vm16_vm1, %v616_v56  ;;  %1013 = vst [vmem:[#allocation2 + $0x14c] sm:$0x1] %v1012_v25  ;;  %v4338_v34 = vadd.f32 %v18793_v62, %v16365_v54  ;;  %v8576_v43 = vrot.slane %v8574_v19, 5  ;;  %v18794_v24 = vld [vmem:[#allocation12_spill] sm:$0xff]  ;;  %v16617_v57 = vpop.f32.mrf.mxu1 }
 0x26a   :  { %v16614_v45 = vadd.f32 %v18794_v24, %v4340_v48  ;;  %v8586_v47 = vrot.slane %v8584_v32, 4  ;;  %v11528_v29 = vrot.slane %v8238_v0, 9  ;;  %v8272_v61 = vrot.slane %v16307_v23, 5  ;;  %18795 = vst [vmem:[#allocation49_spill] sm:$0xff] %v16617_v57  ;;  %v18796_v25 = vld [vmem:[#allocation50_spill] sm:$0xff]  ;;  %v18797_v20 = vld [vmem:[#allocation52_spill] sm:$0xff] }
 0x26b   :  { %v8577_v56 = vor.u32 %v8576_v43, %v8573_v33  ;;  %v4341_v9 = vadd.f32 %v18796_v25, %v16400_v10  ;;  %v4339_v8 = vadd.f32 %v18797_v20, %v16431_v38  ;;  %v8275_v54 = vrot.slane %v16309_v39, 5  ;;  %18798 = vst [vmem:[#allocation25_spill] sm:$0xff] %v16624_v7  ;;  %v18799_v19 = vld [vmem:[#allocation21_spill] sm:$0xff]  ;;  %v8239_v62 = vld [vmem:[#allocation2 + $0xfc] sm:$0xe]  ;;  %v18803_v10 = vld [vmem:[#allocation58_spill] sm:$0xff]  ;;  %v16638_v38 = vpop.f32.mrf.mxu1 }
 0x26c   :  { %v16627_v48 = vadd.f32 %v18799_v19, %v4338_v34  ;;  %v8587_v0 = vor.u32 %v8586_v47, %v16611_v15  ;;  %v8592_v32 = vrot.slane %v8590_v27, 5  ;;  %v8274_v23 = vrot.slane %v8272_v61, 4  ;;  %v18801_v43 = vld [vmem:[#allocation57_spill] sm:$0xff]  ;;  %18805 = vst [vmem:[#allocation12_spill] sm:$0xff] %v16638_v38 }
 0x26d   :  { %v7878_v24 = vld [vmem:[#allocation2 + $0x144] sm:$0xf]  ;;  %v8578_v33 = vrot.slane %v8577_v56, 4  ;;  %v16631_v57 = vadd.f32 %v18801_v43, %v4341_v9  ;;  %v16634_v25 = vadd.f32 %v18803_v10, %v4339_v8  ;;  %v8273_v39 = vsel %vm13242_vm15, %v11528_v29, %v8272_v61  ;;  %v18807_v8 = vld [vmem:[#allocation29_spill] sm:$0xff]  ;;  %v16650_v61 = vpop.f32.mrf.mxu0 }
 0x26e   :  { %18800 = vst [vmem:[#allocation6_spill] sm:$0xff] %v16627_v48  ;;  %v8050_v34 = vshrl.u32 %v7878_v24, 16  ;;  %v8053_v20 = vshll.u32 %v7878_v24, 16  ;;  %v8588_v19 = vrot.slane %v8587_v0, 4  ;;  %v16640_v47 = vld [vmem:[#allocation2 + $0x144] sm:$0xf]  ;;  %v8276_v27 = vsel %vm13242_vm15, %v8274_v23, %v8275_v54 }
 0x26f   :  { %18802 = vst [vmem:[#allocation14_spill] sm:$0xff] %v16631_v57  ;;  %18804 = vst [vmem:[#allocation28_spill] sm:$0xff] %v16634_v25  ;;  %v8595_v56 = vshrl.u32 %v16640_v47, 16  ;;  %v8598_v9 = vshll.u32 %v16640_v47, 16  ;;  %v16648_v43 = vadd.f32 %v18807_v8, %v16439_v37  ;;  %v11529_v10 = vrot.slane %v8239_v62, 9  ;;  %v18809_v54 = vld [vmem:[#allocation42_spill] sm:$0xff] }
 0x270   :  { %18806 = vst [vmem:[#allocation50_spill] sm:$0xff] %v16640_v47  ;;  %18808 = vst [vmem:[#allocation52_spill] sm:$0xff] %v16650_v61  ;;  %v16652_v29 = vld [vmem:[#allocation2 + $0x148] sm:$0xf]  ;;  %v16654_v24 = vld [vmem:[#allocation2 + $0x14c] sm:$0x1]  ;;  %v11537_v7 = vcombine.low %v8273_v39, %v8276_v27  ;;  %v16658_v23 = vadd.f32 %v18809_v54, %v16386_v36  ;;  %v8583_v8 = vsel %vm13197_vm14, %v8578_v33, %v16611_v15  ;;  %v16666_v61 = vpop.f32.mrf.mxu1  ;;  %v16676_v15 = vpop.f32.mrf.mxu0 }
 0x271   :  { %v8052_v0 = vrot.slane %v8050_v34, 4  ;;  %v8055_v38 = vrot.slane %v8053_v20, 5  ;;  %v8059_v22 = vshll.u32 %v16652_v29, 16  ;;  %v8063_v28 = vshrl.u32 %v16652_v29, 16  ;;  %v12795_v62 = vld [vmem:[#allocation2 + $0x144] sm:$0xff]   ;;  %18810 = vst [vmem:[#allocation21_spill] sm:$0xff] %v16666_v61 }
 0x272   :  { %v8069_v37 = vshll.u32 %v16654_v24, 16  ;;  %v8593_v39 = vsel %vm13197_vm14, %v8588_v19, %v8592_v32  ;;  %v16670_v20 = vld [vmem:[#allocation2 + $0x148] sm:$0xf]  ;;  %v16672_v36 = vld [vmem:[#allocation2 + $0x14c] sm:$0x1]  ;;  %v8597_v27 = vrot.slane %v8595_v56, 4  ;;  %12492 = vmatmul.mubr.msk.bf16.gmra.mxu0 %vm1310_vm8, %v12795_v62  ;;  %v16691_v62 = vpop.f32.mrf.mxu1 }
 0x273   :  { %v8056_v34 = vor.u32 %v8055_v38, %v8052_v0  ;;  %18811 = vst [vmem:[#allocation57_spill] sm:$0xff] %v16670_v20  ;;  %18812 = vst [vmem:[#allocation58_spill] sm:$0xff] %v16672_v36  ;;  %v8600_v54 = vrot.slane %v8598_v9, 5  ;;  %v8061_v25 = vrot.slane %v8059_v22, 5  ;;  %v8065_v17 = vrot.slane %v8063_v28, 4  ;;  %12515 = vmatprep.mubr.msk.bf16.mxu0 %vm1310_vm8, %v11537_v7 }
 0x274   :  { %v8071_v59 = vrot.slane %v8069_v37, 5  ;;  %v8604_v47 = vshll.u32 %v16670_v20, 16  ;;  %18813 = vst [vmem:[#allocation29_spill] sm:$0xff] %v16676_v15  ;;  %v8608_v0 = vshrl.u32 %v16670_v20, 16  ;;  %v8614_v32 = vshll.u32 %v16672_v36, 16  ;;  %18814 = vst [vmem:[#allocation42_spill] sm:$0xff] %v16691_v62  ;;  %v16697_v15 = vpop.f32.mrf.mxu0 }
 0x275   :  { %v8057_v33 = vrot.slane %v8056_v34, 4  ;;  %v8601_v38 = vor.u32 %v8600_v54, %v8597_v27  ;;  %v176_v22 = vld [vmem:[%s18406_s0 + $0xc8] sm:$0xf]  ;;  %v8066_v28 = vor.u32 %v8065_v17, %v8061_v25  ;;  %v8279_v56 = vrot.slane %v16327_v60, 5  ;;  %v177_v37 = vld [vmem:[%s18406_s0 + $0xcc] sm:$0xf] }
 0x276   :  { %v16684_v19 = vrot.slane %v8604_v47, 5  ;;  %v8282_v9 = vrot.slane %v16335_v42, 5  ;;  %v11553_v34 = vcombine.low %v8583_v8, %v8593_v39  ;;  %v8610_v54 = vrot.slane %v8608_v0, 4  ;;  %18815 = vst [vmem:[#allocation97_spill] sm:$0xff] %v16697_v15  ;;  %v1018_v48 = vld [vmem:[#allocation2 + $0x158] sm:$0x1] }
 0x277   :  { %v8062_v7 = vsel %vm13197_vm14, %v8057_v33, %v8061_v25  ;;  %v8602_v27 = vrot.slane %v8601_v38, 4  ;;  %v8067_v61 = vrot.slane %v8066_v28, 4  ;;  %v8280_v17 = vsel %vm13242_vm15, %v11529_v10, %v8279_v56  ;;  %v178_v25 = vld [vmem:[%s18406_s0 + $0xd0] sm:$0xf]  ;;  %v16707_v38 = vpop.f32.mrf.mxu1 }
 0x278   :  { %v8281_v47 = vrot.slane %v8279_v56, 4  ;;  %v619_v60 = vshrl.u32 %v176_v22, 16  ;;  %v8611_v42 = vor.u32 %v8610_v54, %v16684_v19  ;;  %v8616_v36 = vrot.slane %v8614_v32, 5  ;;  %18816 = vst [vmem:[#allocation98_spill] sm:$0xff] %v16707_v38  ;;  %v179_v54 = vld [vmem:[%s18406_s0 + $0xd4] sm:$0xf] }
 0x279   :  { %v622_v20 = vshll.u32 %v176_v22, 16  ;;  %v627_v57 = vshrl.u32 %v177_v37, 16  ;;  %v8072_v8 = vsel %vm13197_vm14, %v8067_v61, %v8071_v59  ;;  %v630_v33 = vshll.u32 %v177_v37, 16  ;;  %v1014_v22 = vld [vmem:[#allocation2 + $0x150] sm:$0xf]  ;;  %v18817_v59 = vld [vmem:[#allocation43_spill] sm:$0xff] }
 0x27a   :  { %v8283_v39 = vsel %vm13242_vm15, %v8281_v47, %v8282_v9  ;;  %v621_v10 = vrot.slane %v619_v60, 7  ;;  %v11519_v0 = vcombine.low %v8062_v7, %v8072_v8  ;;  %v8612_v28 = vrot.slane %v8611_v42, 4  ;;  %v16714_v47 = vpop.f32.mrf.mxu0  ;;  %v18819_v60 = vld [vmem:[#allocation36_spill] sm:$0xff] }
 0x27b   :  { %v11538_v56 = vcombine.low %v8280_v17, %v8283_v39  ;;  %v629_v32 = vrot.slane %v627_v57, 7  ;;  %v4900_v61 = vadd.f32 %v18817_v59, %v16462_v52  ;;  %v636_v9 = vshrl.u32 %v178_v25, 16  ;;  %18818 = vst [vmem:[#allocation43_spill] sm:$0xff] %v16714_v47  ;;  %v1025_v59 = vld [vmem:[#allocation2 + $0x164] sm:$0x1] }
 0x27c   :  { %v624_v62 = vor.u32 %v622_v20, %v621_v10  ;;  %v625_v15 = vrot.slane %v621_v10, 4  ;;  %12510 = vmatmul.mubr.msk.bf16.gmra.mxu1 %vm1310_vm8, %v11519_v0  ;;  %v8607_v57 = vsel %vm13197_vm14, %v8602_v27, %v16684_v19  ;;  %v639_v17 = vshll.u32 %v178_v25, 16  ;;  %v8240_v20 = vld [vmem:[#allocation2 + $0x108] sm:$0xe]  ;;  %v16727_v10 = vpop.f32.mrf.mxu1  ;;  %v8241_v0 = vld [vmem:[#allocation2 + $0x114] sm:$0xe] }
 0x27d   :  { %12516 = vmatmul.mubr.msk.bf16.vlgmr.msra.gmra.mxu0 %vm1310_vm8, %v11538_v56  ;;  %v632_v37 = vor.u32 %v630_v33, %v629_v32  ;;  %v634_v7 = vrot.slane %v629_v32, 4  ;;  %12533 = vmatprep.mubr.msk.bf16.mxu1 %vm1310_vm8, %v11553_v34  ;;  %v8617_v52 = vsel %vm13197_vm14, %v8612_v28, %v8616_v36  ;;  %v638_v8 = vrot.slane %v636_v9, 7  ;;  %18820 = vst [vmem:[#allocation36_spill] sm:$0xff] %v16727_v10  ;;  %v18821_v19 = vld [vmem:[#allocation60_spill] sm:$0xff]  ;;  %v1021_v33 = vld [vmem:[#allocation2 + $0x15c] sm:$0xf]  ;;  %v16742_v32 = vpop.f32.mrf.mxu0 }
 0x27e   :  { %12550 = vmatpush3.bf16.msra.mxu0 %v18819_v60  ;;  %v1015_v42 = vsel %vm13157_vm10, %v624_v62, %v1014_v22  ;;  %v644_v39 = vshrl.u32 %v179_v54, 16  ;;  %v16731_v27 = vadd.f32 %v18821_v19, %v16648_v43  ;;  %v647_v34 = vshll.u32 %v179_v54, 16  ;;  %v12833_v62 = vld [vmem:[%s18407_s1 + $0x6] sm:$0x3]  ;;  %18822 = vst [vmem:[#allocation60_spill] sm:$0xff] %v16742_v32 }
 0x27f   :  { %v633_v25 = vsel %vm13134_vm9, %v625_v15, %v632_v37  ;;  %1016 = vst [vmem:[#allocation2 + $0x150] sm:$0xf] %v1015_v42  ;;  %v1019_v36 = vsel %vm13173_vm11, %v634_v7, %v1018_v48  ;;  %12723 = vmatprep.subr.msk.bf16.mxu0 %vm1335_vm0, %v12833_v62  ;;  %v641_v43 = vor.u32 %v639_v17, %v638_v8  ;;  %v642_v28 = vrot.slane %v638_v8, 4  ;;  %v18823_v48 = vld [vmem:[#allocation61_spill] sm:$0xff] }
 0x280   :  { %1017 = vst.msk [vmem:[#allocation2 + $0x154] sm:$0xf] %vm16_vm1, %v633_v25  ;;  %1020 = vst [vmem:[#allocation2 + $0x158] sm:$0x1] %v1019_v36  ;;  %v646_v56 = vrot.slane %v644_v39, 7  ;;  %v11530_v15 = vrot.slane %v8240_v20, 9  ;;  %v11554_v22 = vcombine.low %v8607_v57, %v8617_v52  ;;  %v16746_v54 = vadd.f32 %v18823_v48, %v16658_v23  ;;  %v16755_v57 = vpop.f32.mrf.mxu1 }
 0x281   :  { %v8286_v9 = vrot.slane %v16369_v13, 5  ;;  %v8289_v37 = vrot.slane %v16375_v18, 5  ;;  %v1022_v17 = vsel %vm13157_vm10, %v641_v43, %v1021_v33  ;;  %v11531_v42 = vrot.slane %v8241_v0, 9  ;;  %v180_v20 = vld [vmem:[%s18406_s0 + $0xd8] sm:$0xf]  ;;  %18824 = vst [vmem:[#allocation61_spill] sm:$0xff] %v16755_v57  ;;  %v16773_v33 = vpop.f32.mrf.mxu0 }
 0x282   :  { %v649_v7 = vor.u32 %v647_v34, %v646_v56  ;;  %v651_v60 = vrot.slane %v646_v56, 4  ;;  %v18825_v52 = vld [vmem:[#allocation62_spill] sm:$0xff]  ;;  %1023 = vst [vmem:[#allocation2 + $0x15c] sm:$0xf] %v1022_v17  ;;  %v8293_v8 = vrot.slane %v16396_v2, 5  ;;  %v8296_v34 = vrot.slane %v16406_v30, 5 }
 0x283   :  { %v16758_v23 = vadd.f32 %v18825_v52, %v4900_v61  ;;  %v8287_v13 = vsel %vm13242_vm15, %v11530_v15, %v8286_v9  ;;  %v8288_v18 = vrot.slane %v8286_v9, 4  ;;  %v181_v39 = vld [vmem:[%s18406_s0 + $0xdc] sm:$0xf]  ;;  %v18826_v61 = vld [vmem:[#allocation17_spill] sm:$0xff]  ;;  %18827 = vst [vmem:[#allocation62_spill] sm:$0xff] %v16773_v33  ;;  %v653_v43 = vshrl.u32 %v180_v20, 16 }
 0x284   :  { %v650_v19 = vsel %vm13134_vm9, %v642_v28, %v649_v7  ;;  %v1026_v25 = vsel %vm13173_vm11, %v651_v60, %v1025_v59  ;;  %v4898_v36 = vadd.f32 %v18826_v61, %v16465_v55  ;;  %12534 = vmatmul.mubr.msk.bf16.vlgmr.msra.gmra.mxu1 %vm1310_vm8, %v11554_v22  ;;  %v8294_v0 = vsel %vm13242_vm15, %v11531_v42, %v8293_v8  ;;  %v18828_v28 = vld [vmem:[#allocation32_spill] sm:$0xff]  ;;  %v18829_v30 = vld [vmem:[#allocation63_spill] sm:$0xff]  ;;  %v16787_v59 = vpop.f32.mrf.mxu1  ;;  %v18831_v17 = vld [vmem:[#allocation54_spill] sm:$0xff] }
 0x285   :  { %1024 = vst.msk [vmem:[#allocation2 + $0x160] sm:$0xf] %vm16_vm1, %v650_v19  ;;  %1027 = vst [vmem:[#allocation2 + $0x164] sm:$0x1] %v1026_v25  ;;  %v8290_v2 = vsel %vm13242_vm15, %v8288_v18, %v8289_v37  ;;  %v8295_v62 = vrot.slane %v8293_v8, 4  ;;  %12568 = vmatpush3.bf16.msra.mxu1 %v18828_v28  ;;  %v656_v22 = vshll.u32 %v180_v20, 16  ;;  %v16797_v42 = vadd.f32 %v18831_v17, %v16506_v4  ;;  %v16809_v4 = vpop.f32.mrf.mxu0 }
 0x286   :  { %v16782_v55 = vld [vmem:[#allocation2 + $0x150] sm:$0xf]  ;;  %v16785_v56 = vadd.f32 %v18829_v30, %v4898_v36  ;;  %v11539_v15 = vcombine.low %v8287_v13, %v8290_v2  ;;  %v661_v48 = vshrl.u32 %v181_v39, 16  ;;  %18830 = vst [vmem:[#allocation17_spill] sm:$0xff] %v16787_v59  ;;  %v12834_v20 = vld [vmem:[%s18407_s1 + $0x8] sm:$0x3] }
 0x287   :  { %v16789_v9 = vld [vmem:[#allocation2 + $0x154] sm:$0xf]  ;;  %v16791_v37 = vld [vmem:[#allocation2 + $0x158] sm:$0x1]  ;;  %v8619_v7 = vshrl.u32 %v16782_v55, 16  ;;  %v8622_v60 = vshll.u32 %v16782_v55, 16  ;;  %v8297_v52 = vsel %vm13242_vm15, %v8295_v62, %v8296_v34  ;;  %12724 = vmatprep.subr.msk.bf16.mxu1 %vm1335_vm0, %v12834_v20  ;;  %v16814_v20 = vpop.f32.mrf.mxu1 }
 0x288   :  { %v8628_v13 = vshll.u32 %v16789_v9, 16  ;;  %v8632_v18 = vshrl.u32 %v16789_v9, 16  ;;  %v8638_v8 = vshll.u32 %v16791_v37, 16  ;;  %12519 = vmatprep.mubr.msk.bf16.mxu0 %vm1310_vm8, %v11539_v15  ;;  %v11540_v19 = vcombine.low %v8294_v0, %v8297_v52  ;;  %18832 = vst [vmem:[#allocation32_spill] sm:$0xff] %v16809_v4  ;;  %18833 = vst [vmem:[#allocation63_spill] sm:$0xff] %v16814_v20 }
 0x289   :  { %v8621_v25 = vrot.slane %v8619_v7, 4  ;;  %v8624_v61 = vrot.slane %v8622_v60, 5  ;;  %v655_v36 = vrot.slane %v653_v43, 7  ;;  %v663_v34 = vrot.slane %v661_v48, 7  ;;  %v16811_v30 = vld [vmem:[#allocation2 + $0x15c] sm:$0xf] }
 0x28a   :  { %v8630_v2 = vrot.slane %v8628_v13, 5  ;;  %v8634_v62 = vrot.slane %v8632_v18, 4  ;;  %v8640_v28 = vrot.slane %v8638_v8, 5  ;;  %12520 = vmatmul.mubr.msk.bf16.gmra.mxu0 %vm1310_vm8, %v11540_v19  ;;  %v664_v17 = vshll.u32 %v181_v39, 16  ;;  %v1028_v7 = vld [vmem:[#allocation2 + $0x168] sm:$0xf]  ;;  %v16825_v19 = vpop.f32.mrf.mxu0 }
 0x28b   :  { %v8625_v59 = vor.u32 %v8624_v61, %v8621_v25  ;;  %v8643_v15 = vshrl.u32 %v16811_v30, 16  ;;  %v8646_v0 = vshll.u32 %v16811_v30, 16  ;;  %v658_v52 = vor.u32 %v656_v22, %v655_v36  ;;  %v1032_v60 = vld [vmem:[#allocation2 + $0x170] sm:$0x1]  ;;  %v182_v39 = vld [vmem:[%s18406_s0 + $0xe0] sm:$0xf] }
 0x28c   :  { %v8635_v43 = vor.u32 %v8634_v62, %v8630_v2  ;;  %v16818_v48 = vld [vmem:[#allocation2 + $0x160] sm:$0xf]  ;;  %v16820_v13 = vld [vmem:[#allocation2 + $0x164] sm:$0x1]  ;;  %v659_v18 = vrot.slane %v655_v36, 4  ;;  %v666_v8 = vor.u32 %v664_v17, %v663_v34  ;;  %v668_v57 = vrot.slane %v663_v34, 4  ;;  %v16832_v34 = vpop.f32.mrf.mxu1 }
 0x28d   :  { %18834 = vst [vmem:[#allocation54_spill] sm:$0xff] %v16825_v19  ;;  %v8626_v25 = vrot.slane %v8625_v59, 4  ;;  %v8645_v61 = vrot.slane %v8643_v15, 4  ;;  %v8648_v20 = vrot.slane %v8646_v0, 5  ;;  %v8652_v22 = vshll.u32 %v16818_v48, 16  ;;  %18835 = vst [vmem:[#allocation99_spill] sm:$0xff] %v16832_v34 }
 0x28e   :  { %v8636_v10 = vrot.slane %v8635_v43, 4  ;;  %v8656_v62 = vshrl.u32 %v16818_v48, 16  ;;  %v8662_v4 = vshll.u32 %v16820_v13, 16  ;;  %v667_v36 = vsel %vm13134_vm9, %v659_v18, %v666_v8  ;;  %v183_v15 = vld [vmem:[%s18406_s0 + $0xe4] sm:$0xf]  ;;  %v18836_v18 = vld [vmem:[#allocation9_spill] sm:$0xff] }
 0x28f   :  { %v8631_v17 = vsel %vm13197_vm14, %v8626_v25, %v8630_v2  ;;  %v8649_v38 = vor.u32 %v8648_v20, %v8645_v61  ;;  %v8654_v19 = vrot.slane %v8652_v22, 5  ;;  %v1029_v59 = vsel %vm13157_vm10, %v658_v52, %v1028_v7  ;;  %1031 = vst.msk [vmem:[#allocation2 + $0x16c] sm:$0xf] %vm16_vm1, %v667_v36  ;;  %v8242_v20 = vld [vmem:[#allocation2 + $0x120] sm:$0xe]  ;;  %v16848_v25 = vpop.f32.mrf.mxu0 }
 0x290   :  { %v8641_v0 = vsel %vm13197_vm14, %v8636_v10, %v8640_v28  ;;  %v8658_v43 = vrot.slane %v8656_v62, 4  ;;  %v4901_v8 = vadd.f32 %v18836_v18, %v16509_v35  ;;  %1030 = vst [vmem:[#allocation2 + $0x168] sm:$0xf] %v1029_v59  ;;  %v1033_v2 = vsel %vm13173_vm11, %v668_v57, %v1032_v60  ;;  %18837 = vst [vmem:[#allocation9_spill] sm:$0xff] %v16848_v25  ;;  %v1035_v28 = vld [vmem:[#allocation2 + $0x174] sm:$0xf]  ;;  %v16850_v62 = vpop.f32.mrf.mxu1 }
 0x291   :  { %v11555_v52 = vcombine.low %v8631_v17, %v8641_v0  ;;  %v8650_v7 = vrot.slane %v8649_v38, 4  ;;  %v8664_v61 = vrot.slane %v8662_v4, 5  ;;  %1034 = vst [vmem:[#allocation2 + $0x170] sm:$0x1] %v1033_v2  ;;  %v670_v22 = vshrl.u32 %v182_v39, 16  ;;  %18838 = vst [vmem:[#allocation100_spill] sm:$0xff] %v16850_v62 }
 0x292   :  { %v8659_v36 = vor.u32 %v8658_v43, %v8654_v19  ;;  %v673_v34 = vshll.u32 %v182_v39, 16  ;;  %v678_v33 = vshrl.u32 %v183_v15, 16  ;;  %v681_v10 = vshll.u32 %v183_v15, 16  ;;  %v18839_v35 = vld [vmem:[#allocation65_spill] sm:$0xff]  ;;  %v18840_v60 = vld [vmem:[#allocation66_spill] sm:$0xff]  ;;  %v16863_v43 = vpop.f32.mrf.mxu0 }
 0x293   :  { %12537 = vmatprep.mubr.msk.bf16.mxu1 %vm1310_vm8, %v11555_v52  ;;  %v16855_v57 = vadd.f32 %v18839_v35, %v16797_v42  ;;  %v16858_v59 = vadd.f32 %v18840_v60, %v4901_v8  ;;  %v672_v38 = vrot.slane %v670_v22, 7  ;;  %v11532_v4 = vrot.slane %v8242_v20, 9  ;;  %18841 = vst [vmem:[#allocation65_spill] sm:$0xff] %v16863_v43  ;;  %v18842_v18 = vld [vmem:[#allocation38_spill] sm:$0xff]  ;;  %v1039_v35 = vld [vmem:[#allocation2 + $0x17c] sm:$0x1] }
 0x294   :  { %v8655_v17 = vsel %vm13197_vm14, %v8650_v7, %v8654_v19  ;;  %v8660_v39 = vrot.slane %v8659_v36, 4  ;;  %v680_v0 = vrot.slane %v678_v33, 7  ;;  %v8300_v15 = vrot.slane %v16451_v12, 5  ;;  %v16874_v33 = vpop.f32.mrf.mxu1 }
 0x295   :  { %v4904_v2 = vadd.f32 %v18842_v18, %v16516_v5  ;;  %v675_v52 = vor.u32 %v673_v34, %v672_v38  ;;  %v676_v42 = vrot.slane %v672_v38, 4  ;;  %v8303_v8 = vrot.slane %v16459_v51, 5  ;;  %18843 = vst [vmem:[#allocation66_spill] sm:$0xff] %v16874_v33  ;;  %v18846_v33 = vld [vmem:[#allocation11_spill] sm:$0xff] }
 0x296   :  { %v8665_v20 = vsel %vm13197_vm14, %v8660_v39, %v8664_v61  ;;  %v16870_v22 = vld [vmem:[#allocation2 + $0x16c] sm:$0xf]  ;;  %v683_v19 = vor.u32 %v681_v10, %v680_v0  ;;  %v685_v7 = vrot.slane %v680_v0, 4  ;;  %v8301_v12 = vsel %vm13242_vm15, %v11532_v4, %v8300_v15  ;;  %v16890_v0 = vpop.f32.mrf.mxu0  ;;  %v16901_v62 = vpop.f32.mrf.mxu1 }
 0x297   :  { %v11556_v36 = vcombine.low %v8655_v17, %v8665_v20  ;;  %v16876_v60 = vld [vmem:[#allocation2 + $0x168] sm:$0xf]  ;;  %v8676_v5 = vshll.u32 %v16870_v22, 16  ;;  %v8680_v34 = vshrl.u32 %v16870_v22, 16  ;;  %v1036_v51 = vsel %vm13157_vm10, %v675_v52, %v1035_v28  ;;  %v8243_v61 = vld [vmem:[#allocation2 + $0x12c] sm:$0xe] }
 0x298   :  { %18844 = vst [vmem:[#allocation38_spill] sm:$0xff] %v16876_v60  ;;  %v16882_v38 = vld [vmem:[#allocation2 + $0x170] sm:$0x1]  ;;  %v8667_v10 = vshrl.u32 %v16876_v60, 16  ;;  %v8670_v39 = vshll.u32 %v16876_v60, 16  ;;  %v684_v4 = vsel %vm13134_vm9, %v676_v42, %v683_v19  ;;  %v1040_v17 = vsel %vm13173_vm11, %v685_v7, %v1039_v35  ;;  %18845 = vst [vmem:[#allocation101_spill] sm:$0xff] %v16890_v0 }
 0x299   :  { %1037 = vst [vmem:[#allocation2 + $0x174] sm:$0xf] %v1036_v51  ;;  %12538 = vmatmul.mubr.msk.bf16.gmra.mxu1 %vm1310_vm8, %v11556_v36  ;;  %v8678_v18 = vrot.slane %v8676_v5, 5  ;;  %v8682_v28 = vrot.slane %v8680_v34, 4  ;;  %v8686_v52 = vshll.u32 %v16882_v38, 16  ;;  %v8302_v20 = vrot.slane %v8300_v15, 4 }
 0x29a   :  { %1038 = vst.msk [vmem:[#allocation2 + $0x178] sm:$0xf] %vm16_vm1, %v684_v4  ;;  %1041 = vst [vmem:[#allocation2 + $0x17c] sm:$0x1] %v1040_v17  ;;  %v184_v42 = vld [vmem:[%s18406_s0 + $0xe8] sm:$0xf]  ;;  %v16899_v35 = vadd.f32 %v18846_v33, %v4904_v2 }
 0x29b   :  { %v8669_v19 = vrot.slane %v8667_v10, 4  ;;  %v8672_v51 = vrot.slane %v8670_v39, 5  ;;  %v11533_v7 = vrot.slane %v8243_v61, 9  ;;  %18847 = vst [vmem:[#allocation11_spill] sm:$0xff] %v16901_v62  ;;  %v8683_v36 = vor.u32 %v8682_v28, %v8678_v18  ;;  %v185_v15 = vld [vmem:[%s18406_s0 + $0xec] sm:$0xf]  ;;  %v16914_v61 = vpop.f32.mrf.mxu0 }
 0x29c   :  { %v8688_v5 = vrot.slane %v8686_v52, 5  ;;  %v8304_v34 = vsel %vm13242_vm15, %v8302_v20, %v8303_v8  ;;  %v8307_v4 = vrot.slane %v16480_v44, 5  ;;  %v8310_v39 = vrot.slane %v16489_v53, 5  ;;  %v18848_v2 = vld [vmem:[#allocation51_spill] sm:$0xff]  ;;  %v18850_v62 = vld [vmem:[#allocation45_spill] sm:$0xff] }
 0x29d   :  { %v8673_v17 = vor.u32 %v8672_v51, %v8669_v19  ;;  %v11541_v10 = vcombine.low %v8301_v12, %v8304_v34  ;;  %v16912_v33 = vadd.f32 %v18848_v2, %v16566_v16  ;;  %18849 = vst [vmem:[#allocation51_spill] sm:$0xff] %v16914_v61  ;;  %v8684_v28 = vrot.slane %v8683_v36, 4  ;;  %v16921_v19 = vpop.f32.mrf.mxu1  ;;  %v16937_v2 = vpop.f32.mrf.mxu0  ;;  %v8244_v60 = vld [vmem:[#allocation2 + $0x138] sm:$0xe] }
 0x29e   :  { %v8308_v8 = vsel %vm13242_vm15, %v11533_v7, %v8307_v4  ;;  %v8309_v52 = vrot.slane %v8307_v4, 4  ;;  %v687_v44 = vshrl.u32 %v184_v42, 16  ;;  %v4902_v0 = vadd.f32 %v18850_v62, %v16545_v41  ;;  %18851 = vst [vmem:[#allocation45_spill] sm:$0xff] %v16921_v19  ;;  %v1042_v4 = vld [vmem:[#allocation2 + $0x180] sm:$0xf]  ;;  %18853 = vst [vmem:[#allocation103_spill] sm:$0xff] %v16937_v2 }
 0x29f   :  { %v8674_v20 = vrot.slane %v8673_v17, 4  ;;  %12523 = vmatprep.mubr.msk.bf16.mxu0 %vm1310_vm8, %v11541_v10  ;;  %v690_v12 = vshll.u32 %v184_v42, 16  ;;  %v695_v53 = vshrl.u32 %v185_v15, 16  ;;  %v8689_v16 = vsel %vm13197_vm14, %v8684_v28, %v8688_v5  ;;  %v18854_v19 = vld [vmem:[#allocation68_spill] sm:$0xff] }
 0x2a0   :  { %v16925_v51 = vld [vmem:[#allocation2 + $0x174] sm:$0xf]  ;;  %v8311_v7 = vsel %vm13242_vm15, %v8309_v52, %v8310_v39  ;;  %v689_v36 = vrot.slane %v687_v44, 7  ;;  %v698_v34 = vshll.u32 %v185_v15, 16  ;;  %v16946_v61 = vadd.f32 %v18854_v19, %v4902_v0 }
 0x2a1   :  { %18852 = vst [vmem:[#allocation102_spill] sm:$0xff] %v16925_v51  ;;  %v8679_v41 = vsel %vm13197_vm14, %v8674_v20, %v8678_v18  ;;  %v16931_v62 = vld [vmem:[#allocation2 + $0x178] sm:$0xf]  ;;  %v16933_v42 = vld [vmem:[#allocation2 + $0x17c] sm:$0x1]  ;;  %v8691_v17 = vshrl.u32 %v16925_v51, 16  ;;  %v11542_v5 = vcombine.low %v8308_v8, %v8311_v7  ;;  %v16952_v7 = vpop.f32.mrf.mxu1 }
 0x2a2   :  { %v8694_v10 = vshll.u32 %v16925_v51, 16  ;;  %v11557_v28 = vcombine.low %v8679_v41, %v8689_v16  ;;  %v8700_v39 = vshll.u32 %v16931_v62, 16  ;;  %v8704_v15 = vshrl.u32 %v16931_v62, 16  ;;  %v186_v18 = vld [vmem:[%s18406_s0 + $0xf0] sm:$0xf]  ;;  %18855 = vst [vmem:[#allocation68_spill] sm:$0xff] %v16952_v7 }
 0x2a3   :  { %v8710_v52 = vshll.u32 %v16933_v42, 16  ;;  %v8693_v44 = vrot.slane %v8691_v17, 4  ;;  %12524 = vmatmul.mubr.msk.bf16.gmra.mxu0 %vm1310_vm8, %v11542_v5  ;;  %v692_v8 = vor.u32 %v690_v12, %v689_v36  ;;  %v187_v16 = vld [vmem:[%s18406_s0 + $0xf4] sm:$0xf]  ;;  %v693_v43 = vrot.slane %v689_v36, 4  ;;  %v16957_v12 = vpop.f32.mrf.mxu0 }
 0x2a4   :  { %v8696_v20 = vrot.slane %v8694_v10, 5  ;;  %12541 = vmatprep.mubr.msk.bf16.mxu1 %vm1310_vm8, %v11557_v28  ;;  %v8702_v41 = vrot.slane %v8700_v39, 5  ;;  %v8706_v2 = vrot.slane %v8704_v15, 4  ;;  %v697_v25 = vrot.slane %v695_v53, 7  ;;  %v1046_v17 = vld [vmem:[#allocation2 + $0x188] sm:$0x1] }
 0x2a5   :  { %v8712_v32 = vrot.slane %v8710_v52, 5  ;;  %v1043_v0 = vsel %vm13157_vm10, %v692_v8, %v1042_v4  ;;  %v704_v19 = vshrl.u32 %v186_v18, 16  ;;  %v707_v7 = vshll.u32 %v186_v18, 16  ;;  %v18856_v39 = vld [vmem:[#allocation47_spill] sm:$0xff] }
 0x2a6   :  { %v8697_v10 = vor.u32 %v8696_v20, %v8693_v44  ;;  %v8707_v5 = vor.u32 %v8706_v2, %v8702_v41  ;;  %v700_v47 = vor.u32 %v698_v34, %v697_v25  ;;  %v702_v51 = vrot.slane %v697_v25, 4  ;;  %1044 = vst [vmem:[#allocation2 + $0x180] sm:$0xf] %v1043_v0  ;;  %v16961_v44 = vpop.f32.mrf.mxu1  ;;  %v1049_v25 = vld [vmem:[#allocation2 + $0x18c] sm:$0xf] }
 0x2a7   :  { %v4907_v36 = vadd.f32 %v18856_v39, %v16563_v3  ;;  %v706_v53 = vrot.slane %v704_v19, 7  ;;  %v712_v15 = vshrl.u32 %v187_v16, 16  ;;  %18857 = vst [vmem:[#allocation47_spill] sm:$0xff] %v16961_v44  ;;  %v715_v34 = vshll.u32 %v187_v16, 16 }
 0x2a8   :  { %v8698_v28 = vrot.slane %v8697_v10, 4  ;;  %v8708_v52 = vrot.slane %v8707_v5, 4  ;;  %v701_v4 = vsel %vm13134_vm9, %v693_v43, %v700_v47  ;;  %v1047_v2 = vsel %vm13173_vm11, %v702_v51, %v1046_v17  ;;  %v16970_v10 = vpop.f32.mrf.mxu0  ;;  %v16972_v0 = vpop.f32.mrf.mxu1  ;;  %v1053_v51 = vld [vmem:[#allocation2 + $0x194] sm:$0x1]  ;;  %v8245_v17 = vld [vmem:[#allocation2 + $0x144] sm:$0xe] }
 0x2a9   :  { %1045 = vst.msk [vmem:[#allocation2 + $0x184] sm:$0xf] %vm16_vm1, %v701_v4  ;;  %1048 = vst [vmem:[#allocation2 + $0x188] sm:$0x1] %v1047_v2  ;;  %v709_v3 = vor.u32 %v707_v7, %v706_v53  ;;  %v710_v20 = vrot.slane %v706_v53, 4  ;;  %v714_v8 = vrot.slane %v712_v15, 7  ;;  %v16977_v43 = vadd.f32 %v16299_v6, %v4907_v36 }
 0x2aa   :  { %v8703_v18 = vsel %vm13197_vm14, %v8698_v28, %v8702_v41  ;;  %18858 = vst [vmem:[#allocation104_spill] sm:$0xff] %v16972_v0  ;;  %v8713_v47 = vsel %vm13197_vm14, %v8708_v52, %v8712_v32  ;;  %v11534_v16 = vrot.slane %v8244_v60, 9  ;;  %v8314_v41 = vrot.slane %v16511_v50, 5  ;;  %v16982_v39 = vpop.f32.mrf.mxu1  ;;  %v18860_v53 = vld [vmem:[#allocation56_spill] sm:$0xff]  ;;  %v18861_v4 = vld [vmem:[#allocation59_spill] sm:$0xff] }
 0x2ab   :  { %v11558_v19 = vcombine.low %v8703_v18, %v8713_v47  ;;  %v717_v5 = vor.u32 %v715_v34, %v714_v8  ;;  %v719_v7 = vrot.slane %v714_v8, 4  ;;  %v1050_v28 = vsel %vm13157_vm10, %v709_v3, %v1049_v25  ;;  %18859 = vst [vmem:[#allocation105_spill] sm:$0xff] %v16982_v39  ;;  %v16998_v34 = vpop.f32.mrf.mxu0  ;;  %v9068_v8 = vld [vmem:[#allocation2 + $0x138] sm:$0xe]  ;;  %v18864_v47 = vld [vmem:[#allocation72_spill] sm:$0xff] }
 0x2ac   :  { %v4908_v15 = vadd.f32 %v18860_v53, %v16579_v14  ;;  %1051 = vst [vmem:[#allocation2 + $0x18c] sm:$0xf] %v1050_v28  ;;  %v8315_v6 = vsel %vm13242_vm15, %v11534_v16, %v8314_v41  ;;  %v8316_v32 = vrot.slane %v8314_v41, 4  ;;  %v8317_v60 = vrot.slane %v16527_v1, 5  ;;  %18862 = vst [vmem:[#allocation56_spill] sm:$0xff] %v16998_v34  ;;  %v17000_v25 = vpop.f32.mrf.mxu1 }
 0x2ad   :  { %12542 = vmatmul.mubr.msk.bf16.gmra.mxu1 %vm1310_vm8, %v11558_v19  ;;  %v16990_v50 = vld [vmem:[#allocation2 + $0x180] sm:$0xf]  ;;  %v718_v36 = vsel %vm13134_vm9, %v710_v20, %v717_v5  ;;  %v1054_v52 = vsel %vm13173_vm11, %v719_v7, %v1053_v51  ;;  %v4911_v14 = vadd.f32 %v18861_v4, %v16614_v45  ;;  %v11535_v2 = vrot.slane %v8245_v17, 9  ;;  %18863 = vst [vmem:[#allocation59_spill] sm:$0xff] %v17000_v25  ;;  %v9069_v39 = vld [vmem:[#allocation2 + $0x144] sm:$0xe] }
 0x2ae   :  { %v8715_v1 = vshrl.u32 %v16990_v50, 16  ;;  %v8718_v18 = vshll.u32 %v16990_v50, 16  ;;  %1052 = vst.msk [vmem:[#allocation2 + $0x190] sm:$0xf] %vm16_vm1, %v718_v36  ;;  %1055 = vst [vmem:[#allocation2 + $0x194] sm:$0x1] %v1054_v52  ;;  %v8318_v3 = vsel %vm13242_vm15, %v8316_v32, %v8317_v60  ;;  %v17010_v45 = vadd.f32 %v16303_v31, %v16912_v33  ;;  %v17016_v17 = vpop.f32.mrf.mxu1  ;;  %v17030_v32 = vpop.f32.mrf.mxu0 }
 0x2af   :  { %v8321_v20 = vrot.slane %v16652_v29, 5  ;;  %v17013_v51 = vadd.f32 %v18864_v47, %v4908_v15  ;;  %v11543_v16 = vcombine.low %v8315_v6, %v8318_v3  ;;  %v8324_v41 = vrot.slane %v16654_v24, 5  ;;  %18865 = vst [vmem:[#allocation72_spill] sm:$0xff] %v17016_v17  ;;  %v18866_v29 = vld [vmem:[#allocation22_spill] sm:$0xff] }
 0x2b0   :  { %v17018_v19 = vld [vmem:[#allocation2 + $0x184] sm:$0xf]  ;;  %v17020_v5 = vld [vmem:[#allocation2 + $0x188] sm:$0x1]  ;;  %v8717_v7 = vrot.slane %v8715_v1, 4  ;;  %v8720_v28 = vrot.slane %v8718_v18, 5  ;;  %v4906_v53 = vadd.f32 %v18866_v29, %v16607_v63  ;;  %v17032_v60 = vpop.f32.mrf.mxu1 }
 0x2b1   :  { %v8322_v31 = vsel %vm13242_vm15, %v11535_v2, %v8321_v20  ;;  %v8724_v33 = vshll.u32 %v17018_v19, 16  ;;  %v8728_v15 = vshrl.u32 %v17018_v19, 16  ;;  %v8734_v24 = vshll.u32 %v17020_v5, 16  ;;  %12527 = vmatprep.mubr.msk.bf16.mxu0 %vm1310_vm8, %v11543_v16  ;;  %18867 = vst [vmem:[#allocation22_spill] sm:$0xff] %v17030_v32  ;;  %18868 = vst [vmem:[#allocation106_spill] sm:$0xff] %v17032_v60  ;;  %v18869_v52 = vld [vmem:[#allocation74_spill] sm:$0xff] }
 0x2b2   :  { %v8323_v6 = vrot.slane %v8321_v20, 4  ;;  %v8721_v36 = vor.u32 %v8720_v28, %v8717_v7  ;;  %v17035_v4 = vadd.f32 %v18869_v52, %v4906_v53  ;;  %v11585_v63 = vrot.slane %v9068_v8, 9  ;;  %v17042_v20 = vpop.f32.mrf.mxu0  ;;  %v17044_v29 = vpop.f32.mrf.mxu1 }
 0x2b3   :  { %v9094_v2 = vrot.slane %v16574_v21, 5  ;;  %v8726_v1 = vrot.slane %v8724_v33, 5  ;;  %v8730_v18 = vrot.slane %v8728_v15, 4  ;;  %v8736_v3 = vrot.slane %v8734_v24, 5  ;;  %v17038_v47 = vld [vmem:[#allocation2 + $0x18c] sm:$0xf] }
 0x2b4   :  { %v8325_v16 = vsel %vm13242_vm15, %v8323_v6, %v8324_v41  ;;  %18870 = vst [vmem:[#allocation74_spill] sm:$0xff] %v17042_v20  ;;  %18871 = vst [vmem:[#allocation107_spill] sm:$0xff] %v17044_v29  ;;  %v8722_v60 = vrot.slane %v8721_v36, 4  ;;  %v8739_v7 = vshrl.u32 %v17038_v47, 16  ;;  %v8742_v28 = vshll.u32 %v17038_v47, 16  ;;  %v18872_v15 = vld [vmem:[#allocation76_spill] sm:$0xff]  ;;  %v17056_v6 = vpop.f32.mrf.mxu0  ;;  %v17058_v29 = vpop.f32.mrf.mxu1 }
 0x2b5   :  { %v11544_v8 = vcombine.low %v8322_v31, %v8325_v16  ;;  %v8731_v53 = vor.u32 %v8730_v18, %v8726_v1  ;;  %v17048_v21 = vld [vmem:[#allocation2 + $0x190] sm:$0xf]  ;;  %v17050_v33 = vld [vmem:[#allocation2 + $0x194] sm:$0x1]  ;;  %v17053_v24 = vadd.f32 %v18872_v15, %v4911_v14  ;;  %v9096_v52 = vrot.slane %v9094_v2, 4  ;;  %18873 = vst [vmem:[#allocation76_spill] sm:$0xff] %v17056_v6 }
 0x2b6   :  { %v9097_v41 = vrot.slane %v16585_v11, 5  ;;  %18874 = vst [vmem:[#allocation108_spill] sm:$0xff] %v17058_v29  ;;  %v8741_v36 = vrot.slane %v8739_v7, 4  ;;  %v8744_v17 = vrot.slane %v8742_v28, 5  ;;  %v8748_v25 = vshll.u32 %v17048_v21, 16  ;;  %v18875_v31 = vld [vmem:[#allocation6_spill] sm:$0xff]  ;;  %v17068_v0 = vpop.f32.mrf.mxu0  ;;  %v17070_v7 = vpop.f32.mrf.mxu1 }
 0x2b7   :  { %12528 = vmatmul.mubr.msk.bf16.gmra.mxu0 %vm1310_vm8, %v11544_v8  ;;  %v18876_v18 = vld [vmem:[#allocation24_spill] sm:$0xff]  ;;  %v8727_v14 = vsel %vm13197_vm14, %v8722_v60, %v8726_v1  ;;  %v8732_v15 = vrot.slane %v8731_v53, 4  ;;  %v8752_v11 = vshrl.u32 %v17048_v21, 16  ;;  %v8758_v6 = vshll.u32 %v17050_v33, 16  ;;  %18877 = vst [vmem:[#allocation6_spill] sm:$0xff] %v17068_v0 }
 0x2b8   :  { %v4909_v16 = vadd.f32 %v18876_v18, %v18875_v31  ;;  %18878 = vst [vmem:[#allocation24_spill] sm:$0xff] %v17070_v7  ;;  %v8745_v28 = vor.u32 %v8744_v17, %v8741_v36  ;;  %v8750_v29 = vrot.slane %v8748_v25, 5  ;;  %v17074_v8 = vsel %vm13242_vm15, %v11585_v63, %v9094_v2  ;;  %v18879_v31 = vld [vmem:[#allocation14_spill] sm:$0xff]  ;;  %v18880_v18 = vld [vmem:[#allocation31_spill] sm:$0xff]  ;;  %v17082_v32 = vpop.f32.mrf.mxu0  ;;  %v17084_v17 = vpop.f32.mrf.mxu1  ;;  %v18882_v63 = vld [vmem:[#allocation57_spill] sm:$0xff] }
 0x2b9   :  { %v4912_v20 = vadd.f32 %v18880_v18, %v18879_v31  ;;  %v8737_v60 = vsel %vm13197_vm14, %v8732_v15, %v8736_v3  ;;  %v8754_v1 = vrot.slane %v8752_v11, 4  ;;  %v9098_v53 = vsel %vm13242_vm15, %v9096_v52, %v9097_v41  ;;  %v9070_v0 = vld [vmem:[#allocation2 + $0x150] sm:$0xe]  ;;  %18881 = vst [vmem:[#allocation14_spill] sm:$0xff] %v17084_v17  ;;  %v12836_v3 = vld [vmem:[#allocation2 + $0x13c] sm:$0xf] }
 0x2ba   :  { %v11586_v44 = vrot.slane %v9069_v39, 9  ;;  %v11559_v25 = vcombine.low %v8727_v14, %v8737_v60  ;;  %v8746_v36 = vrot.slane %v8745_v28, 4  ;;  %v9101_v2 = vrot.slane %v18882_v63, 5  ;;  %v18883_v7 = vld [vmem:[#allocation58_spill] sm:$0xff]  ;;  %v18884_v11 = vld [vmem:[#allocation64_spill] sm:$0xff]  ;;  %v17090_v39 = vpop.f32.mrf.mxu0  ;;  %v17092_v41 = vpop.f32.mrf.mxu1  ;;  %v18886_v14 = vld [vmem:[#allocation77_spill] sm:$0xff] }
 0x2bb   :  { %v9104_v34 = vrot.slane %v18883_v7, 5  ;;  %v8755_v31 = vor.u32 %v8754_v1, %v8750_v29  ;;  %v8760_v18 = vrot.slane %v8758_v6, 5  ;;  %v11569_v15 = vcombine.low %v12835_v49, %v12836_v3  ;;  %18885 = vst [vmem:[#allocation31_spill] sm:$0xff] %v17092_v41  ;;  %v18887_v6 = vld [vmem:[#allocation50_spill] sm:$0xff]  ;;  %v18889_v41 = vld [vmem:[#allocation55_spill] sm:$0xff] }
 0x2bc   :  { %v5342_v52 = vadd.f32 %v18884_v11, %v16731_v27  ;;  %12545 = vmatprep.mubr.msk.bf16.mxu1 %vm1310_vm8, %v11559_v25  ;;  %v17096_v28 = vadd.f32 %v18886_v14, %v4909_v16  ;;  %v11593_v60 = vcombine.low %v17074_v8, %v9098_v53  ;;  %v9103_v7 = vrot.slane %v9101_v2, 4  ;;  %v18888_v27 = vld [vmem:[#allocation81_spill] sm:$0xff]  ;;  %v17107_v17 = vpop.f32.mrf.mxu0  ;;  %v17109_v16 = vpop.f32.mrf.mxu1 }
 0x2bd   :  { %v11570_v1 = vcombine.low %v18887_v6, %v18882_v63  ;;  %v8751_v49 = vsel %vm13197_vm14, %v8746_v36, %v8750_v29  ;;  %v8756_v3 = vrot.slane %v8755_v31, 4  ;;  %12551 = vmatprep.mubr.msk.bf16.mxu0 %vm1310_vm8, %v11569_v15  ;;  %v5340_v25 = vadd.f32 %v18889_v41, %v16746_v54  ;;  %18890 = vst [vmem:[#allocation57_spill] sm:$0xff] %v17109_v16  ;;  %v18891_v63 = vld [vmem:[#allocation83_spill] sm:$0xff]  ;;  %v18892_v15 = vld [vmem:[#allocation16_spill] sm:$0xff]  ;;  %v12803_v16 = vld [vmem:[#allocation2 + $0x18c] sm:$0xff]  }
 0x2be   :  { %v5719_v11 = vadd.f32 %v18888_v27, %v5342_v52  ;;  %v17113_v8 = vsel %vm13242_vm15, %v11586_v44, %v9101_v2  ;;  %v17117_v53 = vsel %vm13242_vm15, %v9103_v7, %v9104_v34  ;;  %v11587_v29 = vrot.slane %v9070_v0, 9  ;;  %v18893_v52 = vld [vmem:[#allocation82_spill] sm:$0xff]  ;;  %v9071_v2 = vld [vmem:[#allocation2 + $0x15c] sm:$0xe]  ;;  %v17127_v14 = vpop.f32.mrf.mxu0  ;;  %v17129_v34 = vpop.f32.mrf.mxu1  ;;  %v18895_v0 = vld [vmem:[#allocation41_spill] sm:$0xff] }
 0x2bf   :  { %12552 = vmatmul.mubr.msk.bf16.vlgmr.msra.gmra.mxu0 %vm1310_vm8, %v11570_v1  ;;  %v9108_v36 = vrot.slane %v16789_v9, 5  ;;  %v8761_v54 = vsel %vm13197_vm14, %v8756_v3, %v8760_v18  ;;  %v5717_v41 = vadd.f32 %v18893_v52, %v5340_v25  ;;  %v9111_v44 = vrot.slane %v16791_v37, 5  ;;  %18894 = vst [vmem:[#allocation58_spill] sm:$0xff] %v17129_v34  ;;  %v18896_v18 = vld [vmem:[#allocation35_spill] sm:$0xff]  ;;  %v12837_v27 = vld [vmem:[%s18407_s1 + $0xa] sm:$0x3] }
 0x2c0   :  { %v5968_v31 = vadd.f32 %v18891_v63, %v5719_v11  ;;  %12586 = vmatpush3.bf16.msra.mxu0 %v18892_v15  ;;  %v11560_v7 = vcombine.low %v8751_v49, %v8761_v54  ;;  %v17132_v6 = vadd.f32 %v18895_v0, %v4912_v20  ;;  %v5343_v3 = vadd.f32 %v18896_v18, %v16758_v23  ;;  %v18897_v37 = vld [vmem:[#allocation28_spill] sm:$0xff]  ;;  %v18898_v11 = vld [vmem:[#allocation53_spill] sm:$0xff]  ;;  %v17147_v49 = vld [vmem:[%s18408_s2] ss:$0 sm:$0xff]  ;;  %v17154_v15 = vpop.f32.mrf.mxu0  ;;  %v17156_v52 = vpop.f32.mrf.mxu1 }
 0x2c1   :  { %v9110_v1 = vrot.slane %v9108_v36, 4  ;;  %12725 = vmatprep.subr.msk.bf16.mxu0 %vm1335_vm0, %v12837_v27  ;;  %v17142_v25 = vadd.f32 %v18898_v11, %v18897_v37  ;;  %v18899_v54 = vld [vmem:[#allocation85_spill] sm:$0xff]  ;;  %v9115_v63 = vrot.slane %v16818_v48, 5  ;;  %18900 = vst [vmem:[#allocation64_spill] sm:$0xff] %v17156_v52  ;;  %v11594_v0 = vcombine.low %v17113_v8, %v17117_v53  ;;  %v18901_v18 = vld [vmem:[#allocation19_spill] sm:$0xff]  ;;  %v18903_v53 = vld [vmem:[#allocation30_spill] sm:$0xff] }
 0x2c2   :  { %v17150_v20 = vadd.f32 %v17147_v49, %v5968_v31  ;;  %v5966_v23 = vadd.f32 %v18899_v54, %v5717_v41  ;;  %12546 = vmatmul.mubr.msk.bf16.gmra.mxu1 %vm1310_vm8, %v11560_v7  ;;  %v5720_v27 = vadd.f32 %v18901_v18, %v5343_v3  ;;  %v11588_v37 = vrot.slane %v9071_v2, 9  ;;  %v18902_v11 = vld [vmem:[#allocation67_spill] sm:$0xff]  ;;  %v9072_v34 = vld [vmem:[#allocation2 + $0x168] sm:$0xe]  ;;  %v17171_v8 = vpop.f32.mrf.mxu0 }
 0x2c3   :  { %v5341_v31 = vadd.f32 %v18902_v11, %v16785_v56  ;;  %12569 = vmatprep.mubr.msk.bf16.mxu1 %vm1310_vm8, %v11593_v60  ;;  %v9109_v54 = vsel %vm13242_vm15, %v11587_v29, %v9108_v36  ;;  %v9112_v52 = vsel %vm13242_vm15, %v9110_v1, %v9111_v44  ;;  %v9118_v7 = vrot.slane %v16820_v13, 5  ;;  %v18904_v18 = vld [vmem:[#allocation84_spill] sm:$0xff]  ;;  %v18905_v29 = vld [vmem:[#allocation69_spill] sm:$0xff]  ;;  %v18906_v13 = vld [vmem:[#allocation70_spill] sm:$0xff] }
 0x2c4   :  { %v6000_v41 = vmax.f32 %v17150_v20, 0.0  ;;  %v5969_v2 = vadd.f32 %v18903_v53, %v5720_v27  ;;  %v9117_v3 = vrot.slane %v9115_v63, 4  ;;  %v11571_v60 = vcombine.low %v16782_v55, %v16789_v9  ;;  %v17184_v11 = vpop.f32.mrf.mxu0  ;;  %v17186_v27 = vpop.f32.mrf.mxu1  ;;  %v18908_v55 = vld [vmem:[#allocation88_spill] sm:$0xff] }
 0x2c5   :  { %v5718_v56 = vadd.f32 %v18904_v18, %v5341_v31  ;;  %v5982_v20 = vadd.f32 %v17147_v49, %v5966_v23  ;;  %v5346_v36 = vadd.f32 %v18905_v29, %v16855_v57  ;;  %v11572_v44 = vcombine.low %v16811_v30, %v16818_v48  ;;  %18907 = vst [vmem:[#allocation77_spill] sm:$0xff] %v17186_v27  ;;  %v18909_v30 = vld [vmem:[#allocation86_spill] sm:$0xff] }
 0x2c6   :  { %v5344_v1 = vadd.f32 %v18906_v13, %v16858_v59  ;;  %v11595_v53 = vcombine.low %v9109_v54, %v9112_v52  ;;  %v17190_v31 = vsel %vm13242_vm15, %v11588_v37, %v9115_v63  ;;  %12555 = vmatprep.mubr.msk.bf16.mxu0 %vm1310_vm8, %v11571_v60  ;;  %v11589_v57 = vrot.slane %v9072_v34, 9  ;;  %v18910_v59 = vld [vmem:[#allocation87_spill] sm:$0xff]  ;;  %v9073_v52 = vld [vmem:[#allocation2 + $0x174] sm:$0xe]  ;;  %v17199_v54 = vpop.f32.mrf.mxu0 }
 0x2c7   :  { %v5967_v9 = vadd.f32 %v18908_v55, %v5718_v56  ;;  %v5985_v23 = vadd.f32 %v17147_v49, %v5969_v2  ;;  %v5723_v48 = vadd.f32 %v18909_v30, %v5346_v36  ;;  %12556 = vmatmul.mubr.msk.bf16.gmra.mxu0 %vm1310_vm8, %v11572_v44  ;;  %v9122_v29 = vrot.slane %v16870_v22, 5  ;;  %v18911_v2 = vld [vmem:[#allocation71_spill] sm:$0xff]  ;;  %v18912_v36 = vld [vmem:[#allocation90_spill] sm:$0xff] }
 0x2c8   :  { %v5721_v18 = vadd.f32 %v18910_v59, %v5344_v1  ;;  %v9119_v63 = vsel %vm13242_vm15, %v9117_v3, %v9118_v7  ;;  %v9125_v34 = vrot.slane %v16882_v38, 5  ;;  %v5347_v56 = vadd.f32 %v18911_v2, %v16899_v35  ;;  %v18913_v13 = vld [vmem:[#allocation91_spill] sm:$0xff]  ;;  %v17209_v30 = vpop.f32.mrf.mxu0  ;;  %v17211_v59 = vpop.f32.mrf.mxu1  ;;  %v18915_v38 = vld [vmem:[#allocation89_spill] sm:$0xff]  ;;  %v18916_v35 = vld [vmem:[#allocation40_spill] sm:$0xff] }
 0x2c9   :  { %v5983_v37 = vadd.f32 %v17147_v49, %v5967_v9  ;;  %v5998_v60 = vmax.f32 %v5982_v20, 0.0  ;;  %v5972_v44 = vadd.f32 %v18912_v36, %v5723_v48  ;;  %v9124_v55 = vrot.slane %v9122_v29, 4  ;;  %18914 = vst [vmem:[#allocation50_spill] sm:$0xff] %v17211_v59  ;;  %v18918_v2 = vld [vmem:[#allocation93_spill] sm:$0xff]  ;;  %v17429_v59 = vld [vmem:[#allocation2 + $0x178] sm:$0xf] }
 0x2ca   :  { %v5970_v1 = vadd.f32 %v18913_v13, %v5721_v18  ;;  %12570 = vmatmul.mubr.msk.bf16.vlgmr.msra.gmra.mxu1 %vm1310_vm8, %v11594_v0  ;;  %v9123_v3 = vsel %vm13242_vm15, %v11589_v57, %v9122_v29  ;;  %v5724_v9 = vadd.f32 %v18915_v38, %v5347_v56  ;;  %v11590_v27 = vrot.slane %v9073_v52, 9 }
 0x2cb   :  { %v5999_v7 = vmax.f32 %v5983_v37, 0.0  ;;  %12604 = vmatpush3.bf16.msra.mxu1 %v18916_v35  ;;  %12573 = vmatprep.mubr.msk.bf16.mxu1 %vm1310_vm8, %v11595_v53  ;;  %v11596_v20 = vcombine.low %v17190_v31, %v9119_v63  ;;  %v17221_v48 = vadd.f32 %v17147_v49, %v5972_v44  ;;  %v9126_v18 = vsel %vm13242_vm15, %v9124_v55, %v9125_v34  ;;  %v17226_v37 = vpop.f32.mrf.mxu0  ;;  %v12839_v53 = vld [vmem:[%s18407_s1 + $0xc] sm:$0x3]  ;;  %v17243_v44 = vpop.f32.mrf.mxu1  ;;  %v18922_v55 = vld [vmem:[#allocation38_spill] sm:$0xff]  ;;  %v18924_v35 = vld [vmem:[#allocation92_spill] sm:$0xff] }
 0x2cc   :  { %v9129_v0 = vrot.slane %v16931_v62, 5  ;;  %18917 = vst [vmem:[#allocation81_spill] sm:$0xff] %v17226_v37  ;;  %v6001_v57 = vmax.f32 %v5985_v23, 0.0  ;;  %v5986_v52 = vadd.f32 %v17147_v49, %v5970_v1  ;;  %v5973_v56 = vadd.f32 %v18918_v2, %v5724_v9  ;;  %12726 = vmatprep.subr.msk.bf16.mxu1 %vm1335_vm0, %v12839_v53  ;;  %v18919_v23 = vld [vmem:[#allocation73_spill] sm:$0xff]  ;;  %18921 = vst [vmem:[#allocation83_spill] sm:$0xff] %v17243_v44  ;;  %v18926_v2 = vld [vmem:[#allocation75_spill] sm:$0xff] }
 0x2cd   :  { %v6014_v29 = vadd.f32 %v5999_v7, %v5998_v60  ;;  %v11597_v31 = vcombine.low %v9123_v3, %v9126_v18  ;;  %v9132_v34 = vrot.slane %v16933_v42, 5  ;;  %v5345_v60 = vadd.f32 %v18919_v23, %v16946_v61  ;;  %v17241_v36 = vpop.f32.mrf.mxu0  ;;  %v18923_v3 = vld [vmem:[#allocation37_spill] sm:$0xff]  ;;  %v18925_v18 = vld [vmem:[#allocation102_spill] sm:$0xff] }
 0x2ce   :  { %v17236_v63 = vsel %vm13242_vm15, %v11590_v27, %v9129_v0  ;;  %18920 = vst [vmem:[#allocation55_spill] sm:$0xff] %v17241_v36  ;;  %v6004_v1 = vmax.f32 %v17221_v48, 0.0  ;;  %v11573_v7 = vcombine.low %v18922_v55, %v16870_v22  ;;  %v5350_v38 = vadd.f32 %v18923_v3, %v16977_v43  ;;  %v9074_v27 = vld [vmem:[#allocation2 + $0x180] sm:$0xe]  ;;  %v18930_v55 = vld [vmem:[#allocation94_spill] sm:$0xff]  ;;  %v18997_v36 = vld [vmem:[#allocation101_spill] sm:$0xff] }
 0x2cf   :  { %v6015_v13 = vadd.f32 %v6014_v29, %v6000_v41  ;;  %v9131_v9 = vrot.slane %v9129_v0, 4  ;;  %v5722_v42 = vadd.f32 %v18924_v35, %v5345_v60  ;;  %v11574_v61 = vcombine.low %v18925_v18, %v16931_v62  ;;  %v17255_v23 = vpop.f32.mrf.mxu0  ;;  %v17257_v41 = vpop.f32.mrf.mxu1  ;;  %v18929_v43 = vld [vmem:[#allocation95_spill] sm:$0xff]  ;;  %v18931_v62 = vld [vmem:[#allocation33_spill] sm:$0xff] }
 0x2d0   :  { %v5348_v53 = vadd.f32 %v18926_v2, %v17010_v45  ;;  %18927 = vst [vmem:[#allocation16_spill] sm:$0xff] %v17255_v23  ;;  %18928 = vst [vmem:[#allocation82_spill] sm:$0xff] %v17257_v41  ;;  %v6002_v48 = vmax.f32 %v5986_v52, 0.0  ;;  %v5989_v22 = vadd.f32 %v17147_v49, %v5973_v56  ;;  %12559 = vmatprep.mubr.msk.bf16.mxu0 %vm1310_vm8, %v11573_v7  ;;  %v11591_v35 = vrot.slane %v9074_v27, 9  ;;  %v9075_v18 = vld [vmem:[#allocation2 + $0x18c] sm:$0xe] }
 0x2d1   :  { %v6016_v29 = vadd.f32 %v6015_v13, %v6001_v57  ;;  %v5727_v0 = vadd.f32 %v18929_v43, %v5350_v38  ;;  %v5971_v60 = vadd.f32 %v18930_v55, %v5722_v42  ;;  %12560 = vmatmul.mubr.msk.bf16.gmra.mxu0 %vm1310_vm8, %v11574_v61  ;;  %v9136_v45 = vrot.slane %v17018_v19, 5  ;;  %v17266_v2 = vpop.f32.mrf.mxu0  ;;  %v17268_v52 = vpop.f32.mrf.mxu1  ;;  %v18934_v56 = vld [vmem:[#allocation96_spill] sm:$0xff]  ;;  %v18935_v38 = vld [vmem:[#allocation39_spill] sm:$0xff]  ;;  %v17408_v44 = vld [vmem:[#allocation2 + $0x170] sm:$0x1] }
 0x2d2   :  { %v5725_v3 = vadd.f32 %v18931_v62, %v5348_v53  ;;  %18932 = vst [vmem:[#allocation41_spill] sm:$0xff] %v17266_v2  ;;  %18933 = vst [vmem:[#allocation35_spill] sm:$0xff] %v17268_v52  ;;  %12574 = vmatmul.mubr.msk.bf16.gmra.mxu1 %vm1310_vm8, %v11596_v20  ;;  %v9139_v7 = vrot.slane %v17020_v5, 5  ;;  %v5351_v42 = vadd.f32 %v18935_v38, %v17013_v51  ;;  %v18936_v53 = vld [vmem:[#allocation27_spill] sm:$0xff]  ;;  %v11592_v51 = vrot.slane %v9075_v18, 9 }
 0x2d3   :  { %v6017_v57 = vadd.f32 %v6016_v29, %v6002_v48  ;;  %v5976_v13 = vadd.f32 %v18934_v56, %v5727_v0  ;;  %12577 = vmatprep.mubr.msk.bf16.mxu1 %vm1310_vm8, %v11597_v31  ;;  %v9133_v27 = vsel %vm13242_vm15, %v9131_v9, %v9132_v34  ;;  %v5987_v61 = vadd.f32 %v17147_v49, %v5971_v60  ;;  %v17280_v62 = vpop.f32.mrf.mxu0  ;;  %v17282_v20 = vpop.f32.mrf.mxu1  ;;  %v18939_v48 = vld [vmem:[#allocation34_spill] sm:$0xff] }
 0x2d4   :  { %v5974_v43 = vadd.f32 %v18936_v53, %v5725_v3  ;;  %v9138_v55 = vrot.slane %v9136_v45, 4  ;;  %18937 = vst [vmem:[#allocation28_spill] sm:$0xff] %v17280_v62  ;;  %18938 = vst [vmem:[#allocation53_spill] sm:$0xff] %v17282_v20  ;;  %v9137_v5 = vsel %vm13242_vm15, %v11591_v35, %v9136_v45  ;;  %v5728_v29 = vadd.f32 %v18939_v48, %v5351_v42  ;;  %v18941_v35 = vld [vmem:[#allocation10_spill] sm:$0xff] }
 0x2d5   :  { %v9143_v31 = vrot.slane %v17048_v21, 5  ;;  %v6005_v0 = vmax.f32 %v5989_v22, 0.0  ;;  %v6003_v56 = vmax.f32 %v5987_v61, 0.0  ;;  %v17291_v60 = vpop.f32.mrf.mxu1  ;;  %v11598_v3 = vcombine.low %v17236_v63, %v9133_v27  ;;  %v17299_v42 = vpop.f32.mrf.mxu0  ;;  %v18945_v27 = vld [vmem:[#allocation79_spill] sm:$0xff] }
 0x2d6   :  { %v5990_v34 = vadd.f32 %v17147_v49, %v5974_v43  ;;  %v9140_v9 = vsel %vm13242_vm15, %v9138_v55, %v9139_v7  ;;  %18940 = vst [vmem:[#allocation85_spill] sm:$0xff] %v17291_v60  ;;  %v17295_v38 = vadd.f32 %v17147_v49, %v5976_v13  ;;  %v5977_v45 = vadd.f32 %v18941_v35, %v5728_v29  ;;  %v18943_v43 = vld [vmem:[#allocation23_spill] sm:$0xff]  ;;  %v9503_v7 = vld [vmem:[#allocation2 + $0x144] sm:$0xf]  ;;  %v18947_v35 = vld [vmem:[#allocation26_spill] sm:$0xff] }
 0x2d7   :  { %v9146_v18 = vrot.slane %v17050_v33, 5  ;;  %18942 = vst [vmem:[#allocation19_spill] sm:$0xff] %v17299_v42  ;;  %v6018_v22 = vadd.f32 %v6017_v57, %v6003_v56  ;;  %v11599_v61 = vcombine.low %v9137_v5, %v9140_v9  ;;  %v9145_v53 = vrot.slane %v9143_v31, 4  ;;  %v17303_v55 = vpop.f32.mrf.mxu1  ;;  %v12797_v5 = vld [vmem:[#allocation2 + $0x144] sm:$0xff]  }
 0x2d8   :  { %v5349_v48 = vadd.f32 %v18943_v43, %v17035_v4  ;;  %18944 = vst [vmem:[#allocation67_spill] sm:$0xff] %v17303_v55  ;;  %v9144_v63 = vsel %vm13242_vm15, %v11592_v51, %v9143_v31  ;;  %v11575_v13 = vcombine.low %v16990_v50, %v17018_v19  ;;  %v5354_v33 = vadd.f32 %v18945_v27, %v17053_v24  ;;  %v18946_v9 = vld [vmem:[#allocation25_spill] sm:$0xff]  ;;  %v18951_v31 = vld [vmem:[#allocation48_spill] sm:$0xff] }
 0x2d9   :  { %v11576_v57 = vcombine.low %v17038_v47, %v17048_v21  ;;  %v6019_v29 = vadd.f32 %v6018_v22, %v6004_v1  ;;  %v6006_v56 = vmax.f32 %v5990_v34, 0.0  ;;  %v5352_v43 = vadd.f32 %v18947_v35, %v17096_v28  ;;  %v17316_v55 = vld [vmem:[#allocation2 + $0x148] sm:$0xf]  ;;  %v17326_v1 = vpop.f32.mrf.mxu0  ;;  %v17328_v51 = vpop.f32.mrf.mxu1  ;;  %v17334_v22 = vld [vmem:[#allocation2 + $0x14c] sm:$0x1] }
 0x2da   :  { %v5726_v4 = vadd.f32 %v18946_v9, %v5349_v48  ;;  %12578 = vmatmul.mubr.msk.bf16.gmra.mxu1 %vm1310_vm8, %v11598_v3  ;;  %v17320_v50 = vadd.f32 %v17147_v49, %v5977_v45  ;;  %v9147_v19 = vsel %vm13242_vm15, %v9145_v53, %v9146_v18  ;;  %12563 = vmatprep.mubr.msk.bf16.mxu0 %vm1310_vm8, %v11575_v13  ;;  %v18948_v47 = vld [vmem:[#allocation52_spill] sm:$0xff]  ;;  %v9528_v24 = vshrl.u32 %v9503_v7, 16  ;;  %v18952_v3 = vld [vmem:[#allocation29_spill] sm:$0xff]  ;;  %v18953_v53 = vld [vmem:[#allocation7_spill] sm:$0xff] }
 0x2db   :  { %v5731_v21 = vadd.f32 %v18948_v47, %v5354_v33  ;;  %18949 = vst [vmem:[#allocation30_spill] sm:$0xff] %v17326_v1  ;;  %18950 = vst [vmem:[#allocation84_spill] sm:$0xff] %v17328_v51  ;;  %v6020_v28 = vadd.f32 %v6019_v29, %v6005_v0  ;;  %12581 = vmatprep.mubr.msk.bf16.mxu1 %vm1310_vm8, %v11599_v61  ;;  %12564 = vmatmul.mubr.msk.bf16.gmra.mxu0 %vm1310_vm8, %v11576_v57  ;;  %v9531_v18 = vshll.u32 %v9503_v7, 16  ;;  %v18954_v29 = vld [vmem:[#allocation49_spill] sm:$0xff]  ;;  %v18966_v51 = vld [vmem:[#allocation43_spill] sm:$0xff] }
 0x2dc   :  { %v5975_v34 = vadd.f32 %v18951_v31, %v5726_v4  ;;  %v5729_v45 = vadd.f32 %v18952_v3, %v5352_v43  ;;  %v9530_v13 = vrot.slane %v9528_v24, 4  ;;  %v9537_v27 = vshll.u32 %v17316_v55, 16  ;;  %12587 = vmatprep.mubr.msk.bf16.mxu0 %vm1310_vm8, %v12797_v5  ;;  %v9506_v4 = vld [vmem:[#allocation2 + $0x150] sm:$0xf]  ;;  %v17345_v24 = vpop.f32.mrf.mxu1  ;;  %v18957_v31 = vld [vmem:[#allocation80_spill] sm:$0xff] }
 0x2dd   :  { %v5980_v48 = vadd.f32 %v18953_v53, %v5731_v21  ;;  %v9541_v33 = vshrl.u32 %v17316_v55, 16  ;;  %v6021_v0 = vadd.f32 %v6020_v28, %v6006_v56  ;;  %v9533_v57 = vrot.slane %v9531_v18, 5  ;;  %v17343_v21 = vpop.f32.mrf.mxu0  ;;  %18956 = vst [vmem:[#allocation70_spill] sm:$0xff] %v17345_v24  ;;  %v18994_v1 = vld [vmem:[#allocation17_spill] sm:$0xff] }
 0x2de   :  { %v5991_v61 = vadd.f32 %v17147_v49, %v5975_v34  ;;  %v5978_v9 = vadd.f32 %v18954_v29, %v5729_v45  ;;  %v11600_v35 = vcombine.low %v9144_v63, %v9147_v19  ;;  %v9539_v43 = vrot.slane %v9537_v27, 5  ;;  %18955 = vst [vmem:[#allocation69_spill] sm:$0xff] %v17343_v21  ;;  %v17350_v34 = vld [vmem:[#allocation2 + $0x154] sm:$0xf]  ;;  %v12799_v27 = vld [vmem:[#allocation2 + $0x15c] sm:$0xff]  }
 0x2df   :  { %v9543_v47 = vrot.slane %v9541_v33, 4  ;;  %v9547_v7 = vshll.u32 %v17334_v22, 16  ;;  %v5159_v3 = vadd.f32 %v18957_v31, %v17142_v25  ;;  %v6008_v5 = vmax.f32 %v17295_v38, 0.0  ;;  %v12798_v45 = vld [vmem:[#allocation2 + $0x150] sm:$0xff]   ;;  %v17353_v33 = vpop.f32.mrf.mxu0 }
 0x2e0   :  { %v6007_v56 = vmax.f32 %v5991_v61, 0.0  ;;  %v9534_v28 = vor.u32 %v9533_v57, %v9530_v13  ;;  %v6009_v63 = vmax.f32 %v17320_v50, 0.0  ;;  %v9552_v53 = vshrl.u32 %v9506_v4, 16  ;;  %18958 = vst [vmem:[#allocation88_spill] sm:$0xff] %v17353_v33  ;;  %v17359_v61 = vld [vmem:[#allocation2 + $0x158] sm:$0x1] }
 0x2e1   :  { %v9544_v19 = vor.u32 %v9543_v47, %v9539_v43  ;;  %v9549_v18 = vrot.slane %v9547_v7, 5  ;;  %v17356_v24 = vadd.f32 %v17147_v49, %v5980_v48  ;;  %v5994_v25 = vadd.f32 %v17147_v49, %v5978_v9  ;;  %v17363_v7 = vpop.f32.mrf.mxu1  ;;  %v18960_v48 = vld [vmem:[#allocation46_spill] sm:$0xff] }
 0x2e2   :  { %v6022_v29 = vadd.f32 %v6021_v0, %v6007_v56  ;;  %v9535_v38 = vrot.slane %v9534_v28, 4  ;;  %12582 = vmatmul.mubr.msk.bf16.gmra.mxu1 %vm1310_vm8, %v11600_v35  ;;  %v9554_v57 = vrot.slane %v9552_v53, 4  ;;  %v9555_v50 = vshll.u32 %v9506_v4, 16  ;;  %18959 = vst [vmem:[#allocation86_spill] sm:$0xff] %v17363_v7  ;;  %v18961_v53 = vld [vmem:[#allocation18_spill] sm:$0xff]  ;;  %v12800_v7 = vld [vmem:[#allocation2 + $0x168] sm:$0xff]  }
 0x2e3   :  { %v9545_v13 = vrot.slane %v9544_v19, 4  ;;  %v9561_v47 = vshll.u32 %v17350_v34, 16  ;;  %v5355_v56 = vadd.f32 %v18960_v48, %v17132_v6  ;;  %v9565_v9 = vshrl.u32 %v17350_v34, 16  ;;  %12588 = vmatmul.mubr.msk.bf16.vlgmr.msra.gmra.mxu0 %vm1310_vm8, %v12798_v45  ;;  %v9509_v48 = vld [vmem:[#allocation2 + $0x15c] sm:$0xf] }
 0x2e4   :  { %v6023_v31 = vadd.f32 %v6022_v29, %v6008_v5  ;;  %v9540_v0 = vsel %vm13197_vm14, %v9535_v38, %v9539_v43  ;;  %v9557_v28 = vrot.slane %v9555_v50, 5  ;;  %v9571_v19 = vshll.u32 %v17359_v61, 16  ;;  %12622 = vmatpush3.bf16.msra.mxu0 %v18961_v53  ;;  %12591 = vmatprep.mubr.msk.bf16.mxu0 %vm1310_vm8, %v12799_v27  ;;  %v17376_v5 = vpop.f32.mrf.mxu0  ;;  %v12840_v45 = vld [vmem:[%s18407_s1 + $0xe] sm:$0x3]  ;;  %v17384_v53 = vld [vmem:[#allocation2 + $0x160] sm:$0xf] }
 0x2e5   :  { %v9550_v35 = vsel %vm13197_vm14, %v9545_v13, %v9549_v18  ;;  %v9563_v4 = vrot.slane %v9561_v47, 5  ;;  %18962 = vst [vmem:[#allocation87_spill] sm:$0xff] %v17376_v5  ;;  %v6010_v43 = vmax.f32 %v5994_v25, 0.0  ;;  %v9567_v38 = vrot.slane %v9565_v9, 4  ;;  %12727 = vmatprep.subr.msk.bf16.mxu0 %vm1335_vm0, %v12840_v45  ;;  %v18963_v50 = vld [vmem:[#allocation13_spill] sm:$0xff]  ;;  %v17388_v25 = vpop.f32.mrf.mxu1  ;;  %v18983_v5 = vld [vmem:[#allocation98_spill] sm:$0xff] }
 0x2e6   :  { %v6024_v29 = vadd.f32 %v6023_v31, %v6009_v63  ;;  %v11625_v6 = vcombine.low %v9540_v0, %v9550_v35  ;;  %v9558_v13 = vor.u32 %v9557_v28, %v9554_v57  ;;  %v5353_v47 = vadd.f32 %v18963_v50, %v5159_v3  ;;  %v17386_v27 = vld [vmem:[#allocation2 + $0x164] sm:$0x1]  ;;  %18964 = vst [vmem:[#allocation71_spill] sm:$0xff] %v17388_v25  ;;  %v18965_v31 = vld [vmem:[#allocation97_spill] sm:$0xff]  ;;  %v12801_v3 = vld [vmem:[#allocation2 + $0x174] sm:$0xff]   ;;  %v17393_v50 = vpop.f32.mrf.mxu0 }
 0x2e7   :  { %v5732_v0 = vadd.f32 %v18965_v31, %v5355_v56  ;;  %v9568_v9 = vor.u32 %v9567_v38, %v9563_v4  ;;  %v9573_v35 = vrot.slane %v9571_v19, 5  ;;  %v9576_v57 = vshrl.u32 %v9509_v48, 16  ;;  %18967 = vst [vmem:[#allocation90_spill] sm:$0xff] %v17393_v50  ;;  %v18968_v19 = vld [vmem:[#allocation21_spill] sm:$0xff]  ;;  %v18970_v31 = vld [vmem:[#allocation12_spill] sm:$0xff]  ;;  %v18982_v50 = vld [vmem:[#allocation62_spill] sm:$0xff] }
 0x2e8   :  { %v6025_v63 = vadd.f32 %v6024_v29, %v6010_v43  ;;  %12605 = vmatprep.mubr.msk.bf16.mxu1 %vm1310_vm8, %v11625_v6  ;;  %v9559_v45 = vrot.slane %v9558_v13, 4  ;;  %v5730_v18 = vadd.f32 %v18966_v51, %v5353_v47  ;;  %v9579_v28 = vshll.u32 %v9509_v48, 16  ;;  %v9512_v51 = vld [vmem:[#allocation2 + $0x168] sm:$0xf]  ;;  %v17401_v47 = vld [vmem:[#allocation2 + $0x16c] sm:$0xf]  ;;  %v17403_v48 = vpop.f32.mrf.mxu1 }
 0x2e9   :  { %v9569_v60 = vrot.slane %v9568_v9, 4  ;;  %v9585_v20 = vshll.u32 %v17384_v53, 16  ;;  %v9589_v43 = vshrl.u32 %v17384_v53, 16  ;;  %v9595_v29 = vshll.u32 %v17386_v27, 16  ;;  %18969 = vst [vmem:[#allocation91_spill] sm:$0xff] %v17403_v48 }
 0x2ea   :  { %v9564_v56 = vsel %vm13197_vm14, %v9559_v45, %v9563_v4  ;;  %v5979_v6 = vadd.f32 %v18968_v19, %v5730_v18  ;;  %v9578_v38 = vrot.slane %v9576_v57, 4  ;;  %v9581_v13 = vrot.slane %v9579_v28, 5  ;;  %v17413_v28 = vpop.f32.mrf.mxu0  ;;  %v9515_v48 = vld [vmem:[#allocation2 + $0x174] sm:$0xf] }
 0x2eb   :  { %v5981_v9 = vadd.f32 %v18970_v31, %v5732_v0  ;;  %v9574_v25 = vsel %vm13197_vm14, %v9569_v60, %v9573_v35  ;;  %v9587_v52 = vrot.slane %v9585_v20, 5  ;;  %v9591_v41 = vrot.slane %v9589_v43, 4  ;;  %12592 = vmatmul.mubr.msk.bf16.gmra.mxu0 %vm1310_vm8, %v12800_v7  ;;  %18971 = vst [vmem:[#allocation89_spill] sm:$0xff] %v17413_v28 }
 0x2ec   :  { %v11626_v4 = vcombine.low %v9564_v56, %v9574_v25  ;;  %v5995_v18 = vadd.f32 %v17147_v49, %v5979_v6  ;;  %v9582_v45 = vor.u32 %v9581_v13, %v9578_v38  ;;  %v9597_v57 = vrot.slane %v9595_v29, 5  ;;  %12595 = vmatprep.mubr.msk.bf16.mxu0 %vm1310_vm8, %v12801_v3  ;;  %v17419_v43 = vpop.f32.mrf.mxu0  ;;  %v17421_v29 = vpop.f32.mrf.mxu1  ;;  %v18974_v3 = vld [vmem:[#allocation20_spill] sm:$0xff] }
 0x2ed   :  { %v9592_v19 = vor.u32 %v9591_v41, %v9587_v52  ;;  %v9600_v0 = vshrl.u32 %v9512_v51, 16  ;;  %v9603_v31 = vshll.u32 %v9512_v51, 16  ;;  %v9609_v60 = vshll.u32 %v17401_v47, 16  ;;  %18972 = vst [vmem:[#allocation40_spill] sm:$0xff] %v17419_v43  ;;  %18973 = vst [vmem:[#allocation93_spill] sm:$0xff] %v17421_v29  ;;  %v12802_v13 = vld [vmem:[#allocation2 + $0x180] sm:$0xff]  }
 0x2ee   :  { %12606 = vmatmul.mubr.msk.bf16.vlgmr.msra.gmra.mxu1 %vm1310_vm8, %v11626_v4  ;;  %v6011_v20 = vmax.f32 %v5995_v18, 0.0  ;;  %v9583_v35 = vrot.slane %v9582_v45, 4  ;;  %v9613_v7 = vshrl.u32 %v17401_v47, 16  ;;  %v9619_v25 = vshll.u32 %v17408_v44, 16 }
 0x2ef   :  { %12640 = vmatpush3.bf16.msra.mxu1 %v18974_v3  ;;  %v9593_v56 = vrot.slane %v9592_v19, 4  ;;  %v9602_v41 = vrot.slane %v9600_v0, 4  ;;  %v9605_v6 = vrot.slane %v9603_v31, 5  ;;  %v9611_v38 = vrot.slane %v9609_v60, 5  ;;  %v12841_v19 = vld [vmem:[%s18407_s1 + $0x10] sm:$0x3] }
 0x2f0   :  { %v17425_v51 = vadd.f32 %v17147_v49, %v5981_v9  ;;  %v6026_v4 = vadd.f32 %v6025_v63, %v6011_v20  ;;  %v9588_v18 = vsel %vm13197_vm14, %v9583_v35, %v9587_v52  ;;  %v9615_v45 = vrot.slane %v9613_v7, 4  ;;  %12728 = vmatprep.subr.msk.bf16.mxu1 %vm1335_vm0, %v12841_v19  ;;  %v18975_v0 = vld [vmem:[#allocation60_spill] sm:$0xff]  ;;  %v18976_v31 = vld [vmem:[#allocation42_spill] sm:$0xff]  ;;  %v17441_v52 = vld [vmem:[#allocation2 + $0x17c] sm:$0x1]  ;;  %v17443_v9 = vpop.f32.mrf.mxu0  ;;  %v17449_v19 = vpop.f32.mrf.mxu1 }
 0x2f1   :  { %v17437_v60 = vadd.f32 %v18976_v31, %v18975_v0  ;;  %v9598_v49 = vsel %vm13197_vm14, %v9593_v56, %v9597_v57  ;;  %v9606_v63 = vor.u32 %v9605_v6, %v9602_v41  ;;  %18977 = vst [vmem:[#allocation73_spill] sm:$0xff] %v17443_v9  ;;  %v18978_v20 = vmax.f32 %v17356_v24, 0.0  ;;  %18979 = vst [vmem:[#allocation38_spill] sm:$0xff] %v17449_v19  ;;  %v9518_v57 = vld [vmem:[#allocation2 + $0x180] sm:$0xf] }
 0x2f2   :  { %v11627_v7 = vcombine.low %v9588_v18, %v9598_v49  ;;  %v9616_v3 = vor.u32 %v9615_v45, %v9611_v38  ;;  %v9621_v29 = vrot.slane %v9619_v25, 5  ;;  %v9624_v0 = vshrl.u32 %v9515_v48, 16  ;;  %v17457_v25 = vld [vmem:[#allocation2 + $0x184] sm:$0xf]  ;;  %v17464_v49 = vpop.f32.mrf.mxu0  ;;  %v17468_v56 = vpop.f32.mrf.mxu1 }
 0x2f3   :  { %v17447_v35 = vadd.f32 %v6026_v4, %v18978_v20  ;;  %v9607_v43 = vrot.slane %v9606_v63, 4  ;;  %v9627_v31 = vshll.u32 %v9515_v48, 16  ;;  %v9633_v28 = vshll.u32 %v17429_v59, 16  ;;  %12596 = vmatmul.mubr.msk.bf16.gmra.mxu0 %vm1310_vm8, %v12802_v13  ;;  %v17462_v13 = vld [vmem:[#allocation2 + $0x188] sm:$0x1]  ;;  %18980 = vst [vmem:[#allocation37_spill] sm:$0xff] %v17464_v49 }
 0x2f4   :  { %12609 = vmatprep.mubr.msk.bf16.mxu1 %vm1310_vm8, %v11627_v7  ;;  %v9617_v24 = vrot.slane %v9616_v3, 4  ;;  %v9637_v41 = vshrl.u32 %v17429_v59, 16  ;;  %v9643_v6 = vshll.u32 %v17441_v52, 16  ;;  %12599 = vmatprep.mubr.msk.bf16.mxu0 %vm1310_vm8, %v12803_v16  ;;  %v9626_v4 = vrot.slane %v9624_v0, 4  ;;  %18981 = vst [vmem:[#allocation92_spill] sm:$0xff] %v17468_v56 }
 0x2f5   :  { %v9612_v48 = vsel %vm13197_vm14, %v9607_v43, %v9611_v38  ;;  %v9629_v18 = vrot.slane %v9627_v31, 5  ;;  %v9635_v45 = vrot.slane %v9633_v28, 5  ;;  %v9648_v3 = vshrl.u32 %v9518_v57, 16  ;;  %v9521_v49 = vld [vmem:[#allocation2 + $0x18c] sm:$0xf] }
 0x2f6   :  { %v9622_v63 = vsel %vm13197_vm14, %v9617_v24, %v9621_v29  ;;  %v9639_v20 = vrot.slane %v9637_v41, 4  ;;  %v9645_v7 = vrot.slane %v9643_v6, 5  ;;  %v9651_v9 = vshll.u32 %v9518_v57, 16  ;;  %v17480_v57 = vpop.f32.mrf.mxu0 }
 0x2f7   :  { %v11628_v19 = vcombine.low %v9612_v48, %v9622_v63  ;;  %v9630_v16 = vor.u32 %v9629_v18, %v9626_v4  ;;  %v9657_v43 = vshll.u32 %v17457_v25, 16  ;;  %v9650_v0 = vrot.slane %v9648_v3, 4  ;;  %v17478_v48 = vld [vmem:[#allocation2 + $0x190] sm:$0xf]  ;;  %18984 = vst [vmem:[#allocation102_spill] sm:$0xff] %v17480_v57  ;;  %v18985_v4 = vld [vmem:[#allocation32_spill] sm:$0xff] }
 0x2f8   :  { %v9640_v38 = vor.u32 %v9639_v20, %v9635_v45  ;;  %v9661_v28 = vshrl.u32 %v17457_v25, 16  ;;  %v9667_v31 = vshll.u32 %v17462_v13, 16  ;;  %v17475_v29 = vadd.f32 %v18983_v5, %v18982_v50  ;;  %v18986_v18 = vld [vmem:[#allocation36_spill] sm:$0xff]  ;;  %v18987_v20 = vld [vmem:[#allocation54_spill] sm:$0xff]  ;;  %v18988_v3 = vld [vmem:[#allocation61_spill] sm:$0xff]  ;;  %v17490_v50 = vpop.f32.mrf.mxu1  ;;  %v17496_v21 = vpop.f32.mrf.mxu0 }
 0x2f9   :  { %12610 = vmatmul.mubr.msk.bf16.gmra.mxu1 %vm1310_vm8, %v11628_v19  ;;  %v9631_v24 = vrot.slane %v9630_v16, 4  ;;  %v9653_v41 = vrot.slane %v9651_v9, 5  ;;  %v9659_v6 = vrot.slane %v9657_v43, 5  ;;  %v17484_v63 = vadd.f32 %v18986_v18, %v18985_v4  ;;  %18989 = vst [vmem:[#allocation75_spill] sm:$0xff] %v17490_v50  ;;  %v17494_v43 = vld [vmem:[#allocation2 + $0x194] sm:$0x1] }
 0x2fa   :  { %v17488_v56 = vadd.f32 %v18988_v3, %v18987_v20  ;;  %v9641_v33 = vrot.slane %v9640_v38, 4  ;;  %v9663_v5 = vrot.slane %v9661_v28, 4  ;;  %v9669_v16 = vrot.slane %v9667_v31, 5  ;;  %18990 = vst [vmem:[#allocation95_spill] sm:$0xff] %v17496_v21  ;;  %v188_v28 = vld [vmem:[%s18406_s0 + $0xf8] sm:$0xf] }
 0x2fb   :  { %v9636_v9 = vsel %vm13197_vm14, %v9631_v24, %v9635_v45  ;;  %v9654_v19 = vor.u32 %v9653_v41, %v9650_v0  ;;  %v9672_v57 = vshrl.u32 %v9521_v49, 16  ;;  %v9675_v20 = vshll.u32 %v9521_v49, 16  ;;  %v17505_v24 = vpop.f32.mrf.mxu0  ;;  %v189_v49 = vld [vmem:[%s18406_s0 + $0xfc] sm:$0xf] }
 0x2fc   :  { %v9646_v4 = vsel %vm13197_vm14, %v9641_v33, %v9645_v7  ;;  %v9664_v18 = vor.u32 %v9663_v5, %v9659_v6  ;;  %v9681_v38 = vshll.u32 %v17478_v48, 16  ;;  %v9685_v31 = vshrl.u32 %v17478_v48, 16  ;;  %18991 = vst [vmem:[#allocation94_spill] sm:$0xff] %v17505_v24  ;;  %v17511_v7 = vpop.f32.mrf.mxu1  ;;  %v18993_v5 = vld [vmem:[#allocation9_spill] sm:$0xff] }
 0x2fd   :  { %v11629_v3 = vcombine.low %v9636_v9, %v9646_v4  ;;  %v9655_v45 = vrot.slane %v9654_v19, 4  ;;  %v9674_v0 = vrot.slane %v9672_v57, 4  ;;  %v9677_v50 = vrot.slane %v9675_v20, 5  ;;  %18992 = vst [vmem:[#allocation33_spill] sm:$0xff] %v17511_v7  ;;  %v17522_v23 = vpop.f32.mrf.mxu0 }
 0x2fe   :  { %v9665_v41 = vrot.slane %v9664_v18, 4  ;;  %v9683_v21 = vrot.slane %v9681_v38, 5  ;;  %v9691_v33 = vshll.u32 %v17494_v43, 16  ;;  %v17515_v9 = vadd.f32 %v18994_v1, %v18993_v5  ;;  %v18995_v1 = vld [vmem:[#allocation65_spill] sm:$0xff]  ;;  %v18996_v5 = vld [vmem:[#allocation63_spill] sm:$0xff] }
 0x2ff   :  { %12613 = vmatprep.mubr.msk.bf16.mxu1 %vm1310_vm8, %v11629_v3  ;;  %v9660_v57 = vsel %vm13197_vm14, %v9655_v45, %v9659_v6  ;;  %v9687_v19 = vrot.slane %v9685_v31, 4  ;;  %v721_v4 = vshrl.u32 %v188_v28, 16  ;;  %v9678_v20 = vor.u32 %v9677_v50, %v9674_v0  ;;  %v18998_v6 = vld [vmem:[#allocation99_spill] sm:$0xff]  ;;  %v17532_v50 = vpop.f32.mrf.mxu1 }
 0x300   :  { %v9670_v18 = vsel %vm13197_vm14, %v9665_v41, %v9669_v16  ;;  %v9693_v38 = vrot.slane %v9691_v33, 5  ;;  %v724_v24 = vshll.u32 %v188_v28, 16  ;;  %v729_v2 = vshrl.u32 %v189_v49, 16  ;;  %v1056_v16 = vld [vmem:[#allocation2 + $0x198] sm:$0xf]  ;;  %18999 = vst [vmem:[#allocation96_spill] sm:$0xff] %v17532_v50 }
 0x301   :  { %v11630_v42 = vcombine.low %v9660_v57, %v9670_v18  ;;  %v9688_v62 = vor.u32 %v9687_v19, %v9683_v21  ;;  %v723_v7 = vrot.slane %v721_v4, 7  ;;  %v17526_v3 = vadd.f32 %v18996_v5, %v18995_v1  ;;  %v9880_v57 = vld [vmem:[#allocation2 + $0x144] sm:$0xe]  ;;  %v19000_v19 = vld [vmem:[#allocation51_spill] sm:$0xff]  ;;  %v19003_v5 = vld [vmem:[#allocation66_spill] sm:$0xff] }
 0x302   :  { %v17530_v45 = vadd.f32 %v18998_v6, %v18997_v36  ;;  %v9679_v31 = vrot.slane %v9678_v20, 4  ;;  %v732_v37 = vshll.u32 %v189_v49, 16  ;;  %v731_v33 = vrot.slane %v729_v2, 7  ;;  %v19001_v4 = vld [vmem:[#allocation100_spill] sm:$0xff]  ;;  %v19002_v1 = vld [vmem:[#allocation103_spill] sm:$0xff] }
 0x303   :  { %12614 = vmatmul.mubr.msk.bf16.gmra.mxu1 %vm1310_vm8, %v11630_v42  ;;  %v9689_v28 = vrot.slane %v9688_v62, 4  ;;  %v726_v0 = vor.u32 %v724_v24, %v723_v7  ;;  %v727_v41 = vrot.slane %v723_v7, 4  ;;  %v17537_v18 = vadd.f32 %v19001_v4, %v19000_v19  ;;  %v19004_v49 = vld [vmem:[#allocation11_spill] sm:$0xff]  ;;  %v17553_v19 = vpop.f32.mrf.mxu0  ;;  %v19081_v40 = vld [vmem:[#allocation94_spill] sm:$0xff] }
 0x304   :  { %v17541_v36 = vadd.f32 %v19003_v5, %v19002_v1  ;;  %v17545_v20 = vadd.f32 %v19004_v49, %v16957_v12  ;;  %v9684_v42 = vsel %vm13197_vm14, %v9679_v31, %v9683_v21  ;;  %v1060_v62 = vld [vmem:[#allocation2 + $0x1a0] sm:$0x1]  ;;  %v734_v24 = vor.u32 %v732_v37, %v731_v33  ;;  %v19005_v1 = vld [vmem:[#allocation45_spill] sm:$0xff]  ;;  %v17560_v31 = vpop.f32.mrf.mxu1 }
 0x305   :  { %v9694_v2 = vsel %vm13197_vm14, %v9689_v28, %v9693_v38  ;;  %v736_v7 = vrot.slane %v731_v33, 4  ;;  %v1057_v6 = vsel %vm13157_vm10, %v726_v0, %v1056_v16  ;;  %v17557_v5 = vadd.f32 %v19005_v1, %v16970_v10  ;;  %19006 = vst [vmem:[#allocation39_spill] sm:$0xff] %v17560_v31  ;;  %v19008_v16 = vld [vmem:[#allocation44_spill] sm:$0xff]  ;;  %v17570_v10 = vpop.f32.mrf.mxu0  ;;  %v19014_v49 = vld [vmem:[#allocation47_spill] sm:$0xff] }
 0x306   :  { %v11631_v4 = vcombine.low %v9684_v42, %v9694_v2  ;;  %1058 = vst [vmem:[#allocation2 + $0x198] sm:$0xf] %v1057_v6  ;;  %v11641_v12 = vrot.slane %v9880_v57, 9  ;;  %v9914_v21 = vrot.slane %v17316_v55, 5  ;;  %v735_v37 = vsel %vm13134_vm9, %v727_v41, %v734_v24  ;;  %19010 = vst [vmem:[#allocation27_spill] sm:$0xff] %v17570_v10  ;;  %v19011_v55 = vld [vmem:[#allocation56_spill] sm:$0xff] }
 0x307   :  { %v1061_v26 = vsel %vm13173_vm11, %v736_v7, %v1060_v62  ;;  %v3571_v28 = vrot.slane %v19008_v16, 4  ;;  %v19009_v0 = vmax.f32 %v17425_v51, 0.0  ;;  %1059 = vst.msk [vmem:[#allocation2 + $0x19c] sm:$0xf] %vm16_vm1, %v735_v37  ;;  %v19012_v57 = vld [vmem:[#allocation68_spill] sm:$0xff]  ;;  %v19013_v41 = vld [vmem:[#allocation22_spill] sm:$0xff]  ;;  %v17589_v37 = vpop.f32.mrf.mxu0 }
 0x308   :  { %12617 = vmatprep.mubr.msk.bf16.mxu1 %vm1310_vm8, %v11631_v4  ;;  %1062 = vst [vmem:[#allocation2 + $0x1a0] sm:$0x1] %v1061_v26  ;;  %v17576_v46 = vadd.f32 %v19012_v57, %v19011_v55  ;;  %v17580_v42 = vadd.f32 %v19014_v49, %v19013_v41  ;;  %v9916_v62 = vrot.slane %v9914_v21, 4  ;;  %v9917_v51 = vrot.slane %v17334_v22, 5  ;;  %v9881_v2 = vld [vmem:[#allocation2 + $0x150] sm:$0xe] }
 0x309   :  { %v6028_v33 = vadd.f32 %v17447_v35, %v19009_v0  ;;  %v19015_v35 = vld [vmem:[#allocation74_spill] sm:$0xff]  ;;  %v19016_v24 = vld [vmem:[#allocation104_spill] sm:$0xff]  ;;  %v3572_v6 = vadd.f32 %v3571_v28, %v19008_v16  ;;  %v9921_v1 = vrot.slane %v17350_v34, 5  ;;  %19017 = vst [vmem:[#allocation34_spill] sm:$0xff] %v17589_v37  ;;  %v19019_v26 = vld [vmem:[#allocation105_spill] sm:$0xff]  ;;  %v9915_v22 = vsel %vm13242_vm15, %v11641_v12, %v9914_v21  ;;  %v17605_v16 = vpop.f32.mrf.mxu1 }
 0x30a   :  { %v17585_v7 = vadd.f32 %v19016_v24, %v19015_v35  ;;  %v19018_v38 = vld [vmem:[#allocation76_spill] sm:$0xff]  ;;  %v19020_v55 = vld [vmem:[#allocation6_spill] sm:$0xff]  ;;  %v19021_v57 = vld [vmem:[#allocation59_spill] sm:$0xff]  ;;  %v17603_v49 = vadd.f32 %v17082_v32, %v17437_v60  ;;  %19022 = vst [vmem:[#allocation10_spill] sm:$0xff] %v17605_v16  ;;  %v11642_v35 = vrot.slane %v9881_v2, 9  ;;  %v9924_v24 = vrot.slane %v17359_v61, 5 }
 0x30b   :  { %v6029_v4 = vrot.slane %v6028_v33, 4  ;;  %v17593_v0 = vadd.f32 %v19019_v26, %v19018_v38  ;;  %v17597_v41 = vadd.f32 %v19021_v57, %v19020_v55  ;;  %v3573_v34 = vrot.slane %v3572_v6, 2  ;;  %v9882_v38 = vld [vmem:[#allocation2 + $0x15c] sm:$0xe]  ;;  %v17608_v26 = vpop.f32.mrf.mxu0  ;;  %v17628_v31 = vpop.f32.mrf.mxu1 }
 0x30c   :  { %19023 = vst [vmem:[#allocation23_spill] sm:$0xff] %v17608_v26  ;;  %v9918_v55 = vsel %vm13242_vm15, %v9916_v62, %v9917_v51  ;;  %v9923_v57 = vrot.slane %v9921_v1, 4  ;;  %v17614_v12 = vadd.f32 %v17090_v39, %v17475_v29  ;;  %v17618_v32 = vadd.f32 %v17107_v17, %v17484_v63  ;;  %v9883_v29 = vld [vmem:[#allocation2 + $0x168] sm:$0xe]  ;;  %19025 = vst [vmem:[#allocation25_spill] sm:$0xff] %v17628_v31 }
 0x30d   :  { %v6030_v28 = vadd.f32 %v6029_v4, %v6028_v33  ;;  %v9524_v60 = vld [vmem:[#allocation2 + $0x198] sm:$0xf]  ;;  %v3574_v21 = vadd.f32 %v3573_v34, %v3572_v6  ;;  %v17622_v61 = vadd.f32 %v17127_v14, %v17488_v56  ;;  %v9928_v2 = vrot.slane %v17384_v53, 5  ;;  %v17625_v4 = vpop.f32.mrf.mxu0 }
 0x30e   :  { %19024 = vst [vmem:[#allocation79_spill] sm:$0xff] %v17625_v4  ;;  %v9696_v62 = vshrl.u32 %v9524_v60, 16  ;;  %v9699_v51 = vshll.u32 %v9524_v60, 16  ;;  %v11643_v16 = vrot.slane %v9882_v38, 9  ;;  %v9931_v39 = vrot.slane %v17386_v27, 5  ;;  %v12804_v50 = vld [vmem:[#allocation2 + $0x198] sm:$0xff]  }
 0x30f   :  { %v6031_v33 = vrot.slane %v6030_v28, 2  ;;  %v17630_v17 = vld [vmem:[#allocation2 + $0x19c] sm:$0xf]  ;;  %v17632_v63 = vld [vmem:[#allocation2 + $0x1a0] sm:$0x1]  ;;  %v11649_v6 = vcombine.low %v9915_v22, %v9918_v55  ;;  %v9922_v14 = vsel %vm13242_vm15, %v11642_v35, %v9921_v1  ;;  %v17638_v53 = vadd.f32 %v17154_v15, %v17515_v9  ;;  %v17640_v56 = vpop.f32.mrf.mxu0  ;;  %12600 = vmatmul.mubr.msk.bf16.gmra.mxu0 %vm1310_vm8, %v12804_v50 }
 0x310   :  { %19026 = vst [vmem:[#allocation26_spill] sm:$0xff] %v17640_v56  ;;  %v9698_v38 = vrot.slane %v9696_v62, 4  ;;  %v9701_v27 = vrot.slane %v9699_v51, 5  ;;  %v9705_v60 = vshll.u32 %v17630_v17, 16  ;;  %v9709_v31 = vshrl.u32 %v17630_v17, 16  ;;  %v17649_v62 = vpop.f32.mrf.mxu1 }
 0x311   :  { %v6032_v34 = vadd.f32 %v6031_v33, %v6030_v28  ;;  %v9715_v4 = vshll.u32 %v17632_v63, 16  ;;  %v3575_v22 = vrot.slane %v3574_v21, 1  ;;  %v9930_v55 = vrot.slane %v9928_v2, 4  ;;  %v17645_v33 = vpop.f32.mrf.mxu0  ;;  %12623 = vmatprep.mubr.msk.bf16.mxu0 %vm1310_vm8, %v11649_v6 }
 0x312   :  { %19027 = vst [vmem:[#allocation52_spill] sm:$0xff] %v17645_v33  ;;  %v9702_v1 = vor.u32 %v9701_v27, %v9698_v38  ;;  %v9707_v35 = vrot.slane %v9705_v60, 5  ;;  %v9711_v15 = vrot.slane %v9709_v31, 4  ;;  %v9935_v9 = vrot.slane %v17401_v47, 5  ;;  %v9884_v31 = vld [vmem:[#allocation2 + $0x174] sm:$0xe] }
 0x313   :  { %v6033_v28 = vrot.slane %v6032_v34, 1  ;;  %v3576_v51 = vadd.f32 %v3575_v22, %v3574_v21  ;;  %v9925_v26 = vsel %vm13242_vm15, %v9923_v57, %v9924_v24  ;;  %v11644_v37 = vrot.slane %v9883_v29, 9  ;;  %v17654_v10 = vpop.f32.mrf.mxu0  ;;  %v17666_v22 = vpop.f32.mrf.mxu1 }
 0x314   :  { %v9703_v33 = vrot.slane %v9702_v1, 4  ;;  %v9712_v38 = vor.u32 %v9711_v15, %v9707_v35  ;;  %v9717_v27 = vrot.slane %v9715_v4, 5  ;;  %v9929_v50 = vsel %vm13242_vm15, %v11643_v16, %v9928_v2  ;;  %19028 = vst [vmem:[#allocation48_spill] sm:$0xff] %v17666_v22 }
 0x315   :  { %v6034_v56 = vadd.f32 %v6033_v28, %v6032_v34  ;;  %v9932_v60 = vsel %vm13242_vm15, %v9930_v55, %v9931_v39  ;;  %v9937_v6 = vrot.slane %v9935_v9, 4  ;;  %v9938_v21 = vrot.slane %v17408_v44, 5  ;;  %v17661_v34 = vpop.f32.mrf.mxu0  ;;  %v12805_v55 = vld [vmem:[#allocation2 + $0x150] sm:$0xff]  }
 0x316   :  { %v9708_v24 = vsel %vm13197_vm14, %v9703_v33, %v9707_v35  ;;  %v9713_v57 = vrot.slane %v9712_v38, 4  ;;  %v11650_v29 = vcombine.low %v9922_v14, %v9925_v26  ;;  %v9942_v4 = vrot.slane %v17429_v59, 5  ;;  %v9887_v38 = vld [vmem:[#allocation2 + $0x198] sm:$0xe] }
 0x317   :  { %v6035_v47 = vadd.f32 %v6034_v56, %v3576_v51  ;;  %v17672_v2 = vadd.f32 %v17171_v8, %v17526_v3  ;;  %v11645_v39 = vrot.slane %v9884_v31, 9  ;;  %v9945_v44 = vrot.slane %v17441_v52, 5  ;;  %v9885_v56 = vld [vmem:[#allocation2 + $0x180] sm:$0xe]  ;;  %v9886_v52 = vld [vmem:[#allocation2 + $0x18c] sm:$0xe]  ;;  %v17684_v35 = vpop.f32.mrf.mxu0 }
 0x318   :  { %v9718_v28 = vsel %vm13197_vm14, %v9713_v57, %v9717_v27  ;;  %v11651_v33 = vcombine.low %v9929_v50, %v9932_v60  ;;  %v9936_v59 = vsel %vm13242_vm15, %v11644_v37, %v9935_v9  ;;  %v9944_v26 = vrot.slane %v9942_v4, 4  ;;  %12624 = vmatmul.mubr.msk.bf16.vlgmr.msra.gmra.mxu0 %vm1310_vm8, %v11650_v29  ;;  %v17696_v27 = vpop.f32.mrf.mxu1  ;;  %v10324_v60 = vld [vmem:[#allocation2 + $0x154] sm:$0xf]  ;;  %v10700_v29 = vld [vmem:[#allocation2 + $0x150] sm:$0xe] }
 0x319   :  { %v17668_v16 = vmul.f32 0.00390625, %v6035_v47  ;;  %v11632_v14 = vcombine.low %v9708_v24, %v9718_v28  ;;  %v9939_v8 = vsel %vm13242_vm15, %v9937_v6, %v9938_v21  ;;  %v9949_v3 = vrot.slane %v17457_v25, 5  ;;  %19030 = vst [vmem:[#allocation7_spill] sm:$0xff] %v17696_v27  ;;  %v19032_v6 = vld [vmem:[#allocation81_spill] sm:$0xff]  ;;  %v19035_v28 = vld [vmem:[#allocation16_spill] sm:$0xff] }
 0x31a   :  { %v17689_v15 = vadd.f32 %v17184_v11, %v17530_v45  ;;  %v17693_v37 = vadd.f32 %v17199_v54, %v17537_v18  ;;  %v11646_v9 = vrot.slane %v9885_v56, 9  ;;  %v9952_v51 = vrot.slane %v17462_v13, 5  ;;  %v19031_v13 = vld [vmem:[#allocation15_spill] sm:$0xff]  ;;  %12627 = vmatprep.mubr.msk.bf16.mxu0 %vm1310_vm8, %v11651_v33  ;;  %v10325_v56 = vld [vmem:[#allocation2 + $0x158] sm:$0x1] }
 0x31b   :  { %19029 = vst [vmem:[#allocation29_spill] sm:$0xff] %v17668_v16  ;;  %v6037_v1 = vmul.f32 %v17668_v16, %v17668_v16  ;;  %12618 = vmatmul.mubr.msk.bf16.gmra.mxu1 %vm1310_vm8, %v11632_v14  ;;  %v9943_v25 = vsel %vm13242_vm15, %v11645_v39, %v9942_v4  ;;  %v9946_v11 = vsel %vm13242_vm15, %v9944_v26, %v9945_v44  ;;  %v9951_v54 = vrot.slane %v9949_v3, 4  ;;  %v17721_v4 = vpop.f32.mrf.mxu0  ;;  %v17742_v14 = vld [vmem:[#allocation2 + $0x160] sm:$0xf] }
 0x31c   :  { %v17705_v45 = vadd.f32 %v17209_v30, %v17541_v36  ;;  %12641 = vmatprep.mubr.msk.bf16.mxu1 %vm1310_vm8, %v12805_v55  ;;  %12658 = vmatpush3.bf16.msra.mxu0 %v19031_v13  ;;  %v11652_v18 = vcombine.low %v9936_v59, %v9939_v8  ;;  %v11647_v50 = vrot.slane %v9886_v52, 9  ;;  %v9956_v31 = vrot.slane %v17478_v48, 5  ;;  %v19033_v30 = vld [vmem:[#allocation55_spill] sm:$0xff]  ;;  %v19036_v55 = vld [vmem:[#allocation41_spill] sm:$0xff] }
 0x31d   :  { %6038 = vadd.xlane.f32.xlu0 %v6037_v1  ;;  %v9959_v47 = vrot.slane %v17494_v43, 5  ;;  %v17714_v21 = vadd.f32 %v19032_v6, %v17545_v20  ;;  %v17718_v36 = vadd.f32 %v19033_v30, %v17557_v5  ;;  %v11648_v24 = vrot.slane %v9887_v38, 9  ;;  %v12806_v48 = vld [vmem:[#allocation2 + $0x15c] sm:$0xff]   ;;  %v17731_v5 = vpop.f32.mrf.mxu1  ;;  %v12807_v8 = vld [vmem:[#allocation2 + $0x168] sm:$0xff]   ;;  %v17764_v13 = vpop.f32.mrf.mxu0 }
 0x31e   :  { %v9963_v57 = vrot.slane %v17630_v17, 5  ;;  %v11653_v39 = vcombine.low %v9943_v25, %v9946_v11  ;;  %v17725_v43 = vsel %vm13242_vm15, %v11646_v9, %v9949_v3  ;;  %v17729_v20 = vsel %vm13242_vm15, %v9951_v54, %v9952_v51  ;;  %19034 = vst [vmem:[#allocation49_spill] sm:$0xff] %v17731_v5  ;;  %v10701_v1 = vld [vmem:[#allocation2 + $0x15c] sm:$0xe]  ;;  %v10323_v51 = vld [vmem:[#allocation2 + $0x150] sm:$0xf] }
 0x31f   :  { %v9958_v44 = vrot.slane %v9956_v31, 4  ;;  %v17735_v17 = vadd.f32 %v19035_v28, %v17576_v46  ;;  %v17739_v33 = vadd.f32 %v19036_v55, %v17580_v42  ;;  %v9966_v59 = vrot.slane %v17632_v63, 5  ;;  %v19037_v38 = vld [vmem:[#allocation28_spill] sm:$0xff]  ;;  %v19048_v16 = vld [vmem:[#allocation107_spill] sm:$0xff] }
 0x320   :  { %v10734_v26 = vrot.slane %v10324_v60, 5  ;;  %v17746_v3 = vsel %vm13242_vm15, %v11647_v50, %v9956_v31  ;;  %v9965_v46 = vrot.slane %v9963_v57, 4  ;;  %v11697_v9 = vrot.slane %v10700_v29, 9  ;;  %v17762_v54 = vld [vmem:[#allocation2 + $0x164] sm:$0x1]  ;;  %12628 = vmatmul.mubr.msk.bf16.gmra.mxu0 %vm1310_vm8, %v11652_v18  ;;  %v19038_v31 = vld [vmem:[#allocation19_spill] sm:$0xff] }
 0x321   :  { %v17750_v52 = vsel %vm13242_vm15, %v9958_v44, %v9959_v47  ;;  %v11654_v42 = vcombine.low %v17725_v43, %v17729_v20  ;;  %v17756_v63 = vsel %vm13242_vm15, %v11648_v24, %v9963_v57  ;;  %v17760_v25 = vadd.f32 %v19037_v38, %v17585_v7  ;;  %v17772_v24 = vpop.f32.mrf.mxu1  ;;  %12631 = vmatprep.mubr.msk.bf16.mxu0 %vm1310_vm8, %v11653_v39  ;;  %v10326_v43 = vld [vmem:[#allocation2 + $0x15c] sm:$0xf]  ;;  %v19040_v20 = vld [vmem:[#allocation78_spill] sm:$0xff]  ;;  %v10702_v5 = vld [vmem:[#allocation2 + $0x168] sm:$0xe] }
 0x322   :  { %v10737_v11 = vrot.slane %v10325_v56, 5  ;;  %v10736_v50 = vrot.slane %v10734_v26, 4  ;;  %v17769_v47 = vadd.f32 %v19038_v31, %v17593_v0  ;;  %v11698_v6 = vrot.slane %v10701_v1, 9  ;;  %19039 = vst [vmem:[#allocation80_spill] sm:$0xff] %v17772_v24 }
 0x323   :  { %v10741_v30 = vrot.slane %v17742_v14, 5  ;;  %12642 = vmatmul.mubr.msk.bf16.vlgmr.msra.gmra.mxu1 %vm1310_vm8, %v12806_v48  ;;  %v11655_v7 = vcombine.low %v17746_v3, %v17750_v52  ;;  %v10348_v57 = vshrl.u32 %v10323_v51, 16  ;;  %v10351_v29 = vshll.u32 %v10323_v51, 16  ;;  %v17789_v52 = vpop.f32.mrf.mxu0  ;;  %v17795_v38 = vpop.f32.mrf.mxu1 }
 0x324   :  { %v10357_v18 = vshll.u32 %v10324_v60, 16  ;;  %12676 = vmatpush3.bf16.msra.mxu1 %v19040_v20  ;;  %12645 = vmatprep.mubr.msk.bf16.mxu1 %vm1310_vm8, %v12807_v8  ;;  %v17782_v0 = vsel %vm13242_vm15, %v9965_v46, %v9966_v59  ;;  %v17786_v48 = vsel %vm13242_vm15, %v11697_v9, %v10734_v26  ;;  %v10744_v39 = vrot.slane %v17762_v54, 5  ;;  %19041 = vst [vmem:[#allocation46_spill] sm:$0xff] %v17795_v38  ;;  %v12808_v26 = vld [vmem:[#allocation2 + $0x174] sm:$0xff]  }
 0x325   :  { %v10361_v44 = vshrl.u32 %v10324_v60, 16  ;;  %v10350_v28 = vrot.slane %v10348_v57, 4  ;;  %v10353_v55 = vrot.slane %v10351_v29, 5  ;;  %v10367_v3 = vshll.u32 %v10325_v56, 16  ;;  %v19042_v60 = vld [vmem:[#allocation30_spill] sm:$0xff]  ;;  %v12809_v29 = vld [vmem:[#allocation2 + $0x180] sm:$0xff]  }
 0x326   :  { %v10359_v1 = vrot.slane %v10357_v18, 5  ;;  %v17793_v8 = vsel %vm13242_vm15, %v10736_v50, %v10737_v11  ;;  %v10743_v51 = vrot.slane %v10741_v30, 4  ;;  %v10372_v46 = vshrl.u32 %v10326_v43, 16 }
 0x327   :  { %v10363_v59 = vrot.slane %v10361_v44, 4  ;;  %v17801_v31 = vadd.f32 %v19042_v60, %v17597_v41  ;;  %v10354_v56 = vor.u32 %v10353_v55, %v10350_v28  ;;  %v10375_v57 = vshll.u32 %v10326_v43, 16  ;;  %v17804_v44 = vld [vmem:[#allocation2 + $0x16c] sm:$0xf]  ;;  %v17809_v41 = vpop.f32.mrf.mxu0 }
 0x328   :  { %v10369_v20 = vrot.slane %v10367_v3, 5  ;;  %v10374_v11 = vrot.slane %v10372_v46, 4  ;;  %v10381_v50 = vshll.u32 %v17742_v14, 16  ;;  %v10385_v9 = vshrl.u32 %v17742_v14, 16  ;;  %12632 = vmatmul.mubr.msk.bf16.gmra.mxu0 %vm1310_vm8, %v11654_v42  ;;  %v17824_v46 = vpop.f32.mrf.mxu1  ;;  %v19044_v14 = vld [vmem:[#allocation72_spill] sm:$0xff] }
 0x329   :  { %v10364_v18 = vor.u32 %v10363_v59, %v10359_v1  ;;  %v10355_v24 = vrot.slane %v10354_v56, 4  ;;  %v10377_v38 = vrot.slane %v10375_v57, 5  ;;  %v17814_v43 = vsel %vm13242_vm15, %v11698_v6, %v10741_v30  ;;  %v17822_v59 = vld [vmem:[#allocation2 + $0x170] sm:$0x1]  ;;  %19043 = vst [vmem:[#allocation18_spill] sm:$0xff] %v17824_v46  ;;  %12635 = vmatprep.mubr.msk.bf16.mxu0 %vm1310_vm8, %v11655_v7 }
 0x32a   :  { %v17818_v28 = vsel %vm13242_vm15, %v10743_v51, %v10744_v39  ;;  %v17820_v3 = vrot.slane %v10381_v50, 5  ;;  %v7011_v42 = vadd.f32 %v19044_v14, %v17603_v49  ;;  %v10387_v30 = vrot.slane %v10385_v9, 4  ;;  %v17831_v39 = vld [vmem:[#allocation2 + $0x178] sm:$0xf]  ;;  %v10703_v51 = vld [vmem:[#allocation2 + $0x174] sm:$0xe] }
 0x32b   :  { %v10365_v55 = vrot.slane %v10364_v18, 4  ;;  %12646 = vmatmul.mubr.msk.bf16.gmra.mxu1 %vm1310_vm8, %v12808_v26  ;;  %v10378_v6 = vor.u32 %v10377_v38, %v10374_v11  ;;  %v10391_v60 = vshll.u32 %v17762_v54, 16  ;;  %v10360_v56 = vsel %vm13197_vm14, %v10355_v24, %v10359_v1  ;;  %v19045_v9 = vld [vmem:[#allocation106_spill] sm:$0xff]  ;;  %v17844_v11 = vld [vmem:[#allocation2 + $0x17c] sm:$0x1]  ;;  %v19049_v46 = vld [vmem:[#allocation69_spill] sm:$0xff] }
 0x32c   :  { %12649 = vmatprep.mubr.msk.bf16.mxu1 %vm1310_vm8, %v12809_v29  ;;  %v11699_v57 = vrot.slane %v10702_v5, 9  ;;  %v10748_v7 = vrot.slane %v17804_v44, 5  ;;  %v10388_v54 = vor.u32 %v10387_v30, %v17820_v3  ;;  %v7009_v18 = vadd.f32 %v19045_v9, %v17614_v12  ;;  %v17846_v29 = vpop.f32.mrf.mxu0  ;;  %v10329_v50 = vld [vmem:[#allocation2 + $0x168] sm:$0xf]  ;;  %v12810_v14 = vld [vmem:[#allocation2 + $0x18c] sm:$0xff]   ;;  %v12811_v9 = vld [vmem:[#allocation2 + $0x198] sm:$0xff]  }
 0x32d   :  { %v10370_v26 = vsel %vm13197_vm14, %v10365_v55, %v10369_v20  ;;  %v10379_v38 = vrot.slane %v10378_v6, 4  ;;  %19046 = vst [vmem:[#allocation13_spill] sm:$0xff] %v17846_v29  ;;  %v10751_v1 = vrot.slane %v17822_v59, 5  ;;  %v11700_v20 = vrot.slane %v10703_v51, 9  ;;  %v17850_v55 = vpop.f32.mrf.mxu1  ;;  %v19050_v29 = vld [vmem:[#allocation88_spill] sm:$0xff] }
 0x32e   :  { %v10750_v24 = vrot.slane %v10748_v7, 4  ;;  %v10755_v5 = vrot.slane %v17831_v39, 5  ;;  %19047 = vst [vmem:[#allocation97_spill] sm:$0xff] %v17850_v55  ;;  %v11681_v6 = vcombine.low %v10360_v56, %v10370_v26  ;;  %v10389_v49 = vrot.slane %v10388_v54, 4  ;;  %v19051_v56 = vld [vmem:[#allocation87_spill] sm:$0xff] }
 0x32f   :  { %v10393_v30 = vrot.slane %v10391_v60, 5  ;;  %v7012_v12 = vadd.f32 %v19048_v16, %v17618_v32  ;;  %v17855_v27 = vadd.f32 %v19049_v46, %v7011_v42  ;;  %v10384_v51 = vsel %vm13197_vm14, %v10379_v38, %v17820_v3  ;;  %v10332_v46 = vld [vmem:[#allocation2 + $0x174] sm:$0xf]  ;;  %v17871_v42 = vpop.f32.mrf.mxu0 }
 0x330   :  { %v17861_v22 = vadd.f32 %v19050_v29, %v7009_v18  ;;  %v17865_v55 = vsel %vm13242_vm15, %v11699_v57, %v10748_v7  ;;  %v10758_v32 = vrot.slane %v17844_v11, 5  ;;  %v10396_v16 = vshrl.u32 %v10329_v50, 16  ;;  %v17886_v18 = vpop.f32.mrf.mxu1 }
 0x331   :  { %v17868_v60 = vadd.f32 %v19051_v56, %v7012_v12  ;;  %v10399_v26 = vshll.u32 %v10329_v50, 16  ;;  %v19052_v3 = vcombine.low %v17756_v63, %v17782_v0  ;;  %v17879_v38 = vsel %vm13242_vm15, %v10750_v24, %v10751_v1  ;;  %19053 = vst [vmem:[#allocation43_spill] sm:$0xff] %v17886_v18  ;;  %v19054_v1 = vld [vmem:[#allocation108_spill] sm:$0xff] }
 0x332   :  { %v17883_v57 = vsel %vm13242_vm15, %v11700_v20, %v10755_v5  ;;  %v10757_v7 = vrot.slane %v10755_v5, 4  ;;  %v10405_v54 = vshll.u32 %v17804_v44, 16  ;;  %v10394_v63 = vsel %vm13197_vm14, %v10389_v49, %v10393_v30  ;;  %v17898_v18 = vld [vmem:[#allocation2 + $0x184] sm:$0xf]  ;;  %v17900_v49 = vpop.f32.mrf.mxu0 }
 0x333   :  { %12636 = vmatmul.mubr.msk.bf16.gmra.mxu0 %vm1310_vm8, %v19052_v3  ;;  %12650 = vmatmul.mubr.msk.bf16.gmra.mxu1 %vm1310_vm8, %v12810_v14  ;;  %v10398_v0 = vrot.slane %v10396_v16, 4  ;;  %v10401_v29 = vrot.slane %v10399_v26, 5  ;;  %v10409_v24 = vshrl.u32 %v17804_v44, 16  ;;  %v7010_v20 = vadd.f32 %v19054_v1, %v17622_v61  ;;  %19055 = vst [vmem:[#allocation21_spill] sm:$0xff] %v17900_v49  ;;  %v17903_v26 = vld [vmem:[#allocation2 + $0x188] sm:$0x1]  ;;  %v17905_v61 = vpop.f32.mrf.mxu1 }
 0x334   :  { %12659 = vmatprep.mubr.msk.bf16.mxu0 %vm1310_vm8, %v11681_v6  ;;  %12653 = vmatprep.mubr.msk.bf16.mxu1 %vm1310_vm8, %v12811_v9  ;;  %v10407_v5 = vrot.slane %v10405_v54, 5  ;;  %v10415_v50 = vshll.u32 %v17822_v59, 16  ;;  %v10420_v12 = vshrl.u32 %v10332_v46, 16  ;;  %v10423_v3 = vshll.u32 %v10332_v46, 16  ;;  %19056 = vst [vmem:[#allocation12_spill] sm:$0xff] %v17905_v61  ;;  %v12812_v59 = vld [vmem:[#allocation2 + $0x1a4] sm:$0xff]   ;;  %v17907_v1 = vpop.f32.mrf.mxu0 }
 0x335   :  { %v10402_v56 = vor.u32 %v10401_v29, %v10398_v0  ;;  %v10411_v14 = vrot.slane %v10409_v24, 4  ;;  %v10429_v6 = vshll.u32 %v17831_v39, 16  ;;  %v11682_v30 = vcombine.low %v10384_v51, %v10394_v63  ;;  %v10704_v24 = vld [vmem:[#allocation2 + $0x180] sm:$0xe]  ;;  %19057 = vst [vmem:[#allocation20_spill] sm:$0xff] %v17907_v1 }
 0x336   :  { %v10417_v44 = vrot.slane %v10415_v50, 5  ;;  %v10422_v16 = vrot.slane %v10420_v12, 4  ;;  %v10433_v9 = vshrl.u32 %v17831_v39, 16  ;;  %v10425_v29 = vrot.slane %v10423_v3, 5  ;;  %v19058_v51 = vld [vmem:[#allocation24_spill] sm:$0xff] }
 0x337   :  { %v10403_v54 = vrot.slane %v10402_v56, 4  ;;  %v10412_v0 = vor.u32 %v10411_v14, %v10407_v5  ;;  %v10431_v46 = vrot.slane %v10429_v6, 5  ;;  %v17911_v49 = vsel %vm13242_vm15, %v10757_v7, %v10758_v32  ;;  %v17921_v7 = vpop.f32.mrf.mxu1 }
 0x338   :  { %v7015_v63 = vadd.f32 %v19058_v51, %v17638_v53  ;;  %v10435_v39 = vrot.slane %v10433_v9, 4  ;;  %v10439_v50 = vshll.u32 %v17844_v11, 16  ;;  %v10426_v14 = vor.u32 %v10425_v29, %v10422_v16  ;;  %19059 = vst [vmem:[#allocation60_spill] sm:$0xff] %v17921_v7  ;;  %v17992_v7 = vld [vmem:[#allocation2 + $0x1a0] sm:$0x1] }
 0x339   :  { %v10408_v12 = vsel %vm13197_vm14, %v10403_v54, %v10407_v5  ;;  %v10413_v56 = vrot.slane %v10412_v0, 4  ;;  %v10762_v3 = vrot.slane %v17898_v18, 5  ;;  %v11701_v1 = vrot.slane %v10704_v24, 9  ;;  %v19060_v5 = vld [vmem:[#allocation14_spill] sm:$0xff]  ;;  %v17928_v0 = vpop.f32.mrf.mxu0 }
 0x33a   :  { %v10436_v6 = vor.u32 %v10435_v39, %v10431_v46  ;;  %v10441_v61 = vrot.slane %v10439_v50, 5  ;;  %v10765_v32 = vrot.slane %v17903_v26, 5  ;;  %v10427_v11 = vrot.slane %v10426_v14, 4  ;;  %v10339_v54 = vld [vmem:[#allocation2 + $0x190] sm:$0xf] }
 0x33b   :  { %12660 = vmatmul.mubr.msk.bf16.vlgmr.msra.gmra.mxu0 %vm1310_vm8, %v11682_v30  ;;  %12654 = vmatmul.mubr.msk.bf16.gmra.mxu1 %vm1310_vm8, %v12812_v59  ;;  %v10418_v53 = vsel %vm13197_vm14, %v10413_v56, %v10417_v44  ;;  %v7013_v16 = vadd.f32 %v19060_v5, %v17672_v2  ;;  %v10764_v9 = vrot.slane %v10762_v3, 4  ;;  %v19061_v30 = vcombine.low %v17786_v48, %v17793_v8  ;;  %v19062_v59 = vld [vmem:[#allocation90_spill] sm:$0xff]  ;;  %v10705_v39 = vld [vmem:[#allocation2 + $0x18c] sm:$0xe]  ;;  %v10335_v50 = vld [vmem:[#allocation2 + $0x180] sm:$0xf] }
 0x33c   :  { %v11707_v29 = vcombine.low %v17865_v55, %v17879_v38  ;;  %v17937_v24 = vadd.f32 %v19062_v59, %v7010_v20  ;;  %v11683_v44 = vcombine.low %v10408_v12, %v10418_v53  ;;  %v10437_v51 = vrot.slane %v10436_v6, 4  ;;  %v19063_v56 = vld [vmem:[#allocation89_spill] sm:$0xff]  ;;  %v19064_v8 = vld [vmem:[#allocation40_spill] sm:$0xff]  ;;  %v10340_v55 = vld [vmem:[#allocation2 + $0x194] sm:$0x1]  ;;  %v17962_v6 = vpop.f32.mrf.mxu1  ;;  %v17964_v59 = vpop.f32.mrf.mxu0 }
 0x33d   :  { %12677 = vmatprep.mubr.msk.bf16.mxu1 %vm1310_vm8, %v19061_v30  ;;  %v17942_v14 = vadd.f32 %v19063_v56, %v7015_v63  ;;  %v10432_v48 = vsel %vm13197_vm14, %v10427_v11, %v10431_v46  ;;  %v17947_v5 = vadd.f32 %v19064_v8, %v7013_v16  ;;  %v17954_v20 = vsel %vm13242_vm15, %v11701_v1, %v10762_v3  ;;  %v19065_v12 = vld [vmem:[#allocation31_spill] sm:$0xff] }
 0x33e   :  { %12663 = vmatprep.mubr.msk.bf16.mxu0 %vm1310_vm8, %v11683_v44  ;;  %v10442_v38 = vsel %vm13197_vm14, %v10437_v51, %v10441_v61  ;;  %v17958_v63 = vsel %vm13242_vm15, %v10764_v9, %v10765_v32  ;;  %v7016_v46 = vadd.f32 %v19065_v12, %v17689_v15  ;;  %19066 = vst [vmem:[#allocation42_spill] sm:$0xff] %v17962_v6  ;;  %v11702_v11 = vrot.slane %v10705_v39, 9  ;;  %v10338_v51 = vld [vmem:[#allocation2 + $0x18c] sm:$0xf]  ;;  %v17977_v2 = vpop.f32.mrf.mxu1 }
 0x33f   :  { %v11684_v53 = vcombine.low %v10432_v48, %v10442_v38  ;;  %v10769_v16 = vrot.slane %v10339_v54, 5  ;;  %v10444_v30 = vshrl.u32 %v10335_v50, 16  ;;  %v10772_v61 = vrot.slane %v10340_v55, 5  ;;  %v19067_v9 = vld [vmem:[#allocation73_spill] sm:$0xff]  ;;  %19069 = vst [vmem:[#allocation62_spill] sm:$0xff] %v17977_v2 }
 0x340   :  { %v10447_v44 = vshll.u32 %v10335_v50, 16  ;;  %v10453_v1 = vshll.u32 %v17898_v18, 16  ;;  %v10457_v3 = vshrl.u32 %v17898_v18, 16  ;;  %v11709_v32 = vcombine.low %v17954_v20, %v17958_v63  ;;  %v19068_v48 = vld [vmem:[#allocation57_spill] sm:$0xff] }
 0x341   :  { %v17971_v15 = vadd.f32 %v19067_v9, %v7016_v46  ;;  %v10446_v56 = vrot.slane %v10444_v30, 4  ;;  %v10463_v39 = vshll.u32 %v17903_v26, 16  ;;  %v7014_v8 = vadd.f32 %v19068_v48, %v17693_v37  ;;  %v17983_v26 = vpop.f32.mrf.mxu0 }
 0x342   :  { %v10449_v50 = vrot.slane %v10447_v44, 5  ;;  %v10455_v38 = vrot.slane %v10453_v1, 5  ;;  %v10459_v12 = vrot.slane %v10457_v3, 4  ;;  %v19070_v18 = vcombine.low %v17814_v43, %v17818_v28  ;;  %v10706_v3 = vld [vmem:[#allocation2 + $0x198] sm:$0xe] }
 0x343   :  { %12664 = vmatmul.mubr.msk.bf16.gmra.mxu0 %vm1310_vm8, %v11684_v53  ;;  %v10771_v20 = vrot.slane %v10769_v16, 4  ;;  %v10465_v63 = vrot.slane %v10463_v39, 5  ;;  %v10468_v46 = vshrl.u32 %v10338_v51, 16  ;;  %v10471_v30 = vshll.u32 %v10338_v51, 16 }
 0x344   :  { %12678 = vmatmul.mubr.msk.bf16.vlgmr.msra.gmra.mxu1 %vm1310_vm8, %v19070_v18  ;;  %v10450_v53 = vor.u32 %v10449_v50, %v10446_v56  ;;  %v10460_v37 = vor.u32 %v10459_v12, %v10455_v38  ;;  %v10477_v44 = vshll.u32 %v10339_v54, 16  ;;  %v10481_v1 = vshrl.u32 %v10339_v54, 16  ;;  %v17990_v18 = vld [vmem:[#allocation2 + $0x19c] sm:$0xf]  ;;  %v18000_v50 = vpop.f32.mrf.mxu0 }
 0x345   :  { %12681 = vmatprep.mubr.msk.bf16.mxu1 %vm1310_vm8, %v11707_v29  ;;  %v17988_v9 = vsel %vm13242_vm15, %v11702_v11, %v10769_v16  ;;  %v10470_v43 = vrot.slane %v10468_v46, 4  ;;  %v10473_v28 = vrot.slane %v10471_v30, 5  ;;  %v10487_v48 = vshll.u32 %v10340_v55, 16  ;;  %v17994_v29 = vpop.f32.mrf.mxu1 }
 0x346   :  { %v10451_v39 = vrot.slane %v10450_v53, 4  ;;  %v10461_v51 = vrot.slane %v10460_v37, 4  ;;  %v10479_v2 = vrot.slane %v10477_v44, 5  ;;  %v10483_v6 = vrot.slane %v10481_v1, 4  ;;  %v18007_v53 = vld [vmem:[#allocation2 + $0x1a8] sm:$0xf] }
 0x347   :  { %v17998_v54 = vsel %vm13242_vm15, %v10771_v20, %v10772_v61  ;;  %v10474_v56 = vor.u32 %v10473_v28, %v10470_v43  ;;  %v10489_v11 = vrot.slane %v10487_v48, 5  ;;  %v11703_v16 = vrot.slane %v10706_v3, 9  ;;  %v19071_v61 = vld [vmem:[#allocation58_spill] sm:$0xff]  ;;  %v10707_v3 = vld [vmem:[#allocation2 + $0x1a4] sm:$0xe]  ;;  %v19072_v28 = vld [vmem:[#allocation37_spill] sm:$0xff] }
 0x348   :  { %v10456_v55 = vsel %vm13197_vm14, %v10451_v39, %v10455_v38  ;;  %v10466_v12 = vsel %vm13197_vm14, %v10461_v51, %v10465_v63  ;;  %v10484_v46 = vor.u32 %v10483_v6, %v10479_v2  ;;  %v10776_v30 = vrot.slane %v17990_v18, 5  ;;  %v10341_v43 = vld [vmem:[#allocation2 + $0x198] sm:$0xf]  ;;  %v10346_v39 = vld [vmem:[#allocation2 + $0x1ac] sm:$0x1]  ;;  %v18017_v51 = vpop.f32.mrf.mxu1 }
 0x349   :  { %v11685_v37 = vcombine.low %v10456_v55, %v10466_v12  ;;  %v7019_v20 = vadd.f32 %v19071_v61, %v17705_v45  ;;  %v10475_v44 = vrot.slane %v10474_v56, 4  ;;  %v10779_v1 = vrot.slane %v17992_v7, 5  ;;  %19073 = vst [vmem:[#allocation98_spill] sm:$0xff] %v18017_v51  ;;  %v19075_v45 = vld [vmem:[#allocation102_spill] sm:$0xff] }
 0x34a   :  { %v11710_v38 = vcombine.low %v17988_v9, %v17998_v54  ;;  %v18015_v48 = vadd.f32 %v19072_v28, %v7014_v8  ;;  %v10485_v6 = vrot.slane %v10484_v46, 4  ;;  %v10778_v63 = vrot.slane %v10776_v30, 4  ;;  %v19076_v8 = vld [vmem:[#allocation64_spill] sm:$0xff]  ;;  %v18032_v46 = vpop.f32.mrf.mxu0 }
 0x34b   :  { %v19074_v55 = vcombine.low %v17883_v57, %v17911_v49  ;;  %12667 = vmatprep.mubr.msk.bf16.mxu0 %vm1310_vm8, %v11685_v37  ;;  %v18025_v56 = vadd.f32 %v19075_v45, %v7019_v20  ;;  %v10480_v9 = vsel %vm13197_vm14, %v10475_v44, %v10479_v2  ;;  %v7017_v54 = vadd.f32 %v19076_v8, %v17714_v21  ;;  %v10344_v28 = vld [vmem:[#allocation2 + $0x1a4] sm:$0xf] }
 0x34c   :  { %v10783_v12 = vrot.slane %v18007_v53, 5  ;;  %v10490_v57 = vsel %vm13197_vm14, %v10485_v6, %v10489_v11  ;;  %v10777_v49 = vsel %vm13242_vm15, %v11703_v16, %v10776_v30  ;;  %v11704_v37 = vrot.slane %v10707_v3, 9  ;;  %v18045_v11 = vpop.f32.mrf.mxu1  ;;  %v19079_v16 = vld [vmem:[#allocation77_spill] sm:$0xff]  ;;  %v19080_v3 = vld [vmem:[#allocation50_spill] sm:$0xff] }
 0x34d   :  { %12682 = vmatmul.mubr.msk.bf16.gmra.mxu1 %vm1310_vm8, %v19074_v55  ;;  %v10492_v61 = vshrl.u32 %v10341_v43, 16  ;;  %v11686_v20 = vcombine.low %v10480_v9, %v10490_v57  ;;  %v10780_v2 = vsel %vm13242_vm15, %v10778_v63, %v10779_v1  ;;  %v10786_v21 = vrot.slane %v10346_v39, 5  ;;  %v19077_v55 = vld [vmem:[#allocation95_spill] sm:$0xff]  ;;  %19078 = vst [vmem:[#allocation32_spill] sm:$0xff] %v18045_v11  ;;  %v18054_v9 = vpop.f32.mrf.mxu0 }
 0x34e   :  { %12685 = vmatprep.mubr.msk.bf16.mxu1 %vm1310_vm8, %v11709_v32  ;;  %v10785_v44 = vrot.slane %v10783_v12, 4  ;;  %v18042_v45 = vadd.f32 %v19077_v55, %v7017_v54  ;;  %v10495_v32 = vshll.u32 %v10341_v43, 16  ;;  %v10501_v51 = vshll.u32 %v17990_v18, 16 }
 0x34f   :  { %v10494_v8 = vrot.slane %v10492_v61, 4  ;;  %12668 = vmatmul.mubr.msk.bf16.gmra.mxu0 %vm1310_vm8, %v11686_v20  ;;  %v7020_v30 = vadd.f32 %v19079_v16, %v17718_v36  ;;  %v7018_v1 = vadd.f32 %v19080_v3, %v17735_v17  ;;  %v10505_v6 = vshrl.u32 %v17990_v18, 16  ;;  %v18062_v3 = vpop.f32.mrf.mxu1 }
 0x350   :  { %v10511_v63 = vshll.u32 %v17992_v7, 16  ;;  %v11711_v54 = vcombine.low %v10777_v49, %v10780_v2  ;;  %v10497_v43 = vrot.slane %v10495_v32, 5  ;;  %v10503_v57 = vrot.slane %v10501_v51, 5 }
 0x351   :  { %v10516_v61 = vshrl.u32 %v10344_v28, 16  ;;  %v10784_v55 = vsel %vm13242_vm15, %v11704_v37, %v10783_v12  ;;  %v10787_v20 = vsel %vm13242_vm15, %v10785_v44, %v10786_v21  ;;  %v10507_v36 = vrot.slane %v10505_v6, 4  ;;  %v18065_v12 = vpop.f32.mrf.mxu0  ;;  %v19082_v6 = vld [vmem:[#allocation83_spill] sm:$0xff] }
 0x352   :  { %v10519_v16 = vshll.u32 %v10344_v28, 16  ;;  %v10498_v11 = vor.u32 %v10497_v43, %v10494_v8  ;;  %v10525_v18 = vshll.u32 %v18007_v53, 16  ;;  %v10529_v7 = vshrl.u32 %v18007_v53, 16 }
 0x353   :  { %v10518_v17 = vrot.slane %v10516_v61, 4  ;;  %v10508_v51 = vor.u32 %v10507_v36, %v10503_v57  ;;  %v10513_v49 = vrot.slane %v10511_v63, 5  ;;  %v10535_v32 = vshll.u32 %v10346_v39, 16 }
 0x354   :  { %v10521_v2 = vrot.slane %v10519_v16, 5  ;;  %v7401_v37 = vadd.f32 %v19081_v40, %v7020_v30  ;;  %v10499_v44 = vrot.slane %v10498_v11, 4  ;;  %v10527_v21 = vrot.slane %v10525_v18, 5  ;;  %v18074_v16 = vpop.f32.mrf.mxu1  ;;  %v8428_v18 = vpop.f32.mrf.mxu0  ;;  %v19088_v40 = vld [vmem:[#allocation67_spill] sm:$0xff] }
 0x355   :  { %12686 = vmatmul.mubr.msk.bf16.gmra.mxu1 %vm1310_vm8, %v11710_v38  ;;  %v10531_v28 = vrot.slane %v10529_v7, 4  ;;  %v7399_v8 = vadd.f32 %v17522_v23, %v7018_v1  ;;  %v10509_v53 = vrot.slane %v10508_v51, 4  ;;  %v7023_v43 = vadd.f32 %v19082_v6, %v17739_v33  ;;  %v19083_v23 = vld [vmem:[#allocation82_spill] sm:$0xff]  ;;  %v19091_v6 = vld [vmem:[#allocation84_spill] sm:$0xff] }
 0x356   :  { %12689 = vmatprep.mubr.msk.bf16.mxu1 %vm1310_vm8, %v11711_v54  ;;  %v10522_v38 = vor.u32 %v10521_v2, %v10518_v17  ;;  %v11712_v61 = vcombine.low %v10784_v55, %v10787_v20  ;;  %v10504_v39 = vsel %vm13197_vm14, %v10499_v44, %v10503_v57  ;;  %v10537_v36 = vrot.slane %v10535_v32, 5  ;;  %v19084_v55 = vld [vmem:[#allocation35_spill] sm:$0xff]  ;;  %v19085_v57 = vld [vmem:[#allocation53_spill] sm:$0xff] }
 0x357   :  { %v10532_v63 = vor.u32 %v10531_v28, %v10527_v21  ;;  %v10514_v11 = vsel %vm13197_vm14, %v10509_v53, %v10513_v49  ;;  %v7404_v30 = vadd.f32 %v17553_v19, %v7023_v43  ;;  %v7021_v1 = vadd.f32 %v19083_v23, %v17760_v25  ;;  %v19086_v2 = vld [vmem:[#allocation27_spill] sm:$0xff]  ;;  %v19087_v19 = vld [vmem:[#allocation85_spill] sm:$0xff]  ;;  %v18099_v43 = vpop.f32.mrf.mxu1 }
 0x358   :  { %v10523_v54 = vrot.slane %v10522_v38, 4  ;;  %v11687_v33 = vcombine.low %v10504_v39, %v10514_v11  ;;  %v7024_v20 = vadd.f32 %v19084_v55, %v17769_v47  ;;  %v7022_v7 = vadd.f32 %v19085_v57, %v17801_v31  ;;  %v19089_v47 = vld [vmem:[#allocation34_spill] sm:$0xff]  ;;  %v19090_v53 = vld [vmem:[#allocation23_spill] sm:$0xff] }
 0x359   :  { %v10533_v17 = vrot.slane %v10532_v63, 4  ;;  %v7402_v49 = vadd.f32 %v19086_v2, %v7021_v1  ;;  %v7645_v32 = vadd.f32 %v19087_v19, %v17855_v27  ;;  %v7643_v25 = vadd.f32 %v19088_v40, %v17861_v22  ;;  %v19092_v38 = vld [vmem:[#allocation79_spill] sm:$0xff]  ;;  %v19093_v22 = vld [vmem:[#allocation26_spill] sm:$0xff] }
 0x35a   :  { %v10528_v51 = vsel %vm13197_vm14, %v10523_v54, %v10527_v21  ;;  %12671 = vmatprep.mubr.msk.bf16.mxu0 %vm1310_vm8, %v11687_v33  ;;  %v7405_v28 = vadd.f32 %v19089_v47, %v7024_v20  ;;  %v7403_v31 = vadd.f32 %v19090_v53, %v7022_v7  ;;  %v7646_v21 = vadd.f32 %v19091_v6, %v17868_v60  ;;  %v19094_v11 = vld [vmem:[#allocation70_spill] sm:$0xff]  ;;  %v19096_v1 = vld [vmem:[#allocation71_spill] sm:$0xff]  ;;  %v19099_v20 = vld [vmem:[#allocation52_spill] sm:$0xff] }
 0x35b   :  { %v10538_v44 = vsel %vm13197_vm14, %v10533_v17, %v10537_v36  ;;  %v7843_v39 = vadd.f32 %v19092_v38, %v7645_v32  ;;  %v7841_v63 = vadd.f32 %v19093_v22, %v7643_v25  ;;  %v7644_v58 = vadd.f32 %v19094_v11, %v17937_v24  ;;  %v12522_v36 = vpop.f32.mrf.mxu0  ;;  %v19095_v54 = vld [vmem:[#allocation86_spill] sm:$0xff]  ;;  %v19097_v60 = vld [vmem:[#allocation91_spill] sm:$0xff]  ;;  %v18125_v32 = vpop.f32.mrf.mxu1 }
 0x35c   :  { %v11688_v27 = vcombine.low %v10528_v51, %v10538_v44  ;;  %v7649_v23 = vadd.f32 %v19095_v54, %v17942_v14  ;;  %v7647_v33 = vadd.f32 %v19096_v1, %v17947_v5  ;;  %v7650_v17 = vadd.f32 %v19097_v60, %v17971_v15  ;;  %v19100_v24 = vld [vmem:[#allocation38_spill] sm:$0xff]  ;;  %v19101_v14 = vld [vmem:[#allocation92_spill] sm:$0xff]  ;;  %v19102_v25 = vld [vmem:[#allocation75_spill] sm:$0xff] }
 0x35d   :  { %12690 = vmatmul.mubr.msk.bf16.gmra.mxu1 %vm1310_vm8, %v11712_v61  ;;  %v19098_v61 = vld [vmem:[#allocation93_spill] sm:$0xff]  ;;  %v7844_v57 = vadd.f32 %v19099_v20, %v7646_v21  ;;  %v7842_v7 = vadd.f32 %v17654_v10, %v7644_v58  ;;  %v7653_v51 = vadd.f32 %v19100_v24, %v18025_v56  ;;  %v7651_v2 = vadd.f32 %v19101_v14, %v18042_v45  ;;  %v8431_v53 = vpop.f32.mrf.mxu0  ;;  %v19104_v45 = vld [vmem:[#allocation96_spill] sm:$0xff] }
 0x35e   :  { %v7648_v55 = vadd.f32 %v19098_v61, %v18015_v48  ;;  %12672 = vmatmul.mubr.msk.bf16.gmra.mxu0 %vm1310_vm8, %v11688_v27  ;;  %v7847_v5 = vadd.f32 %v17661_v34, %v7649_v23  ;;  %v7845_v19 = vadd.f32 %v17684_v35, %v7647_v33  ;;  %v7848_v15 = vadd.f32 %v17721_v4, %v7650_v17  ;;  %v19103_v56 = vld [vmem:[#allocation33_spill] sm:$0xff]  ;;  %v19105_v34 = vld [vmem:[#allocation39_spill] sm:$0xff]  ;;  %v19106_v4 = vld [vmem:[#allocation48_spill] sm:$0xff]  ;;  %v18142_v23 = vpop.f32.mrf.mxu1 }
 0x35f   :  { %v7851_v40 = vadd.f32 %v17789_v52, %v7653_v51  ;;  %v7849_v10 = vadd.f32 %v17809_v41, %v7651_v2  ;;  %v7654_v44 = vadd.f32 %v19102_v25, %v7401_v37  ;;  %v7652_v47 = vadd.f32 %v19103_v56, %v7399_v8  ;;  %v19108_v52 = vld [vmem:[#allocation7_spill] sm:$0xff]  ;;  %v19109_v41 = vld [vmem:[#allocation49_spill] sm:$0xff]  ;;  %v19110_v37 = vld [vmem:[#allocation10_spill] sm:$0xff] }
 0x360   :  { %v7846_v48 = vadd.f32 %v17764_v13, %v7648_v55  ;;  %v7657_v6 = vadd.f32 %v19104_v45, %v7404_v30  ;;  %v7655_v21 = vadd.f32 %v19105_v34, %v7402_v49  ;;  %v8224_v35 = vadd.f32 %v17649_v62, %v7843_v39  ;;  %v19107_v13 = vld [vmem:[#allocation13_spill] sm:$0xff]  ;;  %v19111_v49 = vld [vmem:[#allocation46_spill] sm:$0xff]  ;;  %v19114_v61 = vld [vmem:[#allocation80_spill] sm:$0xff] }
 0x361   :  { %v8222_v27 = vadd.f32 %v19106_v4, %v7841_v63  ;;  %v7852_v38 = vadd.f32 %v19107_v13, %v7654_v44  ;;  %v7850_v22 = vadd.f32 %v17871_v42, %v7652_v47  ;;  %v8225_v11 = vadd.f32 %v19108_v52, %v7844_v57  ;;  %v19112_v39 = vld [vmem:[#allocation25_spill] sm:$0xff]  ;;  %v19117_v2 = vld [vmem:[#allocation20_spill] sm:$0xff]  ;;  %v18164_v44 = vpop.f32.mrf.mxu1 }
 0x362   :  { %v8223_v58 = vadd.f32 %v19109_v41, %v7842_v7  ;;  %v7658_v54 = vadd.f32 %v19110_v37, %v7405_v28  ;;  %v8477_v8 = vadd.f32 %v17983_v26, %v8224_v35  ;;  %v8226_v62 = vadd.f32 %v19111_v49, %v7845_v19  ;;  %v19113_v33 = vld [vmem:[#allocation97_spill] sm:$0xff]  ;;  %v18152_v28 = vld [vmem:[%s18408_s2] ss:$0 sm:$0xff]  ;;  %v19122_v37 = vld [vmem:[#allocation62_spill] sm:$0xff]  ;;  %s12866_s2 = smov [#allocation3]  }
 0x363   :  { %v8475_v30 = vadd.f32 %v18000_v50, %v8222_v27  ;;  %v7656_v63 = vadd.f32 %v19112_v39, %v7403_v31  ;;  %v8478_v1 = vadd.f32 %v18032_v46, %v8225_v11  ;;  %v8227_v60 = vadd.f32 %v19113_v33, %v7846_v48  ;;  %v12525_v17 = vpop.f32.mrf.mxu0  ;;  %v19116_v51 = vld [vmem:[#allocation21_spill] sm:$0xff]  ;;  %v18172_v11 = vpop.f32.mrf.mxu1  ;;  %v19124_v39 = vld [vmem:[#allocation32_spill] sm:$0xff]  ;;  %s11024_s27 = sshll.u32 %s12866_s2, 4  ;;  %s11025_s27 = int_to_ptr.vmem [resolvable:$true] %s11024_s27 }
 0x364   :  { %v8476_v42 = vadd.f32 %v18054_v9, %v8223_v58  ;;  %v8493_v26 = vadd.f32 %v18152_v28, %v8477_v8  ;;  %v8228_v55 = vadd.f32 %v19114_v61, %v7847_v5  ;;  %v8479_v20 = vadd.f32 %v8428_v18, %v8226_v62  ;;  %v19115_v9 = vld [vmem:[#allocation18_spill] sm:$0xff]  ;;  %s12843_s28 = scalar_lea.vmem %s11025_s27, 32  ;;  %p12848_p1 = scmp.lt.s32.totalorder %s11025_s27, %s11025_s27 }
 0x365   :  { %v8491_v50 = vadd.f32 %v18152_v28, %v8475_v30  ;;  %v8494_v31 = vadd.f32 %v18152_v28, %v8478_v1  ;;  %v8229_v57 = vadd.f32 %v19115_v9, %v7848_v15  ;;  %v8480_v7 = vadd.f32 %v8431_v53, %v8227_v60  ;;  %v8444_v24 = vpop.f32.mrf.mxu0  ;;  %v19118_v53 = vld [vmem:[#allocation43_spill] sm:$0xff]  ;;  %v18180_v60 = vpop.f32.mrf.mxu1  ;;  %p12844_p0 = scmp.ne.s32.totalorder %s11025_s27, %s12843_s28  ;;  %p12849_p2 = scmp.lt.s32.totalorder %s12843_s28, %s12843_s28 }
 0x366   :  { %v8492_v46 = vadd.f32 %v18152_v28, %v8476_v42  ;;  %v7855_v14 = vadd.f32 %v19116_v51, %v7657_v6  ;;  %v7853_v19 = vadd.f32 %v19117_v2, %v7655_v21  ;;  %v7856_v48 = vadd.f32 %v17928_v0, %v7658_v54  ;;  %v19119_v6 = vld [vmem:[#allocation12_spill] sm:$0xff] }
 0x367   :  { %v7854_v25 = vadd.f32 %v17964_v59, %v7656_v63  ;;  %v8507_v5 = vmax.f32 %v8491_v50, 0.0  ;;  %v8481_v56 = vadd.f32 %v18065_v12, %v8228_v55  ;;  %v8482_v47 = vadd.f32 %v12522_v36, %v8229_v57  ;;  %v12526_v45 = vpop.f32.mrf.mxu0  ;;  %v19120_v59 = vld [vmem:[#allocation60_spill] sm:$0xff]  ;;  %v19121_v36 = vld [vmem:[#allocation42_spill] sm:$0xff]  ;;  %p12850_p3 = por %p12849_p2, %p12848_p1 }
 0x368   :  { %v8508_v18 = vmax.f32 %v8492_v46, 0.0  ;;  %v8509_v34 = vmax.f32 %v8493_v26, 0.0  ;;  %v8495_v15 = vadd.f32 %v18152_v28, %v8479_v20  ;;  %v8232_v35 = vadd.f32 %v19118_v53, %v7851_v40 }
 0x369   :  { %v8230_v4 = vadd.f32 %v19119_v6, %v7849_v10  ;;  %v8510_v21 = vmax.f32 %v8494_v31, 0.0  ;;  %v8496_v0 = vadd.f32 %v18152_v28, %v8480_v7  ;;  %v8233_v13 = vadd.f32 %v19120_v59, %v7852_v38  ;;  %v8447_v52 = vpop.f32.mrf.mxu0  ;;  %v19123_v10 = vld [vmem:[#allocation98_spill] sm:$0xff]  ;;  %p12851_p4 = pnand %p12850_p3, %p12844_p0 }
 0x36a   :  { %v8523_v27 = vadd.f32 %v8508_v18, %v8507_v5  ;;  %v8485_v41 = vadd.f32 %v12525_v17, %v8232_v35  ;;  %v8231_v58 = vadd.f32 %v19121_v36, %v7850_v22  ;;  %v8236_v54 = vadd.f32 %v19122_v37, %v7855_v14 }
 0x36b   :  { %v8483_v12 = vadd.f32 %v8444_v24, %v8230_v4  ;;  %v8486_v30 = vadd.f32 %v12526_v45, %v8233_v13  ;;  %v8234_v40 = vadd.f32 %v17994_v29, %v7853_v19  ;;  %v8237_v49 = vadd.f32 %v19123_v10, %v7856_v48 }
 0x36c   :  { %v8524_v8 = vadd.f32 %v8523_v27, %v8509_v34  ;;  %v8484_v62 = vadd.f32 %v8447_v52, %v8231_v58  ;;  %v8235_v63 = vadd.f32 %v19124_v39, %v7854_v25  ;;  %v8497_v38 = vadd.f32 %v18152_v28, %v8481_v56 }
 0x36d   :  { %v8511_v1 = vmax.f32 %v8495_v15, 0.0  ;;  %v8512_v33 = vmax.f32 %v8496_v0, 0.0  ;;  %v8498_v22 = vadd.f32 %v18152_v28, %v8482_v47  ;;  %v8499_v61 = vadd.f32 %v18152_v28, %v8483_v12  ;;  %v18185_v55 = vpop.f32.mrf.mxu1 }
 0x36e   :  { %v8525_v42 = vadd.f32 %v8524_v8, %v8510_v21  ;;  %v8513_v26 = vmax.f32 %v8497_v38, 0.0  ;;  %v8500_v29 = vadd.f32 %v18152_v28, %v8484_v62  ;;  %v8501_v46 = vadd.f32 %v18152_v28, %v8485_v41 }
 0x36f   :  { %v8514_v20 = vmax.f32 %v8498_v22, 0.0  ;;  %v8515_v9 = vmax.f32 %v8499_v61, 0.0  ;;  %v18188_v24 = vpop.f32.mrf.mxu1  ;;  %v8502_v2 = vadd.f32 %v18152_v28, %v8486_v30 }
 0x370   :  { %v8526_v17 = vadd.f32 %v8525_v42, %v8511_v1  ;;  %v8516_v7 = vmax.f32 %v8500_v29, 0.0  ;;  %v8517_v25 = vmax.f32 %v8501_v46, 0.0 }
 0x371   :  { %v12544_v56 = vpop.f32.mrf.mxu1  ;;  %v8518_v45 = vmax.f32 %v8502_v2, 0.0 }
 0x372   :  { %v8527_v50 = vadd.f32 %v8526_v17, %v8512_v33 }
 0x373   :  { %v8879_v27 = vpop.f32.mrf.mxu1 }
 0x374   :  { %v8528_v31 = vadd.f32 %v8527_v50, %v8513_v26 }
 0x376   :  { %v8529_v57 = vadd.f32 %v8528_v31, %v8514_v20 }
 0x377   :  { %v12529_v51 = vpop.f32.mrf.mxu0 }
 0x378   :  { %v8530_v14 = vadd.f32 %v8529_v57, %v8515_v9  ;;  %v8489_v19 = vadd.f32 %v12529_v51, %v8236_v54 }
 0x379   :  { %v8460_v48 = vpop.f32.mrf.mxu0 }
 0x37a   :  { %v8531_v5 = vadd.f32 %v8530_v14, %v8516_v7  ;;  %v8487_v18 = vadd.f32 %v8460_v48, %v8234_v40  ;;  %v8505_v59 = vadd.f32 %v18152_v28, %v8489_v19 }
 0x37b   :  { %v12530_v47 = vpop.f32.mrf.mxu0 }
 0x37c   :  { %v8532_v34 = vadd.f32 %v8531_v5, %v8517_v25  ;;  %v8503_v15 = vadd.f32 %v18152_v28, %v8487_v18  ;;  %v8490_v53 = vadd.f32 %v12530_v47, %v8237_v49  ;;  %v8521_v30 = vmax.f32 %v8505_v59, 0.0 }
 0x37d   :  { %v8463_v35 = vpop.f32.mrf.mxu0 }
 0x37e   :  { %v8519_v6 = vmax.f32 %v8503_v15, 0.0  ;;  %v8533_v4 = vadd.f32 %v8532_v34, %v8518_v45  ;;  %v8488_v21 = vadd.f32 %v8463_v35, %v8235_v63  ;;  %v8506_v36 = vadd.f32 %v18152_v28, %v8490_v53 }
 0x37f   :  { %v12553_v0 = vpop.f32.mrf.mxu0 }
 0x380   :  { %v8534_v13 = vadd.f32 %v8533_v4, %v8519_v6  ;;  %v8504_v52 = vadd.f32 %v18152_v28, %v8488_v21  ;;  %v9014_v41 = vadd.f32 %v12553_v0, %v18062_v3  ;;  %v8522_v39 = vmax.f32 %v8506_v36, 0.0 }
 0x381   :  { %v9005_v12 = vpop.f32.mrf.mxu0 }
 0x382   :  { %v8520_v58 = vmax.f32 %v8504_v52, 0.0  ;;  %v9006_v37 = vadd.f32 %v9005_v12, %v18074_v16  ;;  %v12547_v54 = vpop.f32.mrf.mxu1 }
 0x383   :  { %v12554_v8 = vpop.f32.mrf.mxu0 }
 0x384   :  { %v8535_v40 = vadd.f32 %v8534_v13, %v8520_v58  ;;  %v9017_v10 = vadd.f32 %v12554_v8, %v18099_v43  ;;  %v8892_v49 = vpop.f32.mrf.mxu1 }
 0x385   :  { %v9008_v62 = vpop.f32.mrf.mxu0 }
 0x386   :  { %v8536_v63 = vadd.f32 %v8535_v40, %v8521_v30  ;;  %v9009_v38 = vadd.f32 %v9008_v62, %v18125_v32  ;;  %v12548_v1 = vpop.f32.mrf.mxu1 }
 0x387   :  { %v12557_v42 = vpop.f32.mrf.mxu0 }
 0x388   :  { %v18199_v3 = vadd.f32 %v8536_v63, %v8522_v39  ;;  %v8895_v33 = vpop.f32.mrf.mxu1  ;;  %v9030_v17 = vadd.f32 %v12557_v42, %v18142_v23 }
 0x389   :  { %v9021_v16 = vpop.f32.mrf.mxu0 }
 0x38a   :  { %19125 = vst [vmem:[#allocation36_spill] sm:$0xff] %v18199_v3  ;;  %v12571_v22 = vpop.f32.mrf.mxu1  ;;  %v9022_v26 = vadd.f32 %v9021_v16, %v18164_v44 }
 0x38b   :  { %v12558_v50 = vpop.f32.mrf.mxu0  ;;  %v9295_v61 = vadd.f32 %v12571_v22, %v9014_v41 }
 0x38c   :  { %v9230_v43 = vpop.f32.mrf.mxu1  ;;  %v9033_v29 = vadd.f32 %v12558_v50, %v18172_v11 }
 0x38d   :  { %v9024_v20 = vpop.f32.mrf.mxu0  ;;  %v18204_v31 = vadd.f32 %v9230_v43, %v9006_v37 }
 0x38e   :  { %v12572_v32 = vpop.f32.mrf.mxu1  ;;  %v9025_v46 = vadd.f32 %v9024_v20, %v18180_v60 }
 0x38f   :  { %v18207_v9 = vadd.f32 %v12572_v32, %v9017_v10 }
 0x390   :  { %v9233_v57 = vpop.f32.mrf.mxu1 }
 0x391   :  { %v12561_v7 = vpop.f32.mrf.mxu0  ;;  %v18209_v23 = vadd.f32 %v9233_v57, %v9009_v38 }
 0x392   :  { %v12575_v51 = vpop.f32.mrf.mxu1  ;;  %v9046_v44 = vadd.f32 %v12561_v7, %v18185_v55 }
 0x393   :  { %v9037_v14 = vpop.f32.mrf.mxu0  ;;  %v9299_v2 = vadd.f32 %v12575_v51, %v9030_v17 }
 0x394   :  { %v9246_v19 = vpop.f32.mrf.mxu1  ;;  %v9038_v11 = vadd.f32 %v9037_v14, %v18188_v24 }
 0x395   :  { %v12562_v48 = vpop.f32.mrf.mxu0  ;;  %v18213_v25 = vadd.f32 %v9246_v19, %v9022_v26 }
 0x396   :  { %v12576_v5 = vpop.f32.mrf.mxu1  ;;  %v9049_v18 = vadd.f32 %v12562_v48, %v12544_v56 }
 0x397   :  { %v9040_v60 = vpop.f32.mrf.mxu0  ;;  %v18215_v47 = vadd.f32 %v12576_v5, %v9033_v29 }
 0x398   :  { %v9249_v45 = vpop.f32.mrf.mxu1  ;;  %v9041_v34 = vadd.f32 %v9040_v60, %v8879_v27 }
 0x399   :  { %v18217_v15 = vadd.f32 %v9249_v45, %v9025_v46 }
 0x39a   :  { %v12579_v53 = vpop.f32.mrf.mxu1 }
 0x39b   :  { %v12565_v35 = vpop.f32.mrf.mxu0  ;;  %v9303_v55 = vadd.f32 %v12579_v53, %v9046_v44 }
 0x39c   :  { %v9262_v6 = vpop.f32.mrf.mxu1  ;;  %v9062_v4 = vadd.f32 %v12565_v35, %v12547_v54  ;;  %v19128_v35 = vld [vmem:[#allocation29_spill] sm:$0xff] }
 0x39d   :  { %v9053_v21 = vpop.f32.mrf.mxu0  ;;  %v18219_v0 = vadd.f32 %v9262_v6, %v9038_v11 }
 0x39e   :  { %v12580_v24 = vpop.f32.mrf.mxu1  ;;  %v9054_v59 = vadd.f32 %v9053_v21, %v8892_v49 }
 0x39f   :  { %v12566_v13 = vpop.f32.mrf.mxu0  ;;  %v18221_v52 = vadd.f32 %v12580_v24, %v9049_v18 }
 0x3a0   :  { %v9265_v56 = vpop.f32.mrf.mxu1  ;;  %v9065_v41 = vadd.f32 %v12566_v13, %v12548_v1 }
 0x3a1   :  { %v9056_v12 = vpop.f32.mrf.mxu0  ;;  %v18223_v36 = vadd.f32 %v9265_v56, %v9041_v34 }
 0x3a2   :  { %v12583_v27 = vpop.f32.mrf.mxu1  ;;  %v9057_v58 = vadd.f32 %v9056_v12, %v8895_v33 }
 0x3a3   :  { %v12589_v37 = vpop.f32.mrf.mxu0  ;;  %v9307_v8 = vadd.f32 %v12583_v27, %v9062_v4 }
 0x3a4   :  { %v9278_v40 = vpop.f32.mrf.mxu1  ;;  %v9489_v54 = vadd.f32 %v12589_v37, %v9295_v61 }
 0x3a5   :  { %v18225_v10 = vpop.f32.mrf.mxu0  ;;  %v18227_v49 = vadd.f32 %v9278_v40, %v9054_v59 }
 0x3a6   :  { %v6039_v30 = vpop.xlane.xlu0 %6038  ;;  %v12584_v62 = vpop.f32.mrf.mxu1 }
 0x3a7   :  { %12813 = vrsqrt.f32 %v6039_v30  ;;  %v18229_v39 = vpop.f32.mrf.mxu0  ;;  %v18231_v63 = vadd.f32 %v12584_v62, %v9065_v41  ;;  %vm6042_vm0 = vcmp.eq.f32.partialorder %v6039_v30, inf  ;;  %v6045_v57 = vand.u32 2147483648, %v6039_v30 }
 0x3a8   :  { %v9281_v38 = vpop.f32.mrf.mxu1  ;;  %vm6044_vm1 = vcmp.eq.f32.partialorder %v6039_v30, 0.0 }
 0x3a9   :  { %19126 = vst [vmem:[#allocation54_spill] sm:$0xff] %v18231_v63  ;;  %v18233_v1 = vpop.f32.mrf.mxu0  ;;  %v18235_v42 = vadd.f32 %v9281_v38, %v9057_v58 }
 0x3ab   :  { %19127 = vst [vmem:[#allocation61_spill] sm:$0xff] %v18235_v42  ;;  %v12593_v33 = vpop.f32.mrf.mxu0 }
 0x3ac   :  { %v9493_v17 = vadd.f32 %v12593_v33, %v9299_v2 }
 0x3ad   :  { %v18237_v16 = vpop.f32.mrf.mxu0 }
 0x3ae   :  { %v12607_v22 = vpop.f32.mrf.mxu1 }
 0x3af   :  { %v18239_v26 = vpop.f32.mrf.mxu0  ;;  %v18241_v50 = vadd.f32 %v12607_v22, %v9489_v54 }
 0x3b0   :  { %v18243_v61 = vpop.f32.mrf.mxu1 }
 0x3b1   :  { %v18245_v43 = vpop.f32.mrf.mxu0 }
 0x3b2   :  { %v18247_v20 = vpop.f32.mrf.mxu1 }
 0x3b3   :  { %v12597_v46 = vpop.f32.mrf.mxu0 }
 0x3b4   :  { %v12814_v29 = vpop.eup %12813  ;;  %v9497_v7 = vadd.f32 %v12597_v46, %v9303_v55  ;;  %v18249_v44 = vpop.f32.mrf.mxu1 }
 0x3b5   :  { %v6041_v32 = vmul.f32 %v12814_v29, %v6039_v30  ;;  %v18261_v53 = vpop.f32.mrf.mxu0 }
 0x3b7   :  { %v6043_v51 = vsel %vm6042_vm0, %v6039_v30, %v6041_v32  ;;  %v18264_v6 = vpop.f32.mrf.mxu0 }
 0x3b8   :  { %v6046_v14 = vsel %vm6044_vm1, %v6045_v57, %v6043_v51 }
 0x3b9   :  { %v6047_v2 = vadd.f32 1e-06, %v6046_v14  ;;  %v12611_v19 = vpop.f32.mrf.mxu1  ;;  %v18266_v4 = vpop.f32.mrf.mxu0 }
 0x3ba   :  { %v18251_v11 = vadd.f32 %v12611_v19, %v9493_v17 }
 0x3bb   :  { %12815 = vrcp.f32 %v6047_v2  ;;  %v18253_v48 = vpop.f32.mrf.mxu1 }
 0x3bd   :  { %v18255_v5 = vpop.f32.mrf.mxu1 }
 0x3bf   :  { %v18257_v18 = vpop.f32.mrf.mxu1 }
 0x3c3   :  { %v12615_v60 = vpop.f32.mrf.mxu1 }
 0x3c4   :  { %v18259_v45 = vadd.f32 %v12615_v60, %v9497_v7 }
 0x3c5   :  { %v18268_v21 = vpop.f32.mrf.mxu1 }
 0x3c7   :  { %v18270_v59 = vpop.f32.mrf.mxu1 }
 0x3c8   :  { %v12816_v34 = vpop.eup %12815 }
 0x3c9   :  { %v6049_v55 = vmul.f32 %v12816_v34, %v19128_v35  ;;  %v18276_v12 = vpop.f32.mrf.mxu1 }
 0x3cb   :  { %6050 = vst [vmem:[#allocation3] sm:$0x1] %v6049_v55 }
 0x3cf   :  { %v12601_v24 = vpop.f32.mrf.mxu0 }
 0x3d0   :  { %v9501_v13 = vadd.f32 %v12601_v24, %v9307_v8 }
 0x3d1   :  { %v18272_v56 = vpop.f32.mrf.mxu0 }
 0x3d2   :  { %19129 = vst [vmem:[#allocation9_spill] sm:$0xff] %v18272_v56 }
 0x3d3   :  { %v18274_v41 = vpop.f32.mrf.mxu0 }
 0x3d4   :  { %19130 = vst [vmem:[#allocation17_spill] sm:$0xff] %v18274_v41  ;;  %v9488_v41 = vadd.f32 %v18233_v1, %v18209_v23 }
 0x3d5   :  { %v18278_v27 = vpop.f32.mrf.mxu0 }
 0x3d6   :  { %19131 = vst [vmem:[#allocation65_spill] sm:$0xff] %v18278_v27 }
 0x3d8   :  { %v12625_v58 = vpop.f32.mrf.mxu0 }
 0x3da   :  { %v10050_v30 = vpop.f32.mrf.mxu0 }
 0x3db   :  { %v12619_v37 = vpop.f32.mrf.mxu1 }
 0x3dc   :  { %v18280_v40 = vadd.f32 %v12619_v37, %v9501_v13  ;;  %v12626_v62 = vpop.f32.mrf.mxu0 }
 0x3dd   :  { %v18282_v54 = vpop.f32.mrf.mxu1 }
 0x3de   :  { %19132 = vst [vmem:[#allocation63_spill] sm:$0xff] %v18280_v40  ;;  %19133 = vst [vmem:[#allocation101_spill] sm:$0xff] %v18282_v54  ;;  %v10053_v33 = vpop.f32.mrf.mxu0 }
 0x3df   :  { %v18284_v38 = vpop.f32.mrf.mxu1 }
 0x3e0   :  { %19134 = vst [vmem:[#allocation99_spill] sm:$0xff] %v18284_v38  ;;  %v12629_v17 = vpop.f32.mrf.mxu0  ;;  %v9487_v38 = vadd.f32 %v18225_v10, %v18204_v31 }
 0x3e1   :  { %v18286_v8 = vpop.f32.mrf.mxu1 }
 0x3e2   :  { %19135 = vst [vmem:[#allocation51_spill] sm:$0xff] %v18286_v8  ;;  %v10066_v29 = vpop.f32.mrf.mxu0 }
 0x3e3   :  { %v12643_v22 = vpop.f32.mrf.mxu1 }
 0x3e4   :  { %v12630_v46 = vpop.f32.mrf.mxu0 }
 0x3e5   :  { %v10244_v32 = vpop.f32.mrf.mxu1 }
 0x3e6   :  { %v10069_v7 = vpop.f32.mrf.mxu0 }
 0x3e7   :  { %v12644_v57 = vpop.f32.mrf.mxu1 }
 0x3e8   :  { %v18288_v14 = vpop.f32.mrf.mxu0 }
 0x3e9   :  { %v10247_v51 = vpop.f32.mrf.mxu1 }
 0x3ea   :  { %v18292_v19 = vpop.f32.mrf.mxu0 }
 0x3eb   :  { %v18290_v2 = vpop.f32.mrf.mxu1 }
 0x3ec   :  { %v18294_v34 = vpop.f32.mrf.mxu0 }
 0x3ed   :  { %v10260_v60 = vpop.f32.mrf.mxu1 }
 0x3ee   :  { %v18298_v55 = vpop.f32.mrf.mxu0 }
 0x3ef   :  { %v18296_v35 = vpop.f32.mrf.mxu1 }
 0x3f1   :  { %v18300_v24 = vpop.f32.mrf.mxu1 }
 0x3f3   :  { %v18302_v13 = vpop.f32.mrf.mxu0  ;;  %v18304_v37 = vpop.f32.mrf.mxu1 }
 0x3f4   :  { %19136 = vst [vmem:[#allocation100_spill] sm:$0xff] %v18302_v13  ;;  %v9490_v13 = vadd.f32 %v18229_v39, %v18207_v9  ;;  %v9865_v9 = vadd.f32 %v18249_v44, %v9488_v41 }
 0x3f5   :  { %v18306_v3 = vpop.f32.mrf.mxu0  ;;  %v18308_v8 = vpop.f32.mrf.mxu1 }
 0x3f6   :  { %19137 = vst [vmem:[#allocation103_spill] sm:$0xff] %v18306_v3  ;;  %v9864_v3 = vadd.f32 %v18243_v61, %v9487_v38  ;;  %v10114_v61 = vadd.f32 %v10053_v33, %v9865_v9 }
 0x3f7   :  { %v18312_v40 = vpop.f32.mrf.mxu0  ;;  %v18314_v27 = vpop.f32.mrf.mxu1 }
 0x3f8   :  { %19138 = vst [vmem:[#allocation66_spill] sm:$0xff] %v18312_v40  ;;  %19139 = vst [vmem:[#allocation11_spill] sm:$0xff] %v18314_v27  ;;  %v10113_v31 = vadd.f32 %v10050_v30, %v9864_v3  ;;  %v9867_v27 = vadd.f32 %v18247_v20, %v9490_v13  ;;  %v9494_v3 = vadd.f32 %v18239_v26, %v18215_v47 }
 0x3f9   :  { %v18316_v42 = vpop.f32.mrf.mxu0  ;;  %v18318_v54 = vpop.f32.mrf.mxu1  ;;  %v9492_v30 = vadd.f32 %v18245_v43, %v18217_v15 }
 0x3fa   :  { %19140 = vst [vmem:[#allocation45_spill] sm:$0xff] %v18316_v42  ;;  %19141 = vst [vmem:[#allocation8_spill] sm:$0xff] %v18318_v54  ;;  %v9491_v42 = vadd.f32 %v18237_v16, %v18213_v25  ;;  %v10115_v54 = vadd.f32 %v12625_v58, %v18241_v50  ;;  %v10116_v1 = vadd.f32 %v12626_v62, %v9867_v27 }
 0x3fb   :  { %v12661_v63 = vpop.f32.mrf.mxu0  ;;  %v18325_v56 = vpop.f32.mrf.mxu1  ;;  %v10307_v38 = vadd.f32 %v10244_v32, %v10113_v31  ;;  %v10308_v62 = vadd.f32 %v10247_v51, %v10114_v61  ;;  %v10119_v32 = vadd.f32 %v12629_v17, %v18251_v11  ;;  %v9871_v47 = vadd.f32 %v18255_v5, %v9494_v3 }
 0x3fc   :  { %19142 = vst [vmem:[#allocation44_spill] sm:$0xff] %v18325_v56  ;;  %v9868_v16 = vadd.f32 %v18253_v48, %v9491_v42  ;;  %v10309_v50 = vadd.f32 %v12643_v22, %v10115_v54  ;;  %v10310_v27 = vadd.f32 %v12644_v57, %v10116_v1  ;;  %v9869_v26 = vadd.f32 %v18257_v18, %v9492_v30 }
 0x3fd   :  { %v10621_v10 = vpop.f32.mrf.mxu0  ;;  %v18327_v40 = vpop.f32.mrf.mxu1  ;;  %v9495_v48 = vadd.f32 %v18261_v53, %v18219_v0  ;;  %v10120_v54 = vadd.f32 %v12630_v46, %v9871_v47  ;;  %v9496_v5 = vadd.f32 %v18266_v4, %v18223_v36  ;;  %v10313_v17 = vadd.f32 %v18290_v2, %v10119_v32 }
 0x3fe   :  { %v10684_v20 = vadd.f32 %v10621_v10, %v10307_v38  ;;  %v10117_v58 = vadd.f32 %v10066_v29, %v9868_v16  ;;  %v10686_v13 = vadd.f32 %v12661_v63, %v10309_v50  ;;  %v10118_v22 = vadd.f32 %v10069_v7, %v9869_v26 }
 0x3ff   :  { %v12662_v39 = vpop.f32.mrf.mxu0  ;;  %v18334_v23 = vpop.f32.mrf.mxu1  ;;  %v9498_v29 = vadd.f32 %v18264_v6, %v18221_v52  ;;  %v9872_v53 = vadd.f32 %v18268_v21, %v9495_v48  ;;  %v10314_v52 = vadd.f32 %v18296_v35, %v10120_v54  ;;  %v10123_v2 = vadd.f32 %v18288_v14, %v18259_v45 }
 0x400   :  { %v10687_v31 = vadd.f32 %v12662_v39, %v10310_v27  ;;  %v10311_v11 = vadd.f32 %v10260_v60, %v10117_v58  ;;  %v10312_v6 = vadd.f32 %v18300_v24, %v10118_v22 }
 0x401   :  { %v10624_v56 = vpop.f32.mrf.mxu0  ;;  %v18340_v25 = vpop.f32.mrf.mxu1  ;;  %v9875_v60 = vadd.f32 %v18270_v59, %v9498_v29  ;;  %v10121_v1 = vadd.f32 %v18292_v19, %v9872_v53  ;;  %v9873_v59 = vadd.f32 %v18276_v12, %v9496_v5  ;;  %v19143_v12 = vld [vmem:[#allocation9_spill] sm:$0xff] }
 0x402   :  { %v10685_v9 = vadd.f32 %v10624_v56, %v10308_v62  ;;  %v9499_v26 = vadd.f32 %v19143_v12, %v18227_v49 }
 0x403   :  { %v12665_v44 = vpop.f32.mrf.mxu0  ;;  %v10124_v24 = vadd.f32 %v18294_v34, %v9875_v60  ;;  %v10122_v14 = vadd.f32 %v18298_v55, %v9873_v59  ;;  %v10315_v27 = vadd.f32 %v18308_v8, %v10121_v1  ;;  %v10317_v34 = vadd.f32 %v18304_v37, %v10123_v2  ;;  %v19151_v1 = vld [vmem:[#allocation103_spill] sm:$0xff] }
 0x404   :  { %v12679_v41 = vpop.f32.mrf.mxu1  ;;  %v10690_v7 = vadd.f32 %v12665_v44, %v10313_v17 }
 0x405   :  { %v10637_v33 = vpop.f32.mrf.mxu0  ;;  %v10935_v57 = vadd.f32 %v12679_v41, %v10686_v13 }
 0x406   :  { %v10870_v15 = vpop.f32.mrf.mxu1  ;;  %v10688_v39 = vadd.f32 %v10637_v33, %v10311_v11 }
 0x407   :  { %v10933_v43 = vadd.f32 %v10870_v15, %v10684_v20  ;;  %v12666_v42 = vpop.f32.mrf.mxu0  ;;  %v10951_v36 = vadd.f32 %v18152_v28, %v10935_v57  ;;  %v19145_v57 = vld [vmem:[#allocation8_spill] sm:$0xff] }
 0x408   :  { %v12680_v63 = vpop.f32.mrf.mxu1  ;;  %v10691_v38 = vadd.f32 %v12666_v42, %v10314_v52  ;;  %v10316_v37 = vadd.f32 %v19145_v57, %v10122_v14 }
 0x409   :  { %v10949_v56 = vadd.f32 %v18152_v28, %v10933_v43  ;;  %v10936_v51 = vadd.f32 %v12680_v63, %v10687_v31  ;;  %v10640_v0 = vpop.f32.mrf.mxu0  ;;  %v10967_v41 = vmax.f32 %v10951_v36, 0.0  ;;  %v19149_v36 = vld [vmem:[#allocation61_spill] sm:$0xff] }
 0x40a   :  { %v10873_v18 = vpop.f32.mrf.mxu1  ;;  %v10689_v21 = vadd.f32 %v10640_v0, %v10312_v6 }
 0x40b   :  { %v10934_v10 = vadd.f32 %v10873_v18, %v10685_v9  ;;  %v10965_v3 = vmax.f32 %v10949_v56, 0.0  ;;  %v10952_v30 = vadd.f32 %v18152_v28, %v10936_v51  ;;  %v19144_v9 = vld [vmem:[#allocation11_spill] sm:$0xff]  ;;  %v19146_v56 = vld [vmem:[#allocation54_spill] sm:$0xff]  ;;  %v19147_v51 = vld [vmem:[#allocation17_spill] sm:$0xff] }
 0x40c   :  { %v10318_v42 = vadd.f32 %v19144_v9, %v10124_v24  ;;  %v19153_v24 = vld [vmem:[#allocation100_spill] sm:$0xff] }
 0x40d   :  { %v12683_v46 = vpop.f32.mrf.mxu1  ;;  %v10950_v4 = vadd.f32 %v18152_v28, %v10934_v10  ;;  %v10968_v33 = vmax.f32 %v10952_v30, 0.0  ;;  %v9502_v10 = vadd.f32 %v19147_v51, %v19146_v56 }
 0x40e   :  { %v10939_v50 = vadd.f32 %v12683_v46, %v10690_v7 }
 0x40f   :  { %v10886_v61 = vpop.f32.mrf.mxu1  ;;  %v10966_v35 = vmax.f32 %v10950_v4, 0.0  ;;  %v12669_v44 = vpop.f32.mrf.mxu0  ;;  %v19150_v4 = vld [vmem:[#allocation65_spill] sm:$0xff] }
 0x410   :  { %v10937_v16 = vadd.f32 %v10886_v61, %v10688_v39  ;;  %v10955_v15 = vadd.f32 %v18152_v28, %v10939_v50  ;;  %v10694_v22 = vadd.f32 %v12669_v44, %v10317_v34  ;;  %v19148_v39 = vld [vmem:[#allocation101_spill] sm:$0xff]  ;;  %v9500_v2 = vadd.f32 %v19150_v4, %v19149_v36  ;;  %v19154_v50 = vld [vmem:[#allocation99_spill] sm:$0xff] }
 0x411   :  { %v12684_v20 = vpop.f32.mrf.mxu1  ;;  %v10981_v58 = vadd.f32 %v10966_v35, %v10965_v3  ;;  %v10653_v62 = vpop.f32.mrf.mxu0  ;;  %v9876_v0 = vadd.f32 %v19148_v39, %v9499_v26 }
 0x412   :  { %v10953_v45 = vadd.f32 %v18152_v28, %v10937_v16  ;;  %v10940_v13 = vadd.f32 %v12684_v20, %v10691_v38  ;;  %v10692_v31 = vadd.f32 %v10653_v62, %v10315_v27  ;;  %v10971_v7 = vmax.f32 %v10955_v15, 0.0  ;;  %v19152_v16 = vld [vmem:[#allocation63_spill] sm:$0xff]  ;;  %v19157_v15 = vld [vmem:[#allocation45_spill] sm:$0xff] }
 0x413   :  { %v10889_v19 = vpop.f32.mrf.mxu1  ;;  %v10982_v32 = vadd.f32 %v10981_v58, %v10967_v41  ;;  %v12670_v55 = vpop.f32.mrf.mxu0  ;;  %v10125_v61 = vadd.f32 %v19151_v1, %v9876_v0  ;;  %v10127_v59 = vadd.f32 %v19153_v24, %v19152_v16  ;;  %v9879_v20 = vadd.f32 %v19154_v50, %v9502_v10  ;;  %v19156_v27 = vld [vmem:[#allocation51_spill] sm:$0xff] }
 0x414   :  { %v10938_v47 = vadd.f32 %v10889_v19, %v10689_v21  ;;  %v10969_v48 = vmax.f32 %v10953_v45, 0.0  ;;  %v10956_v63 = vadd.f32 %v18152_v28, %v10940_v13  ;;  %v10695_v17 = vadd.f32 %v12670_v55, %v10318_v42  ;;  %v19155_v19 = vld [vmem:[#allocation66_spill] sm:$0xff] }
 0x415   :  { %v12687_v43 = vpop.f32.mrf.mxu1  ;;  %v10983_v54 = vadd.f32 %v10982_v32, %v10968_v33  ;;  %v10656_v11 = vpop.f32.mrf.mxu0  ;;  %v10128_v13 = vadd.f32 %v19155_v19, %v9879_v20  ;;  %v9877_v62 = vadd.f32 %v19156_v27, %v9500_v2  ;;  %v10319_v26 = vadd.f32 %v18327_v40, %v10125_v61 }
 0x416   :  { %v10954_v8 = vadd.f32 %v18152_v28, %v10938_v47  ;;  %v10693_v46 = vadd.f32 %v10656_v11, %v10316_v37  ;;  %v10943_v6 = vadd.f32 %v12687_v43, %v10694_v22  ;;  %v10972_v21 = vmax.f32 %v10956_v63, 0.0 }
 0x417   :  { %v10902_v29 = vpop.f32.mrf.mxu1  ;;  %v10984_v5 = vadd.f32 %v10983_v54, %v10969_v48  ;;  %v10126_v43 = vadd.f32 %v19157_v15, %v9877_v62  ;;  %v10322_v22 = vadd.f32 %v18334_v23, %v10128_v13  ;;  %v19159_v23 = vld [vmem:[#allocation36_spill] sm:$0xff] }
 0x418   :  { %v10970_v49 = vmax.f32 %v10954_v8, 0.0  ;;  %v10941_v18 = vadd.f32 %v10902_v29, %v10692_v31  ;;  %v10959_v41 = vadd.f32 %v18152_v28, %v10943_v6  ;;  %v19158_v31 = vld [vmem:[#allocation44_spill] sm:$0xff] }
 0x419   :  { %v12688_v53 = vpop.f32.mrf.mxu1  ;;  %v10321_v9 = vadd.f32 %v19158_v31, %v10127_v59 }
 0x41a   :  { %v10985_v52 = vadd.f32 %v10984_v5, %v10970_v49  ;;  %v10957_v60 = vadd.f32 %v18152_v28, %v10941_v18  ;;  %v10944_v30 = vadd.f32 %v12688_v53, %v10695_v17  ;;  %v10975_v55 = vmax.f32 %v10959_v41, 0.0 }
 0x41b   :  { %v10905_v38 = vpop.f32.mrf.mxu1  ;;  %v10320_v49 = vadd.f32 %v18340_v25, %v10126_v43 }
 0x41c   :  { %v10986_v3 = vadd.f32 %v10985_v52, %v10971_v7  ;;  %v10942_v35 = vadd.f32 %v10905_v38, %v10693_v46  ;;  %v10973_v58 = vmax.f32 %v10957_v60, 0.0  ;;  %v10960_v47 = vadd.f32 %v18152_v28, %v10944_v30 }
 0x41d   :  { %v12691_v44 = vpop.f32.mrf.mxu1  ;;  %v8538_v7 = vrot.slane %v19159_v23, 4 }
 0x41e   :  { %v10987_v45 = vadd.f32 %v10986_v3, %v10972_v21  ;;  %v10958_v14 = vadd.f32 %v18152_v28, %v10942_v35  ;;  %v12673_v33 = vpop.f32.mrf.mxu0  ;;  %v10976_v29 = vmax.f32 %v10960_v47, 0.0 }
 0x41f   :  { %v10918_v12 = vpop.f32.mrf.mxu1  ;;  %v10698_v8 = vadd.f32 %v12673_v33, %v10321_v9  ;;  %v8539_v2 = vadd.f32 %v8538_v7, %v19159_v23 }
 0x420   :  { %v10988_v32 = vadd.f32 %v10987_v45, %v10973_v58  ;;  %v10974_v34 = vmax.f32 %v10958_v14, 0.0  ;;  %v10669_v42 = vpop.f32.mrf.mxu0 }
 0x421   :  { %v10696_v54 = vadd.f32 %v10669_v42, %v10319_v26  ;;  %v12692_v37 = vpop.f32.mrf.mxu1  ;;  %v10947_v56 = vadd.f32 %v12691_v44, %v10698_v8  ;;  %v8540_v21 = vrot.slane %v8539_v2, 2 }
 0x422   :  { %v10989_v48 = vadd.f32 %v10988_v32, %v10974_v34  ;;  %v12674_v63 = vpop.f32.mrf.mxu0 }
 0x423   :  { %v10945_v11 = vadd.f32 %v10918_v12, %v10696_v54  ;;  %v10699_v5 = vadd.f32 %v12674_v63, %v10322_v22  ;;  %v10921_v39 = vpop.f32.mrf.mxu1  ;;  %v10963_v52 = vadd.f32 %v18152_v28, %v10947_v56  ;;  %v8541_v30 = vadd.f32 %v8540_v21, %v8539_v2 }
 0x424   :  { %v10990_v57 = vadd.f32 %v10989_v48, %v10975_v55  ;;  %v10672_v40 = vpop.f32.mrf.mxu0 }
 0x425   :  { %v10961_v18 = vadd.f32 %v18152_v28, %v10945_v11  ;;  %v10697_v51 = vadd.f32 %v10672_v40, %v10320_v49  ;;  %v10948_v0 = vadd.f32 %v12692_v37, %v10699_v5  ;;  %v10979_v36 = vmax.f32 %v10963_v52, 0.0 }
 0x426   :  { %v10991_v17 = vadd.f32 %v10990_v57, %v10976_v29  ;;  %v8542_v24 = vrot.slane %v8541_v30, 1 }
 0x427   :  { %v10977_v10 = vmax.f32 %v10961_v18, 0.0  ;;  %v10946_v53 = vadd.f32 %v10921_v39, %v10697_v51  ;;  %v10964_v60 = vadd.f32 %v18152_v28, %v10948_v0 }
 0x428   :  { %v8543_v20 = vadd.f32 %v8542_v24, %v8541_v30 }
 0x429   :  { %v10992_v46 = vadd.f32 %v10991_v17, %v10977_v10  ;;  %v10962_v6 = vadd.f32 %v18152_v28, %v10946_v53  ;;  %v10980_v1 = vmax.f32 %v10964_v60, 0.0 }
 0x42b   :  { %v10978_v25 = vmax.f32 %v10962_v6, 0.0 }
 0x42d   :  { %v10993_v4 = vadd.f32 %v10992_v46, %v10978_v25 }
 0x42f   :  { %v10994_v61 = vadd.f32 %v10993_v4, %v10979_v36 }
 0x431   :  { %v10995_v38 = vadd.f32 %v10994_v61, %v10980_v1 }
 0x433   :  { %v10996_v3 = vrot.slane %v10995_v38, 4 }
 0x435   :  { %v10997_v35 = vadd.f32 %v10996_v3, %v10995_v38 }
 0x437   :  { %v10998_v16 = vrot.slane %v10997_v35, 2 }
 0x439   :  { %v10999_v59 = vadd.f32 %v10998_v16, %v10997_v35 }
 0x43b   :  { %v11000_v50 = vrot.slane %v10999_v59, 1 }
 0x43d   :  { %v11001_v44 = vadd.f32 %v11000_v50, %v10999_v59 }
 0x43f   :  { %v11002_v41 = vadd.f32 %v11001_v44, %v8543_v20 }
 0x441   :  { %v11003_v28 = vmul.f32 0.00390625, %v11002_v41 }
 0x443   :  { %v11004_v58 = vmul.f32 %v11003_v28, %v11003_v28 }
 0x445   :  { %11005 = vadd.xlane.f32.xlu0 %v11004_v58 }
 0x4ce   :  { %v11006_v45 = vpop.xlane.xlu0 %11005 }
 0x4cf   :  { %12817 = vrsqrt.f32 %v11006_v45  ;;  %vm11009_vm2 = vcmp.eq.f32.partialorder %v11006_v45, inf  ;;  %v11012_v13 = vand.u32 2147483648, %v11006_v45  ;;  %vm11011_vm3 = vcmp.eq.f32.partialorder %v11006_v45, 0.0 }
 0x4dc   :  { %v12818_v14 = vpop.eup %12817 }
 0x4dd   :  { %v11008_v19 = vmul.f32 %v12818_v14, %v11006_v45 }
 0x4df   :  { %v11010_v27 = vsel %vm11009_vm2, %v11006_v45, %v11008_v19 }
 0x4e0   :  { %v11013_v62 = vsel %vm11011_vm3, %v11012_v13, %v11010_v27 }
 0x4e1   :  { %v11014_v33 = vadd.f32 1e-06, %v11013_v62 }
 0x4e3   :  { %12819 = vrcp.f32 %v11014_v33 }
 0x4f0   :  { %v12820_v32 = vpop.eup %12819 }
 0x4f1   :  { %v11016_v47 = vmul.f32 %v12820_v32, %v11003_v28 }
 0x4f3   :  { %11017 = vst [vmem:[#allocation3 + $0x1] sm:$0x1] %v11016_v47 }
 0x4f4   :  { %12854 = shalt.err (!%p12851_p4)
}
 0x4f5   :  { %11027 = dma.vmem_to_hbm [thread:$0]  %s11025_s27, 32, %s18409_s3, [#allocation4]  }
 0x4f6   :  { %12863 = dma.done.wait [#allocation4], 32  }
 0x4f7   :  { %12864 = vsyncadd [#allocation4], 4294967264 }
 0x4f8   :  { %11031 = vsyncpa [#allocation4], 1 }

</bundles_post_ra>
